<compile_context>
chip_gen: v6e
topology: v6e:2x2x1
jax: 0.10.0
libtpu: 0.0.40
codegen_flags: <defaults>
</compile_context>

<pallas_src>
import jax
import jax.numpy as jnp
from jax import lax
from jax.experimental import pallas as pl
from jax.experimental.pallas import tpu as pltpu

CFG = dict(
    USE_RPN_FEATURES=True,
    USE_INTENSITY=False, USE_MASK=True, USE_DEPTH=True,
    USE_BN=False,
    XYZ_UP_LAYER=[32, 32],
    SA_NPOINTS=[32, 16, -1],
    SA_RADIUS=[0.2, 0.4, 100.0],
    SA_NSAMPLE=[16, 16, 16],
    SA_MLPS=[[32, 32, 32], [32, 32, 64], [64, 64, 128]],
    CLS_FC=[32, 32], REG_FC=[32, 32],
    LOC_SCOPE=1.5, LOC_BIN_SIZE=0.5,
    LOC_Y_SCOPE=0.5, LOC_Y_BIN_SIZE=0.25,
    NUM_HEAD_BIN=9, LOC_Y_BY_BIN=False,
    DP_RATIO=0.0,
)

NUM_CLASSES = 2


# ----------------------------------------------------------------------------
# Fused Pallas kernels
# ----------------------------------------------------------------------------
def _mxu(x, w_ref):
    """bf16 operands on the MXU, f32 accumulation; bias/ReLU stay f32."""
    return jnp.dot(x.astype(jnp.bfloat16), w_ref[...],
                   preferred_element_type=jnp.float32)


def _pick_row_tile(m, max_tile):
    """Biggest tile that fits: one block when the whole extent fits (grid=(1,)),
    otherwise a large 8-aligned tile (Pallas masks the partial last tile).
    Per-grid-step overhead dominates small tiles, so never force >=2 tiles."""
    if m <= max_tile:
        return m
    assert max_tile % 8 == 0
    return max_tile


# ---- xyz_up SharedMLP + merge_down SharedMLP, fused -------------------------
def _make_xyz_merge_kernel(n_up):
    def kernel(*refs):
        xyz_ref, rpn_ref = refs[0], refs[1]
        idx = 2
        h = xyz_ref[...]
        for _ in range(n_up):                       # xyz_up chain, VMEM-resident
            w, b = refs[idx], refs[idx + 1]; idx += 2
            h = jnp.maximum(_mxu(h, w) + b[...], 0.0)
        wmx, wmr, bm = refs[idx], refs[idx + 1], refs[idx + 2]; idx += 3
        o_ref = refs[idx]
        # merge_down as split-K (both K's are 32): avoids the HBM
        # concat([xyz_feature, rpn_feature])
        y = _mxu(h, wmx) + _mxu(rpn_ref[...], wmr) + bm[...]
        o_ref[...] = jnp.maximum(y, 0.0).astype(o_ref.dtype)
    return kernel


def fused_xyz_merge(xyz_in, rpn_in, up_params, merge_params):
    """xyz_in: (M, C_xyz), rpn_in: (M, C_rpn) -> (M, C_out) bf16."""
    m, c_xyz = xyz_in.shape
    c_rpn = rpn_in.shape[1]
    assert len(merge_params) == 1
    wm, bm = merge_params[0]
    c_mid = up_params[-1][0].shape[1]
    c_out = wm.shape[1]
    # split-K hard-codes the [xyz_feature; rpn_feature] concat order: fail loudly
    assert wm.shape[0] == c_mid + c_rpn, (wm.shape, c_mid, c_rpn)
    wmx, wmr = wm[:c_mid], wm[c_mid:]

    tile_m = _pick_row_tile(m, max_tile=2048)
    grid = (pl.cdiv(m, tile_m),)

    args = [xyz_in, rpn_in]
    in_specs = [pl.BlockSpec((tile_m, c_xyz), lambda i: (i, 0)),
                pl.BlockSpec((tile_m, c_rpn), lambda i: (i, 0))]
    for (w, b) in up_params:
        args += [w, b.reshape(1, -1)]
        in_specs += [pl.BlockSpec(w.shape, lambda i: (0, 0)),
                     pl.BlockSpec((1, b.shape[0]), lambda i: (0, 0))]
    args += [wmx, wmr, bm.reshape(1, -1)]
    in_specs += [pl.BlockSpec(wmx.shape, lambda i: (0, 0)),
                 pl.BlockSpec(wmr.shape, lambda i: (0, 0)),
                 pl.BlockSpec((1, c_out), lambda i: (0, 0))]

    return pl.pallas_call(
        _make_xyz_merge_kernel(len(up_params)),
        out_shape=jax.ShapeDtypeStruct((m, c_out), jnp.bfloat16),
        grid=grid,
        in_specs=in_specs,
        out_specs=pl.BlockSpec((tile_m, c_out), lambda i: (i, 0)),
        compiler_params=pltpu.CompilerParams(dimension_semantics=("parallel",)),
    )(*args)


# ---- PointNet++ SA shared-MLP + group max-pool, fused -----------------------
def _make_sa_kernel(n_layers):
    def kernel(*refs):
        g_ref = refs[0]
        idx = 1
        tg, s, cin = g_ref.shape
        # S stays whole in a block and the lane dim is unchanged, so this
        # collapse is a layout relabel, not a VMEM copy.
        h = g_ref[...].reshape(tg * s, cin)
        for _ in range(n_layers):                    # single K=C+3 first matmul
            w, b = refs[idx], refs[idx + 1]; idx += 2
            h = jnp.maximum(_mxu(h, w) + b[...], 0.0)
        o_ref = refs[idx]
        c_out = h.shape[-1]
        # PointNet++ symmetric max-pool folded into the same kernel
        o_ref[...] = jnp.max(h.reshape(tg, s, c_out), axis=1).astype(o_ref.dtype)
    return kernel


def fused_sa_mlp_pool(g_pts, sa_params):
    """g_pts: (G, S, 3+C) grouped [local_xyz, feat] -> pooled (G, C_out) bf16."""
    g, s, cin = g_pts.shape
    assert sa_params[0][0].shape[0] == cin, (sa_params[0][0].shape, cin)
    c_out = sa_params[-1][0].shape[1]

    tile_g = _pick_row_tile(g, max_tile=512)
    grid = (pl.cdiv(g, tile_g),)

    args = [g_pts]
    in_specs = [pl.BlockSpec((tile_g, s, cin), lambda i: (i, 0, 0))]
    for (w, b) in sa_params:
        args += [w, b.reshape(1, -1)]
        in_specs += [pl.BlockSpec(w.shape, lambda i: (0, 0)),
                     pl.BlockSpec((1, b.shape[0]), lambda i: (0, 0))]

    return pl.pallas_call(
        _make_sa_kernel(len(sa_params)),
        out_shape=jax.ShapeDtypeStruct((g, c_out), jnp.bfloat16),
        grid=grid,
        in_specs=in_specs,
        out_specs=pl.BlockSpec((tile_g, c_out), lambda i: (i, 0)),
        compiler_params=pltpu.CompilerParams(dimension_semantics=("parallel",)),
    )(*args)


# ---- cls + reg heads, one packed weight stack, one kernel -------------------
def _make_head_kernel(n_layers):
    def kernel(*refs):
        idx = 1
        h = refs[0][...]
        for li in range(n_layers):
            w, b = refs[idx], refs[idx + 1]; idx += 2
            h = _mxu(h, w) + b[...]
            if li < n_layers - 1:
                h = jnp.maximum(h, 0.0)
        refs[idx][...] = h                      # single lane-dense (B, 128) store
    return kernel


def fused_heads(feat, head_params, c_cls, c_reg):
    """feat: (B, C) -> (rcnn_cls (B, c_cls), rcnn_reg (B, c_reg))."""
    m, c = feat.shape
    c_pad = head_params[-1][0].shape[1]          # lane-padded (>= c_cls + c_reg)
    assert c_pad >= c_cls + c_reg

    args = [feat]
    in_specs = [pl.BlockSpec((m, c), lambda i: (0, 0))]
    for (w, b) in head_params:
        args += [w, b.reshape(1, -1)]
        in_specs += [pl.BlockSpec(w.shape, lambda i: (0, 0)),
                     pl.BlockSpec((1, b.shape[0]), lambda i: (0, 0))]

    out = pl.pallas_call(
        _make_head_kernel(len(head_params)),
        out_shape=jax.ShapeDtypeStruct((m, c_pad), jnp.float32),
        grid=(1,),
        in_specs=in_specs,
        out_specs=pl.BlockSpec((m, c_pad), lambda i: (0, 0)),
        compiler_params=pltpu.CompilerParams(dimension_semantics=("arbitrary",)),
    )(*args)
    return out[:, :c_cls], out[:, c_cls:c_cls + c_reg]


# ----------------------------------------------------------------------------
# Glue: sampling / grouping (data-dependent gathers, plain JAX)
# TODO(synk): at production point counts the grouping gather should move into
# the SA kernel (PrefetchScalarGridSpec + memory_space=pl.ANY) and FPS should
# become its own Pallas kernel; both are kept in XLA here for robustness.
# ----------------------------------------------------------------------------
def batched_gather(x, idx):
    """x: (B, N, C), idx: (B, ...) int -> (B, ..., C)."""
    return jax.vmap(lambda xb, ib: xb[ib])(x, idx)


def pairwise_sqdist(xyz):
    """xyz: (B, N, 3) -> (B, N, N) squared distances (shared by FPS + ball query)."""
    d = xyz[:, :, None, :] - xyz[:, None, :, :]
    return jnp.sum(d * d, axis=-1)


def farthest_point_sample(d2_full, npoint):
    """Deterministic FPS (seed idx 0) over precomputed pairwise distances:
    each iteration is one row gather + min + argmax."""
    b, n, _ = d2_full.shape

    def body(i, state):
        idx, dist, last = state
        row = jax.vmap(lambda d, l: d[l])(d2_full, last)        # (B, N)
        dist = jnp.minimum(dist, row)
        nxt = jnp.argmax(dist, axis=-1).astype(jnp.int32)
        idx = idx.at[:, i].set(nxt)
        return idx, dist, nxt

    idx0 = jnp.zeros((b, npoint), jnp.int32)
    dist0 = jnp.full((b, n), 1e10, jnp.float32)
    last0 = jnp.zeros((b,), jnp.int32)
    idx, _, _ = lax.fori_loop(1, npoint, body, (idx0, dist0, last0))
    return idx


def ball_query(d2_pn, radius, nsample):
    """Matches pointnet2 ball_query: first `nsample` in-radius points in index
    order; remaining slots filled with the first in-radius index.  Implemented
    as masked cumsum + scatter-min (no (B,P,N) sort, no (B,P,S,N) tensor)."""
    b, p, n = d2_pn.shape
    mask = d2_pn < radius * radius                               # (B, P, N)
    rank = jnp.cumsum(mask.astype(jnp.int32), axis=-1) - 1       # order among in-radius
    slot = jnp.where(mask & (rank < nsample), rank, nsample)     # overflow bucket
    arange_n = jnp.broadcast_to(jnp.arange(n, dtype=jnp.int32), (b, p, n))
    b_ix = jnp.arange(b, dtype=jnp.int32)[:, None, None]
    p_ix = jnp.arange(p, dtype=jnp.int32)[None, :, None]
    filled = jnp.full((b, p, nsample + 1), n, jnp.int32)
    filled = filled.at[b_ix, p_ix, slot].min(arange_n)
    idx = filled[..., :nsample]
    first = idx[..., 0]
    first = jnp.where(first < n, first, 0)
    return jnp.where(idx < n, idx, first[..., None]).astype(jnp.int32)


# ----------------------------------------------------------------------------
# Parameters (weights pre-cast to bf16 once; biases stay f32)
# ----------------------------------------------------------------------------
def _xavier(key, cin, cout):
    std = (2.0 / (cin + cout)) ** 0.5
    return std * jax.random.normal(key, (cin, cout), jnp.float32)


def make_mlp_params(key, dims):
    params = []
    for i in range(len(dims) - 1):
        key, k = jax.random.split(key)
        params.append((_xavier(k, dims[i], dims[i + 1]).astype(jnp.bfloat16),
                       jnp.zeros((dims[i + 1],), jnp.float32)))
    return params, key


def rcnn_input_channel():
    return 3 + int(CFG['USE_INTENSITY']) + int(CFG['USE_MASK']) + int(CFG['USE_DEPTH'])


def reg_channel():
    per_loc_bin_num = int(CFG['LOC_SCOPE'] / CFG['LOC_BIN_SIZE']) * 2
    loc_y_bin_num = int(CFG['LOC_Y_SCOPE'] / CFG['LOC_Y_BIN_SIZE']) * 2
    rc = per_loc_bin_num * 4 + CFG['NUM_HEAD_BIN'] * 2 + 3
    rc += loc_y_bin_num * 2 if CFG['LOC_Y_BY_BIN'] else 1
    return rc


def pack_head_params(cls_params, reg_params, lane_pad=128):
    """Pack cls + reg heads into one weight stack: layer 0 concatenated along
    the output axis, deeper layers block-diagonal, final layer zero-padded to
    a lane-dense width (single unmasked store)."""
    assert len(cls_params) == len(reg_params)
    nl = len(cls_params)
    packed = []
    for li in range(nl):
        wc, bc = cls_params[li]
        wr, br = reg_params[li]
        if li == 0:
            w = jnp.concatenate([wc, wr], axis=1)
        else:
            top = jnp.concatenate(
                [wc, jnp.zeros((wc.shape[0], wr.shape[1]), wc.dtype)], axis=1)
            bot = jnp.concatenate(
                [jnp.zeros((wr.shape[0], wc.shape[1]), wr.dtype), wr], axis=1)
            w = jnp.concatenate([top, bot], axis=0)
        b = jnp.concatenate([bc, br], axis=0)
        if li == nl - 1:
            c_pad = pl.cdiv(w.shape[1], lane_pad) * lane_pad
            if c_pad > w.shape[1]:
                w = jnp.concatenate(
                    [w, jnp.zeros((w.shape[0], c_pad - w.shape[1]), w.dtype)], axis=1)
                b = jnp.concatenate(
                    [b, jnp.zeros((c_pad - b.shape[0],), b.dtype)], axis=0)
        packed.append((w, b))
    return packed


def init_params(key):
    params = {}
    in_ch = rcnn_input_channel()
    params['xyz_up'], key = make_mlp_params(key, [in_ch] + CFG['XYZ_UP_LAYER'])
    c_out = CFG['XYZ_UP_LAYER'][-1]
    params['merge_down'], key = make_mlp_params(key, [c_out * 2, c_out])

    channel_in = c_out
    params['sa'] = []
    for k in range(len(CFG['SA_NPOINTS'])):
        mlps = [channel_in + 3] + CFG['SA_MLPS'][k]        # use_xyz=True
        p, key = make_mlp_params(key, mlps)
        params['sa'].append(p)
        channel_in = CFG['SA_MLPS'][k][-1]

    cls_channel = 1 if NUM_CLASSES == 2 else NUM_CLASSES
    cls_params, key = make_mlp_params(key, [channel_in] + CFG['CLS_FC'] + [cls_channel])
    reg_params, key = make_mlp_params(key, [channel_in] + CFG['REG_FC'] + [reg_channel()])
    # init_weights: last reg conv weight ~ Normal(0, 0.001)
    key, kk = jax.random.split(key)
    w_last, b_last = reg_params[-1]
    reg_params[-1] = ((0.001 * jax.random.normal(kk, w_last.shape, jnp.float32)
                       ).astype(jnp.bfloat16), b_last)
    params['head'] = pack_head_params(cls_params, reg_params)
    return params, key


# ----------------------------------------------------------------------------
# Forward pass (eval, ROI_SAMPLE_JIT=False, USE_RPN_FEATURES=True)
# ----------------------------------------------------------------------------
def rcnn_forward(params, pts_input):
    """pts_input: (B, N, rcnn_input_channel + C_rpn) -> dict(rcnn_cls, rcnn_reg)."""
    b, n, c_tot = pts_input.shape
    in_ch = rcnn_input_channel()

    xyz = pts_input[..., 0:3]                                     # (B, N, 3) f32

    # xyz_up_layer + merge_down_layer fused (SharedMLP 1x1 convs, USE_BN=False)
    xyz_in = pts_input[..., :in_ch].reshape(b * n, in_ch)
    rpn_in = pts_input[..., in_ch:].reshape(b * n, c_tot - in_ch)
    merged = fused_xyz_merge(xyz_in, rpn_in, params['xyz_up'], params['merge_down'])
    features = merged.reshape(b, n, -1)                           # bf16

    # PointNet++ SA modules: fused shared-MLP + max-pool per module
    cur_xyz, cur_feat = xyz, features
    for k in range(len(CFG['SA_NPOINTS'])):
        npoint = CFG['SA_NPOINTS'][k]
        if npoint != -1:
            d2_full = pairwise_sqdist(cur_xyz)                    # shared FPS/ball-query
            fps_idx = farthest_point_sample(d2_full, npoint)      # (B, P)
            new_xyz = batched_gather(cur_xyz, fps_idx)            # (B, P, 3)
            d2_pn = batched_gather(d2_full, fps_idx)              # (B, P, N)
            g_idx = ball_query(d2_pn, CFG['SA_RADIUS'][k], CFG['SA_NSAMPLE'][k])
            # translate in f32 (small local offsets), then cast once to bf16 and
            # pre-concat so the kernel does a single K=C+3 matmul.
            g_xyz = batched_gather(cur_xyz, g_idx) - new_xyz[:, :, None, :]
            g_feat = batched_gather(cur_feat, g_idx)
            g_pts = jnp.concatenate([g_xyz.astype(jnp.bfloat16), g_feat], axis=-1)
            p, s = npoint, CFG['SA_NSAMPLE'][k]
            g_pts = g_pts.reshape(b * p, s, g_pts.shape[-1])
        else:  # group_all (last SA module): one group per batch element
            new_xyz = None
            p, s = 1, cur_xyz.shape[1]
            g_pts = jnp.concatenate([cur_xyz.astype(jnp.bfloat16), cur_feat], axis=-1)

        pooled = fused_sa_mlp_pool(g_pts, params['sa'][k])        # (B*P, C_out) bf16
        cur_xyz = new_xyz
        cur_feat = pooled.reshape(b, p, -1)

    feat = cur_feat.reshape(b, -1)      # (B, 128) bf16 (last SA is group_all -> P=1)

    # cls / reg heads packed into one kernel; last layers have no activation.
    # TODO(synk): nn.Dropout (DP_RATIO) is identity in eval mode and not modeled.
    cls_channel = 1 if NUM_CLASSES == 2 else NUM_CLASSES
    rcnn_cls, rcnn_reg = fused_heads(feat, params['head'], cls_channel, reg_channel())

    return {'rcnn_cls': rcnn_cls, 'rcnn_reg': rcnn_reg}


# TODO(synk): ProposalTargetLayer / roipool3d_gpu / rotate_pc_along_y (training
# and ROI_SAMPLE_JIT branches) are external CUDA ops and are not translated;
# this script implements the eval path that consumes `pts_input` directly.


if __name__ == "__main__":
    key = jax.random.PRNGKey(0)
    params, key = init_params(key)

    B, N = 2, 64
    C_RPN = 32
    key, kx = jax.random.split(key)
    pts_input = jax.random.normal(
        kx, (B, N, rcnn_input_channel() + C_RPN), jnp.float32)
    # keep xyz coordinates in a small box so ball_query radii are meaningful
    pts_input = pts_input.at[..., 0:3].multiply(0.3)

    out = jax.jit(rcnn_forward)(params, pts_input)
    jax.block_until_ready(out)

    assert out['rcnn_cls'].shape == (B, 1), out['rcnn_cls'].shape
    assert out['rcnn_reg'].shape == (B, reg_channel()), out['rcnn_reg'].shape
    assert jnp.all(jnp.isfinite(out['rcnn_cls'])) and jnp.all(jnp.isfinite(out['rcnn_reg']))
    print("KERNEL_OK")
</pallas_src>

<mosaic_0001>
module attributes {stable_mosaic.version = 11 : i64} {
  func.func private @main(%arg0: i32) attributes {dimension_semantics = [#tpu.dimension_semantics<core_parallel>], iteration_bounds = array<i64: 2>, tpu.core_type = #tpu.core_type<sc_scalar_subcore>, window_params = []} {
    return
  }
}

module attributes {stable_mosaic.version = 11 : i64} {
  func.func private @main(%arg0: i32) attributes {dimension_semantics = [#tpu.dimension_semantics<core_parallel>], iteration_bounds = array<i64: 2>, tpu.core_type = #tpu.core_type<sc_scalar_subcore>, window_params = []} {
    return
  }
}

module attributes {stable_mosaic.version = 11 : i64} {
  func.func @kernel(%arg0: i32, %arg1: memref<128x5xf32, #tpu.memory_space<vmem>>, %arg2: memref<128x32xf32, #tpu.memory_space<vmem>>, %arg3: memref<5x32xbf16, #tpu.memory_space<vmem>>, %arg4: memref<1x32xf32, #tpu.memory_space<vmem>>, %arg5: memref<32x32xbf16, #tpu.memory_space<vmem>>, %arg6: memref<1x32xf32, #tpu.memory_space<vmem>>, %arg7: memref<32x32xbf16, #tpu.memory_space<vmem>>, %arg8: memref<32x32xbf16, #tpu.memory_space<vmem>>, %arg9: memref<1x32xf32, #tpu.memory_space<vmem>>, %arg10: memref<128x32xbf16, #tpu.memory_space<vmem>>) attributes {dimension_semantics = [#tpu.dimension_semantics<parallel>], iteration_bounds = array<i64: 1>, scalar_prefetch = 0 : i64, scratch_operands = 0 : i64, tpu.core_type = #tpu.core_type<tc>, window_params = [{transform_indices = @transform_0, window_bounds = array<i64: 128, 5>}, {transform_indices = @transform_1, window_bounds = array<i64: 128, 32>}, {pipeline_mode = #tpu.pipeline_mode<synchronous>, transform_indices = @transform_2, window_bounds = array<i64: 5, 32>}, {pipeline_mode = #tpu.pipeline_mode<synchronous>, transform_indices = @transform_3, window_bounds = array<i64: 1, 32>}, {pipeline_mode = #tpu.pipeline_mode<synchronous>, transform_indices = @transform_4, window_bounds = array<i64: 32, 32>}, {pipeline_mode = #tpu.pipeline_mode<synchronous>, transform_indices = @transform_5, window_bounds = array<i64: 1, 32>}, {pipeline_mode = #tpu.pipeline_mode<synchronous>, transform_indices = @transform_6, window_bounds = array<i64: 32, 32>}, {pipeline_mode = #tpu.pipeline_mode<synchronous>, transform_indices = @transform_7, window_bounds = array<i64: 32, 32>}, {pipeline_mode = #tpu.pipeline_mode<synchronous>, transform_indices = @transform_8, window_bounds = array<i64: 1, 32>}, {transform_indices = @transform_9, window_bounds = array<i64: 128, 32>}]} {
    %c0 = arith.constant 0 : index
    %c0_0 = arith.constant 0 : index
    %0 = vector.load %arg1[%c0, %c0_0] : memref<128x5xf32, #tpu.memory_space<vmem>>, vector<128x5xf32>
    %1 = arith.truncf %0 : vector<128x5xf32> to vector<128x5xbf16>
    %c0_1 = arith.constant 0 : index
    %c0_2 = arith.constant 0 : index
    %2 = vector.load %arg3[%c0_1, %c0_2] : memref<5x32xbf16, #tpu.memory_space<vmem>>, vector<5x32xbf16>
    %cst = arith.constant dense<0.000000e+00> : vector<128x32xf32>
    %3 = tpu.matmul %1, %2, %cst {dimension_numbers = #tpu.dot_dimension_numbers<[1], [0], [0], [1], [0, 0, 1, 1], [], []>} : vector<128x5xbf16>, vector<5x32xbf16>, vector<128x32xf32> -> vector<128x32xf32>
    %c0_3 = arith.constant 0 : index
    %c0_4 = arith.constant 0 : index
    %4 = vector.load %arg4[%c0_3, %c0_4] : memref<1x32xf32, #tpu.memory_space<vmem>>, vector<1x32xf32>
    %5 = vector.broadcast %4 : vector<1x32xf32> to vector<128x32xf32>
    %6 = arith.addf %3, %5 : vector<128x32xf32>
    %cst_5 = arith.constant 0.000000e+00 : f32
    %7 = vector.broadcast %cst_5 : f32 to vector<128x32xf32>
    %8 = arith.maximumf %6, %7 : vector<128x32xf32>
    %9 = arith.truncf %8 : vector<128x32xf32> to vector<128x32xbf16>
    %c0_6 = arith.constant 0 : index
    %c0_7 = arith.constant 0 : index
    %10 = vector.load %arg5[%c0_6, %c0_7] : memref<32x32xbf16, #tpu.memory_space<vmem>>, vector<32x32xbf16>
    %cst_8 = arith.constant dense<0.000000e+00> : vector<128x32xf32>
    %11 = tpu.matmul %9, %10, %cst_8 {dimension_numbers = #tpu.dot_dimension_numbers<[1], [0], [0], [1], [0, 0, 1, 1], [], []>} : vector<128x32xbf16>, vector<32x32xbf16>, vector<128x32xf32> -> vector<128x32xf32>
    %c0_9 = arith.constant 0 : index
    %c0_10 = arith.constant 0 : index
    %12 = vector.load %arg6[%c0_9, %c0_10] : memref<1x32xf32, #tpu.memory_space<vmem>>, vector<1x32xf32>
    %13 = vector.broadcast %12 : vector<1x32xf32> to vector<128x32xf32>
    %14 = arith.addf %11, %13 : vector<128x32xf32>
    %cst_11 = arith.constant 0.000000e+00 : f32
    %15 = vector.broadcast %cst_11 : f32 to vector<128x32xf32>
    %16 = arith.maximumf %14, %15 : vector<128x32xf32>
    %17 = arith.truncf %16 : vector<128x32xf32> to vector<128x32xbf16>
    %c0_12 = arith.constant 0 : index
    %c0_13 = arith.constant 0 : index
    %18 = vector.load %arg7[%c0_12, %c0_13] : memref<32x32xbf16, #tpu.memory_space<vmem>>, vector<32x32xbf16>
    %cst_14 = arith.constant dense<0.000000e+00> : vector<128x32xf32>
    %19 = tpu.matmul %17, %18, %cst_14 {dimension_numbers = #tpu.dot_dimension_numbers<[1], [0], [0], [1], [0, 0, 1, 1], [], []>} : vector<128x32xbf16>, vector<32x32xbf16>, vector<128x32xf32> -> vector<128x32xf32>
    %c0_15 = arith.constant 0 : index
    %c0_16 = arith.constant 0 : index
    %20 = vector.load %arg2[%c0_15, %c0_16] : memref<128x32xf32, #tpu.memory_space<vmem>>, vector<128x32xf32>
    %21 = arith.truncf %20 : vector<128x32xf32> to vector<128x32xbf16>
    %c0_17 = arith.constant 0 : index
    %c0_18 = arith.constant 0 : index
    %22 = vector.load %arg8[%c0_17, %c0_18] : memref<32x32xbf16, #tpu.memory_space<vmem>>, vector<32x32xbf16>
    %cst_19 = arith.constant dense<0.000000e+00> : vector<128x32xf32>
    %23 = tpu.matmul %21, %22, %cst_19 {dimension_numbers = #tpu.dot_dimension_numbers<[1], [0], [0], [1], [0, 0, 1, 1], [], []>} : vector<128x32xbf16>, vector<32x32xbf16>, vector<128x32xf32> -> vector<128x32xf32>
    %24 = arith.addf %19, %23 : vector<128x32xf32>
    %c0_20 = arith.constant 0 : index
    %c0_21 = arith.constant 0 : index
    %25 = vector.load %arg9[%c0_20, %c0_21] : memref<1x32xf32, #tpu.memory_space<vmem>>, vector<1x32xf32>
    %26 = vector.broadcast %25 : vector<1x32xf32> to vector<128x32xf32>
    %27 = arith.addf %24, %26 : vector<128x32xf32>
    %cst_22 = arith.constant 0.000000e+00 : f32
    %28 = vector.broadcast %cst_22 : f32 to vector<128x32xf32>
    %29 = arith.maximumf %27, %28 : vector<128x32xf32>
    %30 = arith.truncf %29 : vector<128x32xf32> to vector<128x32xbf16>
    %c0_23 = arith.constant 0 : index
    %c0_24 = arith.constant 0 : index
    %31 = vector.load %arg10[%c0_23, %c0_24] : memref<128x32xbf16, #tpu.memory_space<vmem>>, vector<128x32xbf16>
    tpu.vector_store %arg10[%c0_23, %c0_24], %30 {strides = array<i32>} : memref<128x32xbf16, #tpu.memory_space<vmem>>, vector<128x32xbf16>,
    return
  }
  func.func @transform_0(%arg0: i32) -> (i32, i32) {
    %c0_i32 = arith.constant 0 : i32
    %c0_i32_0 = arith.constant 0 : i32
    return %arg0, %c0_i32 : i32, i32
  }
  func.func @transform_1(%arg0: i32) -> (i32, i32) {
    %c0_i32 = arith.constant 0 : i32
    %c0_i32_0 = arith.constant 0 : i32
    return %arg0, %c0_i32 : i32, i32
  }
  func.func @transform_2(%arg0: i32) -> (i32, i32) {
    %c0_i32 = arith.constant 0 : i32
    %c0_i32_0 = arith.constant 0 : i32
    %c0_i32_1 = arith.constant 0 : i32
    return %c0_i32, %c0_i32_0 : i32, i32
  }
  func.func @transform_3(%arg0: i32) -> (i32, i32) {
    %c0_i32 = arith.constant 0 : i32
    %c0_i32_0 = arith.constant 0 : i32
    %c0_i32_1 = arith.constant 0 : i32
    return %c0_i32, %c0_i32_0 : i32, i32
  }
  func.func @transform_4(%arg0: i32) -> (i32, i32) {
    %c0_i32 = arith.constant 0 : i32
    %c0_i32_0 = arith.constant 0 : i32
    %c0_i32_1 = arith.constant 0 : i32
    return %c0_i32, %c0_i32_0 : i32, i32
  }
  func.func @transform_5(%arg0: i32) -> (i32, i32) {
    %c0_i32 = arith.constant 0 : i32
    %c0_i32_0 = arith.constant 0 : i32
    %c0_i32_1 = arith.constant 0 : i32
    return %c0_i32, %c0_i32_0 : i32, i32
  }
  func.func @transform_6(%arg0: i32) -> (i32, i32) {
    %c0_i32 = arith.constant 0 : i32
    %c0_i32_0 = arith.constant 0 : i32
    %c0_i32_1 = arith.constant 0 : i32
    return %c0_i32, %c0_i32_0 : i32, i32
  }
  func.func @transform_7(%arg0: i32) -> (i32, i32) {
    %c0_i32 = arith.constant 0 : i32
    %c0_i32_0 = arith.constant 0 : i32
    %c0_i32_1 = arith.constant 0 : i32
    return %c0_i32, %c0_i32_0 : i32, i32
  }
  func.func @transform_8(%arg0: i32) -> (i32, i32) {
    %c0_i32 = arith.constant 0 : i32
    %c0_i32_0 = arith.constant 0 : i32
    %c0_i32_1 = arith.constant 0 : i32
    return %c0_i32, %c0_i32_0 : i32, i32
  }
  func.func @transform_9(%arg0: i32) -> (i32, i32) {
    %c0_i32 = arith.constant 0 : i32
    %c0_i32_0 = arith.constant 0 : i32
    return %arg0, %c0_i32 : i32, i32
  }
}

module attributes {stable_mosaic.version = 11 : i64} {
  func.func @kernel(%arg0: i32, %arg1: memref<64x16x35xbf16, #tpu.memory_space<vmem>>, %arg2: memref<35x32xbf16, #tpu.memory_space<vmem>>, %arg3: memref<1x32xf32, #tpu.memory_space<vmem>>, %arg4: memref<32x32xbf16, #tpu.memory_space<vmem>>, %arg5: memref<1x32xf32, #tpu.memory_space<vmem>>, %arg6: memref<32x32xbf16, #tpu.memory_space<vmem>>, %arg7: memref<1x32xf32, #tpu.memory_space<vmem>>, %arg8: memref<64x32xbf16, #tpu.memory_space<vmem>>) attributes {dimension_semantics = [#tpu.dimension_semantics<parallel>], iteration_bounds = array<i64: 1>, scalar_prefetch = 0 : i64, scratch_operands = 0 : i64, tpu.core_type = #tpu.core_type<tc>, window_params = [{transform_indices = @transform_0, window_bounds = array<i64: 64, 16, 35>}, {pipeline_mode = #tpu.pipeline_mode<synchronous>, transform_indices = @transform_1, window_bounds = array<i64: 35, 32>}, {pipeline_mode = #tpu.pipeline_mode<synchronous>, transform_indices = @transform_2, window_bounds = array<i64: 1, 32>}, {pipeline_mode = #tpu.pipeline_mode<synchronous>, transform_indices = @transform_3, window_bounds = array<i64: 32, 32>}, {pipeline_mode = #tpu.pipeline_mode<synchronous>, transform_indices = @transform_4, window_bounds = array<i64: 1, 32>}, {pipeline_mode = #tpu.pipeline_mode<synchronous>, transform_indices = @transform_5, window_bounds = array<i64: 32, 32>}, {pipeline_mode = #tpu.pipeline_mode<synchronous>, transform_indices = @transform_6, window_bounds = array<i64: 1, 32>}, {transform_indices = @transform_7, window_bounds = array<i64: 64, 32>}]} {
    %c0 = arith.constant 0 : index
    %c0_0 = arith.constant 0 : index
    %c0_1 = arith.constant 0 : index
    %0 = vector.load %arg1[%c0, %c0_0, %c0_1] : memref<64x16x35xbf16, #tpu.memory_space<vmem>>, vector<64x16x35xbf16>
    %1 = vector.shape_cast %0 : vector<64x16x35xbf16> to vector<1024x35xbf16>
    %c0_2 = arith.constant 0 : index
    %c0_3 = arith.constant 0 : index
    %2 = vector.load %arg2[%c0_2, %c0_3] : memref<35x32xbf16, #tpu.memory_space<vmem>>, vector<35x32xbf16>
    %cst = arith.constant dense<0.000000e+00> : vector<1024x32xf32>
    %3 = tpu.matmul %1, %2, %cst {dimension_numbers = #tpu.dot_dimension_numbers<[1], [0], [0], [1], [0, 0, 1, 1], [], []>} : vector<1024x35xbf16>, vector<35x32xbf16>, vector<1024x32xf32> -> vector<1024x32xf32>
    %c0_4 = arith.constant 0 : index
    %c0_5 = arith.constant 0 : index
    %4 = vector.load %arg3[%c0_4, %c0_5] : memref<1x32xf32, #tpu.memory_space<vmem>>, vector<1x32xf32>
    %5 = vector.broadcast %4 : vector<1x32xf32> to vector<1024x32xf32>
    %6 = arith.addf %3, %5 : vector<1024x32xf32>
    %cst_6 = arith.constant 0.000000e+00 : f32
    %7 = vector.broadcast %cst_6 : f32 to vector<1024x32xf32>
    %8 = arith.maximumf %6, %7 : vector<1024x32xf32>
    %9 = arith.truncf %8 : vector<1024x32xf32> to vector<1024x32xbf16>
    %c0_7 = arith.constant 0 : index
    %c0_8 = arith.constant 0 : index
    %10 = vector.load %arg4[%c0_7, %c0_8] : memref<32x32xbf16, #tpu.memory_space<vmem>>, vector<32x32xbf16>
    %cst_9 = arith.constant dense<0.000000e+00> : vector<1024x32xf32>
    %11 = tpu.matmul %9, %10, %cst_9 {dimension_numbers = #tpu.dot_dimension_numbers<[1], [0], [0], [1], [0, 0, 1, 1], [], []>} : vector<1024x32xbf16>, vector<32x32xbf16>, vector<1024x32xf32> -> vector<1024x32xf32>
    %c0_10 = arith.constant 0 : index
    %c0_11 = arith.constant 0 : index
    %12 = vector.load %arg5[%c0_10, %c0_11] : memref<1x32xf32, #tpu.memory_space<vmem>>, vector<1x32xf32>
    %13 = vector.broadcast %12 : vector<1x32xf32> to vector<1024x32xf32>
    %14 = arith.addf %11, %13 : vector<1024x32xf32>
    %cst_12 = arith.constant 0.000000e+00 : f32
    %15 = vector.broadcast %cst_12 : f32 to vector<1024x32xf32>
    %16 = arith.maximumf %14, %15 : vector<1024x32xf32>
    %17 = arith.truncf %16 : vector<1024x32xf32> to vector<1024x32xbf16>
    %c0_13 = arith.constant 0 : index
    %c0_14 = arith.constant 0 : index
    %18 = vector.load %arg6[%c0_13, %c0_14] : memref<32x32xbf16, #tpu.memory_space<vmem>>, vector<32x32xbf16>
    %cst_15 = arith.constant dense<0.000000e+00> : vector<1024x32xf32>
    %19 = tpu.matmul %17, %18, %cst_15 {dimension_numbers = #tpu.dot_dimension_numbers<[1], [0], [0], [1], [0, 0, 1, 1], [], []>} : vector<1024x32xbf16>, vector<32x32xbf16>, vector<1024x32xf32> -> vector<1024x32xf32>
    %c0_16 = arith.constant 0 : index
    %c0_17 = arith.constant 0 : index
    %20 = vector.load %arg7[%c0_16, %c0_17] : memref<1x32xf32, #tpu.memory_space<vmem>>, vector<1x32xf32>
    %21 = vector.broadcast %20 : vector<1x32xf32> to vector<1024x32xf32>
    %22 = arith.addf %19, %21 : vector<1024x32xf32>
    %cst_18 = arith.constant 0.000000e+00 : f32
    %23 = vector.broadcast %cst_18 : f32 to vector<1024x32xf32>
    %24 = arith.maximumf %22, %23 : vector<1024x32xf32>
    %25 = vector.shape_cast %24 : vector<1024x32xf32> to vector<64x16x32xf32>
    %cst_19 = arith.constant dense<0xFF800000> : vector<64x32xf32>
    %26 = vector.multi_reduction <maximumf>, %25, %cst_19 [1] : vector<64x16x32xf32> to vector<64x32xf32>
    %27 = arith.truncf %26 : vector<64x32xf32> to vector<64x32xbf16>
    %c0_20 = arith.constant 0 : index
    %c0_21 = arith.constant 0 : index
    %28 = vector.load %arg8[%c0_20, %c0_21] : memref<64x32xbf16, #tpu.memory_space<vmem>>, vector<64x32xbf16>
    tpu.vector_store %arg8[%c0_20, %c0_21], %27 {strides = array<i32>} : memref<64x32xbf16, #tpu.memory_space<vmem>>, vector<64x32xbf16>,
    return
  }
  func.func @transform_0(%arg0: i32) -> (i32, i32, i32) {
    %c0_i32 = arith.constant 0 : i32
    %c0_i32_0 = arith.constant 0 : i32
    %c0_i32_1 = arith.constant 0 : i32
    return %arg0, %c0_i32, %c0_i32_0 : i32, i32, i32
  }
  func.func @transform_1(%arg0: i32) -> (i32, i32) {
    %c0_i32 = arith.constant 0 : i32
    %c0_i32_0 = arith.constant 0 : i32
    %c0_i32_1 = arith.constant 0 : i32
    return %c0_i32, %c0_i32_0 : i32, i32
  }
  func.func @transform_2(%arg0: i32) -> (i32, i32) {
    %c0_i32 = arith.constant 0 : i32
    %c0_i32_0 = arith.constant 0 : i32
    %c0_i32_1 = arith.constant 0 : i32
    return %c0_i32, %c0_i32_0 : i32, i32
  }
  func.func @transform_3(%arg0: i32) -> (i32, i32) {
    %c0_i32 = arith.constant 0 : i32
    %c0_i32_0 = arith.constant 0 : i32
    %c0_i32_1 = arith.constant 0 : i32
    return %c0_i32, %c0_i32_0 : i32, i32
  }
  func.func @transform_4(%arg0: i32) -> (i32, i32) {
    %c0_i32 = arith.constant 0 : i32
    %c0_i32_0 = arith.constant 0 : i32
    %c0_i32_1 = arith.constant 0 : i32
    return %c0_i32, %c0_i32_0 : i32, i32
  }
  func.func @transform_5(%arg0: i32) -> (i32, i32) {
    %c0_i32 = arith.constant 0 : i32
    %c0_i32_0 = arith.constant 0 : i32
    %c0_i32_1 = arith.constant 0 : i32
    return %c0_i32, %c0_i32_0 : i32, i32
  }
  func.func @transform_6(%arg0: i32) -> (i32, i32) {
    %c0_i32 = arith.constant 0 : i32
    %c0_i32_0 = arith.constant 0 : i32
    %c0_i32_1 = arith.constant 0 : i32
    return %c0_i32, %c0_i32_0 : i32, i32
  }
  func.func @transform_7(%arg0: i32) -> (i32, i32) {
    %c0_i32 = arith.constant 0 : i32
    %c0_i32_0 = arith.constant 0 : i32
    return %arg0, %c0_i32 : i32, i32
  }
}

module attributes {stable_mosaic.version = 11 : i64} {
  func.func @kernel(%arg0: i32, %arg1: memref<32x16x35xbf16, #tpu.memory_space<vmem>>, %arg2: memref<35x32xbf16, #tpu.memory_space<vmem>>, %arg3: memref<1x32xf32, #tpu.memory_space<vmem>>, %arg4: memref<32x32xbf16, #tpu.memory_space<vmem>>, %arg5: memref<1x32xf32, #tpu.memory_space<vmem>>, %arg6: memref<32x64xbf16, #tpu.memory_space<vmem>>, %arg7: memref<1x64xf32, #tpu.memory_space<vmem>>, %arg8: memref<32x64xbf16, #tpu.memory_space<vmem>>) attributes {dimension_semantics = [#tpu.dimension_semantics<parallel>], iteration_bounds = array<i64: 1>, scalar_prefetch = 0 : i64, scratch_operands = 0 : i64, tpu.core_type = #tpu.core_type<tc>, window_params = [{transform_indices = @transform_0, window_bounds = array<i64: 32, 16, 35>}, {pipeline_mode = #tpu.pipeline_mode<synchronous>, transform_indices = @transform_1, window_bounds = array<i64: 35, 32>}, {pipeline_mode = #tpu.pipeline_mode<synchronous>, transform_indices = @transform_2, window_bounds = array<i64: 1, 32>}, {pipeline_mode = #tpu.pipeline_mode<synchronous>, transform_indices = @transform_3, window_bounds = array<i64: 32, 32>}, {pipeline_mode = #tpu.pipeline_mode<synchronous>, transform_indices = @transform_4, window_bounds = array<i64: 1, 32>}, {pipeline_mode = #tpu.pipeline_mode<synchronous>, transform_indices = @transform_5, window_bounds = array<i64: 32, 64>}, {pipeline_mode = #tpu.pipeline_mode<synchronous>, transform_indices = @transform_6, window_bounds = array<i64: 1, 64>}, {transform_indices = @transform_7, window_bounds = array<i64: 32, 64>}]} {
    %c0 = arith.constant 0 : index
    %c0_0 = arith.constant 0 : index
    %c0_1 = arith.constant 0 : index
    %0 = vector.load %arg1[%c0, %c0_0, %c0_1] : memref<32x16x35xbf16, #tpu.memory_space<vmem>>, vector<32x16x35xbf16>
    %1 = vector.shape_cast %0 : vector<32x16x35xbf16> to vector<512x35xbf16>
    %c0_2 = arith.constant 0 : index
    %c0_3 = arith.constant 0 : index
    %2 = vector.load %arg2[%c0_2, %c0_3] : memref<35x32xbf16, #tpu.memory_space<vmem>>, vector<35x32xbf16>
    %cst = arith.constant dense<0.000000e+00> : vector<512x32xf32>
    %3 = tpu.matmul %1, %2, %cst {dimension_numbers = #tpu.dot_dimension_numbers<[1], [0], [0], [1], [0, 0, 1, 1], [], []>} : vector<512x35xbf16>, vector<35x32xbf16>, vector<512x32xf32> -> vector<512x32xf32>
    %c0_4 = arith.constant 0 : index
    %c0_5 = arith.constant 0 : index
    %4 = vector.load %arg3[%c0_4, %c0_5] : memref<1x32xf32, #tpu.memory_space<vmem>>, vector<1x32xf32>
    %5 = vector.broadcast %4 : vector<1x32xf32> to vector<512x32xf32>
    %6 = arith.addf %3, %5 : vector<512x32xf32>
    %cst_6 = arith.constant 0.000000e+00 : f32
    %7 = vector.broadcast %cst_6 : f32 to vector<512x32xf32>
    %8 = arith.maximumf %6, %7 : vector<512x32xf32>
    %9 = arith.truncf %8 : vector<512x32xf32> to vector<512x32xbf16>
    %c0_7 = arith.constant 0 : index
    %c0_8 = arith.constant 0 : index
    %10 = vector.load %arg4[%c0_7, %c0_8] : memref<32x32xbf16, #tpu.memory_space<vmem>>, vector<32x32xbf16>
    %cst_9 = arith.constant dense<0.000000e+00> : vector<512x32xf32>
    %11 = tpu.matmul %9, %10, %cst_9 {dimension_numbers = #tpu.dot_dimension_numbers<[1], [0], [0], [1], [0, 0, 1, 1], [], []>} : vector<512x32xbf16>, vector<32x32xbf16>, vector<512x32xf32> -> vector<512x32xf32>
    %c0_10 = arith.constant 0 : index
    %c0_11 = arith.constant 0 : index
    %12 = vector.load %arg5[%c0_10, %c0_11] : memref<1x32xf32, #tpu.memory_space<vmem>>, vector<1x32xf32>
    %13 = vector.broadcast %12 : vector<1x32xf32> to vector<512x32xf32>
    %14 = arith.addf %11, %13 : vector<512x32xf32>
    %cst_12 = arith.constant 0.000000e+00 : f32
    %15 = vector.broadcast %cst_12 : f32 to vector<512x32xf32>
    %16 = arith.maximumf %14, %15 : vector<512x32xf32>
    %17 = arith.truncf %16 : vector<512x32xf32> to vector<512x32xbf16>
    %c0_13 = arith.constant 0 : index
    %c0_14 = arith.constant 0 : index
    %18 = vector.load %arg6[%c0_13, %c0_14] : memref<32x64xbf16, #tpu.memory_space<vmem>>, vector<32x64xbf16>
    %cst_15 = arith.constant dense<0.000000e+00> : vector<512x64xf32>
    %19 = tpu.matmul %17, %18, %cst_15 {dimension_numbers = #tpu.dot_dimension_numbers<[1], [0], [0], [1], [0, 0, 1, 1], [], []>} : vector<512x32xbf16>, vector<32x64xbf16>, vector<512x64xf32> -> vector<512x64xf32>
    %c0_16 = arith.constant 0 : index
    %c0_17 = arith.constant 0 : index
    %20 = vector.load %arg7[%c0_16, %c0_17] : memref<1x64xf32, #tpu.memory_space<vmem>>, vector<1x64xf32>
    %21 = vector.broadcast %20 : vector<1x64xf32> to vector<512x64xf32>
    %22 = arith.addf %19, %21 : vector<512x64xf32>
    %cst_18 = arith.constant 0.000000e+00 : f32
    %23 = vector.broadcast %cst_18 : f32 to vector<512x64xf32>
    %24 = arith.maximumf %22, %23 : vector<512x64xf32>
    %25 = vector.shape_cast %24 : vector<512x64xf32> to vector<32x16x64xf32>
    %cst_19 = arith.constant dense<0xFF800000> : vector<32x64xf32>
    %26 = vector.multi_reduction <maximumf>, %25, %cst_19 [1] : vector<32x16x64xf32> to vector<32x64xf32>
    %27 = arith.truncf %26 : vector<32x64xf32> to vector<32x64xbf16>
    %c0_20 = arith.constant 0 : index
    %c0_21 = arith.constant 0 : index
    %28 = vector.load %arg8[%c0_20, %c0_21] : memref<32x64xbf16, #tpu.memory_space<vmem>>, vector<32x64xbf16>
    tpu.vector_store %arg8[%c0_20, %c0_21], %27 {strides = array<i32>} : memref<32x64xbf16, #tpu.memory_space<vmem>>, vector<32x64xbf16>,
    return
  }
  func.func @transform_0(%arg0: i32) -> (i32, i32, i32) {
    %c0_i32 = arith.constant 0 : i32
    %c0_i32_0 = arith.constant 0 : i32
    %c0_i32_1 = arith.constant 0 : i32
    return %arg0, %c0_i32, %c0_i32_0 : i32, i32, i32
  }
  func.func @transform_1(%arg0: i32) -> (i32, i32) {
    %c0_i32 = arith.constant 0 : i32
    %c0_i32_0 = arith.constant 0 : i32
    %c0_i32_1 = arith.constant 0 : i32
    return %c0_i32, %c0_i32_0 : i32, i32
  }
  func.func @transform_2(%arg0: i32) -> (i32, i32) {
    %c0_i32 = arith.constant 0 : i32
    %c0_i32_0 = arith.constant 0 : i32
    %c0_i32_1 = arith.constant 0 : i32
    return %c0_i32, %c0_i32_0 : i32, i32
  }
  func.func @transform_3(%arg0: i32) -> (i32, i32) {
    %c0_i32 = arith.constant 0 : i32
    %c0_i32_0 = arith.constant 0 : i32
    %c0_i32_1 = arith.constant 0 : i32
    return %c0_i32, %c0_i32_0 : i32, i32
  }
  func.func @transform_4(%arg0: i32) -> (i32, i32) {
    %c0_i32 = arith.constant 0 : i32
    %c0_i32_0 = arith.constant 0 : i32
    %c0_i32_1 = arith.constant 0 : i32
    return %c0_i32, %c0_i32_0 : i32, i32
  }
  func.func @transform_5(%arg0: i32) -> (i32, i32) {
    %c0_i32 = arith.constant 0 : i32
    %c0_i32_0 = arith.constant 0 : i32
    %c0_i32_1 = arith.constant 0 : i32
    return %c0_i32, %c0_i32_0 : i32, i32
  }
  func.func @transform_6(%arg0: i32) -> (i32, i32) {
    %c0_i32 = arith.constant 0 : i32
    %c0_i32_0 = arith.constant 0 : i32
    %c0_i32_1 = arith.constant 0 : i32
    return %c0_i32, %c0_i32_0 : i32, i32
  }
  func.func @transform_7(%arg0: i32) -> (i32, i32) {
    %c0_i32 = arith.constant 0 : i32
    %c0_i32_0 = arith.constant 0 : i32
    return %arg0, %c0_i32 : i32, i32
  }
}

module attributes {stable_mosaic.version = 11 : i64} {
  func.func @kernel(%arg0: i32, %arg1: memref<2x16x67xbf16, #tpu.memory_space<vmem>>, %arg2: memref<67x64xbf16, #tpu.memory_space<vmem>>, %arg3: memref<1x64xf32, #tpu.memory_space<vmem>>, %arg4: memref<64x64xbf16, #tpu.memory_space<vmem>>, %arg5: memref<1x64xf32, #tpu.memory_space<vmem>>, %arg6: memref<64x128xbf16, #tpu.memory_space<vmem>>, %arg7: memref<1x128xf32, #tpu.memory_space<vmem>>, %arg8: memref<2x128xbf16, #tpu.memory_space<vmem>>) attributes {dimension_semantics = [#tpu.dimension_semantics<parallel>], iteration_bounds = array<i64: 1>, scalar_prefetch = 0 : i64, scratch_operands = 0 : i64, tpu.core_type = #tpu.core_type<tc>, window_params = [{transform_indices = @transform_0, window_bounds = array<i64: 2, 16, 67>}, {pipeline_mode = #tpu.pipeline_mode<synchronous>, transform_indices = @transform_1, window_bounds = array<i64: 67, 64>}, {pipeline_mode = #tpu.pipeline_mode<synchronous>, transform_indices = @transform_2, window_bounds = array<i64: 1, 64>}, {pipeline_mode = #tpu.pipeline_mode<synchronous>, transform_indices = @transform_3, window_bounds = array<i64: 64, 64>}, {pipeline_mode = #tpu.pipeline_mode<synchronous>, transform_indices = @transform_4, window_bounds = array<i64: 1, 64>}, {pipeline_mode = #tpu.pipeline_mode<synchronous>, transform_indices = @transform_5, window_bounds = array<i64: 64, 128>}, {pipeline_mode = #tpu.pipeline_mode<synchronous>, transform_indices = @transform_6, window_bounds = array<i64: 1, 128>}, {transform_indices = @transform_7, window_bounds = array<i64: 2, 128>}]} {
    %c0 = arith.constant 0 : index
    %c0_0 = arith.constant 0 : index
    %c0_1 = arith.constant 0 : index
    %0 = vector.load %arg1[%c0, %c0_0, %c0_1] : memref<2x16x67xbf16, #tpu.memory_space<vmem>>, vector<2x16x67xbf16>
    %1 = vector.shape_cast %0 : vector<2x16x67xbf16> to vector<32x67xbf16>
    %c0_2 = arith.constant 0 : index
    %c0_3 = arith.constant 0 : index
    %2 = vector.load %arg2[%c0_2, %c0_3] : memref<67x64xbf16, #tpu.memory_space<vmem>>, vector<67x64xbf16>
    %cst = arith.constant dense<0.000000e+00> : vector<32x64xf32>
    %3 = tpu.matmul %1, %2, %cst {dimension_numbers = #tpu.dot_dimension_numbers<[1], [0], [0], [1], [0, 0, 1, 1], [], []>} : vector<32x67xbf16>, vector<67x64xbf16>, vector<32x64xf32> -> vector<32x64xf32>
    %c0_4 = arith.constant 0 : index
    %c0_5 = arith.constant 0 : index
    %4 = vector.load %arg3[%c0_4, %c0_5] : memref<1x64xf32, #tpu.memory_space<vmem>>, vector<1x64xf32>
    %5 = vector.broadcast %4 : vector<1x64xf32> to vector<32x64xf32>
    %6 = arith.addf %3, %5 : vector<32x64xf32>
    %cst_6 = arith.constant 0.000000e+00 : f32
    %7 = vector.broadcast %cst_6 : f32 to vector<32x64xf32>
    %8 = arith.maximumf %6, %7 : vector<32x64xf32>
    %9 = arith.truncf %8 : vector<32x64xf32> to vector<32x64xbf16>
    %c0_7 = arith.constant 0 : index
    %c0_8 = arith.constant 0 : index
    %10 = vector.load %arg4[%c0_7, %c0_8] : memref<64x64xbf16, #tpu.memory_space<vmem>>, vector<64x64xbf16>
    %cst_9 = arith.constant dense<0.000000e+00> : vector<32x64xf32>
    %11 = tpu.matmul %9, %10, %cst_9 {dimension_numbers = #tpu.dot_dimension_numbers<[1], [0], [0], [1], [0, 0, 1, 1], [], []>} : vector<32x64xbf16>, vector<64x64xbf16>, vector<32x64xf32> -> vector<32x64xf32>
    %c0_10 = arith.constant 0 : index
    %c0_11 = arith.constant 0 : index
    %12 = vector.load %arg5[%c0_10, %c0_11] : memref<1x64xf32, #tpu.memory_space<vmem>>, vector<1x64xf32>
    %13 = vector.broadcast %12 : vector<1x64xf32> to vector<32x64xf32>
    %14 = arith.addf %11, %13 : vector<32x64xf32>
    %cst_12 = arith.constant 0.000000e+00 : f32
    %15 = vector.broadcast %cst_12 : f32 to vector<32x64xf32>
    %16 = arith.maximumf %14, %15 : vector<32x64xf32>
    %17 = arith.truncf %16 : vector<32x64xf32> to vector<32x64xbf16>
    %c0_13 = arith.constant 0 : index
    %c0_14 = arith.constant 0 : index
    %18 = vector.load %arg6[%c0_13, %c0_14] : memref<64x128xbf16, #tpu.memory_space<vmem>>, vector<64x128xbf16>
    %cst_15 = arith.constant dense<0.000000e+00> : vector<32x128xf32>
    %19 = tpu.matmul %17, %18, %cst_15 {dimension_numbers = #tpu.dot_dimension_numbers<[1], [0], [0], [1], [0, 0, 1, 1], [], []>} : vector<32x64xbf16>, vector<64x128xbf16>, vector<32x128xf32> -> vector<32x128xf32>
    %c0_16 = arith.constant 0 : index
    %c0_17 = arith.constant 0 : index
    %20 = vector.load %arg7[%c0_16, %c0_17] : memref<1x128xf32, #tpu.memory_space<vmem>>, vector<1x128xf32>
    %21 = vector.broadcast %20 : vector<1x128xf32> to vector<32x128xf32>
    %22 = arith.addf %19, %21 : vector<32x128xf32>
    %cst_18 = arith.constant 0.000000e+00 : f32
    %23 = vector.broadcast %cst_18 : f32 to vector<32x128xf32>
    %24 = arith.maximumf %22, %23 : vector<32x128xf32>
    %25 = vector.shape_cast %24 : vector<32x128xf32> to vector<2x16x128xf32>
    %cst_19 = arith.constant dense<0xFF800000> : vector<2x128xf32>
    %26 = vector.multi_reduction <maximumf>, %25, %cst_19 [1] : vector<2x16x128xf32> to vector<2x128xf32>
    %27 = arith.truncf %26 : vector<2x128xf32> to vector<2x128xbf16>
    %c0_20 = arith.constant 0 : index
    %c0_21 = arith.constant 0 : index
    %28 = vector.load %arg8[%c0_20, %c0_21] : memref<2x128xbf16, #tpu.memory_space<vmem>>, vector<2x128xbf16>
    tpu.vector_store %arg8[%c0_20, %c0_21], %27 {strides = array<i32>} : memref<2x128xbf16, #tpu.memory_space<vmem>>, vector<2x128xbf16>,
    return
  }
  func.func @transform_0(%arg0: i32) -> (i32, i32, i32) {
    %c0_i32 = arith.constant 0 : i32
    %c0_i32_0 = arith.constant 0 : i32
    %c0_i32_1 = arith.constant 0 : i32
    return %arg0, %c0_i32, %c0_i32_0 : i32, i32, i32
  }
  func.func @transform_1(%arg0: i32) -> (i32, i32) {
    %c0_i32 = arith.constant 0 : i32
    %c0_i32_0 = arith.constant 0 : i32
    %c0_i32_1 = arith.constant 0 : i32
    return %c0_i32, %c0_i32_0 : i32, i32
  }
  func.func @transform_2(%arg0: i32) -> (i32, i32) {
    %c0_i32 = arith.constant 0 : i32
    %c0_i32_0 = arith.constant 0 : i32
    %c0_i32_1 = arith.constant 0 : i32
    return %c0_i32, %c0_i32_0 : i32, i32
  }
  func.func @transform_3(%arg0: i32) -> (i32, i32) {
    %c0_i32 = arith.constant 0 : i32
    %c0_i32_0 = arith.constant 0 : i32
    %c0_i32_1 = arith.constant 0 : i32
    return %c0_i32, %c0_i32_0 : i32, i32
  }
  func.func @transform_4(%arg0: i32) -> (i32, i32) {
    %c0_i32 = arith.constant 0 : i32
    %c0_i32_0 = arith.constant 0 : i32
    %c0_i32_1 = arith.constant 0 : i32
    return %c0_i32, %c0_i32_0 : i32, i32
  }
  func.func @transform_5(%arg0: i32) -> (i32, i32) {
    %c0_i32 = arith.constant 0 : i32
    %c0_i32_0 = arith.constant 0 : i32
    %c0_i32_1 = arith.constant 0 : i32
    return %c0_i32, %c0_i32_0 : i32, i32
  }
  func.func @transform_6(%arg0: i32) -> (i32, i32) {
    %c0_i32 = arith.constant 0 : i32
    %c0_i32_0 = arith.constant 0 : i32
    %c0_i32_1 = arith.constant 0 : i32
    return %c0_i32, %c0_i32_0 : i32, i32
  }
  func.func @transform_7(%arg0: i32) -> (i32, i32) {
    %c0_i32 = arith.constant 0 : i32
    %c0_i32_0 = arith.constant 0 : i32
    return %arg0, %c0_i32 : i32, i32
  }
}

module attributes {stable_mosaic.version = 11 : i64} {
  func.func @kernel(%arg0: i32, %arg1: memref<2x128xbf16, #tpu.memory_space<vmem>>, %arg2: memref<128x64xbf16, #tpu.memory_space<vmem>>, %arg3: memref<1x64xf32, #tpu.memory_space<vmem>>, %arg4: memref<64x64xbf16, #tpu.memory_space<vmem>>, %arg5: memref<1x64xf32, #tpu.memory_space<vmem>>, %arg6: memref<64x128xbf16, #tpu.memory_space<vmem>>, %arg7: memref<1x128xf32, #tpu.memory_space<vmem>>, %arg8: memref<2x128xf32, #tpu.memory_space<vmem>>) attributes {dimension_semantics = [#tpu.dimension_semantics<arbitrary>], iteration_bounds = array<i64: 1>, scalar_prefetch = 0 : i64, scratch_operands = 0 : i64, tpu.core_type = #tpu.core_type<tc>, window_params = [{pipeline_mode = #tpu.pipeline_mode<synchronous>, transform_indices = @transform_0, window_bounds = array<i64: 2, 128>}, {pipeline_mode = #tpu.pipeline_mode<synchronous>, transform_indices = @transform_1, window_bounds = array<i64: 128, 64>}, {pipeline_mode = #tpu.pipeline_mode<synchronous>, transform_indices = @transform_2, window_bounds = array<i64: 1, 64>}, {pipeline_mode = #tpu.pipeline_mode<synchronous>, transform_indices = @transform_3, window_bounds = array<i64: 64, 64>}, {pipeline_mode = #tpu.pipeline_mode<synchronous>, transform_indices = @transform_4, window_bounds = array<i64: 1, 64>}, {pipeline_mode = #tpu.pipeline_mode<synchronous>, transform_indices = @transform_5, window_bounds = array<i64: 64, 128>}, {pipeline_mode = #tpu.pipeline_mode<synchronous>, transform_indices = @transform_6, window_bounds = array<i64: 1, 128>}, {pipeline_mode = #tpu.pipeline_mode<synchronous>, transform_indices = @transform_7, window_bounds = array<i64: 2, 128>}]} {
    %c0 = arith.constant 0 : index
    %c0_0 = arith.constant 0 : index
    %0 = vector.load %arg1[%c0, %c0_0] : memref<2x128xbf16, #tpu.memory_space<vmem>>, vector<2x128xbf16>
    %c0_1 = arith.constant 0 : index
    %c0_2 = arith.constant 0 : index
    %1 = vector.load %arg2[%c0_1, %c0_2] : memref<128x64xbf16, #tpu.memory_space<vmem>>, vector<128x64xbf16>
    %cst = arith.constant dense<0.000000e+00> : vector<2x64xf32>
    %2 = tpu.matmul %0, %1, %cst {dimension_numbers = #tpu.dot_dimension_numbers<[1], [0], [0], [1], [0, 0, 1, 1], [], []>} : vector<2x128xbf16>, vector<128x64xbf16>, vector<2x64xf32> -> vector<2x64xf32>
    %c0_3 = arith.constant 0 : index
    %c0_4 = arith.constant 0 : index
    %3 = vector.load %arg3[%c0_3, %c0_4] : memref<1x64xf32, #tpu.memory_space<vmem>>, vector<1x64xf32>
    %4 = vector.broadcast %3 : vector<1x64xf32> to vector<2x64xf32>
    %5 = arith.addf %2, %4 : vector<2x64xf32>
    %cst_5 = arith.constant 0.000000e+00 : f32
    %6 = vector.broadcast %cst_5 : f32 to vector<2x64xf32>
    %7 = arith.maximumf %5, %6 : vector<2x64xf32>
    %8 = arith.truncf %7 : vector<2x64xf32> to vector<2x64xbf16>
    %c0_6 = arith.constant 0 : index
    %c0_7 = arith.constant 0 : index
    %9 = vector.load %arg4[%c0_6, %c0_7] : memref<64x64xbf16, #tpu.memory_space<vmem>>, vector<64x64xbf16>
    %cst_8 = arith.constant dense<0.000000e+00> : vector<2x64xf32>
    %10 = tpu.matmul %8, %9, %cst_8 {dimension_numbers = #tpu.dot_dimension_numbers<[1], [0], [0], [1], [0, 0, 1, 1], [], []>} : vector<2x64xbf16>, vector<64x64xbf16>, vector<2x64xf32> -> vector<2x64xf32>
    %c0_9 = arith.constant 0 : index
    %c0_10 = arith.constant 0 : index
    %11 = vector.load %arg5[%c0_9, %c0_10] : memref<1x64xf32, #tpu.memory_space<vmem>>, vector<1x64xf32>
    %12 = vector.broadcast %11 : vector<1x64xf32> to vector<2x64xf32>
    %13 = arith.addf %10, %12 : vector<2x64xf32>
    %cst_11 = arith.constant 0.000000e+00 : f32
    %14 = vector.broadcast %cst_11 : f32 to vector<2x64xf32>
    %15 = arith.maximumf %13, %14 : vector<2x64xf32>
    %16 = arith.truncf %15 : vector<2x64xf32> to vector<2x64xbf16>
    %c0_12 = arith.constant 0 : index
    %c0_13 = arith.constant 0 : index
    %17 = vector.load %arg6[%c0_12, %c0_13] : memref<64x128xbf16, #tpu.memory_space<vmem>>, vector<64x128xbf16>
    %cst_14 = arith.constant dense<0.000000e+00> : vector<2x128xf32>
    %18 = tpu.matmul %16, %17, %cst_14 {dimension_numbers = #tpu.dot_dimension_numbers<[1], [0], [0], [1], [0, 0, 1, 1], [], []>} : vector<2x64xbf16>, vector<64x128xbf16>, vector<2x128xf32> -> vector<2x128xf32>
    %c0_15 = arith.constant 0 : index
    %c0_16 = arith.constant 0 : index
    %19 = vector.load %arg7[%c0_15, %c0_16] : memref<1x128xf32, #tpu.memory_space<vmem>>, vector<1x128xf32>
    %20 = vector.broadcast %19 : vector<1x128xf32> to vector<2x128xf32>
    %21 = arith.addf %18, %20 : vector<2x128xf32>
    %c0_17 = arith.constant 0 : index
    %c0_18 = arith.constant 0 : index
    %22 = vector.load %arg8[%c0_17, %c0_18] : memref<2x128xf32, #tpu.memory_space<vmem>>, vector<2x128xf32>
    tpu.vector_store %arg8[%c0_17, %c0_18], %21 {strides = array<i32>} : memref<2x128xf32, #tpu.memory_space<vmem>>, vector<2x128xf32>,
    return
  }
  func.func @transform_0(%arg0: i32) -> (i32, i32) {
    %c0_i32 = arith.constant 0 : i32
    %c0_i32_0 = arith.constant 0 : i32
    %c0_i32_1 = arith.constant 0 : i32
    return %c0_i32, %c0_i32_0 : i32, i32
  }
  func.func @transform_1(%arg0: i32) -> (i32, i32) {
    %c0_i32 = arith.constant 0 : i32
    %c0_i32_0 = arith.constant 0 : i32
    %c0_i32_1 = arith.constant 0 : i32
    return %c0_i32, %c0_i32_0 : i32, i32
  }
  func.func @transform_2(%arg0: i32) -> (i32, i32) {
    %c0_i32 = arith.constant 0 : i32
    %c0_i32_0 = arith.constant 0 : i32
    %c0_i32_1 = arith.constant 0 : i32
    return %c0_i32, %c0_i32_0 : i32, i32
  }
  func.func @transform_3(%arg0: i32) -> (i32, i32) {
    %c0_i32 = arith.constant 0 : i32
    %c0_i32_0 = arith.constant 0 : i32
    %c0_i32_1 = arith.constant 0 : i32
    return %c0_i32, %c0_i32_0 : i32, i32
  }
  func.func @transform_4(%arg0: i32) -> (i32, i32) {
    %c0_i32 = arith.constant 0 : i32
    %c0_i32_0 = arith.constant 0 : i32
    %c0_i32_1 = arith.constant 0 : i32
    return %c0_i32, %c0_i32_0 : i32, i32
  }
  func.func @transform_5(%arg0: i32) -> (i32, i32) {
    %c0_i32 = arith.constant 0 : i32
    %c0_i32_0 = arith.constant 0 : i32
    %c0_i32_1 = arith.constant 0 : i32
    return %c0_i32, %c0_i32_0 : i32, i32
  }
  func.func @transform_6(%arg0: i32) -> (i32, i32) {
    %c0_i32 = arith.constant 0 : i32
    %c0_i32_0 = arith.constant 0 : i32
    %c0_i32_1 = arith.constant 0 : i32
    return %c0_i32, %c0_i32_0 : i32, i32
  }
  func.func @transform_7(%arg0: i32) -> (i32, i32) {
    %c0_i32 = arith.constant 0 : i32
    %c0_i32_0 = arith.constant 0 : i32
    %c0_i32_1 = arith.constant 0 : i32
    return %c0_i32, %c0_i32_0 : i32, i32
  }
}

</mosaic_0001>

<bundles_post_ra>
// kernel: custom-call.20
= control target key start
LH: loop header
LB: loop body
LE: loop exit
PB: predicated region body
PF: predicated region fallthrough
CT: control target
= control target key end

     0   :  { %s6_s0 = inlined_call_operand.vmem [shape: f32[2,64], index: 0, kind: output, shape index: {}]  }

// kernel: custom-call.21
= control target key start
LH: loop header
LB: loop body
LE: loop exit
PB: predicated region body
PF: predicated region fallthrough
CT: control target
= control target key end

     0   :  { %s6_s0 = inlined_call_operand.vmem [shape: f32[2,32], index: 0, kind: output, shape index: {}]  }

// kernel: rcnn_forward.5
= control target key start
LH: loop header
LB: loop body
LE: loop exit
PB: predicated region body
PF: predicated region fallthrough
CT: control target
= control target key end

     0   :  { %vm90_vm0 = vcmask 1041408   ;;  %vm91_vm1 = vcmask 1042432   ;;  %v1006_v1 = vmov 65535   ;;  %vm65_vm2 = vcmask 39936   ;;  %s1297_s2 = inlined_call_operand.vmem [shape: bf16[5,32], index: 2, kind: input, shape index: {}]   ;;  %s1298_s0 = inlined_call_operand.vmem [shape: f32[128,5], index: 0, kind: input, shape index: {}]   ;;  %s1299_s4 = inlined_call_operand.vmem [shape: bf16[32,32], index: 4, kind: input, shape index: {}]   ;;  %s1300_s7 = inlined_call_operand.vmem [shape: bf16[32,32], index: 7, kind: input, shape index: {}]   ;;  %s1301_s6 = inlined_call_operand.vmem [shape: bf16[32,32], index: 6, kind: input, shape index: {}]   ;;  %s1302_s3 = inlined_call_operand.vmem [shape: f32[1,32], index: 3, kind: input, shape index: {}]   ;;  %s1303_s1 = inlined_call_operand.vmem [shape: f32[128,32], index: 1, kind: input, shape index: {}]   ;;  %s1304_s5 = inlined_call_operand.vmem [shape: f32[1,32], index: 5, kind: input, shape index: {}]   ;;  %s1305_s8 = inlined_call_operand.vmem [shape: f32[1,32], index: 8, kind: input, shape index: {}]   ;;  %s1306_s9 = inlined_call_operand.vmem [shape: bf16[128,32], index: 9, kind: output, shape index: {}]  }
   0x1   :  { %v57_v0 = vld [vmem:[%s1297_s2] sm:$0x7]  ;;  %v92_v2 = vsel %vm90_vm0, 4294967295, %v1006_v1  ;;  %v34_v4 = vld [vmem:[%s1298_s0 + $0x8] sm:$0xff]  ;;  %v35_v7 = vld [vmem:[%s1298_s0 + $0x10] sm:$0xff]  ;;  %vm241_vm3 = vcmask 261120  }
   0x2   :  { %v33_v3 = vld [vmem:[%s1298_s0] sm:$0xff]  ;;  %v93_v5 = vsel %vm91_vm1, %v92_v2, 0  ;;  %v36_v8 = vld [vmem:[%s1298_s0 + $0x18] sm:$0xff]  ;;  %v38_v11 = vld [vmem:[%s1298_s0 + $0x28] sm:$0xff]  ;;  %vm788_vm4 = vcmask 257024  }
   0x3   :  { %v49_v6 = vpack.c.bf16 %v34_v4, %v33_v3  ;;  %v95_v9 = vand.u32 %v93_v5, %v57_v0  ;;  %v37_v10 = vld [vmem:[%s1298_s0 + $0x20] sm:$0xff]  ;;  %v50_v12 = vpack.c.bf16 %v36_v8, %v35_v7  ;;  %v39_v14 = vld [vmem:[%s1298_s0 + $0x30] sm:$0xff]  ;;  %v40_v15 = vld [vmem:[%s1298_s0 + $0x38] sm:$0xff] }
   0x4   :  { %v51_v13 = vpack.c.bf16 %v38_v11, %v37_v10  ;;  %v41_v16 = vld [vmem:[%s1298_s0 + $0x40] sm:$0xff]  ;;  %v42_v17 = vld [vmem:[%s1298_s0 + $0x48] sm:$0xff]  ;;  %v52_v18 = vpack.c.bf16 %v40_v15, %v39_v14  ;;  %v43_v20 = vld [vmem:[%s1298_s0 + $0x50] sm:$0xff] }
   0x5   :  { %923 = vmatprep.mubr.msk.bf16.mxu0 %vm65_vm2, %v49_v6  ;;  %921 = vmatprep.subr.bf16.mxu0 %v95_v9  ;;  %v53_v19 = vpack.c.bf16 %v42_v17, %v41_v16  ;;  %v44_v21 = vld [vmem:[%s1298_s0 + $0x58] sm:$0xff]  ;;  %v45_v22 = vld [vmem:[%s1298_s0 + $0x60] sm:$0xff]  ;;  %v46_v23 = vld [vmem:[%s1298_s0 + $0x68] sm:$0xff] }
   0x6   :  { %922 = vmatpush3.bf16.msra.mxu0 %v95_v9  ;;  %v54_v24 = vpack.c.bf16 %v44_v21, %v43_v20  ;;  %v55_v25 = vpack.c.bf16 %v46_v23, %v45_v22  ;;  %v47_v26 = vld [vmem:[%s1298_s0 + $0x70] sm:$0xff]  ;;  %v48_v27 = vld [vmem:[%s1298_s0 + $0x78] sm:$0xff]  ;;  %v1000_v29 = vld [vmem:[%s1299_s4 + $0x8] sm:$0xff]  }
   0x7   :  { %v56_v28 = vpack.c.bf16 %v48_v27, %v47_v26  ;;  %939 = vmatprep.subr.bf16.mxu1 %v1000_v29  ;;  %v1001_v30 = vld [vmem:[%s1299_s4] sm:$0xff]   ;;  %v1002_v31 = vld [vmem:[%s1300_s7 + $0x8] sm:$0xff]  }
   0x8   :  { %940 = vmatpush3.bf16.msra.mxu1 %v1000_v29  ;;  %v1003_v32 = vld [vmem:[%s1301_s6 + $0x8] sm:$0xff]   ;;  %959 = vmatprep.subr.bf16.mxu0 %v1002_v31  ;;  %v1004_v33 = vld [vmem:[%s1300_s7] sm:$0xff]  }
   0x9   :  { %924 = vmatmul.mubr.msk.bf16.vlgmr.msra.gmra.mxu0 %vm65_vm2, %v50_v12  ;;  %941 = vmatprep.subr.bf16.mxu1 %v1001_v30  ;;  %v809_v36 = vld [vmem:[%s1302_s3] ss:$0 sm:$0xff]  ;;  %v392_v29 = vld [vmem:[%s1303_s1 + $0x8] sm:$0xff] }
   0xa   :  { %927 = vmatprep.mubr.msk.bf16.mxu0 %vm65_vm2, %v51_v13  ;;  %960 = vmatpush3.bf16.msra.mxu0 %v1002_v31  ;;  %v1005_v52 = vld [vmem:[%s1301_s6] sm:$0xff]   ;;  %v393_v31 = vld [vmem:[%s1303_s1 + $0x10] sm:$0xff] }
   0xb   :  { %961 = vmatprep.subr.bf16.mxu0 %v1004_v33 }
   0xc   :  { %942 = vmatpush3.bf16.msra.mxu1 %v1001_v30 }
   0xd   :  { %979 = vmatprep.subr.bf16.mxu1 %v1003_v32 }
   0xe   :  { %962 = vmatpush3.bf16.msra.mxu0 %v1004_v33 }
  0x11   :  { %928 = vmatmul.mubr.msk.bf16.gmra.mxu0 %vm65_vm2, %v52_v18 }
  0x12   :  { %931 = vmatprep.mubr.msk.bf16.mxu0 %vm65_vm2, %v53_v19 }
  0x19   :  { %932 = vmatmul.mubr.msk.bf16.gmra.mxu0 %vm65_vm2, %v54_v24 }
  0x1a   :  { %935 = vmatprep.mubr.msk.bf16.mxu0 %vm65_vm2, %v55_v25 }
  0x21   :  { %936 = vmatmul.mubr.msk.bf16.gmra.mxu0 %vm65_vm2, %v56_v28  ;;  %v391_v28 = vld [vmem:[%s1303_s1] sm:$0xff] }
  0x22   :  { %v407_v30 = vpack.c.bf16 %v392_v29, %v391_v28 }
  0x24   :  { %963 = vmatprep.mubr.msk.bf16.mxu0 %vm241_vm3, %v407_v30 }
  0xc9   :  { %v925_v34 = vpop.f32.mrf.mxu0 }
  0xca   :  { %v140_v40 = vadd.f32 %v925_v34, %v809_v36  ;;  %v395_v34 = vld [vmem:[%s1303_s1 + $0x20] sm:$0xff] }
  0xcb   :  { %v131_v35 = vpop.f32.mrf.mxu0 }
  0xcc   :  { %v132_v38 = vadd.f32 %v809_v36, %v131_v35  ;;  %v196_v47 = vmax.f32 %v140_v40, 0.0  ;;  %v396_v35 = vld [vmem:[%s1303_s1 + $0x28] sm:$0xff]  ;;  %v399_v40 = vld [vmem:[%s1303_s1 + $0x40] sm:$0xff] }
  0xcd   :  { %v926_v37 = vpop.f32.mrf.mxu0 }
  0xce   :  { %v143_v39 = vadd.f32 %v926_v37, %v809_v36  ;;  %v194_v45 = vmax.f32 %v132_v38, 0.0  ;;  %v397_v37 = vld [vmem:[%s1303_s1 + $0x30] sm:$0xff]  ;;  %v398_v38 = vld [vmem:[%s1303_s1 + $0x38] sm:$0xff] }
  0xcf   :  { %v134_v41 = vpop.f32.mrf.mxu0 }
  0xd0   :  { %v135_v42 = vadd.f32 %v809_v36, %v134_v41  ;;  %v197_v43 = vmax.f32 %v143_v39, 0.0  ;;  %v410_v39 = vpack.c.bf16 %v398_v38, %v397_v37  ;;  %v400_v41 = vld [vmem:[%s1303_s1 + $0x48] sm:$0xff] }
  0xd1   :  { %v929_v44 = vpop.f32.mrf.mxu0 }
  0xd2   :  { %v195_v46 = vmax.f32 %v135_v42, 0.0  ;;  %v211_v50 = vpack.c.bf16 %v197_v43, %v196_v47  ;;  %v156_v55 = vadd.f32 %v929_v44, %v809_v36  ;;  %v411_v42 = vpack.c.bf16 %v400_v41, %v399_v40  ;;  %v401_v43 = vld [vmem:[%s1303_s1 + $0x50] sm:$0xff]  ;;  %v402_v44 = vld [vmem:[%s1303_s1 + $0x58] sm:$0xff]  ;;  %v404_v47 = vld [vmem:[%s1303_s1 + $0x68] sm:$0xff] }
  0xd3   :  { %v147_v48 = vpop.f32.mrf.mxu0 }
  0xd4   :  { %v210_v49 = vpack.c.bf16 %v195_v46, %v194_v45  ;;  %v148_v53 = vadd.f32 %v809_v36, %v147_v48  ;;  %v200_v62 = vmax.f32 %v156_v55, 0.0  ;;  %v412_v45 = vpack.c.bf16 %v402_v44, %v401_v43  ;;  %v403_v46 = vld [vmem:[%s1303_s1 + $0x60] sm:$0xff] }
  0xd5   :  { %v930_v51 = vpop.f32.mrf.mxu0  ;;  %v413_v48 = vpack.c.bf16 %v404_v47, %v403_v46 }
  0xd6   :  { %v159_v54 = vadd.f32 %v930_v51, %v809_v36  ;;  %943 = vmatprep.mubr.msk.bf16.mxu1 %vm241_vm3, %v210_v49  ;;  %v198_v60 = vmax.f32 %v148_v53, 0.0  ;;  %v405_v49 = vld [vmem:[%s1303_s1 + $0x70] sm:$0xff] }
  0xd7   :  { %v150_v56 = vpop.f32.mrf.mxu0  ;;  %944 = vmatmul.mubr.msk.bf16.vlgmr.msra.gmra.mxu1 %vm241_vm3, %v211_v50  ;;  %v406_v50 = vld [vmem:[%s1303_s1 + $0x78] sm:$0xff] }
  0xd8   :  { %v151_v57 = vadd.f32 %v809_v36, %v150_v56  ;;  %980 = vmatpush3.bf16.msra.mxu1 %v1003_v32  ;;  %v201_v58 = vmax.f32 %v159_v54, 0.0  ;;  %v394_v32 = vld [vmem:[%s1303_s1 + $0x18] sm:$0xff]  ;;  %v414_v51 = vpack.c.bf16 %v406_v50, %v405_v49  ;;  %v818_v54 = vld [vmem:[%s1304_s5] ss:$0 sm:$0xff] }
  0xd9   :  { %v933_v59 = vpop.f32.mrf.mxu0  ;;  %981 = vmatprep.subr.bf16.mxu1 %v1005_v52  ;;  %v408_v33 = vpack.c.bf16 %v394_v32, %v393_v31 }
  0xda   :  { %v199_v61 = vmax.f32 %v151_v57, 0.0  ;;  %v213_v1 = vpack.c.bf16 %v201_v58, %v200_v62  ;;  %v172_v5 = vadd.f32 %v933_v59, %v809_v36 }
  0xdb   :  { %v163_v63 = vpop.f32.mrf.mxu0  ;;  %964 = vmatmul.mubr.msk.bf16.vlgmr.msra.gmra.mxu0 %vm241_vm3, %v408_v33 }
  0xdc   :  { %v212_v0 = vpack.c.bf16 %v199_v61, %v198_v60  ;;  %982 = vmatpush3.bf16.msra.mxu1 %v1005_v52  ;;  %v164_v3 = vadd.f32 %v809_v36, %v163_v63  ;;  %v204_v12 = vmax.f32 %v172_v5, 0.0 }
  0xdd   :  { %v934_v2 = vpop.f32.mrf.mxu0 }
  0xde   :  { %v175_v4 = vadd.f32 %v934_v2, %v809_v36  ;;  %947 = vmatprep.mubr.msk.bf16.mxu1 %vm241_vm3, %v212_v0  ;;  %v202_v10 = vmax.f32 %v164_v3, 0.0 }
  0xdf   :  { %v166_v6 = vpop.f32.mrf.mxu0  ;;  %948 = vmatmul.mubr.msk.bf16.gmra.mxu1 %vm241_vm3, %v213_v1 }
  0xe0   :  { %v167_v7 = vadd.f32 %v809_v36, %v166_v6  ;;  %v205_v8 = vmax.f32 %v175_v4, 0.0 }
  0xe1   :  { %v937_v9 = vpop.f32.mrf.mxu0 }
  0xe2   :  { %v203_v11 = vmax.f32 %v167_v7, 0.0  ;;  %v215_v15 = vpack.c.bf16 %v205_v8, %v204_v12  ;;  %v188_v19 = vadd.f32 %v937_v9, %v809_v36 }
  0xe3   :  { %v179_v13 = vpop.f32.mrf.mxu0 }
  0xe4   :  { %v214_v14 = vpack.c.bf16 %v203_v11, %v202_v10  ;;  %v180_v17 = vadd.f32 %v809_v36, %v179_v13  ;;  %v208_v25 = vmax.f32 %v188_v19, 0.0 }
  0xe5   :  { %v938_v16 = vpop.f32.mrf.mxu0 }
  0xe6   :  { %v191_v18 = vadd.f32 %v938_v16, %v809_v36  ;;  %951 = vmatprep.mubr.msk.bf16.mxu1 %vm241_vm3, %v214_v14  ;;  %v206_v23 = vmax.f32 %v180_v17, 0.0 }
  0xe7   :  { %v182_v20 = vpop.f32.mrf.mxu0  ;;  %952 = vmatmul.mubr.msk.bf16.gmra.mxu1 %vm241_vm3, %v215_v15 }
  0xe8   :  { %v183_v21 = vadd.f32 %v809_v36, %v182_v20  ;;  %v209_v22 = vmax.f32 %v191_v18, 0.0  ;;  %v409_v36 = vpack.c.bf16 %v396_v35, %v395_v34 }
  0xea   :  { %v207_v24 = vmax.f32 %v183_v21, 0.0  ;;  %v217_v27 = vpack.c.bf16 %v209_v22, %v208_v25  ;;  %967 = vmatprep.mubr.msk.bf16.mxu0 %vm241_vm3, %v409_v36 }
  0xeb   :  { %968 = vmatmul.mubr.msk.bf16.gmra.mxu0 %vm241_vm3, %v410_v39 }
  0xec   :  { %v216_v26 = vpack.c.bf16 %v207_v24, %v206_v23  ;;  %971 = vmatprep.mubr.msk.bf16.mxu0 %vm241_vm3, %v411_v42 }
  0xee   :  { %955 = vmatprep.mubr.msk.bf16.mxu1 %vm241_vm3, %v216_v26 }
  0xef   :  { %956 = vmatmul.mubr.msk.bf16.gmra.mxu1 %vm241_vm3, %v217_v27 }
  0xf3   :  { %972 = vmatmul.mubr.msk.bf16.gmra.mxu0 %vm241_vm3, %v412_v45 }
  0xf4   :  { %975 = vmatprep.mubr.msk.bf16.mxu0 %vm241_vm3, %v413_v48 }
  0xfb   :  { %976 = vmatmul.mubr.msk.bf16.gmra.mxu0 %vm241_vm3, %v414_v51 }
 0x197   :  { %v945_v52 = vpop.f32.mrf.mxu1 }
 0x198   :  { %v309_v58 = vadd.f32 %v945_v52, %v818_v54 }
 0x199   :  { %v300_v53 = vpop.f32.mrf.mxu1 }
 0x19a   :  { %v301_v56 = vadd.f32 %v818_v54, %v300_v53  ;;  %v365_v1 = vmax.f32 %v309_v58, 0.0 }
 0x19b   :  { %v946_v55 = vpop.f32.mrf.mxu1  ;;  %v965_v45 = vpop.f32.mrf.mxu0 }
 0x19c   :  { %v312_v57 = vadd.f32 %v946_v55, %v818_v54  ;;  %v363_v63 = vmax.f32 %v301_v56, 0.0 }
 0x19d   :  { %v303_v59 = vpop.f32.mrf.mxu1  ;;  %v489_v46 = vpop.f32.mrf.mxu0 }
 0x19e   :  { %v304_v60 = vadd.f32 %v818_v54, %v303_v59  ;;  %v366_v61 = vmax.f32 %v312_v57, 0.0 }
 0x19f   :  { %v949_v62 = vpop.f32.mrf.mxu1  ;;  %v966_v47 = vpop.f32.mrf.mxu0 }
 0x1a0   :  { %v364_v0 = vmax.f32 %v304_v60, 0.0  ;;  %v380_v4 = vpack.c.bf16 %v366_v61, %v365_v1  ;;  %v325_v8 = vadd.f32 %v949_v62, %v818_v54 }
 0x1a1   :  { %v316_v2 = vpop.f32.mrf.mxu1  ;;  %v492_v48 = vpop.f32.mrf.mxu0 }
 0x1a2   :  { %v379_v3 = vpack.c.bf16 %v364_v0, %v363_v63  ;;  %v317_v6 = vadd.f32 %v818_v54, %v316_v2  ;;  %v369_v15 = vmax.f32 %v325_v8, 0.0 }
 0x1a3   :  { %v950_v5 = vpop.f32.mrf.mxu1 }
 0x1a4   :  { %v328_v7 = vadd.f32 %v950_v5, %v818_v54  ;;  %983 = vmatprep.mubr.msk.bf16.mxu1 %vm241_vm3, %v379_v3  ;;  %v367_v13 = vmax.f32 %v317_v6, 0.0 }
 0x1a5   :  { %v319_v9 = vpop.f32.mrf.mxu1  ;;  %984 = vmatmul.mubr.msk.bf16.vlgmr.msra.gmra.mxu1 %vm241_vm3, %v380_v4 }
 0x1a6   :  { %v320_v10 = vadd.f32 %v818_v54, %v319_v9  ;;  %v370_v11 = vmax.f32 %v328_v7, 0.0 }
 0x1a7   :  { %v953_v12 = vpop.f32.mrf.mxu1 }
 0x1a8   :  { %v368_v14 = vmax.f32 %v320_v10, 0.0  ;;  %v382_v18 = vpack.c.bf16 %v370_v11, %v369_v15  ;;  %v341_v22 = vadd.f32 %v953_v12, %v818_v54 }
 0x1a9   :  { %v332_v16 = vpop.f32.mrf.mxu1 }
 0x1aa   :  { %v381_v17 = vpack.c.bf16 %v368_v14, %v367_v13  ;;  %v333_v20 = vadd.f32 %v818_v54, %v332_v16  ;;  %v373_v29 = vmax.f32 %v341_v22, 0.0 }
 0x1ab   :  { %v954_v19 = vpop.f32.mrf.mxu1  ;;  %v969_v49 = vpop.f32.mrf.mxu0 }
 0x1ac   :  { %v344_v21 = vadd.f32 %v954_v19, %v818_v54  ;;  %987 = vmatprep.mubr.msk.bf16.mxu1 %vm241_vm3, %v381_v17  ;;  %v371_v27 = vmax.f32 %v333_v20, 0.0 }
 0x1ad   :  { %v335_v23 = vpop.f32.mrf.mxu1  ;;  %988 = vmatmul.mubr.msk.bf16.gmra.mxu1 %vm241_vm3, %v382_v18  ;;  %v505_v50 = vpop.f32.mrf.mxu0 }
 0x1ae   :  { %v336_v24 = vadd.f32 %v818_v54, %v335_v23  ;;  %v374_v25 = vmax.f32 %v344_v21, 0.0 }
 0x1af   :  { %v957_v26 = vpop.f32.mrf.mxu1  ;;  %v970_v51 = vpop.f32.mrf.mxu0 }
 0x1b0   :  { %v372_v28 = vmax.f32 %v336_v24, 0.0  ;;  %v384_v32 = vpack.c.bf16 %v374_v25, %v373_v29  ;;  %v357_v36 = vadd.f32 %v957_v26, %v818_v54 }
 0x1b1   :  { %v348_v30 = vpop.f32.mrf.mxu1  ;;  %v508_v52 = vpop.f32.mrf.mxu0 }
 0x1b2   :  { %v383_v31 = vpack.c.bf16 %v372_v28, %v371_v27  ;;  %v349_v34 = vadd.f32 %v818_v54, %v348_v30  ;;  %v377_v42 = vmax.f32 %v357_v36, 0.0 }
 0x1b3   :  { %v958_v33 = vpop.f32.mrf.mxu1  ;;  %v973_v57 = vpop.f32.mrf.mxu0 }
 0x1b4   :  { %v360_v35 = vadd.f32 %v958_v33, %v818_v54  ;;  %991 = vmatprep.mubr.msk.bf16.mxu1 %vm241_vm3, %v383_v31  ;;  %v375_v40 = vmax.f32 %v349_v34, 0.0 }
 0x1b5   :  { %v351_v37 = vpop.f32.mrf.mxu1  ;;  %992 = vmatmul.mubr.msk.bf16.gmra.mxu1 %vm241_vm3, %v384_v32  ;;  %v521_v1 = vpop.f32.mrf.mxu0 }
 0x1b6   :  { %v352_v38 = vadd.f32 %v818_v54, %v351_v37  ;;  %v378_v39 = vmax.f32 %v360_v35, 0.0  ;;  %v1215_v54 = vld [vmem:[%s1305_s8] ss:$0 sm:$0xff] }
 0x1b7   :  { %v974_v12 = vpop.f32.mrf.mxu0 }
 0x1b8   :  { %v376_v41 = vmax.f32 %v352_v38, 0.0  ;;  %v386_v44 = vpack.c.bf16 %v378_v39, %v377_v42 }
 0x1b9   :  { %v524_v23 = vpop.f32.mrf.mxu0 }
 0x1ba   :  { %v385_v43 = vpack.c.bf16 %v376_v41, %v375_v40 }
 0x1bb   :  { %v977_v33 = vpop.f32.mrf.mxu0 }
 0x1bc   :  { %995 = vmatprep.mubr.msk.bf16.mxu1 %vm241_vm3, %v385_v43 }
 0x1bd   :  { %996 = vmatmul.mubr.msk.bf16.gmra.mxu1 %vm241_vm3, %v386_v44  ;;  %v537_v44 = vpop.f32.mrf.mxu0 }
 0x265   :  { %v985_v53 = vpop.f32.mrf.mxu1 }
 0x266   :  { %v631_v55 = vadd.f32 %v985_v53, %v965_v45 }
 0x267   :  { %v622_v56 = vpop.f32.mrf.mxu1 }
 0x268   :  { %v694_v58 = vadd.f32 %v1215_v54, %v631_v55  ;;  %v623_v59 = vadd.f32 %v622_v56, %v489_v46  ;;  %v978_v56 = vpop.f32.mrf.mxu0 }
 0x269   :  { %v986_v60 = vpop.f32.mrf.mxu1 }
 0x26a   :  { %v710_v61 = vmax.f32 %v694_v58, 0.0  ;;  %v692_v62 = vadd.f32 %v1215_v54, %v623_v59  ;;  %v634_v63 = vadd.f32 %v986_v60, %v966_v47 }
 0x26b   :  { %v625_v0 = vpop.f32.mrf.mxu1 }
 0x26c   :  { %v868_v2 = vpack.c.bf16 %v710_v61, %v710_v61  ;;  %v708_v3 = vmax.f32 %v692_v62, 0.0  ;;  %v695_v4 = vadd.f32 %v1215_v54, %v634_v63  ;;  %v626_v5 = vadd.f32 %v625_v0, %v492_v48 }
 0x26d   :  { %v989_v6 = vpop.f32.mrf.mxu1 }
 0x26e   :  { %791 = vst.msk [vmem:[%s1306_s9 + $0x8] sm:$0xf] %vm788_vm4, %v868_v2  ;;  %v866_v7 = vpack.c.bf16 %v708_v3, %v708_v3  ;;  %v711_v8 = vmax.f32 %v695_v4, 0.0  ;;  %v693_v9 = vadd.f32 %v1215_v54, %v626_v5  ;;  %v647_v10 = vadd.f32 %v989_v6, %v969_v49  ;;  %v540_v3 = vpop.f32.mrf.mxu0 }
 0x26f   :  { %v638_v11 = vpop.f32.mrf.mxu1 }
 0x270   :  { %789 = vst.msk [vmem:[%s1306_s9] sm:$0xf] %vm788_vm4, %v866_v7  ;;  %v869_v13 = vpack.c.bf16 %v711_v8, %v711_v8  ;;  %v709_v14 = vmax.f32 %v693_v9, 0.0  ;;  %v698_v15 = vadd.f32 %v1215_v54, %v647_v10  ;;  %v639_v16 = vadd.f32 %v638_v11, %v505_v50 }
 0x271   :  { %v990_v17 = vpop.f32.mrf.mxu1 }
 0x272   :  { %792 = vst.msk [vmem:[%s1306_s9 + $0xc] sm:$0xf] %vm788_vm4, %v869_v13  ;;  %v867_v18 = vpack.c.bf16 %v709_v14, %v709_v14  ;;  %v714_v19 = vmax.f32 %v698_v15, 0.0  ;;  %v696_v20 = vadd.f32 %v1215_v54, %v639_v16  ;;  %v650_v21 = vadd.f32 %v990_v17, %v970_v51 }
 0x273   :  { %v641_v22 = vpop.f32.mrf.mxu1 }
 0x274   :  { %790 = vst.msk [vmem:[%s1306_s9 + $0x4] sm:$0xf] %vm788_vm4, %v867_v18  ;;  %v872_v24 = vpack.c.bf16 %v714_v19, %v714_v19  ;;  %v712_v25 = vmax.f32 %v696_v20, 0.0  ;;  %v699_v26 = vadd.f32 %v1215_v54, %v650_v21  ;;  %v642_v27 = vadd.f32 %v641_v22, %v508_v52 }
 0x275   :  { %v993_v28 = vpop.f32.mrf.mxu1 }
 0x276   :  { %795 = vst.msk [vmem:[%s1306_s9 + $0x18] sm:$0xf] %vm788_vm4, %v872_v24  ;;  %v870_v29 = vpack.c.bf16 %v712_v25, %v712_v25  ;;  %v715_v30 = vmax.f32 %v699_v26, 0.0  ;;  %v697_v31 = vadd.f32 %v1215_v54, %v642_v27  ;;  %v663_v32 = vadd.f32 %v993_v28, %v973_v57 }
 0x277   :  { %v654_v34 = vpop.f32.mrf.mxu1 }
 0x278   :  { %793 = vst.msk [vmem:[%s1306_s9 + $0x10] sm:$0xf] %vm788_vm4, %v870_v29  ;;  %v873_v35 = vpack.c.bf16 %v715_v30, %v715_v30  ;;  %v713_v36 = vmax.f32 %v697_v31, 0.0  ;;  %v702_v37 = vadd.f32 %v1215_v54, %v663_v32  ;;  %v655_v38 = vadd.f32 %v654_v34, %v521_v1 }
 0x279   :  { %v994_v39 = vpop.f32.mrf.mxu1 }
 0x27a   :  { %796 = vst.msk [vmem:[%s1306_s9 + $0x1c] sm:$0xf] %vm788_vm4, %v873_v35  ;;  %v871_v40 = vpack.c.bf16 %v713_v36, %v713_v36  ;;  %v718_v41 = vmax.f32 %v702_v37, 0.0  ;;  %v700_v42 = vadd.f32 %v1215_v54, %v655_v38  ;;  %v666_v43 = vadd.f32 %v994_v39, %v974_v12 }
 0x27b   :  { %v657_v45 = vpop.f32.mrf.mxu1 }
 0x27c   :  { %794 = vst.msk [vmem:[%s1306_s9 + $0x14] sm:$0xf] %vm788_vm4, %v871_v40  ;;  %v876_v46 = vpack.c.bf16 %v718_v41, %v718_v41  ;;  %v716_v47 = vmax.f32 %v700_v42, 0.0  ;;  %v703_v48 = vadd.f32 %v1215_v54, %v666_v43  ;;  %v658_v49 = vadd.f32 %v657_v45, %v524_v23 }
 0x27d   :  { %v997_v50 = vpop.f32.mrf.mxu1 }
 0x27e   :  { %799 = vst.msk [vmem:[%s1306_s9 + $0x28] sm:$0xf] %vm788_vm4, %v876_v46  ;;  %v874_v51 = vpack.c.bf16 %v716_v47, %v716_v47  ;;  %v719_v52 = vmax.f32 %v703_v48, 0.0  ;;  %v701_v53 = vadd.f32 %v1215_v54, %v658_v49  ;;  %v679_v55 = vadd.f32 %v997_v50, %v977_v33 }
 0x27f   :  { %v670_v57 = vpop.f32.mrf.mxu1 }
 0x280   :  { %797 = vst.msk [vmem:[%s1306_s9 + $0x20] sm:$0xf] %vm788_vm4, %v874_v51  ;;  %v877_v58 = vpack.c.bf16 %v719_v52, %v719_v52  ;;  %v717_v59 = vmax.f32 %v701_v53, 0.0  ;;  %v706_v60 = vadd.f32 %v1215_v54, %v679_v55  ;;  %v671_v61 = vadd.f32 %v670_v57, %v537_v44 }
 0x281   :  { %v998_v62 = vpop.f32.mrf.mxu1 }
 0x282   :  { %800 = vst.msk [vmem:[%s1306_s9 + $0x2c] sm:$0xf] %vm788_vm4, %v877_v58  ;;  %v875_v63 = vpack.c.bf16 %v717_v59, %v717_v59  ;;  %v722_v0 = vmax.f32 %v706_v60, 0.0  ;;  %v704_v1 = vadd.f32 %v1215_v54, %v671_v61  ;;  %v682_v2 = vadd.f32 %v998_v62, %v978_v56 }
 0x283   :  { %v673_v4 = vpop.f32.mrf.mxu1 }
 0x284   :  { %798 = vst.msk [vmem:[%s1306_s9 + $0x24] sm:$0xf] %vm788_vm4, %v875_v63  ;;  %v880_v5 = vpack.c.bf16 %v722_v0, %v722_v0  ;;  %v720_v6 = vmax.f32 %v704_v1, 0.0  ;;  %v707_v7 = vadd.f32 %v1215_v54, %v682_v2  ;;  %v674_v8 = vadd.f32 %v673_v4, %v540_v3 }
 0x286   :  { %803 = vst.msk [vmem:[%s1306_s9 + $0x38] sm:$0xf] %vm788_vm4, %v880_v5  ;;  %v878_v9 = vpack.c.bf16 %v720_v6, %v720_v6  ;;  %v723_v10 = vmax.f32 %v707_v7, 0.0  ;;  %v705_v11 = vadd.f32 %v1215_v54, %v674_v8 }
 0x288   :  { %801 = vst.msk [vmem:[%s1306_s9 + $0x30] sm:$0xf] %vm788_vm4, %v878_v9  ;;  %v881_v12 = vpack.c.bf16 %v723_v10, %v723_v10  ;;  %v721_v13 = vmax.f32 %v705_v11, 0.0 }
 0x28a   :  { %804 = vst.msk [vmem:[%s1306_s9 + $0x3c] sm:$0xf] %vm788_vm4, %v881_v12  ;;  %v879_v14 = vpack.c.bf16 %v721_v13, %v721_v13 }
 0x28c   :  { %802 = vst.msk [vmem:[%s1306_s9 + $0x34] sm:$0xf] %vm788_vm4, %v879_v14 }

// kernel: rcnn_forward.6
= control target key start
LH: loop header
LB: loop body
LE: loop exit
PB: predicated region body
PF: predicated region fallthrough
CT: control target
= control target key end

     0   :  { %vm695_vm0 = vcmask 1040384   ;;  %vm696_vm1 = vcmask 1041408   ;;  %v5338_v1 = vmov 65535   ;;  %vm502_vm2 = vcmask 285696   ;;  %s6810_s1 = inlined_call_operand.vmem [shape: bf16[35,32], index: 1, kind: input, shape index: {}]   ;;  %s6811_s0 = inlined_call_operand.vmem [shape: bf16[64,16,35], index: 0, kind: input, shape index: {}]   ;;  %s6812_s3 = inlined_call_operand.vmem [shape: bf16[32,32], index: 3, kind: input, shape index: {}]   ;;  %s6813_s5 = inlined_call_operand.vmem [shape: bf16[32,32], index: 5, kind: input, shape index: {}]   ;;  %s6814_s2 = inlined_call_operand.vmem [shape: f32[1,32], index: 2, kind: input, shape index: {}]   ;;  %s6815_s4 = inlined_call_operand.vmem [shape: f32[1,32], index: 4, kind: input, shape index: {}]   ;;  %s6816_s6 = inlined_call_operand.vmem [shape: f32[1,32], index: 6, kind: input, shape index: {}]   ;;  %s6817_s7 = inlined_call_operand.vmem [shape: bf16[64,32], index: 7, kind: output, shape index: {}]  }
   0x1   :  { %v5264_v0 = vld [vmem:[%s6810_s1 + $0x10] ss:$0 sps:$4 sm:$0x33]   ;;  %v697_v2 = vsel %vm695_vm0, 4294967295, %v5338_v1  ;;  %v5265_v5 = vld [vmem:[%s6810_s1 + $0x8] sm:$0xff]   ;;  %v5267_v6 = vld [vmem:[%s6811_s0] sm:$0xff]  }
   0x2   :  { %v698_v3 = vsel %vm696_vm1, %v697_v2, 0  ;;  %4867 = vmatprep.mubr.msk.bf16.mxu0 %vm502_vm2, %v5267_v6  ;;  %v5269_v7 = vld [vmem:[%s6812_s3 + $0x8] sm:$0xff]   ;;  %v5266_v8 = vld [vmem:[%s6810_s1] sm:$0xff]   ;;  %v5270_v10 = vld [vmem:[%s6811_s0 + $0x10] sm:$0xff]   ;;  %vm1462_vm3 = vcmask 261120   ;;  %vm4176_vm4 = vcmask 1041409  }
   0x3   :  { %v700_v4 = vand.u32 %v5264_v0, %v698_v3  ;;  %5259 = vmatprep.subr.bf16.mxu1 %v5269_v7  ;;  %v5268_v9 = vld [vmem:[%s6811_s0 + $0x8] sm:$0xff]   ;;  %v5271_v11 = vld [vmem:[%s6811_s0 + $0x18] sm:$0xff]   ;;  %v5272_v12 = vld [vmem:[%s6811_s0 + $0x20] sm:$0xff]   ;;  %vm4178_vm5 = vcmask 1042434   ;;  %vm4180_vm6 = vcmask 1043459   ;;  %vm4182_vm7 = vcmask 1044484  }
   0x4   :  { %5261 = vmatpush3.bf16.msra.mxu1 %v5269_v7  ;;  %v5273_v13 = vld [vmem:[%s6811_s0 + $0x28] sm:$0xff]   ;;  %v5274_v14 = vld [vmem:[%s6811_s0 + $0x30] sm:$0xff]   ;;  %v5275_v15 = vld [vmem:[%s6811_s0 + $0x38] sm:$0xff]   ;;  %vm4184_vm8 = vcmask 1045509   ;;  %vm4186_vm9 = vcmask 1046534   ;;  %vm4188_vm10 = vcmask 1047559  }
   0x5   :  { %4861 = vmatprep.subr.bf16.mxu0 %v700_v4  ;;  %v5276_v16 = vld [vmem:[%s6811_s0 + $0x40] sm:$0xff]   ;;  %v5277_v18 = vld [vmem:[%s6811_s0 + $0x48] sm:$0xff]   ;;  %v5278_v19 = vld [vmem:[%s6811_s0 + $0x50] sm:$0xff]   ;;  %vm4255_vm11 = vcmask 257024  }
   0x6   :  { %4862 = vmatpush3.bf16.msra.mxu0 %v700_v4  ;;  %v5302_v17 = vld [vmem:[%s6812_s3] sm:$0xff]   ;;  %v5279_v20 = vld [vmem:[%s6811_s0 + $0x58] sm:$0xff]   ;;  %v5281_v22 = vld [vmem:[%s6811_s0 + $0x68] sm:$0xff]  }
   0x7   :  { %4863 = vmatprep.subr.bf16.mxu0 %v5265_v5  ;;  %5260 = vmatprep.subr.bf16.mxu1 %v5302_v17  ;;  %v5280_v21 = vld [vmem:[%s6811_s0 + $0x60] sm:$0xff]   ;;  %v5282_v23 = vld [vmem:[%s6811_s0 + $0x70] sm:$0xff]   ;;  %v5283_v24 = vld [vmem:[%s6811_s0 + $0x78] sm:$0xff]  }
   0x8   :  { %5262 = vmatpush3.bf16.msra.mxu1 %v5302_v17  ;;  %v5284_v25 = vld [vmem:[%s6811_s0 + $0x80] sm:$0xff]   ;;  %v5285_v26 = vld [vmem:[%s6811_s0 + $0x88] sm:$0xff]   ;;  %v5286_v27 = vld [vmem:[%s6811_s0 + $0x90] sm:$0xff]  }
   0x9   :  { %v5287_v28 = vld [vmem:[%s6811_s0 + $0x98] sm:$0xff]   ;;  %v5288_v29 = vld [vmem:[%s6811_s0 + $0xa0] sm:$0xff]   ;;  %v5289_v30 = vld [vmem:[%s6811_s0 + $0xa8] sm:$0xff]  }
   0xa   :  { %4864 = vmatpush3.bf16.msra.mxu0 %v5265_v5  ;;  %v5290_v31 = vld [vmem:[%s6811_s0 + $0xb0] sm:$0xff]   ;;  %v5291_v32 = vld [vmem:[%s6811_s0 + $0xb8] sm:$0xff]   ;;  %v5292_v33 = vld [vmem:[%s6811_s0 + $0xc0] sm:$0xff]  }
   0xb   :  { %4865 = vmatprep.subr.bf16.mxu0 %v5266_v8  ;;  %v5293_v34 = vld [vmem:[%s6811_s0 + $0xc8] sm:$0xff]   ;;  %v5294_v35 = vld [vmem:[%s6811_s0 + $0xd0] sm:$0xff]   ;;  %v5295_v36 = vld [vmem:[%s6811_s0 + $0xd8] sm:$0xff]  }
   0xc   :  { %v5296_v37 = vld [vmem:[%s6811_s0 + $0xe0] sm:$0xff]   ;;  %v5297_v38 = vld [vmem:[%s6811_s0 + $0xe8] sm:$0xff]   ;;  %v5298_v39 = vld [vmem:[%s6811_s0 + $0xf0] sm:$0xff]  }
   0xd   :  { %v5299_v40 = vld [vmem:[%s6811_s0 + $0xf8] sm:$0xff]   ;;  %v5300_v41 = vld [vmem:[%s6811_s0 + $0x100] sm:$0xff]   ;;  %v5301_v42 = vld [vmem:[%s6811_s0 + $0x108] sm:$0xff]  }
   0xe   :  { %4866 = vmatpush3.bf16.msra.mxu0 %v5266_v8  ;;  %v5303_v43 = vld [vmem:[%s6811_s0 + $0x110] sm:$0xff]   ;;  %v5304_v44 = vld [vmem:[%s6811_s0 + $0x118] sm:$0xff]   ;;  %v5305_v45 = vld [vmem:[%s6811_s0 + $0x120] sm:$0xff]  }
   0xf   :  { %4995 = vmatprep.subr.bf16.mxu0 %v5269_v7  ;;  %v5306_v46 = vld [vmem:[%s6811_s0 + $0x128] sm:$0xff]   ;;  %v5307_v47 = vld [vmem:[%s6811_s0 + $0x130] sm:$0xff]   ;;  %v5308_v48 = vld [vmem:[%s6811_s0 + $0x138] sm:$0xff]  }
  0x10   :  { %v5309_v49 = vld [vmem:[%s6811_s0 + $0x140] sm:$0xff]   ;;  %v5310_v50 = vld [vmem:[%s6811_s0 + $0x148] sm:$0xff]   ;;  %v5311_v51 = vld [vmem:[%s6811_s0 + $0x150] sm:$0xff]  }
  0x11   :  { %4868 = vmatmul.mubr.msk.bf16.vlgmr.msra.gmra.mxu0 %vm502_vm2, %v5268_v9  ;;  %v5312_v52 = vld [vmem:[%s6811_s0 + $0x158] sm:$0xff]   ;;  %v5313_v53 = vld [vmem:[%s6811_s0 + $0x160] sm:$0xff]   ;;  %v5314_v54 = vld [vmem:[%s6811_s0 + $0x168] sm:$0xff]  }
  0x12   :  { %4996 = vmatpush3.bf16.msra.mxu0 %v5269_v7  ;;  %4871 = vmatprep.mubr.msk.bf16.mxu0 %vm502_vm2, %v5270_v10  ;;  %v5315_v55 = vld [vmem:[%s6811_s0 + $0x170] sm:$0xff]   ;;  %v5316_v56 = vld [vmem:[%s6811_s0 + $0x178] sm:$0xff]   ;;  %v5317_v57 = vld [vmem:[%s6811_s0 + $0x180] sm:$0xff]  }
  0x13   :  { %4997 = vmatprep.subr.bf16.mxu0 %v5302_v17  ;;  %v5318_v58 = vld [vmem:[%s6811_s0 + $0x188] sm:$0xff]   ;;  %v5319_v59 = vld [vmem:[%s6811_s0 + $0x190] sm:$0xff]   ;;  %v5320_v63 = vld [vmem:[%s6811_s0 + $0x198] sm:$0xff]  }
  0x14   :  { %v5321_v0 = vld [vmem:[%s6811_s0 + $0x1a0] sm:$0xff]   ;;  %v5322_v4 = vld [vmem:[%s6811_s0 + $0x1a8] sm:$0xff]   ;;  %v5323_v7 = vld [vmem:[%s6811_s0 + $0x1b0] sm:$0xff]  }
  0x15   :  { %v5618_v6 = vld [vmem:[%s6813_s5 + $0x8] sm:$0xff]  }
  0x16   :  { %4998 = vmatpush3.bf16.msra.mxu0 %v5302_v17  ;;  %5127 = vmatprep.subr.bf16.mxu1 %v5618_v6 }
  0x19   :  { %4872 = vmatmul.mubr.msk.bf16.gmra.mxu0 %vm502_vm2, %v5271_v11 }
  0x1a   :  { %4875 = vmatprep.mubr.msk.bf16.mxu0 %vm502_vm2, %v5272_v12  ;;  %v5324_v12 = vld [vmem:[%s6811_s0 + $0x1b8] sm:$0xff]  }
  0x21   :  { %4876 = vmatmul.mubr.msk.bf16.gmra.mxu0 %vm502_vm2, %v5273_v13  ;;  %v5325_v13 = vld [vmem:[%s6811_s0 + $0x1c0] sm:$0xff]  }
  0x22   :  { %4879 = vmatprep.mubr.msk.bf16.mxu0 %vm502_vm2, %v5274_v14 }
  0x29   :  { %4880 = vmatmul.mubr.msk.bf16.gmra.mxu0 %vm502_vm2, %v5275_v15 }
  0x2a   :  { %4883 = vmatprep.mubr.msk.bf16.mxu0 %vm502_vm2, %v5276_v16 }
  0x31   :  { %4884 = vmatmul.mubr.msk.bf16.gmra.mxu0 %vm502_vm2, %v5277_v18  ;;  %v5326_v18 = vld [vmem:[%s6811_s0 + $0x1c8] sm:$0xff]  }
  0x32   :  { %4887 = vmatprep.mubr.msk.bf16.mxu0 %vm502_vm2, %v5278_v19  ;;  %v5327_v19 = vld [vmem:[%s6811_s0 + $0x1d0] sm:$0xff]  }
  0x39   :  { %4888 = vmatmul.mubr.msk.bf16.gmra.mxu0 %vm502_vm2, %v5279_v20 }
  0x3a   :  { %4891 = vmatprep.mubr.msk.bf16.mxu0 %vm502_vm2, %v5280_v21 }
  0x41   :  { %4892 = vmatmul.mubr.msk.bf16.gmra.mxu0 %vm502_vm2, %v5281_v22 }
  0x42   :  { %4895 = vmatprep.mubr.msk.bf16.mxu0 %vm502_vm2, %v5282_v23 }
  0x49   :  { %4896 = vmatmul.mubr.msk.bf16.gmra.mxu0 %vm502_vm2, %v5283_v24  ;;  %v5328_v24 = vld [vmem:[%s6811_s0 + $0x1d8] sm:$0xff]  }
  0x4a   :  { %4899 = vmatprep.mubr.msk.bf16.mxu0 %vm502_vm2, %v5284_v25  ;;  %v5329_v25 = vld [vmem:[%s6811_s0 + $0x1e0] sm:$0xff]  }
  0x51   :  { %4900 = vmatmul.mubr.msk.bf16.gmra.mxu0 %vm502_vm2, %v5285_v26 }
  0x52   :  { %4903 = vmatprep.mubr.msk.bf16.mxu0 %vm502_vm2, %v5286_v27 }
  0x59   :  { %4904 = vmatmul.mubr.msk.bf16.gmra.mxu0 %vm502_vm2, %v5287_v28 }
  0x5a   :  { %4907 = vmatprep.mubr.msk.bf16.mxu0 %vm502_vm2, %v5288_v29 }
  0x61   :  { %4908 = vmatmul.mubr.msk.bf16.gmra.mxu0 %vm502_vm2, %v5289_v30  ;;  %v5330_v30 = vld [vmem:[%s6811_s0 + $0x1e8] sm:$0xff]  }
  0x62   :  { %4911 = vmatprep.mubr.msk.bf16.mxu0 %vm502_vm2, %v5290_v31  ;;  %v5331_v31 = vld [vmem:[%s6811_s0 + $0x1f0] sm:$0xff]  }
  0x69   :  { %4912 = vmatmul.mubr.msk.bf16.gmra.mxu0 %vm502_vm2, %v5291_v32  ;;  %v5687_v32 = vld [vmem:[%s6814_s2] ss:$0 sm:$0xff] }
  0x6a   :  { %4915 = vmatprep.mubr.msk.bf16.mxu0 %vm502_vm2, %v5292_v33 }
  0x71   :  { %4916 = vmatmul.mubr.msk.bf16.gmra.mxu0 %vm502_vm2, %v5293_v34 }
  0x72   :  { %4919 = vmatprep.mubr.msk.bf16.mxu0 %vm502_vm2, %v5294_v35 }
  0x79   :  { %4920 = vmatmul.mubr.msk.bf16.gmra.mxu0 %vm502_vm2, %v5295_v36 }
  0x7a   :  { %4923 = vmatprep.mubr.msk.bf16.mxu0 %vm502_vm2, %v5296_v37 }
  0x81   :  { %4924 = vmatmul.mubr.msk.bf16.gmra.mxu0 %vm502_vm2, %v5297_v38 }
  0x82   :  { %4927 = vmatprep.mubr.msk.bf16.mxu0 %vm502_vm2, %v5298_v39 }
  0x89   :  { %4928 = vmatmul.mubr.msk.bf16.gmra.mxu0 %vm502_vm2, %v5299_v40  ;;  %v5332_v40 = vld [vmem:[%s6811_s0 + $0x1f8] sm:$0xff]  }
  0x8a   :  { %4931 = vmatprep.mubr.msk.bf16.mxu0 %vm502_vm2, %v5300_v41 }
  0x91   :  { %4932 = vmatmul.mubr.msk.bf16.gmra.mxu0 %vm502_vm2, %v5301_v42 }
  0x92   :  { %4935 = vmatprep.mubr.msk.bf16.mxu0 %vm502_vm2, %v5303_v43 }
  0x99   :  { %4936 = vmatmul.mubr.msk.bf16.gmra.mxu0 %vm502_vm2, %v5304_v44 }
  0x9a   :  { %4939 = vmatprep.mubr.msk.bf16.mxu0 %vm502_vm2, %v5305_v45 }
  0xa1   :  { %4940 = vmatmul.mubr.msk.bf16.gmra.mxu0 %vm502_vm2, %v5306_v46 }
  0xa2   :  { %4943 = vmatprep.mubr.msk.bf16.mxu0 %vm502_vm2, %v5307_v47 }
  0xa9   :  { %4944 = vmatmul.mubr.msk.bf16.gmra.mxu0 %vm502_vm2, %v5308_v48 }
  0xaa   :  { %4947 = vmatprep.mubr.msk.bf16.mxu0 %vm502_vm2, %v5309_v49 }
  0xb1   :  { %4948 = vmatmul.mubr.msk.bf16.gmra.mxu0 %vm502_vm2, %v5310_v50 }
  0xb2   :  { %4951 = vmatprep.mubr.msk.bf16.mxu0 %vm502_vm2, %v5311_v51 }
  0xb9   :  { %4952 = vmatmul.mubr.msk.bf16.gmra.mxu0 %vm502_vm2, %v5312_v52 }
  0xba   :  { %4955 = vmatprep.mubr.msk.bf16.mxu0 %vm502_vm2, %v5313_v53 }
  0xc1   :  { %4956 = vmatmul.mubr.msk.bf16.gmra.mxu0 %vm502_vm2, %v5314_v54 }
  0xc2   :  { %4959 = vmatprep.mubr.msk.bf16.mxu0 %vm502_vm2, %v5315_v55 }
  0xc9   :  { %4960 = vmatmul.mubr.msk.bf16.gmra.mxu0 %vm502_vm2, %v5316_v56 }
  0xca   :  { %4963 = vmatprep.mubr.msk.bf16.mxu0 %vm502_vm2, %v5317_v57 }
  0xd1   :  { %v5596_v60 = vpop.f32.mrf.mxu0  ;;  %4964 = vmatmul.mubr.msk.bf16.gmra.mxu0 %vm502_vm2, %v5318_v58 }
  0xd2   :  { %4967 = vmatprep.mubr.msk.bf16.mxu0 %vm502_vm2, %v5319_v59  ;;  %v745_v46 = vadd.f32 %v5596_v60, %v5687_v32 }
  0xd3   :  { %v736_v61 = vpop.f32.mrf.mxu0 }
  0xd4   :  { %v737_v36 = vadd.f32 %v5687_v32, %v736_v61  ;;  %v1249_v52 = vmax.f32 %v745_v46, 0.0 }
  0xd5   :  { %v4870_v62 = vpop.f32.mrf.mxu0 }
  0xd6   :  { %v1247_v41 = vmax.f32 %v737_v36, 0.0  ;;  %v748_v42 = vadd.f32 %v4870_v62, %v5687_v32 }
  0xd7   :  { %v739_v1 = vpop.f32.mrf.mxu0 }
  0xd8   :  { %v740_v34 = vadd.f32 %v5687_v32, %v739_v1  ;;  %v1250_v49 = vmax.f32 %v748_v42, 0.0 }
  0xd9   :  { %v5606_v2 = vpop.f32.mrf.mxu0  ;;  %4968 = vmatmul.mubr.msk.bf16.gmra.mxu0 %vm502_vm2, %v5320_v63 }
  0xda   :  { %4971 = vmatprep.mubr.msk.bf16.mxu0 %vm502_vm2, %v5321_v0  ;;  %v1248_v38 = vmax.f32 %v740_v34, 0.0  ;;  %v1376_v55 = vpack.c.bf16 %v1250_v49, %v1249_v52  ;;  %v761_v60 = vadd.f32 %v5606_v2, %v5687_v32 }
  0xdb   :  { %v752_v3 = vpop.f32.mrf.mxu0 }
  0xdc   :  { %v1375_v44 = vpack.c.bf16 %v1248_v38, %v1247_v41  ;;  %v753_v48 = vadd.f32 %v5687_v32, %v752_v3  ;;  %v1253_v3 = vmax.f32 %v761_v60, 0.0 }
  0xdd   :  { %v5613_v5 = vpop.f32.mrf.mxu0 }
  0xde   :  { %v1251_v54 = vmax.f32 %v753_v48, 0.0  ;;  %v764_v56 = vadd.f32 %v5613_v5, %v5687_v32 }
  0xdf   :  { %v755_v8 = vpop.f32.mrf.mxu0 }
  0xe0   :  { %v756_v45 = vadd.f32 %v5687_v32, %v755_v8  ;;  %v1254_v63 = vmax.f32 %v764_v56, 0.0 }
  0xe1   :  { %v5624_v9 = vpop.f32.mrf.mxu0  ;;  %4972 = vmatmul.mubr.msk.bf16.gmra.mxu0 %vm502_vm2, %v5322_v4 }
  0xe2   :  { %4975 = vmatprep.mubr.msk.bf16.mxu0 %vm502_vm2, %v5323_v7  ;;  %v1252_v51 = vmax.f32 %v756_v45, 0.0  ;;  %v1378_v7 = vpack.c.bf16 %v1254_v63, %v1253_v3 }
  0xe3   :  { %v5628_v10 = vpop.f32.mrf.mxu0 }
  0xe4   :  { %v1377_v58 = vpack.c.bf16 %v1252_v51, %v1251_v54  ;;  %v769_v62 = vadd.f32 %v5687_v32, %v5628_v10 }
  0xe5   :  { %v5630_v11 = vpop.f32.mrf.mxu0 }
  0xe6   :  { %v1255_v5 = vmax.f32 %v769_v62, 0.0  ;;  %v780_v2 = vadd.f32 %v5630_v11, %v5687_v32 }
  0xe7   :  { %v771_v14 = vpop.f32.mrf.mxu0 }
  0xe8   :  { %v772_v59 = vadd.f32 %v5687_v32, %v771_v14 }
  0xe9   :  { %v5638_v15 = vpop.f32.mrf.mxu0  ;;  %4976 = vmatmul.mubr.msk.bf16.gmra.mxu0 %vm502_vm2, %v5324_v12 }
  0xea   :  { %4979 = vmatprep.mubr.msk.bf16.mxu0 %vm502_vm2, %v5325_v13  ;;  %v1256_v1 = vmax.f32 %v772_v59, 0.0  ;;  %v777_v13 = vadd.f32 %v5624_v9, %v5687_v32  ;;  %v793_v38 = vadd.f32 %v5638_v15, %v5687_v32 }
  0xeb   :  { %v5642_v16 = vpop.f32.mrf.mxu0 }
  0xec   :  { %v1379_v12 = vpack.c.bf16 %v1256_v1, %v1255_v5  ;;  %v1261_v45 = vmax.f32 %v793_v38, 0.0 }
  0xed   :  { %v5644_v17 = vpop.f32.mrf.mxu0 }
  0xee   :  { %v796_v9 = vadd.f32 %v5644_v17, %v5687_v32 }
  0xef   :  { %v5652_v20 = vpop.f32.mrf.mxu0 }
  0xf0   :  { %v788_v10 = vadd.f32 %v5687_v32, %v5652_v20  ;;  %v1262_v42 = vmax.f32 %v796_v9, 0.0 }
  0xf1   :  { %v5654_v21 = vpop.f32.mrf.mxu0  ;;  %4980 = vmatmul.mubr.msk.bf16.gmra.mxu0 %vm502_vm2, %v5326_v18  ;;  %v785_v18 = vadd.f32 %v5687_v32, %v5642_v16 }
  0xf2   :  { %4983 = vmatprep.mubr.msk.bf16.mxu0 %vm502_vm2, %v5327_v19  ;;  %v1258_v19 = vmax.f32 %v780_v2, 0.0  ;;  %v1382_v48 = vpack.c.bf16 %v1262_v42, %v1261_v45  ;;  %v809_v52 = vadd.f32 %v5654_v21, %v5687_v32 }
  0xf3   :  { %v5658_v22 = vpop.f32.mrf.mxu0  ;;  %v1259_v20 = vmax.f32 %v785_v18, 0.0 }
  0xf4   :  { %v801_v41 = vadd.f32 %v5687_v32, %v5658_v22  ;;  %v1265_v59 = vmax.f32 %v809_v52, 0.0 }
  0xf5   :  { %v5660_v23 = vpop.f32.mrf.mxu0 }
  0xf6   :  { %v812_v15 = vadd.f32 %v5660_v23, %v5687_v32 }
  0xf7   :  { %v5668_v26 = vpop.f32.mrf.mxu0 }
  0xf8   :  { %v804_v16 = vadd.f32 %v5687_v32, %v5668_v26  ;;  %v1263_v26 = vmax.f32 %v801_v41, 0.0  ;;  %v1266_v56 = vmax.f32 %v812_v15, 0.0 }
  0xf9   :  { %v5670_v27 = vpop.f32.mrf.mxu0  ;;  %4984 = vmatmul.mubr.msk.bf16.gmra.mxu0 %vm502_vm2, %v5328_v24  ;;  %v1260_v24 = vmax.f32 %v788_v10, 0.0 }
  0xfa   :  { %4987 = vmatprep.mubr.msk.bf16.mxu0 %vm502_vm2, %v5329_v25  ;;  %v1257_v25 = vmax.f32 %v777_v13, 0.0  ;;  %v1384_v62 = vpack.c.bf16 %v1266_v56, %v1265_v59  ;;  %v825_v3 = vadd.f32 %v5670_v27, %v5687_v32 }
  0xfb   :  { %v5674_v28 = vpop.f32.mrf.mxu0  ;;  %v1381_v36 = vpack.c.bf16 %v1260_v24, %v1259_v20 }
  0xfc   :  { %v1269_v10 = vmax.f32 %v825_v3, 0.0 }
  0xfd   :  { %v5676_v29 = vpop.f32.mrf.mxu0 }
  0xfe   :  { %v828_v21 = vadd.f32 %v5676_v29, %v5687_v32 }
  0xff   :  { %v5689_v33 = vpop.f32.mrf.mxu0 }
 0x100   :  { %v820_v22 = vadd.f32 %v5687_v32, %v5689_v33  ;;  %v1270_v2 = vmax.f32 %v828_v21, 0.0 }
 0x101   :  { %v5692_v35 = vpop.f32.mrf.mxu0  ;;  %4988 = vmatmul.mubr.msk.bf16.gmra.mxu0 %vm502_vm2, %v5330_v30 }
 0x102   :  { %4991 = vmatprep.mubr.msk.bf16.mxu0 %vm502_vm2, %v5331_v31  ;;  %v1380_v31 = vpack.c.bf16 %v1258_v19, %v1257_v25  ;;  %v1386_v18 = vpack.c.bf16 %v1270_v2, %v1269_v10  ;;  %v841_v25 = vadd.f32 %v5692_v35, %v5687_v32 }
 0x103   :  { %v5697_v37 = vpop.f32.mrf.mxu0 }
 0x105   :  { %v5699_v39 = vpop.f32.mrf.mxu0 }
 0x106   :  { %v844_v27 = vadd.f32 %v5699_v39, %v5687_v32 }
 0x107   :  { %v5705_v43 = vpop.f32.mrf.mxu0 }
 0x108   :  { %v1274_v9 = vmax.f32 %v844_v27, 0.0 }
 0x109   :  { %v5710_v47 = vpop.f32.mrf.mxu0  ;;  %4992 = vmatmul.mubr.msk.bf16.gmra.mxu0 %vm502_vm2, %v5332_v40 }
 0x10a   :  { %4999 = vmatprep.mubr.msk.bf16.mxu0 %vm1462_vm3, %v1375_v44  ;;  %v1264_v44 = vmax.f32 %v804_v16, 0.0  ;;  %v1273_v16 = vmax.f32 %v841_v25, 0.0  ;;  %v857_v45 = vadd.f32 %v5710_v47, %v5687_v32 }
 0x10b   :  { %v5715_v50 = vpop.f32.mrf.mxu0 }
 0x10c   :  { %v1383_v51 = vpack.c.bf16 %v1264_v44, %v1263_v26  ;;  %v1388_v41 = vpack.c.bf16 %v1274_v9, %v1273_v16 }
 0x10d   :  { %v5717_v53 = vpop.f32.mrf.mxu0 }
 0x10e   :  { %v860_v35 = vadd.f32 %v5717_v53, %v5687_v32 }
 0x10f   :  { %v5721_v57 = vpop.f32.mrf.mxu0 }
 0x110   :  { %v1278_v15 = vmax.f32 %v860_v35, 0.0 }
 0x111   :  { %v5726_v61 = vpop.f32.mrf.mxu0  ;;  %5000 = vmatmul.mubr.msk.bf16.vlgmr.msra.gmra.mxu0 %vm1462_vm3, %v1376_v55  ;;  %v817_v55 = vadd.f32 %v5687_v32, %v5674_v28  ;;  %v836_v28 = vadd.f32 %v5687_v32, %v5705_v43 }
 0x112   :  { %5003 = vmatprep.mubr.msk.bf16.mxu0 %vm1462_vm3, %v1377_v58  ;;  %v1268_v58 = vmax.f32 %v820_v22, 0.0  ;;  %v1277_v22 = vmax.f32 %v857_v45, 0.0  ;;  %v873_v59 = vadd.f32 %v5726_v61, %v5687_v32 }
 0x113   :  { %v5732_v0 = vpop.f32.mrf.mxu0  ;;  %v1267_v33 = vmax.f32 %v817_v55, 0.0 }
 0x114   :  { %v1390_v55 = vpack.c.bf16 %v1278_v15, %v1277_v22 }
 0x115   :  { %v5734_v4 = vpop.f32.mrf.mxu0  ;;  %v1385_v1 = vpack.c.bf16 %v1268_v58, %v1267_v33 }
 0x116   :  { %v876_v47 = vadd.f32 %v5734_v4, %v5687_v32 }
 0x117   :  { %v5738_v8 = vpop.f32.mrf.mxu0 }
 0x118   :  { %v1282_v21 = vmax.f32 %v876_v47, 0.0 }
 0x119   :  { %v5744_v14 = vpop.f32.mrf.mxu0  ;;  %5004 = vmatmul.mubr.msk.bf16.gmra.mxu0 %vm1462_vm3, %v1378_v7  ;;  %v833_v7 = vadd.f32 %v5687_v32, %v5697_v37  ;;  %v852_v37 = vadd.f32 %v5687_v32, %v5721_v57 }
 0x11a   :  { %5007 = vmatprep.mubr.msk.bf16.mxu0 %vm1462_vm3, %v1379_v12  ;;  %v1272_v12 = vmax.f32 %v836_v28, 0.0  ;;  %v1281_v28 = vmax.f32 %v873_v59, 0.0 }
 0x11b   :  { %v5750_v11 = vpop.f32.mrf.mxu0  ;;  %v1271_v43 = vmax.f32 %v833_v7, 0.0 }
 0x11d   :  { %v5752_v30 = vpop.f32.mrf.mxu0  ;;  %v1387_v24 = vpack.c.bf16 %v1272_v12, %v1271_v43  ;;  %v1392_v12 = vpack.c.bf16 %v1282_v21, %v1281_v28 }
 0x11e   :  { %v892_v61 = vadd.f32 %v5752_v30, %v5687_v32 }
 0x11f   :  { %v5756_v34 = vpop.f32.mrf.mxu0 }
 0x121   :  { %v5762_v40 = vpop.f32.mrf.mxu0  ;;  %5008 = vmatmul.mubr.msk.bf16.gmra.mxu0 %vm1462_vm3, %v1380_v31  ;;  %v849_v31 = vadd.f32 %v5687_v32, %v5715_v50  ;;  %v868_v50 = vadd.f32 %v5687_v32, %v5738_v8 }
 0x122   :  { %5011 = vmatprep.mubr.msk.bf16.mxu0 %vm1462_vm3, %v1381_v36  ;;  %v1276_v36 = vmax.f32 %v852_v37, 0.0 }
 0x123   :  { %v5768_v17 = vpop.f32.mrf.mxu0  ;;  %v1275_v57 = vmax.f32 %v849_v31, 0.0 }
 0x124   :  { %v897_v31 = vadd.f32 %v5687_v32, %v5768_v17 }
 0x125   :  { %v5770_v46 = vpop.f32.mrf.mxu0  ;;  %v1389_v44 = vpack.c.bf16 %v1276_v36, %v1275_v57  ;;  %v1286_v36 = vmax.f32 %v892_v61, 0.0 }
 0x126   :  { %v1287_v45 = vmax.f32 %v897_v31, 0.0 }
 0x127   :  { %v5774_v49 = vpop.f32.mrf.mxu0 }
 0x129   :  { %v5780_v54 = vpop.f32.mrf.mxu0  ;;  %5012 = vmatmul.mubr.msk.bf16.gmra.mxu0 %vm1462_vm3, %v1382_v48  ;;  %v865_v48 = vadd.f32 %v5687_v32, %v5732_v0  ;;  %v884_v0 = vadd.f32 %v5687_v32, %v5756_v34 }
 0x12a   :  { %5015 = vmatprep.mubr.msk.bf16.mxu0 %vm1462_vm3, %v1383_v51  ;;  %v1280_v51 = vmax.f32 %v868_v50, 0.0 }
 0x12b   :  { %v5786_v23 = vpop.f32.mrf.mxu0  ;;  %v1279_v8 = vmax.f32 %v865_v48, 0.0  ;;  %v1284_v4 = vmax.f32 %v884_v0, 0.0  ;;  %v905_v0 = vadd.f32 %v5762_v40, %v5687_v32 }
 0x12d   :  { %v5788_v60 = vpop.f32.mrf.mxu0  ;;  %v1391_v58 = vpack.c.bf16 %v1280_v51, %v1279_v8  ;;  %v908_v51 = vadd.f32 %v5770_v46, %v5687_v32  ;;  %v913_v46 = vadd.f32 %v5687_v32, %v5786_v23 }
 0x12e   :  { %v924_v61 = vadd.f32 %v5788_v60, %v5687_v32 }
 0x12f   :  { %v5792_v63 = vpop.f32.mrf.mxu0 }
 0x130   :  { %v916_v47 = vadd.f32 %v5687_v32, %v5792_v63  ;;  %v1290_v63 = vmax.f32 %v908_v51, 0.0 }
 0x131   :  { %v5798_v5 = vpop.f32.mrf.mxu0  ;;  %5016 = vmatmul.mubr.msk.bf16.gmra.mxu0 %vm1462_vm3, %v1384_v62  ;;  %v881_v62 = vadd.f32 %v5687_v32, %v5750_v11 }
 0x132   :  { %5019 = vmatprep.mubr.msk.bf16.mxu0 %vm1462_vm3, %v1385_v1  ;;  %v1292_v28 = vmax.f32 %v916_v47, 0.0 }
 0x133   :  { %v5804_v29 = vpop.f32.mrf.mxu0  ;;  %v1283_v7 = vmax.f32 %v881_v62, 0.0 }
 0x134   :  { %v929_v60 = vadd.f32 %v5687_v32, %v5804_v29 }
 0x135   :  { %v5806_v13 = vpop.f32.mrf.mxu0  ;;  %v1393_v11 = vpack.c.bf16 %v1284_v4, %v1283_v7 }
 0x137   :  { %v5810_v19 = vpop.f32.mrf.mxu0 }
 0x139   :  { %v5816_v20 = vpop.f32.mrf.mxu0  ;;  %5020 = vmatmul.mubr.msk.bf16.gmra.mxu0 %vm1462_vm3, %v1386_v18  ;;  %v900_v18 = vadd.f32 %v5687_v32, %v5774_v49 }
 0x13a   :  { %5023 = vmatprep.mubr.msk.bf16.mxu0 %vm1462_vm3, %v1387_v24  ;;  %v889_v24 = vadd.f32 %v5744_v14, %v5687_v32  ;;  %v5334_v14 = vld [vmem:[%s6813_s5] sm:$0xff]  }
 0x13b   :  { %v5822_v39 = vpop.f32.mrf.mxu0  ;;  %v1288_v49 = vmax.f32 %v900_v18, 0.0  ;;  %v932_v18 = vadd.f32 %v5687_v32, %v5810_v19 }
 0x13c   :  { %v1285_v35 = vmax.f32 %v889_v24, 0.0  ;;  %v921_v24 = vadd.f32 %v5780_v54, %v5687_v32  ;;  %v1295_v54 = vmax.f32 %v929_v60, 0.0 }
 0x13d   :  { %v5824_v38 = vpop.f32.mrf.mxu0  ;;  %v1296_v19 = vmax.f32 %v932_v18, 0.0 }
 0x13e   :  { %v1394_v15 = vpack.c.bf16 %v1286_v36, %v1285_v35 }
 0x13f   :  { %v5828_v42 = vpop.f32.mrf.mxu0 }
 0x141   :  { %v5834_v26 = vpop.f32.mrf.mxu0  ;;  %5024 = vmatmul.mubr.msk.bf16.gmra.mxu0 %vm1462_vm3, %v1388_v41 }
 0x142   :  { %5027 = vmatprep.mubr.msk.bf16.mxu0 %vm1462_vm3, %v1389_v44 }
 0x143   :  { %v5840_v53 = vpop.f32.mrf.mxu0 }
 0x145   :  { %v5842_v52 = vpop.f32.mrf.mxu0 }
 0x147   :  { %v5846_v56 = vpop.f32.mrf.mxu0 }
 0x149   :  { %v4929_v33 = vpop.f32.mrf.mxu0  ;;  %5028 = vmatmul.mubr.msk.bf16.gmra.mxu0 %vm1462_vm3, %v1390_v55  ;;  %v1395_v55 = vpack.c.bf16 %v1288_v49, %v1287_v45  ;;  %v1293_v49 = vmax.f32 %v921_v24, 0.0 }
 0x14a   :  { %5031 = vmatprep.mubr.msk.bf16.mxu0 %vm1462_vm3, %v1391_v58  ;;  %v985_v10 = vadd.f32 %v4929_v33, %v5687_v32 }
 0x14b   :  { %v976_v1 = vpop.f32.mrf.mxu0 }
 0x14c   :  { %v977_v2 = vadd.f32 %v5687_v32, %v976_v1  ;;  %v1309_v16 = vmax.f32 %v985_v10, 0.0 }
 0x14d   :  { %v4930_v3 = vpop.f32.mrf.mxu0 }
 0x14e   :  { %v988_v34 = vadd.f32 %v4930_v3, %v5687_v32  ;;  %v1307_v30 = vmax.f32 %v977_v2, 0.0  ;;  %v1289_v3 = vmax.f32 %v905_v0, 0.0  ;;  %v1291_v2 = vmax.f32 %v913_v46, 0.0 }
 0x14f   :  { %v979_v43 = vpop.f32.mrf.mxu0 }
 0x150   :  { %v980_v27 = vadd.f32 %v5687_v32, %v979_v43  ;;  %v1310_v37 = vmax.f32 %v988_v34, 0.0  ;;  %v1396_v23 = vpack.c.bf16 %v1290_v63, %v1289_v3 }
 0x151   :  { %v4933_v25 = vpop.f32.mrf.mxu0  ;;  %5032 = vmatmul.mubr.msk.bf16.gmra.mxu0 %vm1462_vm3, %v1392_v12 }
 0x152   :  { %v1308_v9 = vmax.f32 %v980_v27, 0.0  ;;  %5035 = vmatprep.mubr.msk.bf16.mxu0 %vm1462_vm3, %v1393_v11  ;;  %v1406_v44 = vpack.c.bf16 %v1310_v37, %v1309_v16  ;;  %v1001_v22 = vadd.f32 %v4933_v25, %v5687_v32  ;;  %v1397_v11 = vpack.c.bf16 %v1292_v28, %v1291_v2 }
 0x153   :  { %v992_v57 = vpop.f32.mrf.mxu0  ;;  %v956_v28 = vadd.f32 %v5824_v38, %v5687_v32  ;;  %v961_v38 = vadd.f32 %v5687_v32, %v5840_v53 }
 0x154   :  { %v1405_v41 = vpack.c.bf16 %v1308_v9, %v1307_v30  ;;  %v993_v48 = vadd.f32 %v5687_v32, %v992_v57  ;;  %v1313_v1 = vmax.f32 %v1001_v22, 0.0  ;;  %v1294_v9 = vmax.f32 %v924_v61, 0.0 }
 0x155   :  { %v4934_v50 = vpop.f32.mrf.mxu0  ;;  %v937_v22 = vadd.f32 %v5798_v5, %v5687_v32 }
 0x156   :  { %v1004_v17 = vadd.f32 %v4934_v50, %v5687_v32  ;;  %5059 = vmatprep.mubr.msk.bf16.mxu1 %vm1462_vm3, %v1405_v41  ;;  %v1311_v62 = vmax.f32 %v993_v48, 0.0  ;;  %v1398_v29 = vpack.c.bf16 %v1294_v9, %v1293_v49 }
 0x157   :  { %v995_v8 = vpop.f32.mrf.mxu0  ;;  %5060 = vmatmul.mubr.msk.bf16.vlgmr.msra.gmra.mxu1 %vm1462_vm3, %v1406_v44 }
 0x158   :  { %v996_v58 = vadd.f32 %v5687_v32, %v995_v8  ;;  %5128 = vmatpush3.bf16.msra.mxu1 %v5618_v6  ;;  %v1314_v59 = vmax.f32 %v1004_v17, 0.0  ;;  %v1399_v17 = vpack.c.bf16 %v1296_v19, %v1295_v54 }
 0x159   :  { %v4937_v33 = vpop.f32.mrf.mxu0  ;;  %5036 = vmatmul.mubr.msk.bf16.gmra.mxu0 %vm1462_vm3, %v1394_v15  ;;  %5129 = vmatprep.subr.bf16.mxu1 %v5334_v14  ;;  %v948_v15 = vadd.f32 %v5687_v32, %v5828_v42 }
 0x15a   :  { %v1312_v21 = vmax.f32 %v996_v58, 0.0  ;;  %5039 = vmatprep.mubr.msk.bf16.mxu0 %vm1462_vm3, %v1395_v55  ;;  %v1408_v40 = vpack.c.bf16 %v1314_v59, %v1313_v1  ;;  %v1017_v10 = vadd.f32 %v4937_v33, %v5687_v32 }
 0x15b   :  { %v1008_v4 = vpop.f32.mrf.mxu0  ;;  %v1300_v42 = vmax.f32 %v948_v15, 0.0 }
 0x15c   :  { %v1407_v6 = vpack.c.bf16 %v1312_v21, %v1311_v62  ;;  %5130 = vmatpush3.bf16.msra.mxu1 %v5334_v14  ;;  %v1009_v34 = vadd.f32 %v5687_v32, %v1008_v4  ;;  %v1317_v36 = vmax.f32 %v1017_v10, 0.0  ;;  %v940_v14 = vadd.f32 %v5806_v13, %v5687_v32 }
 0x15d   :  { %v4938_v7 = vpop.f32.mrf.mxu0  ;;  %v945_v13 = vadd.f32 %v5687_v32, %v5822_v39  ;;  %v1297_v62 = vmax.f32 %v937_v22, 0.0 }
 0x15e   :  { %v1020_v12 = vadd.f32 %v4938_v7, %v5687_v32  ;;  %5063 = vmatprep.mubr.msk.bf16.mxu1 %vm1462_vm3, %v1407_v6  ;;  %v1315_v31 = vmax.f32 %v1009_v34, 0.0  ;;  %v1298_v0 = vmax.f32 %v940_v14, 0.0  ;;  %v964_v7 = vadd.f32 %v5687_v32, %v5846_v56 }
 0x15f   :  { %v1011_v43 = vpop.f32.mrf.mxu0  ;;  %5064 = vmatmul.mubr.msk.bf16.gmra.mxu1 %vm1462_vm3, %v1408_v40  ;;  %v1299_v5 = vmax.f32 %v945_v13, 0.0  ;;  %v953_v34 = vadd.f32 %v5816_v20, %v5687_v32  ;;  %v1303_v20 = vmax.f32 %v961_v38, 0.0 }
 0x160   :  { %v1012_v27 = vadd.f32 %v5687_v32, %v1011_v43  ;;  %v1318_v37 = vmax.f32 %v1020_v12, 0.0  ;;  %v1400_v39 = vpack.c.bf16 %v1298_v0, %v1297_v62  ;;  %v1302_v43 = vmax.f32 %v956_v28, 0.0 }
 0x161   :  { %v4941_v25 = vpop.f32.mrf.mxu0  ;;  %5040 = vmatmul.mubr.msk.bf16.gmra.mxu0 %vm1462_vm3, %v1396_v23  ;;  %v1401_v40 = vpack.c.bf16 %v1300_v42, %v1299_v5  ;;  %v1304_v56 = vmax.f32 %v964_v7, 0.0  ;;  %v1301_v24 = vmax.f32 %v953_v34, 0.0 }
 0x162   :  { %v1316_v30 = vmax.f32 %v1012_v27, 0.0  ;;  %5043 = vmatprep.mubr.msk.bf16.mxu0 %vm1462_vm3, %v1397_v11  ;;  %v1410_v41 = vpack.c.bf16 %v1318_v37, %v1317_v36  ;;  %v1033_v45 = vadd.f32 %v4941_v25, %v5687_v32 }
 0x163   :  { %v1024_v16 = vpop.f32.mrf.mxu0  ;;  %v1402_v53 = vpack.c.bf16 %v1302_v43, %v1301_v24 }
 0x164   :  { %v1409_v57 = vpack.c.bf16 %v1316_v30, %v1315_v31  ;;  %v1025_v44 = vadd.f32 %v5687_v32, %v1024_v16  ;;  %v1321_v59 = vmax.f32 %v1033_v45, 0.0  ;;  %v972_v30 = vadd.f32 %v5842_v52, %v5687_v32 }
 0x165   :  { %v4942_v35 = vpop.f32.mrf.mxu0  ;;  %v1403_v16 = vpack.c.bf16 %v1304_v56, %v1303_v20 }
 0x166   :  { %v1036_v50 = vadd.f32 %v4942_v35, %v5687_v32  ;;  %5067 = vmatprep.mubr.msk.bf16.mxu1 %vm1462_vm3, %v1409_v57  ;;  %v1319_v47 = vmax.f32 %v1025_v44, 0.0  ;;  %v969_v57 = vadd.f32 %v5834_v26, %v5687_v32  ;;  %v1306_v52 = vmax.f32 %v972_v30, 0.0 }
 0x167   :  { %v1027_v48 = vpop.f32.mrf.mxu0  ;;  %5068 = vmatmul.mubr.msk.bf16.gmra.mxu1 %vm1462_vm3, %v1410_v41 }
 0x168   :  { %v1028_v51 = vadd.f32 %v5687_v32, %v1027_v48  ;;  %v1322_v8 = vmax.f32 %v1036_v50, 0.0  ;;  %v1305_v14 = vmax.f32 %v969_v57, 0.0 }
 0x169   :  { %v4945_v55 = vpop.f32.mrf.mxu0  ;;  %5044 = vmatmul.mubr.msk.bf16.gmra.mxu0 %vm1462_vm3, %v1398_v29 }
 0x16a   :  { %v1320_v58 = vmax.f32 %v1028_v51, 0.0  ;;  %5047 = vmatprep.mubr.msk.bf16.mxu0 %vm1462_vm3, %v1399_v17  ;;  %v1412_v21 = vpack.c.bf16 %v1322_v8, %v1321_v59  ;;  %v1049_v6 = vadd.f32 %v4945_v55, %v5687_v32  ;;  %v1404_v26 = vpack.c.bf16 %v1306_v52, %v1305_v14 }
 0x16b   :  { %v1040_v33 = vpop.f32.mrf.mxu0 }
 0x16c   :  { %v1411_v46 = vpack.c.bf16 %v1320_v58, %v1319_v47  ;;  %v1041_v1 = vadd.f32 %v5687_v32, %v1040_v33  ;;  %v1325_v11 = vmax.f32 %v1049_v6, 0.0 }
 0x16d   :  { %v4946_v63 = vpop.f32.mrf.mxu0 }
 0x16e   :  { %v1052_v4 = vadd.f32 %v4946_v63, %v5687_v32  ;;  %5071 = vmatprep.mubr.msk.bf16.mxu1 %vm1462_vm3, %v1411_v46  ;;  %v1323_v61 = vmax.f32 %v1041_v1, 0.0 }
 0x16f   :  { %v1043_v3 = vpop.f32.mrf.mxu0  ;;  %5072 = vmatmul.mubr.msk.bf16.gmra.mxu1 %vm1462_vm3, %v1412_v21 }
 0x170   :  { %v1044_v2 = vadd.f32 %v5687_v32, %v1043_v3  ;;  %v1326_v12 = vmax.f32 %v1052_v4, 0.0 }
 0x171   :  { %v4949_v23 = vpop.f32.mrf.mxu0  ;;  %5048 = vmatmul.mubr.msk.bf16.gmra.mxu0 %vm1462_vm3, %v1400_v39 }
 0x172   :  { %v1324_v10 = vmax.f32 %v1044_v2, 0.0  ;;  %5051 = vmatprep.mubr.msk.bf16.mxu0 %vm1462_vm3, %v1401_v40  ;;  %v1414_v37 = vpack.c.bf16 %v1326_v12, %v1325_v11  ;;  %v1065_v9 = vadd.f32 %v4949_v23, %v5687_v32 }
 0x173   :  { %v1056_v18 = vpop.f32.mrf.mxu0 }
 0x174   :  { %v1413_v27 = vpack.c.bf16 %v1324_v10, %v1323_v61  ;;  %v1057_v60 = vadd.f32 %v5687_v32, %v1056_v18  ;;  %v1329_v44 = vmax.f32 %v1065_v9, 0.0 }
 0x175   :  { %v4950_v25 = vpop.f32.mrf.mxu0 }
 0x176   :  { %v1068_v31 = vadd.f32 %v4950_v25, %v5687_v32  ;;  %5075 = vmatprep.mubr.msk.bf16.mxu1 %vm1462_vm3, %v1413_v27  ;;  %v1327_v35 = vmax.f32 %v1057_v60, 0.0 }
 0x177   :  { %v1059_v36 = vpop.f32.mrf.mxu0  ;;  %5076 = vmatmul.mubr.msk.bf16.gmra.mxu1 %vm1462_vm3, %v1414_v37 }
 0x178   :  { %v1060_v19 = vadd.f32 %v5687_v32, %v1059_v36  ;;  %v1330_v49 = vmax.f32 %v1068_v31, 0.0 }
 0x179   :  { %v4953_v41 = vpop.f32.mrf.mxu0  ;;  %5052 = vmatmul.mubr.msk.bf16.gmra.mxu0 %vm1462_vm3, %v1402_v53 }
 0x17a   :  { %v1328_v54 = vmax.f32 %v1060_v19, 0.0  ;;  %5055 = vmatprep.mubr.msk.bf16.mxu0 %vm1462_vm3, %v1403_v16  ;;  %v1416_v45 = vpack.c.bf16 %v1330_v49, %v1329_v44  ;;  %v1081_v51 = vadd.f32 %v4953_v41, %v5687_v32 }
 0x17b   :  { %v1072_v50 = vpop.f32.mrf.mxu0 }
 0x17c   :  { %v1415_v29 = vpack.c.bf16 %v1328_v54, %v1327_v35  ;;  %v1073_v17 = vadd.f32 %v5687_v32, %v1072_v50  ;;  %v1333_v0 = vmax.f32 %v1081_v51, 0.0 }
 0x17d   :  { %v4954_v48 = vpop.f32.mrf.mxu0 }
 0x17e   :  { %v1084_v15 = vadd.f32 %v4954_v48, %v5687_v32  ;;  %5079 = vmatprep.mubr.msk.bf16.mxu1 %vm1462_vm3, %v1415_v29  ;;  %v1331_v47 = vmax.f32 %v1073_v17, 0.0 }
 0x17f   :  { %v1075_v22 = vpop.f32.mrf.mxu0  ;;  %5080 = vmatmul.mubr.msk.bf16.gmra.mxu1 %vm1462_vm3, %v1416_v45 }
 0x180   :  { %v1076_v8 = vadd.f32 %v5687_v32, %v1075_v22  ;;  %v1334_v55 = vmax.f32 %v1084_v15, 0.0 }
 0x181   :  { %v4957_v13 = vpop.f32.mrf.mxu0  ;;  %5056 = vmatmul.mubr.msk.bf16.gmra.mxu0 %vm1462_vm3, %v1404_v26 }
 0x182   :  { %v1332_v58 = vmax.f32 %v1076_v8, 0.0  ;;  %v1418_v42 = vpack.c.bf16 %v1334_v55, %v1333_v0  ;;  %v1097_v63 = vadd.f32 %v4957_v13, %v5687_v32 }
 0x183   :  { %v1088_v59 = vpop.f32.mrf.mxu0 }
 0x184   :  { %v1417_v33 = vpack.c.bf16 %v1332_v58, %v1331_v47  ;;  %v1089_v62 = vadd.f32 %v5687_v32, %v1088_v59  ;;  %v1337_v3 = vmax.f32 %v1097_v63, 0.0 }
 0x185   :  { %v4958_v46 = vpop.f32.mrf.mxu0 }
 0x186   :  { %v1100_v21 = vadd.f32 %v4958_v46, %v5687_v32  ;;  %5083 = vmatprep.mubr.msk.bf16.mxu1 %vm1462_vm3, %v1417_v33  ;;  %v1335_v28 = vmax.f32 %v1089_v62, 0.0 }
 0x187   :  { %v1091_v5 = vpop.f32.mrf.mxu0  ;;  %5084 = vmatmul.mubr.msk.bf16.gmra.mxu1 %vm1462_vm3, %v1418_v42 }
 0x188   :  { %v1092_v1 = vadd.f32 %v5687_v32, %v1091_v5  ;;  %v1338_v4 = vmax.f32 %v1100_v21, 0.0 }
 0x189   :  { %v4961_v39 = vpop.f32.mrf.mxu0 }
 0x18a   :  { %v1336_v6 = vmax.f32 %v1092_v1, 0.0  ;;  %v1420_v2 = vpack.c.bf16 %v1338_v4, %v1337_v3  ;;  %v1113_v38 = vadd.f32 %v4961_v39, %v5687_v32 }
 0x18b   :  { %v1104_v40 = vpop.f32.mrf.mxu0 }
 0x18c   :  { %v1419_v7 = vpack.c.bf16 %v1336_v6, %v1335_v28  ;;  %v1105_v12 = vadd.f32 %v5687_v32, %v1104_v40  ;;  %v1341_v27 = vmax.f32 %v1113_v38, 0.0 }
 0x18d   :  { %v4962_v34 = vpop.f32.mrf.mxu0 }
 0x18e   :  { %v1116_v23 = vadd.f32 %v4962_v34, %v5687_v32  ;;  %5087 = vmatprep.mubr.msk.bf16.mxu1 %vm1462_vm3, %v1419_v7  ;;  %v1339_v18 = vmax.f32 %v1105_v12, 0.0 }
 0x18f   :  { %v1107_v61 = vpop.f32.mrf.mxu0  ;;  %5088 = vmatmul.mubr.msk.bf16.gmra.mxu1 %vm1462_vm3, %v1420_v2 }
 0x190   :  { %v1108_v10 = vadd.f32 %v5687_v32, %v1107_v61  ;;  %v1342_v43 = vmax.f32 %v1116_v23, 0.0 }
 0x191   :  { %v4965_v11 = vpop.f32.mrf.mxu0 }
 0x192   :  { %v1340_v56 = vmax.f32 %v1108_v10, 0.0  ;;  %v1422_v25 = vpack.c.bf16 %v1342_v43, %v1341_v27  ;;  %v1129_v53 = vadd.f32 %v4965_v11, %v5687_v32 }
 0x193   :  { %v1120_v24 = vpop.f32.mrf.mxu0 }
 0x194   :  { %v1421_v37 = vpack.c.bf16 %v1340_v56, %v1339_v18  ;;  %v1121_v60 = vadd.f32 %v5687_v32, %v1120_v24  ;;  %v1345_v49 = vmax.f32 %v1129_v53, 0.0 }
 0x195   :  { %v4966_v20 = vpop.f32.mrf.mxu0 }
 0x196   :  { %v1132_v31 = vadd.f32 %v4966_v20, %v5687_v32  ;;  %5091 = vmatprep.mubr.msk.bf16.mxu1 %vm1462_vm3, %v1421_v37  ;;  %v1343_v19 = vmax.f32 %v1121_v60, 0.0 }
 0x197   :  { %v1123_v30 = vpop.f32.mrf.mxu0  ;;  %5092 = vmatmul.mubr.msk.bf16.gmra.mxu1 %vm1462_vm3, %v1422_v25 }
 0x198   :  { %v1124_v9 = vadd.f32 %v5687_v32, %v1123_v30  ;;  %v1346_v36 = vmax.f32 %v1132_v31, 0.0 }
 0x199   :  { %v4969_v16 = vpop.f32.mrf.mxu0 }
 0x19a   :  { %v1344_v57 = vmax.f32 %v1124_v9, 0.0  ;;  %v1424_v54 = vpack.c.bf16 %v1346_v36, %v1345_v49  ;;  %v1145_v29 = vadd.f32 %v4969_v16, %v5687_v32 }
 0x19b   :  { %v1136_v41 = vpop.f32.mrf.mxu0 }
 0x19c   :  { %v1423_v35 = vpack.c.bf16 %v1344_v57, %v1343_v19  ;;  %v1137_v44 = vadd.f32 %v5687_v32, %v1136_v41  ;;  %v1349_v51 = vmax.f32 %v1145_v29, 0.0 }
 0x19d   :  { %v4970_v52 = vpop.f32.mrf.mxu0 }
 0x19e   :  { %v1148_v50 = vadd.f32 %v4970_v52, %v5687_v32  ;;  %5095 = vmatprep.mubr.msk.bf16.mxu1 %vm1462_vm3, %v1423_v35  ;;  %v1347_v15 = vmax.f32 %v1137_v44, 0.0 }
 0x19f   :  { %v1139_v14 = vpop.f32.mrf.mxu0  ;;  %5096 = vmatmul.mubr.msk.bf16.gmra.mxu1 %vm1462_vm3, %v1424_v54 }
 0x1a0   :  { %v1140_v45 = vadd.f32 %v5687_v32, %v1139_v14  ;;  %v1350_v48 = vmax.f32 %v1148_v50, 0.0 }
 0x1a1   :  { %v4973_v17 = vpop.f32.mrf.mxu0 }
 0x1a2   :  { %v1348_v26 = vmax.f32 %v1140_v45, 0.0  ;;  %v1426_v55 = vpack.c.bf16 %v1350_v48, %v1349_v51  ;;  %v1161_v0 = vadd.f32 %v4973_v17, %v5687_v32 }
 0x1a3   :  { %v1152_v22 = vpop.f32.mrf.mxu0 }
 0x1a4   :  { %v1425_v8 = vpack.c.bf16 %v1348_v26, %v1347_v15  ;;  %v1153_v47 = vadd.f32 %v5687_v32, %v1152_v22  ;;  %v1353_v63 = vmax.f32 %v1161_v0, 0.0 }
 0x1a5   :  { %v4974_v13 = vpop.f32.mrf.mxu0 }
 0x1a6   :  { %v1164_v58 = vadd.f32 %v4974_v13, %v5687_v32  ;;  %5099 = vmatprep.mubr.msk.bf16.mxu1 %vm1462_vm3, %v1425_v8  ;;  %v1351_v62 = vmax.f32 %v1153_v47, 0.0 }
 0x1a7   :  { %v1155_v59 = vpop.f32.mrf.mxu0  ;;  %5100 = vmatmul.mubr.msk.bf16.gmra.mxu1 %vm1462_vm3, %v1426_v55 }
 0x1a8   :  { %v1156_v33 = vadd.f32 %v5687_v32, %v1155_v59  ;;  %v1354_v42 = vmax.f32 %v1164_v58, 0.0 }
 0x1a9   :  { %v4977_v46 = vpop.f32.mrf.mxu0 }
 0x1aa   :  { %v1352_v21 = vmax.f32 %v1156_v33, 0.0  ;;  %v1428_v4 = vpack.c.bf16 %v1354_v42, %v1353_v63  ;;  %v1177_v3 = vadd.f32 %v4977_v46, %v5687_v32 }
 0x1ab   :  { %v1168_v5 = vpop.f32.mrf.mxu0 }
 0x1ac   :  { %v1427_v1 = vpack.c.bf16 %v1352_v21, %v1351_v62  ;;  %v1169_v28 = vadd.f32 %v5687_v32, %v1168_v5  ;;  %v1357_v38 = vmax.f32 %v1177_v3, 0.0 }
 0x1ad   :  { %v4978_v39 = vpop.f32.mrf.mxu0 }
 0x1ae   :  { %v1180_v6 = vadd.f32 %v4978_v39, %v5687_v32  ;;  %5103 = vmatprep.mubr.msk.bf16.mxu1 %vm1462_vm3, %v1427_v1  ;;  %v1355_v12 = vmax.f32 %v1169_v28, 0.0 }
 0x1af   :  { %v1171_v40 = vpop.f32.mrf.mxu0  ;;  %5104 = vmatmul.mubr.msk.bf16.gmra.mxu1 %vm1462_vm3, %v1428_v4 }
 0x1b0   :  { %v1172_v7 = vadd.f32 %v5687_v32, %v1171_v40  ;;  %v1358_v2 = vmax.f32 %v1180_v6, 0.0 }
 0x1b1   :  { %v4981_v34 = vpop.f32.mrf.mxu0 }
 0x1b2   :  { %v1356_v23 = vmax.f32 %v1172_v7, 0.0  ;;  %v1430_v43 = vpack.c.bf16 %v1358_v2, %v1357_v38  ;;  %v1193_v27 = vadd.f32 %v4981_v34, %v5687_v32  ;;  %v6020_v2 = vld [vmem:[%s6815_s4] ss:$0 sm:$0xff] }
 0x1b3   :  { %v1184_v61 = vpop.f32.mrf.mxu0 }
 0x1b4   :  { %v1429_v10 = vpack.c.bf16 %v1356_v23, %v1355_v12  ;;  %v1185_v18 = vadd.f32 %v5687_v32, %v1184_v61  ;;  %v1361_v53 = vmax.f32 %v1193_v27, 0.0 }
 0x1b5   :  { %v4982_v11 = vpop.f32.mrf.mxu0 }
 0x1b6   :  { %v1196_v56 = vadd.f32 %v4982_v11, %v5687_v32  ;;  %5107 = vmatprep.mubr.msk.bf16.mxu1 %vm1462_vm3, %v1429_v10  ;;  %v1359_v60 = vmax.f32 %v1185_v18, 0.0 }
 0x1b7   :  { %v1187_v24 = vpop.f32.mrf.mxu0  ;;  %5108 = vmatmul.mubr.msk.bf16.gmra.mxu1 %vm1462_vm3, %v1430_v43 }
 0x1b8   :  { %v1188_v37 = vadd.f32 %v5687_v32, %v1187_v24  ;;  %v1362_v25 = vmax.f32 %v1196_v56, 0.0 }
 0x1b9   :  { %v4985_v20 = vpop.f32.mrf.mxu0 }
 0x1ba   :  { %v1360_v31 = vmax.f32 %v1188_v37, 0.0  ;;  %v1432_v36 = vpack.c.bf16 %v1362_v25, %v1361_v53  ;;  %v1209_v49 = vadd.f32 %v4985_v20, %v5687_v32 }
 0x1bb   :  { %v1200_v30 = vpop.f32.mrf.mxu0 }
 0x1bc   :  { %v1431_v9 = vpack.c.bf16 %v1360_v31, %v1359_v60  ;;  %v1201_v19 = vadd.f32 %v5687_v32, %v1200_v30  ;;  %v1365_v29 = vmax.f32 %v1209_v49, 0.0 }
 0x1bd   :  { %v4986_v16 = vpop.f32.mrf.mxu0 }
 0x1be   :  { %v1212_v57 = vadd.f32 %v4986_v16, %v5687_v32  ;;  %5111 = vmatprep.mubr.msk.bf16.mxu1 %vm1462_vm3, %v1431_v9  ;;  %v1363_v44 = vmax.f32 %v1201_v19, 0.0 }
 0x1bf   :  { %v1203_v41 = vpop.f32.mrf.mxu0  ;;  %5112 = vmatmul.mubr.msk.bf16.gmra.mxu1 %vm1462_vm3, %v1432_v36 }
 0x1c0   :  { %v1204_v35 = vadd.f32 %v5687_v32, %v1203_v41  ;;  %v1366_v54 = vmax.f32 %v1212_v57, 0.0 }
 0x1c1   :  { %v4989_v52 = vpop.f32.mrf.mxu0 }
 0x1c2   :  { %v1364_v50 = vmax.f32 %v1204_v35, 0.0  ;;  %v1434_v48 = vpack.c.bf16 %v1366_v54, %v1365_v29  ;;  %v1225_v51 = vadd.f32 %v4989_v52, %v5687_v32 }
 0x1c3   :  { %v1216_v14 = vpop.f32.mrf.mxu0 }
 0x1c4   :  { %v1433_v45 = vpack.c.bf16 %v1364_v50, %v1363_v44  ;;  %v1217_v15 = vadd.f32 %v5687_v32, %v1216_v14  ;;  %v1369_v0 = vmax.f32 %v1225_v51, 0.0 }
 0x1c5   :  { %v4990_v17 = vpop.f32.mrf.mxu0 }
 0x1c6   :  { %v1228_v26 = vadd.f32 %v4990_v17, %v5687_v32  ;;  %5115 = vmatprep.mubr.msk.bf16.mxu1 %vm1462_vm3, %v1433_v45  ;;  %v1367_v47 = vmax.f32 %v1217_v15, 0.0 }
 0x1c7   :  { %v1219_v22 = vpop.f32.mrf.mxu0  ;;  %5116 = vmatmul.mubr.msk.bf16.gmra.mxu1 %vm1462_vm3, %v1434_v48 }
 0x1c8   :  { %v1220_v8 = vadd.f32 %v5687_v32, %v1219_v22  ;;  %v1370_v55 = vmax.f32 %v1228_v26, 0.0 }
 0x1c9   :  { %v4993_v13 = vpop.f32.mrf.mxu0 }
 0x1ca   :  { %v1368_v58 = vmax.f32 %v1220_v8, 0.0  ;;  %v1436_v42 = vpack.c.bf16 %v1370_v55, %v1369_v0  ;;  %v1241_v63 = vadd.f32 %v4993_v13, %v5687_v32 }
 0x1cb   :  { %v1232_v59 = vpop.f32.mrf.mxu0 }
 0x1cc   :  { %v1435_v33 = vpack.c.bf16 %v1368_v58, %v1367_v47  ;;  %v1233_v62 = vadd.f32 %v5687_v32, %v1232_v59  ;;  %v1373_v3 = vmax.f32 %v1241_v63, 0.0 }
 0x1cd   :  { %v4994_v46 = vpop.f32.mrf.mxu0 }
 0x1ce   :  { %v1244_v21 = vadd.f32 %v4994_v46, %v5687_v32  ;;  %5119 = vmatprep.mubr.msk.bf16.mxu1 %vm1462_vm3, %v1435_v33  ;;  %v1371_v28 = vmax.f32 %v1233_v62, 0.0 }
 0x1cf   :  { %v1235_v5 = vpop.f32.mrf.mxu0  ;;  %5120 = vmatmul.mubr.msk.bf16.gmra.mxu1 %vm1462_vm3, %v1436_v42 }
 0x1d0   :  { %v1236_v1 = vadd.f32 %v5687_v32, %v1235_v5  ;;  %v1374_v4 = vmax.f32 %v1244_v21, 0.0 }
 0x1d1   :  { %v5001_v39 = vpop.f32.mrf.mxu0 }
 0x1d2   :  { %v1372_v6 = vmax.f32 %v1236_v1, 0.0  ;;  %v1438_v34 = vpack.c.bf16 %v1374_v4, %v1373_v3  ;;  %v1698_v32 = vadd.f32 %v5001_v39, %v6020_v2 }
 0x1d3   :  { %v1689_v40 = vpop.f32.mrf.mxu0 }
 0x1d4   :  { %v1437_v7 = vpack.c.bf16 %v1372_v6, %v1371_v28  ;;  %v1690_v23 = vadd.f32 %v6020_v2, %v1689_v40  ;;  %v2202_v27 = vmax.f32 %v1698_v32, 0.0 }
 0x1d5   :  { %v5002_v12 = vpop.f32.mrf.mxu0 }
 0x1d6   :  { %v1701_v38 = vadd.f32 %v5002_v12, %v6020_v2  ;;  %5123 = vmatprep.mubr.msk.bf16.mxu1 %vm1462_vm3, %v1437_v7  ;;  %v2200_v18 = vmax.f32 %v1690_v23, 0.0 }
 0x1d7   :  { %v1692_v61 = vpop.f32.mrf.mxu0  ;;  %5124 = vmatmul.mubr.msk.bf16.gmra.mxu1 %vm1462_vm3, %v1438_v34 }
 0x1d8   :  { %v1693_v10 = vadd.f32 %v6020_v2, %v1692_v61  ;;  %v2203_v43 = vmax.f32 %v1701_v38, 0.0 }
 0x1d9   :  { %v5005_v11 = vpop.f32.mrf.mxu0 }
 0x1da   :  { %v2201_v56 = vmax.f32 %v1693_v10, 0.0  ;;  %v2329_v25 = vpack.c.bf16 %v2203_v43, %v2202_v27  ;;  %v1714_v53 = vadd.f32 %v5005_v11, %v6020_v2 }
 0x1db   :  { %v1705_v24 = vpop.f32.mrf.mxu0 }
 0x1dc   :  { %v2328_v37 = vpack.c.bf16 %v2201_v56, %v2200_v18  ;;  %v1706_v60 = vadd.f32 %v6020_v2, %v1705_v24  ;;  %v2206_v49 = vmax.f32 %v1714_v53, 0.0 }
 0x1dd   :  { %v5006_v20 = vpop.f32.mrf.mxu0 }
 0x1de   :  { %v1717_v31 = vadd.f32 %v5006_v20, %v6020_v2  ;;  %5131 = vmatprep.mubr.msk.bf16.mxu1 %vm1462_vm3, %v2328_v37  ;;  %v2204_v19 = vmax.f32 %v1706_v60, 0.0 }
 0x1df   :  { %v1708_v30 = vpop.f32.mrf.mxu0  ;;  %5132 = vmatmul.mubr.msk.bf16.vlgmr.msra.gmra.mxu1 %vm1462_vm3, %v2329_v25 }
 0x1e0   :  { %v1709_v9 = vadd.f32 %v6020_v2, %v1708_v30  ;;  %v2207_v36 = vmax.f32 %v1717_v31, 0.0 }
 0x1e1   :  { %v5009_v16 = vpop.f32.mrf.mxu0 }
 0x1e2   :  { %v2205_v57 = vmax.f32 %v1709_v9, 0.0  ;;  %v2331_v54 = vpack.c.bf16 %v2207_v36, %v2206_v49  ;;  %v1730_v29 = vadd.f32 %v5009_v16, %v6020_v2 }
 0x1e3   :  { %v1721_v41 = vpop.f32.mrf.mxu0 }
 0x1e4   :  { %v2330_v35 = vpack.c.bf16 %v2205_v57, %v2204_v19  ;;  %v1722_v44 = vadd.f32 %v6020_v2, %v1721_v41  ;;  %v2210_v51 = vmax.f32 %v1730_v29, 0.0 }
 0x1e5   :  { %v5010_v52 = vpop.f32.mrf.mxu0 }
 0x1e6   :  { %v1733_v50 = vadd.f32 %v5010_v52, %v6020_v2  ;;  %5135 = vmatprep.mubr.msk.bf16.mxu1 %vm1462_vm3, %v2330_v35  ;;  %v2208_v15 = vmax.f32 %v1722_v44, 0.0 }
 0x1e7   :  { %v1724_v14 = vpop.f32.mrf.mxu0  ;;  %5136 = vmatmul.mubr.msk.bf16.gmra.mxu1 %vm1462_vm3, %v2331_v54 }
 0x1e8   :  { %v1725_v45 = vadd.f32 %v6020_v2, %v1724_v14  ;;  %v2211_v48 = vmax.f32 %v1733_v50, 0.0 }
 0x1e9   :  { %v5013_v17 = vpop.f32.mrf.mxu0 }
 0x1ea   :  { %v2209_v26 = vmax.f32 %v1725_v45, 0.0  ;;  %v2333_v55 = vpack.c.bf16 %v2211_v48, %v2210_v51  ;;  %v1746_v0 = vadd.f32 %v5013_v17, %v6020_v2 }
 0x1eb   :  { %v1737_v22 = vpop.f32.mrf.mxu0 }
 0x1ec   :  { %v2332_v8 = vpack.c.bf16 %v2209_v26, %v2208_v15  ;;  %v1738_v47 = vadd.f32 %v6020_v2, %v1737_v22  ;;  %v2214_v63 = vmax.f32 %v1746_v0, 0.0 }
 0x1ed   :  { %v5014_v13 = vpop.f32.mrf.mxu0 }
 0x1ee   :  { %v1749_v58 = vadd.f32 %v5014_v13, %v6020_v2  ;;  %5139 = vmatprep.mubr.msk.bf16.mxu1 %vm1462_vm3, %v2332_v8  ;;  %v2212_v62 = vmax.f32 %v1738_v47, 0.0 }
 0x1ef   :  { %v1740_v59 = vpop.f32.mrf.mxu0  ;;  %5140 = vmatmul.mubr.msk.bf16.gmra.mxu1 %vm1462_vm3, %v2333_v55 }
 0x1f0   :  { %v1741_v33 = vadd.f32 %v6020_v2, %v1740_v59  ;;  %v2215_v42 = vmax.f32 %v1749_v58, 0.0 }
 0x1f1   :  { %v5017_v46 = vpop.f32.mrf.mxu0 }
 0x1f2   :  { %v2213_v21 = vmax.f32 %v1741_v33, 0.0  ;;  %v2335_v4 = vpack.c.bf16 %v2215_v42, %v2214_v63  ;;  %v1762_v3 = vadd.f32 %v5017_v46, %v6020_v2 }
 0x1f3   :  { %v1753_v5 = vpop.f32.mrf.mxu0 }
 0x1f4   :  { %v2334_v1 = vpack.c.bf16 %v2213_v21, %v2212_v62  ;;  %v1754_v28 = vadd.f32 %v6020_v2, %v1753_v5  ;;  %v2218_v32 = vmax.f32 %v1762_v3, 0.0 }
 0x1f5   :  { %v5018_v39 = vpop.f32.mrf.mxu0 }
 0x1f6   :  { %v1765_v6 = vadd.f32 %v5018_v39, %v6020_v2  ;;  %5143 = vmatprep.mubr.msk.bf16.mxu1 %vm1462_vm3, %v2334_v1  ;;  %v2216_v23 = vmax.f32 %v1754_v28, 0.0 }
 0x1f7   :  { %v1756_v40 = vpop.f32.mrf.mxu0  ;;  %5144 = vmatmul.mubr.msk.bf16.gmra.mxu1 %vm1462_vm3, %v2335_v4 }
 0x1f8   :  { %v1757_v7 = vadd.f32 %v6020_v2, %v1756_v40  ;;  %v2219_v34 = vmax.f32 %v1765_v6, 0.0 }
 0x1f9   :  { %v5021_v12 = vpop.f32.mrf.mxu0 }
 0x1fa   :  { %v2217_v38 = vmax.f32 %v1757_v7, 0.0  ;;  %v2337_v43 = vpack.c.bf16 %v2219_v34, %v2218_v32  ;;  %v1778_v27 = vadd.f32 %v5021_v12, %v6020_v2 }
 0x1fb   :  { %v1769_v61 = vpop.f32.mrf.mxu0 }
 0x1fc   :  { %v2336_v10 = vpack.c.bf16 %v2217_v38, %v2216_v23  ;;  %v1770_v18 = vadd.f32 %v6020_v2, %v1769_v61  ;;  %v2222_v53 = vmax.f32 %v1778_v27, 0.0 }
 0x1fd   :  { %v5022_v11 = vpop.f32.mrf.mxu0 }
 0x1fe   :  { %v1781_v56 = vadd.f32 %v5022_v11, %v6020_v2  ;;  %5147 = vmatprep.mubr.msk.bf16.mxu1 %vm1462_vm3, %v2336_v10  ;;  %v2220_v60 = vmax.f32 %v1770_v18, 0.0 }
 0x1ff   :  { %v1772_v24 = vpop.f32.mrf.mxu0  ;;  %5148 = vmatmul.mubr.msk.bf16.gmra.mxu1 %vm1462_vm3, %v2337_v43 }
 0x200   :  { %v1773_v37 = vadd.f32 %v6020_v2, %v1772_v24  ;;  %v2223_v25 = vmax.f32 %v1781_v56, 0.0 }
 0x201   :  { %v5025_v20 = vpop.f32.mrf.mxu0 }
 0x202   :  { %v2221_v31 = vmax.f32 %v1773_v37, 0.0  ;;  %v2339_v36 = vpack.c.bf16 %v2223_v25, %v2222_v53  ;;  %v1794_v49 = vadd.f32 %v5025_v20, %v6020_v2 }
 0x203   :  { %v1785_v30 = vpop.f32.mrf.mxu0 }
 0x204   :  { %v2338_v9 = vpack.c.bf16 %v2221_v31, %v2220_v60  ;;  %v1786_v19 = vadd.f32 %v6020_v2, %v1785_v30  ;;  %v2226_v29 = vmax.f32 %v1794_v49, 0.0 }
 0x205   :  { %v5026_v16 = vpop.f32.mrf.mxu0 }
 0x206   :  { %v1797_v57 = vadd.f32 %v5026_v16, %v6020_v2  ;;  %5151 = vmatprep.mubr.msk.bf16.mxu1 %vm1462_vm3, %v2338_v9  ;;  %v2224_v44 = vmax.f32 %v1786_v19, 0.0 }
 0x207   :  { %v1788_v41 = vpop.f32.mrf.mxu0  ;;  %5152 = vmatmul.mubr.msk.bf16.gmra.mxu1 %vm1462_vm3, %v2339_v36 }
 0x208   :  { %v1789_v35 = vadd.f32 %v6020_v2, %v1788_v41  ;;  %v2227_v54 = vmax.f32 %v1797_v57, 0.0 }
 0x209   :  { %v5029_v52 = vpop.f32.mrf.mxu0 }
 0x20a   :  { %v2225_v50 = vmax.f32 %v1789_v35, 0.0  ;;  %v2341_v48 = vpack.c.bf16 %v2227_v54, %v2226_v29  ;;  %v1810_v51 = vadd.f32 %v5029_v52, %v6020_v2 }
 0x20b   :  { %v1801_v14 = vpop.f32.mrf.mxu0 }
 0x20c   :  { %v2340_v45 = vpack.c.bf16 %v2225_v50, %v2224_v44  ;;  %v1802_v15 = vadd.f32 %v6020_v2, %v1801_v14  ;;  %v2230_v0 = vmax.f32 %v1810_v51, 0.0 }
 0x20d   :  { %v5030_v17 = vpop.f32.mrf.mxu0 }
 0x20e   :  { %v1813_v26 = vadd.f32 %v5030_v17, %v6020_v2  ;;  %5155 = vmatprep.mubr.msk.bf16.mxu1 %vm1462_vm3, %v2340_v45  ;;  %v2228_v47 = vmax.f32 %v1802_v15, 0.0 }
 0x20f   :  { %v1804_v22 = vpop.f32.mrf.mxu0  ;;  %5156 = vmatmul.mubr.msk.bf16.gmra.mxu1 %vm1462_vm3, %v2341_v48 }
 0x210   :  { %v1805_v8 = vadd.f32 %v6020_v2, %v1804_v22  ;;  %v2231_v55 = vmax.f32 %v1813_v26, 0.0 }
 0x211   :  { %v5033_v13 = vpop.f32.mrf.mxu0 }
 0x212   :  { %v2229_v58 = vmax.f32 %v1805_v8, 0.0  ;;  %v2343_v42 = vpack.c.bf16 %v2231_v55, %v2230_v0  ;;  %v1826_v63 = vadd.f32 %v5033_v13, %v6020_v2 }
 0x213   :  { %v1817_v59 = vpop.f32.mrf.mxu0 }
 0x214   :  { %v2342_v33 = vpack.c.bf16 %v2229_v58, %v2228_v47  ;;  %v1818_v62 = vadd.f32 %v6020_v2, %v1817_v59  ;;  %v2234_v7 = vmax.f32 %v1826_v63, 0.0 }
 0x215   :  { %v5034_v46 = vpop.f32.mrf.mxu0 }
 0x216   :  { %v1829_v21 = vadd.f32 %v5034_v46, %v6020_v2  ;;  %5159 = vmatprep.mubr.msk.bf16.mxu1 %vm1462_vm3, %v2342_v33  ;;  %v2232_v3 = vmax.f32 %v1818_v62, 0.0 }
 0x217   :  { %v1820_v5 = vpop.f32.mrf.mxu0  ;;  %v6074_v1 = vpop.f32.mrf.mxu1  ;;  %5160 = vmatmul.mubr.msk.bf16.gmra.mxu1 %vm1462_vm3, %v2343_v42 }
 0x218   :  { %v1821_v4 = vadd.f32 %v6020_v2, %v1820_v5  ;;  %v2235_v39 = vmax.f32 %v1829_v21, 0.0 }
 0x219   :  { %v5037_v28 = vpop.f32.mrf.mxu0  ;;  %v6078_v6 = vpop.f32.mrf.mxu1 }
 0x21a   :  { %v2233_v40 = vmax.f32 %v1821_v4, 0.0  ;;  %v2345_v38 = vpack.c.bf16 %v2235_v39, %v2234_v7  ;;  %v1842_v11 = vadd.f32 %v5037_v28, %v6020_v2 }
 0x21b   :  { %v1833_v34 = vpop.f32.mrf.mxu0  ;;  %v6080_v12 = vpop.f32.mrf.mxu1 }
 0x21c   :  { %v2344_v23 = vpack.c.bf16 %v2233_v40, %v2232_v3  ;;  %v1834_v10 = vadd.f32 %v6020_v2, %v1833_v34  ;;  %v2238_v31 = vmax.f32 %v1842_v11, 0.0 }
 0x21d   :  { %v5038_v32 = vpop.f32.mrf.mxu0  ;;  %v6082_v61 = vpop.f32.mrf.mxu1 }
 0x21e   :  { %v1845_v43 = vadd.f32 %v5038_v32, %v6020_v2  ;;  %5163 = vmatprep.mubr.msk.bf16.mxu1 %vm1462_vm3, %v2344_v23  ;;  %v2236_v20 = vmax.f32 %v1834_v10, 0.0 }
 0x21f   :  { %v1836_v18 = vpop.f32.mrf.mxu0  ;;  %v6088_v56 = vpop.f32.mrf.mxu1  ;;  %5164 = vmatmul.mubr.msk.bf16.gmra.mxu1 %vm1462_vm3, %v2345_v38 }
 0x220   :  { %v1837_v27 = vadd.f32 %v6020_v2, %v1836_v18  ;;  %v2239_v24 = vmax.f32 %v1845_v43, 0.0 }
 0x221   :  { %v5041_v37 = vpop.f32.mrf.mxu0  ;;  %v6092_v25 = vpop.f32.mrf.mxu1 }
 0x222   :  { %v2237_v60 = vmax.f32 %v1837_v27, 0.0  ;;  %v2347_v36 = vpack.c.bf16 %v2239_v24, %v2238_v31  ;;  %v1858_v41 = vadd.f32 %v5041_v37, %v6020_v2 }
 0x223   :  { %v1849_v53 = vpop.f32.mrf.mxu0  ;;  %v6094_v30 = vpop.f32.mrf.mxu1 }
 0x224   :  { %v2346_v9 = vpack.c.bf16 %v2237_v60, %v2236_v20  ;;  %v1850_v57 = vadd.f32 %v6020_v2, %v1849_v53  ;;  %v2242_v48 = vmax.f32 %v1858_v41, 0.0 }
 0x225   :  { %v5042_v16 = vpop.f32.mrf.mxu0  ;;  %v6096_v19 = vpop.f32.mrf.mxu1 }
 0x226   :  { %v1861_v49 = vadd.f32 %v5042_v16, %v6020_v2  ;;  %5167 = vmatprep.mubr.msk.bf16.mxu1 %vm1462_vm3, %v2346_v9  ;;  %v2240_v14 = vmax.f32 %v1850_v57, 0.0 }
 0x227   :  { %v1852_v35 = vpop.f32.mrf.mxu0  ;;  %v6102_v54 = vpop.f32.mrf.mxu1  ;;  %5168 = vmatmul.mubr.msk.bf16.gmra.mxu1 %vm1462_vm3, %v2347_v36 }
 0x228   :  { %v1853_v52 = vadd.f32 %v6020_v2, %v1852_v35  ;;  %v2243_v44 = vmax.f32 %v1861_v49, 0.0 }
 0x229   :  { %v5045_v50 = vpop.f32.mrf.mxu0  ;;  %v6106_v29 = vpop.f32.mrf.mxu1 }
 0x22a   :  { %v2241_v45 = vmax.f32 %v1853_v52, 0.0  ;;  %v2349_v51 = vpack.c.bf16 %v2243_v44, %v2242_v48  ;;  %v1874_v47 = vadd.f32 %v5045_v50, %v6020_v2 }
 0x22b   :  { %v1865_v17 = vpop.f32.mrf.mxu0  ;;  %v6108_v15 = vpop.f32.mrf.mxu1 }
 0x22c   :  { %v2348_v26 = vpack.c.bf16 %v2241_v45, %v2240_v14  ;;  %v1866_v55 = vadd.f32 %v6020_v2, %v1865_v17  ;;  %v2246_v63 = vmax.f32 %v1874_v47, 0.0 }
 0x22d   :  { %v5046_v22 = vpop.f32.mrf.mxu0  ;;  %v6110_v8 = vpop.f32.mrf.mxu1 }
 0x22e   :  { %v1877_v13 = vadd.f32 %v5046_v22, %v6020_v2  ;;  %5171 = vmatprep.mubr.msk.bf16.mxu1 %vm1462_vm3, %v2348_v26  ;;  %v2244_v62 = vmax.f32 %v1866_v55, 0.0 }
 0x22f   :  { %v1868_v58 = vpop.f32.mrf.mxu0  ;;  %v6116_v0 = vpop.f32.mrf.mxu1  ;;  %5172 = vmatmul.mubr.msk.bf16.gmra.mxu1 %vm1462_vm3, %v2349_v51 }
 0x230   :  { %v1869_v59 = vadd.f32 %v6020_v2, %v1868_v58  ;;  %v2247_v33 = vmax.f32 %v1877_v13, 0.0  ;;  %v1933_v58 = vadd.f32 %v6020_v2, %v6082_v61 }
 0x231   :  { %v5049_v42 = vpop.f32.mrf.mxu0  ;;  %v6120_v46 = vpop.f32.mrf.mxu1 }
 0x232   :  { %v2245_v21 = vmax.f32 %v1869_v59, 0.0  ;;  %v2351_v28 = vpack.c.bf16 %v2247_v33, %v2246_v63  ;;  %v1890_v23 = vadd.f32 %v5049_v42, %v6020_v2  ;;  %v1930_v63 = vadd.f32 %v6020_v2, %v6078_v6 }
 0x233   :  { %v1881_v5 = vpop.f32.mrf.mxu0  ;;  %v6122_v4 = vpop.f32.mrf.mxu1 }
 0x234   :  { %v2350_v39 = vpack.c.bf16 %v2245_v21, %v2244_v62  ;;  %v1882_v7 = vadd.f32 %v6020_v2, %v1881_v5  ;;  %v2250_v37 = vmax.f32 %v1890_v23, 0.0 }
 0x235   :  { %v5050_v3 = vpop.f32.mrf.mxu0  ;;  %v6124_v40 = vpop.f32.mrf.mxu1 }
 0x236   :  { %v1893_v34 = vadd.f32 %v5050_v3, %v6020_v2  ;;  %5175 = vmatprep.mubr.msk.bf16.mxu1 %vm1462_vm3, %v2350_v39  ;;  %v2248_v27 = vmax.f32 %v1882_v7, 0.0 }
 0x237   :  { %v1884_v38 = vpop.f32.mrf.mxu0  ;;  %v6130_v32 = vpop.f32.mrf.mxu1  ;;  %5176 = vmatmul.mubr.msk.bf16.gmra.mxu1 %vm1462_vm3, %v2351_v28  ;;  %v2261_v28 = vmax.f32 %v1933_v58, 0.0 }
 0x238   :  { %v1885_v10 = vadd.f32 %v6020_v2, %v1884_v38  ;;  %v2251_v43 = vmax.f32 %v1893_v34, 0.0  ;;  %v2260_v38 = vmax.f32 %v1930_v63, 0.0 }
 0x239   :  { %v5053_v11 = vpop.f32.mrf.mxu0  ;;  %v6134_v18 = vpop.f32.mrf.mxu1 }
 0x23a   :  { %v2249_v24 = vmax.f32 %v1885_v10, 0.0  ;;  %v2353_v53 = vpack.c.bf16 %v2251_v43, %v2250_v37  ;;  %v1906_v49 = vadd.f32 %v5053_v11, %v6020_v2  ;;  %v1941_v43 = vadd.f32 %v6080_v12, %v6020_v2 }
 0x23b   :  { %v1897_v20 = vpop.f32.mrf.mxu0  ;;  %v6136_v60 = vpop.f32.mrf.mxu1  ;;  %v2358_v6 = vpack.c.bf16 %v2261_v28, %v2260_v38  ;;  %v1938_v37 = vadd.f32 %v6074_v1, %v6020_v2  ;;  %v1957_v1 = vadd.f32 %v6094_v30, %v6020_v2 }
 0x23c   :  { %v2352_v31 = vpack.c.bf16 %v2249_v24, %v2248_v27  ;;  %v1898_v16 = vadd.f32 %v6020_v2, %v1897_v20  ;;  %v2254_v17 = vmax.f32 %v1906_v49, 0.0  ;;  %v1949_v24 = vadd.f32 %v6020_v2, %v6096_v19 }
 0x23d   :  { %v5054_v9 = vpop.f32.mrf.mxu0  ;;  %v6138_v36 = vpop.f32.mrf.mxu1  ;;  %v2263_v12 = vmax.f32 %v1941_v43, 0.0 }
 0x23e   :  { %v1909_v57 = vadd.f32 %v5054_v9, %v6020_v2  ;;  %5179 = vmatprep.mubr.msk.bf16.mxu1 %vm1462_vm3, %v2352_v31  ;;  %v2252_v45 = vmax.f32 %v1898_v16, 0.0  ;;  %v1946_v31 = vadd.f32 %v6020_v2, %v6092_v25  ;;  %v2265_v9 = vmax.f32 %v1949_v24, 0.0 }
 0x23f   :  { %v1900_v41 = vpop.f32.mrf.mxu0  ;;  %v6144_v35 = vpop.f32.mrf.mxu1  ;;  %5180 = vmatmul.mubr.msk.bf16.gmra.mxu1 %vm1462_vm3, %v2353_v53  ;;  %v2262_v16 = vmax.f32 %v1938_v37, 0.0  ;;  %v1965_v25 = vadd.f32 %v6020_v2, %v6110_v8 }
 0x240   :  { %v1901_v52 = vadd.f32 %v6020_v2, %v1900_v41  ;;  %v2255_v44 = vmax.f32 %v1909_v57, 0.0  ;;  %v2264_v57 = vmax.f32 %v1946_v31, 0.0 }
 0x241   :  { %v5057_v50 = vpop.f32.mrf.mxu0  ;;  %v6148_v14 = vpop.f32.mrf.mxu1  ;;  %v2359_v49 = vpack.c.bf16 %v2263_v12, %v2262_v16 }
 0x242   :  { %v2253_v48 = vmax.f32 %v1901_v52, 0.0  ;;  %v2355_v55 = vpack.c.bf16 %v2255_v44, %v2254_v17  ;;  %v1922_v42 = vadd.f32 %v5057_v50, %v6020_v2  ;;  %v2360_v52 = vpack.c.bf16 %v2265_v9, %v2264_v57 }
 0x243   :  { %v1913_v26 = vpop.f32.mrf.mxu0  ;;  %v6150_v51 = vpop.f32.mrf.mxu1  ;;  %v1954_v44 = vadd.f32 %v6088_v56, %v6020_v2  ;;  %v2269_v17 = vmax.f32 %v1965_v25, 0.0  ;;  %v1973_v56 = vadd.f32 %v6108_v15, %v6020_v2  ;;  %v2002_v9 = vadd.f32 %v6130_v32, %v6020_v2 }
 0x244   :  { %v2354_v22 = vpack.c.bf16 %v2253_v48, %v2252_v45  ;;  %v1914_v59 = vadd.f32 %v6020_v2, %v1913_v26  ;;  %v2258_v34 = vmax.f32 %v1922_v42, 0.0  ;;  %v1962_v45 = vadd.f32 %v6020_v2, %v6106_v29 }
 0x245   :  { %v5058_v13 = vpop.f32.mrf.mxu0  ;;  %v6152_v47 = vpop.f32.mrf.mxu1  ;;  %v2267_v48 = vmax.f32 %v1957_v1, 0.0  ;;  %v2266_v26 = vmax.f32 %v1954_v44, 0.0  ;;  %v1981_v29 = vadd.f32 %v6020_v2, %v6124_v40  ;;  %v1978_v42 = vadd.f32 %v6020_v2, %v6120_v46 }
 0x246   :  { %v1925_v33 = vadd.f32 %v5058_v13, %v6020_v2  ;;  %5183 = vmatprep.mubr.msk.bf16.mxu1 %vm1462_vm3, %v2354_v22  ;;  %v2256_v3 = vmax.f32 %v1914_v59, 0.0  ;;  %v2268_v8 = vmax.f32 %v1962_v45, 0.0  ;;  %v1970_v59 = vadd.f32 %v6102_v54, %v6020_v2 }
 0x247   :  { %v1916_v62 = vpop.f32.mrf.mxu0  ;;  %v6160_v21 = vpop.f32.mrf.mxu1  ;;  %5184 = vmatmul.mubr.msk.bf16.gmra.mxu1 %vm1462_vm3, %v2355_v55  ;;  %v2361_v55 = vpack.c.bf16 %v2267_v48, %v2266_v26  ;;  %v2273_v63 = vmax.f32 %v1981_v29, 0.0  ;;  %v2272_v40 = vmax.f32 %v1978_v42, 0.0  ;;  %v1989_v54 = vadd.f32 %v6122_v4, %v6020_v2 }
 0x248   :  { %v1917_v5 = vadd.f32 %v6020_v2, %v1916_v62  ;;  %v2259_v39 = vmax.f32 %v1925_v33, 0.0  ;;  %v2362_v58 = vpack.c.bf16 %v2269_v17, %v2268_v8  ;;  %v2271_v62 = vmax.f32 %v1973_v56, 0.0 }
 0x249   :  { %v6166_v61 = vpop.f32.mrf.mxu1  ;;  %v1997_v46 = vadd.f32 %v6020_v2, %v6138_v36  ;;  %v2275_v43 = vmax.f32 %v1989_v54, 0.0  ;;  %v2010_v57 = vadd.f32 %v6020_v2, %v6148_v14  ;;  %v2021_v32 = vadd.f32 %v6150_v51, %v6020_v2 }
 0x24a   :  { %v2257_v7 = vmax.f32 %v1917_v5, 0.0  ;;  %v2357_v11 = vpack.c.bf16 %v2259_v39, %v2258_v34  ;;  %v2270_v5 = vmax.f32 %v1970_v59, 0.0  ;;  %v1986_v34 = vadd.f32 %v6116_v0, %v6020_v2 }
 0x24b   :  { %v6168_v23 = vpop.f32.mrf.mxu1  ;;  %v2005_v0 = vadd.f32 %v6136_v60, %v6020_v2  ;;  %v2018_v17 = vadd.f32 %v6144_v35, %v6020_v2  ;;  %v2026_v8 = vadd.f32 %v6020_v2, %v6166_v61 }
 0x24c   :  { %v2356_v10 = vpack.c.bf16 %v2257_v7, %v2256_v3  ;;  %v2363_v28 = vpack.c.bf16 %v2271_v62, %v2270_v5  ;;  %v2364_v7 = vpack.c.bf16 %v2273_v63, %v2272_v40  ;;  %v2037_v35 = vadd.f32 %v6168_v23, %v6020_v2 }
 0x24d   :  { %v6172_v27 = vpop.f32.mrf.mxu1  ;;  %v2034_v63 = vadd.f32 %v6160_v21, %v6020_v2 }
 0x24e   :  { %5187 = vmatprep.mubr.msk.bf16.mxu1 %vm1462_vm3, %v2356_v10  ;;  %v1994_v10 = vadd.f32 %v6020_v2, %v6134_v18  ;;  %v2013_v18 = vadd.f32 %v6020_v2, %v6152_v47  ;;  %v2280_v47 = vmax.f32 %v2010_v57, 0.0  ;;  %v2029_v14 = vadd.f32 %v6020_v2, %v6172_v27 }
 0x24f   :  { %v6179_v20 = vpop.f32.mrf.mxu1  ;;  %5188 = vmatmul.mubr.msk.bf16.gmra.mxu1 %vm1462_vm3, %v2357_v11  ;;  %v2277_v11 = vmax.f32 %v1997_v46, 0.0  ;;  %v2284_v27 = vmax.f32 %v2026_v8, 0.0 }
 0x250   :  { %5191 = vmatprep.mubr.msk.bf16.mxu1 %vm1462_vm3, %v2358_v6  ;;  %v2274_v6 = vmax.f32 %v1986_v34, 0.0  ;;  %v2276_v36 = vmax.f32 %v1994_v10, 0.0  ;;  %v2281_v1 = vmax.f32 %v2013_v18, 0.0  ;;  %v2285_v56 = vmax.f32 %v2029_v14, 0.0 }
 0x251   :  { %v6185_v53 = vpop.f32.mrf.mxu1 }
 0x252   :  { %v2365_v37 = vpack.c.bf16 %v2275_v43, %v2274_v6  ;;  %v2366_v12 = vpack.c.bf16 %v2277_v11, %v2276_v36  ;;  %v2368_v48 = vpack.c.bf16 %v2281_v1, %v2280_v47  ;;  %v2370_v62 = vpack.c.bf16 %v2285_v56, %v2284_v27 }
 0x253   :  { %v6187_v19 = vpop.f32.mrf.mxu1  ;;  %v2042_v40 = vadd.f32 %v6020_v2, %v6185_v53  ;;  %v2050_v53 = vadd.f32 %v6179_v20, %v6020_v2 }
 0x254   :  { %v2053_v21 = vadd.f32 %v6187_v19, %v6020_v2 }
 0x255   :  { %v6191_v41 = vpop.f32.mrf.mxu1  ;;  %v2288_v34 = vmax.f32 %v2042_v40, 0.0 }
 0x256   :  { %v2045_v61 = vadd.f32 %v6020_v2, %v6191_v41 }
 0x257   :  { %v6197_v50 = vpop.f32.mrf.mxu1  ;;  %5192 = vmatmul.mubr.msk.bf16.gmra.mxu1 %vm1462_vm3, %v2359_v49  ;;  %v2279_v49 = vmax.f32 %v2005_v0, 0.0 }
 0x258   :  { %5195 = vmatprep.mubr.msk.bf16.mxu1 %vm1462_vm3, %v2360_v52  ;;  %v2278_v52 = vmax.f32 %v2002_v9, 0.0  ;;  %v2289_v54 = vmax.f32 %v2045_v61, 0.0  ;;  %v2066_v1 = vadd.f32 %v6197_v50, %v6020_v2 }
 0x259   :  { %v6203_v30 = vpop.f32.mrf.mxu1 }
 0x25a   :  { %v2367_v44 = vpack.c.bf16 %v2279_v49, %v2278_v52  ;;  %v2372_v43 = vpack.c.bf16 %v2289_v54, %v2288_v34  ;;  %v2058_v36 = vadd.f32 %v6020_v2, %v6203_v30 }
 0x25b   :  { %v6205_v22 = vpop.f32.mrf.mxu1 }
 0x25c   :  { %v2069_v20 = vadd.f32 %v6205_v22, %v6020_v2 }
 0x25d   :  { %v6209_v13 = vpop.f32.mrf.mxu1 }
 0x25e   :  { %v2061_v11 = vadd.f32 %v6020_v2, %v6209_v13  ;;  %v2292_v13 = vmax.f32 %v2058_v36, 0.0 }
 0x25f   :  { %v6215_v33 = vpop.f32.mrf.mxu1  ;;  %5196 = vmatmul.mubr.msk.bf16.gmra.mxu1 %vm1462_vm3, %v2361_v55  ;;  %v2283_v55 = vmax.f32 %v2021_v32, 0.0 }
 0x260   :  { %5199 = vmatprep.mubr.msk.bf16.mxu1 %vm1462_vm3, %v2362_v58  ;;  %v2282_v58 = vmax.f32 %v2018_v17, 0.0  ;;  %v2293_v19 = vmax.f32 %v2061_v11, 0.0  ;;  %v2082_v8 = vadd.f32 %v6215_v33, %v6020_v2 }
 0x261   :  { %v6221_v15 = vpop.f32.mrf.mxu1 }
 0x262   :  { %v2369_v59 = vpack.c.bf16 %v2283_v55, %v2282_v58  ;;  %v2374_v49 = vpack.c.bf16 %v2293_v19, %v2292_v13  ;;  %v2074_v47 = vadd.f32 %v6020_v2, %v6221_v15 }
 0x263   :  { %v6223_v39 = vpop.f32.mrf.mxu1 }
 0x264   :  { %v2296_v50 = vmax.f32 %v2074_v47, 0.0 }
 0x265   :  { %v6227_v3 = vpop.f32.mrf.mxu1 }
 0x266   :  { %v2077_v30 = vadd.f32 %v6020_v2, %v6227_v3  ;;  %v2085_v3 = vadd.f32 %v6223_v39, %v6020_v2 }
 0x267   :  { %v6233_v38 = vpop.f32.mrf.mxu1  ;;  %5200 = vmatmul.mubr.msk.bf16.gmra.mxu1 %vm1462_vm3, %v2363_v28  ;;  %v2287_v28 = vmax.f32 %v2037_v35, 0.0 }
 0x268   :  { %5203 = vmatprep.mubr.msk.bf16.mxu1 %vm1462_vm3, %v2364_v7  ;;  %v2286_v7 = vmax.f32 %v2034_v63, 0.0  ;;  %v2297_v32 = vmax.f32 %v2077_v30, 0.0  ;;  %v2299_v58 = vmax.f32 %v2085_v3, 0.0  ;;  %v2098_v63 = vadd.f32 %v6233_v38, %v6020_v2 }
 0x269   :  { %v6239_v4 = vpop.f32.mrf.mxu1 }
 0x26a   :  { %v2371_v41 = vpack.c.bf16 %v2287_v28, %v2286_v7  ;;  %v2376_v15 = vpack.c.bf16 %v2297_v32, %v2296_v50  ;;  %v2090_v39 = vadd.f32 %v6020_v2, %v6239_v4 }
 0x26b   :  { %v6241_v24 = vpop.f32.mrf.mxu1 }
 0x26c   :  { %v2101_v33 = vadd.f32 %v6241_v24, %v6020_v2  ;;  %v2300_v28 = vmax.f32 %v2090_v39, 0.0 }
 0x26d   :  { %v6245_v31 = vpop.f32.mrf.mxu1 }
 0x26e   :  { %v2093_v56 = vadd.f32 %v6020_v2, %v6245_v31 }
 0x26f   :  { %v6251_v16 = vpop.f32.mrf.mxu1  ;;  %5204 = vmatmul.mubr.msk.bf16.gmra.mxu1 %vm1462_vm3, %v2365_v37  ;;  %v2291_v37 = vmax.f32 %v2053_v21, 0.0 }
 0x270   :  { %5207 = vmatprep.mubr.msk.bf16.mxu1 %vm1462_vm3, %v2366_v12  ;;  %v2290_v12 = vmax.f32 %v2050_v53, 0.0  ;;  %v2114_v54 = vadd.f32 %v6251_v16, %v6020_v2  ;;  %v6370_v16 = vld [vmem:[%s6816_s6] ss:$0 sm:$0xff] }
 0x271   :  { %v6257_v60 = vpop.f32.mrf.mxu1 }
 0x272   :  { %v2373_v9 = vpack.c.bf16 %v2291_v37, %v2290_v12  ;;  %v2106_v34 = vadd.f32 %v6020_v2, %v6257_v60  ;;  %v2302_v60 = vmax.f32 %v2098_v63, 0.0  ;;  %v2306_v36 = vmax.f32 %v2114_v54, 0.0 }
 0x273   :  { %v6259_v25 = vpop.f32.mrf.mxu1 }
 0x274   :  { %v2117_v31 = vadd.f32 %v6259_v25, %v6020_v2  ;;  %v2303_v25 = vmax.f32 %v2101_v33, 0.0 }
 0x275   :  { %v6263_v45 = vpop.f32.mrf.mxu1 }
 0x276   :  { %v2109_v40 = vadd.f32 %v6020_v2, %v6263_v45 }
 0x277   :  { %v6269_v26 = vpop.f32.mrf.mxu1  ;;  %5208 = vmatmul.mubr.msk.bf16.gmra.mxu1 %vm1462_vm3, %v2367_v44  ;;  %v2295_v44 = vmax.f32 %v2069_v20, 0.0 }
 0x278   :  { %5211 = vmatprep.mubr.msk.bf16.mxu1 %vm1462_vm3, %v2368_v48  ;;  %v2294_v48 = vmax.f32 %v2066_v1, 0.0  ;;  %v2305_v11 = vmax.f32 %v2109_v40, 0.0 }
 0x279   :  { %v6275_v51 = vpop.f32.mrf.mxu1 }
 0x27a   :  { %v2375_v17 = vpack.c.bf16 %v2295_v44, %v2294_v48 }
 0x27b   :  { %v6277_v29 = vpop.f32.mrf.mxu1 }
 0x27c   :  { %v2133_v24 = vadd.f32 %v6277_v29, %v6020_v2  ;;  %v2307_v29 = vmax.f32 %v2117_v31, 0.0 }
 0x27d   :  { %v6281_v42 = vpop.f32.mrf.mxu1 }
 0x27e   :  { %v2125_v7 = vadd.f32 %v6020_v2, %v6281_v42  ;;  %v2130_v42 = vadd.f32 %v6269_v26, %v6020_v2  ;;  %v2311_v37 = vmax.f32 %v2133_v24, 0.0  ;;  %v2379_v26 = vpack.c.bf16 %v2303_v25, %v2302_v60 }
 0x27f   :  { %v6287_v5 = vpop.f32.mrf.mxu1  ;;  %5212 = vmatmul.mubr.msk.bf16.gmra.mxu1 %vm1462_vm3, %v2369_v59  ;;  %v2298_v59 = vmax.f32 %v2082_v8, 0.0 }
 0x280   :  { %5215 = vmatprep.mubr.msk.bf16.mxu1 %vm1462_vm3, %v2370_v62  ;;  %v2301_v62 = vmax.f32 %v2093_v56, 0.0  ;;  %v2309_v19 = vmax.f32 %v2125_v7, 0.0 }
 0x281   :  { %v6293_v23 = vpop.f32.mrf.mxu1  ;;  %v2377_v61 = vpack.c.bf16 %v2299_v58, %v2298_v59 }
 0x282   :  { %v2378_v21 = vpack.c.bf16 %v2301_v62, %v2300_v28 }
 0x283   :  { %v5114_v46 = vpop.f32.mrf.mxu1 }
 0x284   :  { %v2149_v38 = vadd.f32 %v5114_v46, %v6020_v2  ;;  %v2146_v46 = vadd.f32 %v6287_v5, %v6020_v2  ;;  %v2310_v5 = vmax.f32 %v2130_v42, 0.0 }
 0x285   :  { %v2140_v10 = vpop.f32.mrf.mxu1 }
 0x286   :  { %v2141_v45 = vadd.f32 %v6020_v2, %v2140_v10  ;;  %v2138_v10 = vadd.f32 %v6020_v2, %v6293_v23  ;;  %v2315_v13 = vmax.f32 %v2149_v38, 0.0  ;;  %v2314_v47 = vmax.f32 %v2146_v46, 0.0 }
 0x287   :  { %v6301_v6 = vpop.f32.mrf.mxu1  ;;  %5216 = vmatmul.mubr.msk.bf16.gmra.mxu1 %vm1462_vm3, %v2371_v41  ;;  %v6388_v3 = vpack.c.bf16 %v2311_v37, %v2310_v5  ;;  %v5335_v5 = vld [vmem:[%s6815_s4] ss:$0 sm:$0xff] }
 0x288   :  { %5219 = vmatprep.mubr.msk.bf16.mxu1 %vm1462_vm3, %v2372_v43  ;;  %v2122_v43 = vadd.f32 %v6020_v2, %v6275_v51  ;;  %v2304_v51 = vmax.f32 %v2106_v34, 0.0  ;;  %v2312_v44 = vmax.f32 %v2138_v10, 0.0  ;;  %v2162_v58 = vadd.f32 %v6301_v6, %v6020_v2 }
 0x289   :  { %v6307_v0 = vpop.f32.mrf.mxu1 }
 0x28a   :  { %v2308_v30 = vmax.f32 %v2122_v43, 0.0  ;;  %v2380_v1 = vpack.c.bf16 %v2305_v11, %v2304_v51 }
 0x28b   :  { %v6309_v18 = vpop.f32.mrf.mxu1 }
 0x28c   :  { %v2165_v32 = vadd.f32 %v6309_v18, %v6020_v2  ;;  %v2382_v50 = vpack.c.bf16 %v2309_v19, %v2308_v30 }
 0x28d   :  { %v6313_v57 = vpop.f32.mrf.mxu1 }
 0x28e   :  { %v2157_v39 = vadd.f32 %v6020_v2, %v6313_v57  ;;  %v2319_v63 = vmax.f32 %v2165_v32, 0.0 }
 0x28f   :  { %v6319_v52 = vpop.f32.mrf.mxu1  ;;  %5220 = vmatmul.mubr.msk.bf16.gmra.mxu1 %vm1462_vm3, %v2373_v9  ;;  %v2313_v9 = vmax.f32 %v2141_v45, 0.0 }
 0x290   :  { %5223 = vmatprep.mubr.msk.bf16.mxu1 %vm1462_vm3, %v2374_v49  ;;  %v6383_v49 = vpack.c.bf16 %v2307_v29, %v2306_v36  ;;  %v2178_v40 = vadd.f32 %v6319_v52, %v6020_v2  ;;  %v2317_v7 = vmax.f32 %v2157_v39, 0.0 }
 0x291   :  { %v6325_v22 = vpop.f32.mrf.mxu1  ;;  %v6393_v56 = vpack.c.bf16 %v2313_v9, %v2312_v44 }
 0x292   :  { %v2170_v52 = vadd.f32 %v6020_v2, %v6325_v22  ;;  %v2322_v10 = vmax.f32 %v2178_v40, 0.0 }
 0x293   :  { %v6329_v14 = vpop.f32.mrf.mxu1 }
 0x294   :  { %v2181_v18 = vadd.f32 %v6329_v14, %v6020_v2  ;;  %v2320_v36 = vmax.f32 %v2170_v52, 0.0 }
 0x295   :  { %v6333_v55 = vpop.f32.mrf.mxu1 }
 0x296   :  { %v2173_v6 = vadd.f32 %v6020_v2, %v6333_v55  ;;  %v2323_v55 = vmax.f32 %v2181_v18, 0.0 }
 0x297   :  { %v6337_v27 = vpop.f32.mrf.mxu1  ;;  %5224 = vmatmul.mubr.msk.bf16.gmra.mxu1 %vm1462_vm3, %v2375_v17 }
 0x298   :  { %5227 = vmatprep.mubr.msk.bf16.mxu1 %vm1462_vm3, %v2376_v15  ;;  %v6391_v15 = vpack.c.bf16 %v2315_v13, %v2314_v47  ;;  %v2321_v42 = vmax.f32 %v2173_v6, 0.0  ;;  %v6432_v30 = vadd.f32 %v5335_v5, %v6337_v27 }
 0x299   :  { %v6345_v35 = vpop.f32.mrf.mxu1 }
 0x29b   :  { %v6353_v4 = vpop.f32.mrf.mxu1 }
 0x29c   :  { %v2197_v18 = vadd.f32 %v5335_v5, %v6353_v4 }
 0x29d   :  { %v6365_v41 = vpop.f32.mrf.mxu1 }
 0x29e   :  { %v2327_v52 = vmax.f32 %v2197_v18, 0.0 }
 0x29f   :  { %v5133_v53 = vpop.f32.mrf.mxu1  ;;  %5228 = vmatmul.mubr.msk.bf16.gmra.mxu1 %vm1462_vm3, %v2377_v61  ;;  %v2154_v61 = vadd.f32 %v6020_v2, %v6307_v0  ;;  %v2318_v0 = vmax.f32 %v2162_v58, 0.0 }
 0x2a0   :  { %v2650_v12 = vadd.f32 %v5133_v53, %v6370_v16  ;;  %5231 = vmatprep.mubr.msk.bf16.mxu1 %vm1462_vm3, %v2378_v21 }
 0x2a1   :  { %v2641_v20 = vpop.f32.mrf.mxu1  ;;  %v2316_v29 = vmax.f32 %v2154_v61, 0.0  ;;  %v6418_v46 = vpack.c.bf16 %v2319_v63, %v2318_v0 }
 0x2a2   :  { %v2642_v23 = vadd.f32 %v6370_v16, %v2641_v20  ;;  %v3154_v17 = vmax.f32 %v2650_v12, 0.0  ;;  %v6426_v20 = vpack.c.bf16 %v2321_v42, %v2320_v36 }
 0x2a3   :  { %v5134_v48 = vpop.f32.mrf.mxu1  ;;  %v6421_v22 = vpack.c.bf16 %v2317_v7, %v2316_v29 }
 0x2a4   :  { %v2653_v8 = vadd.f32 %v5134_v48, %v6370_v16  ;;  %v3152_v33 = vmax.f32 %v2642_v23, 0.0  ;;  %v3289_v57 = vsel %vm1462_vm3, %v3154_v17, -inf }
 0x2a5   :  { %v2644_v59 = vpop.f32.mrf.mxu1 }
 0x2a6   :  { %v3155_v62 = vmax.f32 %v2653_v8, 0.0  ;;  %v2645_v31 = vadd.f32 %v6370_v16, %v2644_v59  ;;  %v3280_v38 = vsel %vm1462_vm3, %v3152_v33, -inf  ;;  %v6441_v8 = vadd.f32 %v5335_v5, %v6345_v35 }
 0x2a7   :  { %v5137_v28 = vpop.f32.mrf.mxu1  ;;  %5232 = vmatmul.mubr.msk.bf16.gmra.mxu1 %vm1462_vm3, %v2379_v26  ;;  %v6423_v26 = vpack.c.bf16 %v2323_v55, %v2322_v10  ;;  %v2326_v35 = vmax.f32 %v6432_v30, 0.0  ;;  %v2189_v55 = vadd.f32 %v5335_v5, %v6365_v41 }
 0x2a8   :  { %v3290_v14 = vsel %vm1462_vm3, %v3155_v62, -inf  ;;  %v3153_v54 = vmax.f32 %v2645_v31, 0.0  ;;  %v2666_v24 = vadd.f32 %v5137_v28, %v6370_v16  ;;  %5235 = vmatprep.mubr.msk.bf16.mxu1 %vm1462_vm3, %v2380_v1  ;;  %v2324_v7 = vmax.f32 %v6441_v8, 0.0 }
 0x2a9   :  { %v3291_v25 = vmax.f32 %v3289_v57, %v3290_v14  ;;  %v2657_v34 = vpop.f32.mrf.mxu1 }
 0x2aa   :  { %v3281_v45 = vsel %vm1462_vm3, %v3153_v54, -inf  ;;  %v2658_v21 = vadd.f32 %v6370_v16, %v2657_v34  ;;  %v3158_v53 = vmax.f32 %v2666_v24, 0.0 }
 0x2ab   :  { %v3292_v43 = vrot.slane %v3291_v25, 4  ;;  %v3282_v60 = vmax.f32 %v3280_v38, %v3281_v45  ;;  %v5138_v11 = vpop.f32.mrf.mxu1 }
 0x2ac   :  { %v2669_v2 = vadd.f32 %v5138_v11, %v6370_v16  ;;  %v3156_v51 = vmax.f32 %v2658_v21, 0.0  ;;  %v3307_v44 = vsel %vm1462_vm3, %v3158_v53, -inf }
 0x2ad   :  { %v3293_v37 = vmax.f32 %v3291_v25, %v3292_v43  ;;  %v3283_v19 = vrot.slane %v3282_v60, 4  ;;  %v2660_v12 = vpop.f32.mrf.mxu1 }
 0x2ae   :  { %v3159_v13 = vmax.f32 %v2669_v2, 0.0  ;;  %v2661_v9 = vadd.f32 %v6370_v16, %v2660_v12 }
 0x2af   :  { %v3294_v23 = vrot.slane %v3293_v37, 2  ;;  %v3284_v1 = vmax.f32 %v3282_v60, %v3283_v19  ;;  %v5141_v47 = vpop.f32.mrf.mxu1  ;;  %5236 = vmatmul.mubr.msk.bf16.gmra.mxu1 %vm1462_vm3, %v6383_v49  ;;  %v3298_v49 = vsel %vm1462_vm3, %v3156_v51, -inf }
 0x2b0   :  { %v3308_v32 = vsel %vm1462_vm3, %v3159_v13, -inf  ;;  %v3157_v48 = vmax.f32 %v2661_v9, 0.0  ;;  %v2682_v17 = vadd.f32 %v5141_v47, %v6370_v16  ;;  %5239 = vmatprep.mubr.msk.bf16.mxu1 %vm1462_vm3, %v2382_v50 }
 0x2b1   :  { %v3295_v27 = vmax.f32 %v3293_v37, %v3294_v23  ;;  %v3285_v58 = vrot.slane %v3284_v1, 2  ;;  %v3309_v39 = vmax.f32 %v3307_v44, %v3308_v32  ;;  %v2673_v59 = vpop.f32.mrf.mxu1  ;;  %v6462_v23 = vpack.c.bf16 %v2327_v52, %v2326_v35 }
 0x2b2   :  { %v3299_v33 = vsel %vm1462_vm3, %v3157_v48, -inf  ;;  %v2674_v62 = vadd.f32 %v6370_v16, %v2673_v59  ;;  %v3162_v6 = vmax.f32 %v2682_v17, 0.0 }
 0x2b3   :  { %v3296_v31 = vrot.slane %v3295_v27, 1  ;;  %v3286_v61 = vmax.f32 %v3284_v1, %v3285_v58  ;;  %v3310_v63 = vrot.slane %v3309_v39, 4  ;;  %v3300_v40 = vmax.f32 %v3298_v49, %v3299_v33  ;;  %v5142_v50 = vpop.f32.mrf.mxu1 }
 0x2b4   :  { %v3160_v28 = vmax.f32 %v2674_v62, 0.0  ;;  %v2685_v57 = vadd.f32 %v5142_v50, %v6370_v16  ;;  %v3325_v42 = vsel %vm1462_vm3, %v3162_v6, -inf }
 0x2b5   :  { %v3297_v14 = vmax.f32 %v3295_v27, %v3296_v31  ;;  %v3287_v54 = vrot.slane %v3286_v61, 1  ;;  %v3311_v4 = vmax.f32 %v3309_v39, %v3310_v63  ;;  %v3301_v24 = vrot.slane %v3300_v40, 4  ;;  %v2676_v0 = vpop.f32.mrf.mxu1 }
 0x2b6   :  { %v3163_v25 = vmax.f32 %v2685_v57, 0.0  ;;  %v2677_v34 = vadd.f32 %v6370_v16, %v2676_v0  ;;  %v3316_v2 = vsel %vm1462_vm3, %v3160_v28, -inf }
 0x2b7   :  { %v3288_v38 = vmax.f32 %v3286_v61, %v3287_v54  ;;  %v3312_v45 = vrot.slane %v3311_v4, 2  ;;  %v3302_v21 = vmax.f32 %v3300_v40, %v3301_v24  ;;  %v5145_v29 = vpop.f32.mrf.mxu1  ;;  %5240 = vmatmul.mubr.msk.bf16.gmra.mxu1 %vm1462_vm3, %v6388_v3  ;;  %v4599_v10 = vpack.c.bf16 %v3297_v14, %v3297_v14 }
 0x2b8   :  { %v3326_v43 = vsel %vm1462_vm3, %v3163_v25, -inf  ;;  %v3161_v60 = vmax.f32 %v2677_v34, 0.0  ;;  %v2698_v11 = vadd.f32 %v5145_v29, %v6370_v16  ;;  %5243 = vmatprep.mubr.msk.bf16.mxu1 %vm1462_vm3, %v6393_v56  ;;  %v2325_v56 = vmax.f32 %v2189_v55, 0.0 }
 0x2b9   :  { %v3313_v41 = vmax.f32 %v3311_v4, %v3312_v45  ;;  %v3303_v53 = vrot.slane %v3302_v21, 2  ;;  %v2689_v36 = vpop.f32.mrf.mxu1  ;;  %v4598_v37 = vpack.c.bf16 %v3288_v38, %v3288_v38  ;;  %v3327_v19 = vmax.f32 %v3325_v42, %v3326_v43 }
 0x2ba   :  { %v3317_v3 = vsel %vm1462_vm3, %v3161_v60, -inf  ;;  %v2690_v12 = vadd.f32 %v6370_v16, %v2689_v36  ;;  %v3166_v5 = vmax.f32 %v2698_v11, 0.0  ;;  %v4113_v44 = vunpack.c.l.b16 %v4599_v10 }
 0x2bb   :  { %v3314_v51 = vrot.slane %v3313_v41, 1  ;;  %v3304_v13 = vmax.f32 %v3302_v21, %v3303_v53  ;;  %v3318_v9 = vmax.f32 %v3316_v2, %v3317_v3  ;;  %v5146_v30 = vpop.f32.mrf.mxu1  ;;  %v3328_v1 = vrot.slane %v3327_v19, 4 }
 0x2bc   :  { %v2701_v47 = vadd.f32 %v5146_v30, %v6370_v16  ;;  %v3164_v17 = vmax.f32 %v2690_v12, 0.0  ;;  %v4112_v58 = vunpack.c.l.b16 %v4598_v37  ;;  %v3343_v31 = vsel %vm1462_vm3, %v3166_v5, -inf }
 0x2bd   :  { %v3305_v32 = vrot.slane %v3304_v13, 1  ;;  %v3319_v48 = vrot.slane %v3318_v9, 4  ;;  %v2692_v27 = vpop.f32.mrf.mxu1  ;;  %v3329_v39 = vmax.f32 %v3327_v19, %v3328_v1  ;;  %v3315_v49 = vmax.f32 %v3313_v41, %v3314_v51 }
 0x2be   :  { %v3167_v59 = vmax.f32 %v2701_v47, 0.0  ;;  %v2693_v18 = vadd.f32 %v6370_v16, %v2692_v27  ;;  %v3334_v57 = vsel %vm1462_vm3, %v3164_v17, -inf  ;;  %v6478_v52 = vpack.c.bf16 %v2325_v56, %v2324_v7 }
 0x2bf   :  { %v3306_v33 = vmax.f32 %v3304_v13, %v3305_v32  ;;  %v3320_v62 = vmax.f32 %v3318_v9, %v3319_v48  ;;  %v5149_v61 = vpop.f32.mrf.mxu1  ;;  %5244 = vmatmul.mubr.msk.bf16.gmra.mxu1 %vm1462_vm3, %v6391_v15  ;;  %v3330_v63 = vrot.slane %v3329_v39, 2  ;;  %v4177_v38 = vsel %vm4176_vm4, %v4113_v44, %v4112_v58 }
 0x2c0   :  { %v3344_v40 = vsel %vm1462_vm3, %v3167_v59, -inf  ;;  %v3165_v50 = vmax.f32 %v2693_v18, 0.0  ;;  %v2714_v35 = vadd.f32 %v5149_v61, %v6370_v16  ;;  %5247 = vmatprep.mubr.msk.bf16.mxu1 %vm1462_vm3, %v6421_v22  ;;  %v4601_v42 = vpack.c.bf16 %v3315_v49, %v3315_v49 }
 0x2c1   :  { %v4600_v6 = vpack.c.bf16 %v3306_v33, %v3306_v33  ;;  %v3321_v28 = vrot.slane %v3320_v62, 2  ;;  %v3345_v14 = vmax.f32 %v3343_v31, %v3344_v40  ;;  %v2705_v54 = vpop.f32.mrf.mxu1  ;;  %v3331_v4 = vmax.f32 %v3329_v39, %v3330_v63 }
 0x2c2   :  { %v3335_v24 = vsel %vm1462_vm3, %v3165_v50, -inf  ;;  %v3170_v15 = vmax.f32 %v2714_v35, 0.0  ;;  %v2706_v0 = vadd.f32 %v6370_v16, %v2705_v54  ;;  %v4115_v44 = vunpack.c.l.b16 %v4601_v42 }
 0x2c3   :  { %v3322_v25 = vmax.f32 %v3320_v62, %v3321_v28  ;;  %v3346_v22 = vrot.slane %v3345_v14, 4  ;;  %v3336_v34 = vmax.f32 %v3334_v57, %v3335_v24  ;;  %v5150_v55 = vpop.f32.mrf.mxu1  ;;  %v4114_v45 = vunpack.c.l.b16 %v4600_v6 }
 0x2c4   :  { %v3332_v21 = vrot.slane %v3331_v4, 1  ;;  %v2717_v29 = vadd.f32 %v5150_v55, %v6370_v16  ;;  %v3361_v8 = vsel %vm1462_vm3, %v3170_v15, -inf  ;;  %v3168_v7 = vmax.f32 %v2706_v0, 0.0 }
 0x2c5   :  { %v3323_v43 = vrot.slane %v3322_v25, 1  ;;  %v3347_v60 = vmax.f32 %v3345_v14, %v3346_v22  ;;  %v3337_v11 = vrot.slane %v3336_v34, 4  ;;  %v2708_v10 = vpop.f32.mrf.mxu1  ;;  %v4179_v12 = vsel %vm4178_vm5, %v4114_v45, %v4177_v38 }
 0x2c6   :  { %v3333_v41 = vmax.f32 %v3331_v4, %v3332_v21  ;;  %v3171_v53 = vmax.f32 %v2717_v29, 0.0  ;;  %v2709_v19 = vadd.f32 %v6370_v16, %v2708_v10  ;;  %v4181_v18 = vsel %vm4180_vm6, %v4115_v44, %v4179_v12 }
 0x2c7   :  { %v3324_v2 = vmax.f32 %v3322_v25, %v3323_v43  ;;  %v3348_v36 = vrot.slane %v3347_v60, 2  ;;  %v3338_v37 = vmax.f32 %v3336_v34, %v3337_v11  ;;  %v5153_v3 = vpop.f32.mrf.mxu1  ;;  %5248 = vmatmul.mubr.msk.bf16.gmra.mxu1 %vm1462_vm3, %v6418_v46 }
 0x2c8   :  { %v4603_v51 = vpack.c.bf16 %v3333_v41, %v3333_v41  ;;  %v3362_v13 = vsel %vm1462_vm3, %v3171_v53, -inf  ;;  %v2730_v9 = vadd.f32 %v5153_v3, %v6370_v16  ;;  %5251 = vmatprep.mubr.msk.bf16.mxu1 %vm1462_vm3, %v6426_v20  ;;  %v3169_v32 = vmax.f32 %v2709_v19, 0.0 }
 0x2c9   :  { %v4602_v5 = vpack.c.bf16 %v3324_v2, %v3324_v2  ;;  %v3349_v30 = vmax.f32 %v3347_v60, %v3348_v36  ;;  %v3339_v56 = vrot.slane %v3338_v37, 2  ;;  %v3363_v1 = vmax.f32 %v3361_v8, %v3362_v13  ;;  %v2721_v47 = vpop.f32.mrf.mxu1 }
 0x2ca   :  { %v3174_v48 = vmax.f32 %v2730_v9, 0.0  ;;  %v2722_v46 = vadd.f32 %v6370_v16, %v2721_v47  ;;  %v3352_v20 = vsel %vm1462_vm3, %v3168_v7, -inf  ;;  %v3353_v49 = vsel %vm1462_vm3, %v3169_v32, -inf }
 0x2cb   :  { %v4116_v17 = vunpack.c.l.b16 %v4602_v5  ;;  %v3350_v27 = vrot.slane %v3349_v30, 1  ;;  %v3340_v58 = vmax.f32 %v3338_v37, %v3339_v56  ;;  %v3364_v39 = vrot.slane %v3363_v1, 4  ;;  %v5154_v59 = vpop.f32.mrf.mxu1 }
 0x2cc   :  { %v2733_v33 = vadd.f32 %v5154_v59, %v6370_v16  ;;  %v4117_v62 = vunpack.c.l.b16 %v4603_v51  ;;  %v3354_v35 = vmax.f32 %v3352_v20, %v3353_v49  ;;  %v3379_v6 = vsel %vm1462_vm3, %v3174_v48, -inf }
 0x2cd   :  { %v3351_v31 = vmax.f32 %v3349_v30, %v3350_v27  ;;  %v3341_v61 = vrot.slane %v3340_v58, 1  ;;  %v3365_v63 = vmax.f32 %v3363_v1, %v3364_v39  ;;  %v2724_v40 = vpop.f32.mrf.mxu1  ;;  %v4183_v50 = vsel %vm4182_vm7, %v4116_v17, %v4181_v18 }
 0x2ce   :  { %v3175_v28 = vmax.f32 %v2733_v33, 0.0  ;;  %v3172_v54 = vmax.f32 %v2722_v46, 0.0  ;;  %v2725_v4 = vadd.f32 %v6370_v16, %v2724_v40  ;;  %v3355_v0 = vrot.slane %v3354_v35, 4 }
 0x2cf   :  { %v3342_v57 = vmax.f32 %v3340_v58, %v3341_v61  ;;  %v3366_v14 = vrot.slane %v3365_v63, 2  ;;  %v5157_v24 = vpop.f32.mrf.mxu1  ;;  %5252 = vmatmul.mubr.msk.bf16.gmra.mxu1 %vm1462_vm3, %v6423_v26  ;;  %v4605_v15 = vpack.c.bf16 %v3351_v31, %v3351_v31  ;;  %v4185_v55 = vsel %vm4184_vm8, %v4117_v62, %v4183_v50 }
 0x2d0   :  { %v3380_v25 = vsel %vm1462_vm3, %v3175_v28, -inf  ;;  %v2746_v22 = vadd.f32 %v5157_v24, %v6370_v16  ;;  %5255 = vmatprep.mubr.msk.bf16.mxu1 %vm1462_vm3, %v6478_v52  ;;  %v3356_v29 = vmax.f32 %v3354_v35, %v3355_v0  ;;  %v3173_v42 = vmax.f32 %v2725_v4, 0.0 }
 0x2d1   :  { %v4604_v34 = vpack.c.bf16 %v3342_v57, %v3342_v57  ;;  %v3367_v38 = vmax.f32 %v3365_v63, %v3366_v14  ;;  %v3381_v45 = vmax.f32 %v3379_v6, %v3380_v25  ;;  %v2737_v21 = vpop.f32.mrf.mxu1  ;;  %v3370_v10 = vsel %vm1462_vm3, %v3172_v54, -inf }
 0x2d2   :  { %v3178_v43 = vmax.f32 %v2746_v22, 0.0  ;;  %v2738_v26 = vadd.f32 %v6370_v16, %v2737_v21  ;;  %v4119_v7 = vunpack.c.l.b16 %v4605_v15  ;;  %v3357_v53 = vrot.slane %v3356_v29, 2 }
 0x2d3   :  { %v4118_v60 = vunpack.c.l.b16 %v4604_v34  ;;  %v3368_v11 = vrot.slane %v3367_v38, 1  ;;  %v3382_v41 = vrot.slane %v3381_v45, 4  ;;  %v5158_v8 = vpop.f32.mrf.mxu1  ;;  %v3371_v52 = vsel %vm1462_vm3, %v3173_v42, -inf }
 0x2d4   :  { %v3176_v2 = vmax.f32 %v2738_v26, 0.0  ;;  %v3372_v3 = vmax.f32 %v3370_v10, %v3371_v52  ;;  %v3358_v13 = vmax.f32 %v3356_v29, %v3357_v53  ;;  %v3397_v9 = vsel %vm1462_vm3, %v3178_v43, -inf }
 0x2d5   :  { %v4187_v36 = vsel %vm4186_vm9, %v4118_v60, %v4185_v55  ;;  %v3369_v37 = vmax.f32 %v3367_v38, %v3368_v11  ;;  %v3383_v19 = vmax.f32 %v3381_v45, %v3382_v41  ;;  %v2740_v12 = vpop.f32.mrf.mxu1  ;;  %v2749_v5 = vadd.f32 %v5158_v8, %v6370_v16 }
 0x2d6   :  { %v4189_v51 = vsel %vm4188_vm10, %v4119_v7, %v4187_v36  ;;  %v3373_v47 = vrot.slane %v3372_v3, 4  ;;  %v3359_v32 = vrot.slane %v3358_v13, 1  ;;  %v2741_v46 = vadd.f32 %v6370_v16, %v2740_v12 }
 0x2d7   :  { %v4239_v30 = vpack.c.b16 %v4189_v51, %v4189_v51  ;;  %v4607_v56 = vpack.c.bf16 %v3369_v37, %v3369_v37  ;;  %v3384_v1 = vrot.slane %v3383_v19, 2  ;;  %v5161_v44 = vpop.f32.mrf.mxu1  ;;  %5256 = vmatmul.mubr.msk.bf16.gmra.mxu1 %vm1462_vm3, %v6462_v23  ;;  %v3179_v48 = vmax.f32 %v2749_v5, 0.0 }
 0x2d8   :  { %v2762_v17 = vadd.f32 %v5161_v44, %v6370_v16  ;;  %v3374_v39 = vmax.f32 %v3372_v3, %v3373_v47  ;;  %v3388_v59 = vsel %vm1462_vm3, %v3176_v2, -inf  ;;  %v3360_v20 = vmax.f32 %v3358_v13, %v3359_v32 }
 0x2d9   :  { %4256 = vst.msk [vmem:[%s6817_s7] sm:$0xf] %vm4255_vm11, %v4239_v30  ;;  %v4121_v27 = vunpack.c.l.b16 %v4607_v56  ;;  %v3385_v58 = vmax.f32 %v3383_v19, %v3384_v1  ;;  %v2753_v18 = vpop.f32.mrf.mxu1  ;;  %v3398_v23 = vsel %vm1462_vm3, %v3179_v48, -inf  ;;  %v3177_v49 = vmax.f32 %v2741_v46, 0.0 }
 0x2da   :  { %v3182_v33 = vmax.f32 %v2762_v17, 0.0  ;;  %v3375_v31 = vrot.slane %v3374_v39, 2  ;;  %v3399_v61 = vmax.f32 %v3397_v9, %v3398_v23  ;;  %v2754_v63 = vadd.f32 %v6370_v16, %v2753_v18 }
 0x2db   :  { %v3386_v62 = vrot.slane %v3385_v58, 1  ;;  %v5162_v40 = vpop.f32.mrf.mxu1  ;;  %v4606_v50 = vpack.c.bf16 %v3360_v20, %v3360_v20  ;;  %v3389_v35 = vsel %vm1462_vm3, %v3177_v49, -inf }
 0x2dc   :  { %v3415_v6 = vsel %vm1462_vm3, %v3182_v33, -inf  ;;  %v2765_v28 = vadd.f32 %v5162_v40, %v6370_v16  ;;  %v3376_v14 = vmax.f32 %v3374_v39, %v3375_v31  ;;  %v3400_v54 = vrot.slane %v3399_v61, 4 }
 0x2dd   :  { %v3387_v57 = vmax.f32 %v3385_v58, %v3386_v62  ;;  %v3390_v4 = vmax.f32 %v3388_v59, %v3389_v35  ;;  %v2756_v24 = vpop.f32.mrf.mxu1  ;;  %v4120_v15 = vunpack.c.l.b16 %v4606_v50  ;;  %v3180_v0 = vmax.f32 %v2754_v63, 0.0 }
 0x2de   :  { %v3183_v25 = vmax.f32 %v2765_v28, 0.0  ;;  %v2757_v22 = vadd.f32 %v6370_v16, %v2756_v24  ;;  %v3377_v55 = vrot.slane %v3376_v14, 1  ;;  %v3401_v38 = vmax.f32 %v3399_v61, %v3400_v54 }
 0x2df   :  { %v4609_v34 = vpack.c.bf16 %v3387_v57, %v3387_v57  ;;  %v3391_v45 = vrot.slane %v3390_v4, 4  ;;  %v5165_v21 = vpop.f32.mrf.mxu1  ;;  %v4190_v29 = vsel %vm4176_vm4, %v4121_v27, %v4120_v15  ;;  %v3406_v42 = vsel %vm1462_vm3, %v3180_v0, -inf }
 0x2e0   :  { %v3416_v43 = vsel %vm1462_vm3, %v3183_v25, -inf  ;;  %v3181_v26 = vmax.f32 %v2757_v22, 0.0  ;;  %v3378_v11 = vmax.f32 %v3376_v14, %v3377_v55  ;;  %v3402_v10 = vrot.slane %v3401_v38, 2 }
 0x2e1   :  { %v4123_v60 = vunpack.c.l.b16 %v4609_v34  ;;  %v3392_v41 = vmax.f32 %v3390_v4, %v3391_v45  ;;  %v2769_v8 = vpop.f32.mrf.mxu1  ;;  %v3417_v7 = vmax.f32 %v3415_v6, %v3416_v43  ;;  %v2778_v52 = vadd.f32 %v5165_v21, %v6370_v16 }
 0x2e2   :  { %v3407_v53 = vsel %vm1462_vm3, %v3181_v26, -inf  ;;  %v2770_v2 = vadd.f32 %v6370_v16, %v2769_v8  ;;  %v4608_v36 = vpack.c.bf16 %v3378_v11, %v3378_v11  ;;  %v3403_v37 = vmax.f32 %v3401_v38, %v3402_v10 }
 0x2e3   :  { %v3393_v19 = vrot.slane %v3392_v41, 2  ;;  %v3408_v3 = vmax.f32 %v3406_v42, %v3407_v53  ;;  %v5166_v12 = vpop.f32.mrf.mxu1  ;;  %v3418_v51 = vrot.slane %v3417_v7, 4  ;;  %v3186_v13 = vmax.f32 %v2778_v52, 0.0 }
 0x2e4   :  { %v3184_v9 = vmax.f32 %v2770_v2, 0.0  ;;  %v2781_v5 = vadd.f32 %v5166_v12, %v6370_v16  ;;  %v4122_v30 = vunpack.c.l.b16 %v4608_v36  ;;  %v3404_v56 = vrot.slane %v3403_v37, 1 }
 0x2e5   :  { %v3394_v1 = vmax.f32 %v3392_v41, %v3393_v19  ;;  %v3409_v47 = vrot.slane %v3408_v3, 4  ;;  %v2772_v44 = vpop.f32.mrf.mxu1  ;;  %v3419_v32 = vmax.f32 %v3417_v7, %v3418_v51  ;;  %v3433_v48 = vsel %vm1462_vm3, %v3186_v13, -inf }
 0x2e6   :  { %v3424_v46 = vsel %vm1462_vm3, %v3184_v9, -inf  ;;  %v3187_v17 = vmax.f32 %v2781_v5, 0.0  ;;  %v4191_v27 = vsel %vm4178_vm5, %v4122_v30, %v4190_v29  ;;  %v3405_v58 = vmax.f32 %v3403_v37, %v3404_v56 }
 0x2e7   :  { %v3395_v39 = vrot.slane %v3394_v1, 1  ;;  %v3410_v59 = vmax.f32 %v3408_v3, %v3409_v47  ;;  %v5169_v18 = vpop.f32.mrf.mxu1  ;;  %v4192_v20 = vsel %vm4180_vm6, %v4123_v60, %v4191_v27  ;;  %v3420_v23 = vrot.slane %v3419_v32, 2 }
 0x2e8   :  { %v3434_v49 = vsel %vm1462_vm3, %v3187_v17, -inf  ;;  %v2773_v33 = vadd.f32 %v6370_v16, %v2772_v44  ;;  %v4611_v62 = vpack.c.bf16 %v3405_v58, %v3405_v58  ;;  %v2794_v6 = vadd.f32 %v5169_v18, %v6370_v16 }
 0x2e9   :  { %v3396_v31 = vmax.f32 %v3394_v1, %v3395_v39  ;;  %v3411_v61 = vrot.slane %v3410_v59, 2  ;;  %v3435_v63 = vmax.f32 %v3433_v48, %v3434_v49  ;;  %v2785_v40 = vpop.f32.mrf.mxu1  ;;  %v3421_v50 = vmax.f32 %v3419_v32, %v3420_v23 }
 0x2ea   :  { %v3185_v35 = vmax.f32 %v2773_v33, 0.0  ;;  %v2786_v28 = vadd.f32 %v6370_v16, %v2785_v40  ;;  %v4125_v57 = vunpack.c.l.b16 %v4611_v62  ;;  %v3190_v25 = vmax.f32 %v2794_v6, 0.0 }
 0x2eb   :  { %v4610_v14 = vpack.c.bf16 %v3396_v31, %v3396_v31  ;;  %v3412_v54 = vmax.f32 %v3410_v59, %v3411_v61  ;;  %v3436_v4 = vrot.slane %v3435_v63, 4  ;;  %v5170_v24 = vpop.f32.mrf.mxu1  ;;  %v3422_v15 = vrot.slane %v3421_v50, 1 }
 0x2ec   :  { %v3425_v0 = vsel %vm1462_vm3, %v3185_v35, -inf  ;;  %v3188_v22 = vmax.f32 %v2786_v28, 0.0  ;;  %v3451_v42 = vsel %vm1462_vm3, %v3190_v25, -inf  ;;  %v2797_v26 = vadd.f32 %v5170_v24, %v6370_v16 }
 0x2ed   :  { %v4124_v34 = vunpack.c.l.b16 %v4610_v14  ;;  %v3413_v55 = vrot.slane %v3412_v54, 1  ;;  %v3437_v38 = vmax.f32 %v3435_v63, %v3436_v4  ;;  %v3426_v45 = vmax.f32 %v3424_v46, %v3425_v0  ;;  %v2788_v21 = vpop.f32.mrf.mxu1 }
 0x2ee   :  { %v3423_v29 = vmax.f32 %v3421_v50, %v3422_v15  ;;  %v3442_v43 = vsel %vm1462_vm3, %v3188_v22, -inf  ;;  %v3191_v52 = vmax.f32 %v2797_v26, 0.0  ;;  %v2789_v2 = vadd.f32 %v6370_v16, %v2788_v21 }
 0x2ef   :  { %v4193_v60 = vsel %vm4182_vm7, %v4124_v34, %v4192_v20  ;;  %v3414_v11 = vmax.f32 %v3412_v54, %v3413_v55  ;;  %v3438_v10 = vrot.slane %v3437_v38, 2  ;;  %v3427_v41 = vrot.slane %v3426_v45, 4  ;;  %v5173_v8 = vpop.f32.mrf.mxu1 }
 0x2f0   :  { %v4613_v7 = vpack.c.bf16 %v3423_v29, %v3423_v29  ;;  %v4194_v53 = vsel %vm4184_vm8, %v4125_v57, %v4193_v60  ;;  %v2810_v3 = vadd.f32 %v5173_v8, %v6370_v16  ;;  %v3452_v13 = vsel %vm1462_vm3, %v3191_v52, -inf }
 0x2f1   :  { %v4612_v36 = vpack.c.bf16 %v3414_v11, %v3414_v11  ;;  %v3439_v37 = vmax.f32 %v3437_v38, %v3438_v10  ;;  %v3428_v19 = vmax.f32 %v3426_v45, %v3427_v41  ;;  %v2801_v12 = vpop.f32.mrf.mxu1  ;;  %v3189_v9 = vmax.f32 %v2789_v2, 0.0 }
 0x2f2   :  { %v4127_v51 = vunpack.c.l.b16 %v4613_v7  ;;  %v2802_v5 = vadd.f32 %v6370_v16, %v2801_v12  ;;  %v3453_v47 = vmax.f32 %v3451_v42, %v3452_v13  ;;  %v3194_v48 = vmax.f32 %v2810_v3, 0.0 }
 0x2f3   :  { %v4126_v30 = vunpack.c.l.b16 %v4612_v36  ;;  %v3440_v56 = vrot.slane %v3439_v37, 1  ;;  %v3429_v1 = vrot.slane %v3428_v19, 2  ;;  %v5174_v44 = vpop.f32.mrf.mxu1  ;;  %v3443_v32 = vsel %vm1462_vm3, %v3189_v9, -inf }
 0x2f4   :  { %v3192_v46 = vmax.f32 %v2802_v5, 0.0  ;;  %v2813_v17 = vadd.f32 %v5174_v44, %v6370_v16  ;;  %v3454_v59 = vrot.slane %v3453_v47, 4  ;;  %v3444_v23 = vmax.f32 %v3442_v43, %v3443_v32 }
 0x2f5   :  { %v4195_v27 = vsel %vm4186_vm9, %v4126_v30, %v4194_v53  ;;  %v3441_v58 = vmax.f32 %v3439_v37, %v3440_v56  ;;  %v3430_v39 = vmax.f32 %v3428_v19, %v3429_v1  ;;  %v2804_v18 = vpop.f32.mrf.mxu1  ;;  %v3469_v57 = vsel %vm1462_vm3, %v3194_v48, -inf }
 0x2f6   :  { %v4196_v20 = vsel %vm4188_vm10, %v4127_v51, %v4195_v27  ;;  %v3455_v31 = vmax.f32 %v3453_v47, %v3454_v59  ;;  %v3445_v63 = vrot.slane %v3444_v23, 4  ;;  %v3195_v40 = vmax.f32 %v2813_v17, 0.0 }
 0x2f7   :  { %v4240_v49 = vpack.c.b16 %v4196_v20, %v4196_v20  ;;  %v4615_v33 = vpack.c.bf16 %v3441_v58, %v3441_v58  ;;  %v3431_v62 = vrot.slane %v3430_v39, 1  ;;  %v5177_v61 = vpop.f32.mrf.mxu1  ;;  %v2805_v50 = vadd.f32 %v6370_v16, %v2804_v18 }
 0x2f8   :  { %v2826_v35 = vadd.f32 %v5177_v61, %v6370_v16  ;;  %v3456_v28 = vrot.slane %v3455_v31, 2  ;;  %v3460_v14 = vsel %vm1462_vm3, %v3192_v46, -inf  ;;  %v3446_v4 = vmax.f32 %v3444_v23, %v3445_v63 }
 0x2f9   :  { %4257 = vst.msk [vmem:[%s6817_s7 + $0x4] sm:$0xf] %vm4255_vm11, %v4240_v49  ;;  %v3432_v6 = vmax.f32 %v3430_v39, %v3431_v62  ;;  %v2817_v54 = vpop.f32.mrf.mxu1  ;;  %v3470_v24 = vsel %vm1462_vm3, %v3195_v40, -inf  ;;  %v3193_v15 = vmax.f32 %v2805_v50, 0.0  ;;  %v4129_v45 = vunpack.c.l.b16 %v4615_v33 }
 0x2fa   :  { %v3198_v0 = vmax.f32 %v2826_v35, 0.0  ;;  %v3457_v22 = vmax.f32 %v3455_v31, %v3456_v28  ;;  %v3471_v34 = vmax.f32 %v3469_v57, %v3470_v24  ;;  %v2818_v55 = vadd.f32 %v6370_v16, %v2817_v54 }
 0x2fb   :  { %v4614_v25 = vpack.c.bf16 %v3432_v6, %v3432_v6  ;;  %v5178_v38 = vpop.f32.mrf.mxu1  ;;  %v3447_v21 = vrot.slane %v3446_v4, 2  ;;  %v3461_v29 = vsel %vm1462_vm3, %v3193_v15, -inf }
 0x2fc   :  { %v2829_v42 = vadd.f32 %v5178_v38, %v6370_v16  ;;  %v3458_v26 = vrot.slane %v3457_v22, 1  ;;  %v3472_v60 = vrot.slane %v3471_v34, 4  ;;  %v3462_v11 = vmax.f32 %v3460_v14, %v3461_v29 }
 0x2fd   :  { %v4128_v43 = vunpack.c.l.b16 %v4614_v25  ;;  %v2820_v10 = vpop.f32.mrf.mxu1  ;;  %v3448_v41 = vmax.f32 %v3446_v4, %v3447_v21  ;;  %v3487_v8 = vsel %vm1462_vm3, %v3198_v0, -inf  ;;  %v3196_v37 = vmax.f32 %v2818_v55, 0.0 }
 0x2fe   :  { %v3199_v7 = vmax.f32 %v2829_v42, 0.0  ;;  %v2821_v53 = vadd.f32 %v6370_v16, %v2820_v10  ;;  %v3459_v52 = vmax.f32 %v3457_v22, %v3458_v26  ;;  %v3473_v2 = vmax.f32 %v3471_v34, %v3472_v60 }
 0x2ff   :  { %v3463_v36 = vrot.slane %v3462_v11, 4  ;;  %v5181_v19 = vpop.f32.mrf.mxu1  ;;  %v4197_v3 = vsel %vm4176_vm4, %v4129_v45, %v4128_v43  ;;  %v3449_v12 = vrot.slane %v3448_v41, 1  ;;  %v3478_v27 = vsel %vm1462_vm3, %v3196_v37, -inf }
 0x300   :  { %v3488_v51 = vsel %vm1462_vm3, %v3199_v7, -inf  ;;  %v3197_v13 = vmax.f32 %v2821_v53, 0.0  ;;  %v4617_v9 = vpack.c.bf16 %v3459_v52, %v3459_v52  ;;  %v3474_v5 = vrot.slane %v3473_v2, 2  ;;  %v6589_v7 = vld [vmem:[%s6816_s6] ss:$0 sm:$0xff] }
 0x301   :  { %v3464_v30 = vmax.f32 %v3462_v11, %v3463_v36  ;;  %v3489_v56 = vmax.f32 %v3487_v8, %v3488_v51  ;;  %v2833_v1 = vpop.f32.mrf.mxu1  ;;  %v3450_v47 = vmax.f32 %v3448_v41, %v3449_v12  ;;  %v2842_v32 = vadd.f32 %v5181_v19, %v6370_v16 }
 0x302   :  { %v3479_v44 = vsel %vm1462_vm3, %v3197_v13, -inf  ;;  %v2834_v48 = vadd.f32 %v6370_v16, %v2833_v1  ;;  %v3475_v46 = vmax.f32 %v3473_v2, %v3474_v5  ;;  %v4131_v63 = vunpack.c.l.b16 %v4617_v9 }
 0x303   :  { %v3465_v17 = vrot.slane %v3464_v30, 2  ;;  %v3490_v58 = vrot.slane %v3489_v56, 4  ;;  %v5182_v39 = vpop.f32.mrf.mxu1  ;;  %v4616_v59 = vpack.c.bf16 %v3450_v47, %v3450_v47  ;;  %v3480_v18 = vmax.f32 %v3478_v27, %v3479_v44 }
 0x304   :  { %v3202_v20 = vmax.f32 %v2842_v32, 0.0  ;;  %v3200_v23 = vmax.f32 %v2834_v48, 0.0  ;;  %v3476_v49 = vrot.slane %v3475_v46, 1  ;;  %v2845_v31 = vadd.f32 %v5182_v39, %v6370_v16 }
 0x305   :  { %v3466_v33 = vmax.f32 %v3464_v30, %v3465_v17  ;;  %v3491_v62 = vmax.f32 %v3489_v56, %v3490_v58  ;;  %v2836_v61 = vpop.f32.mrf.mxu1  ;;  %v4130_v40 = vunpack.c.l.b16 %v4616_v59  ;;  %v3481_v50 = vrot.slane %v3480_v18, 4 }
 0x306   :  { %v3505_v35 = vsel %vm1462_vm3, %v3202_v20, -inf  ;;  %v3477_v6 = vmax.f32 %v3475_v46, %v3476_v49  ;;  %v3203_v14 = vmax.f32 %v2845_v31, 0.0  ;;  %v2837_v15 = vadd.f32 %v6370_v16, %v2836_v61 }
 0x307   :  { %v3467_v28 = vrot.slane %v3466_v33, 1  ;;  %v3492_v57 = vrot.slane %v3491_v62, 2  ;;  %v5185_v54 = vpop.f32.mrf.mxu1  ;;  %v4198_v4 = vsel %vm4178_vm5, %v4130_v40, %v4197_v3  ;;  %v3482_v24 = vmax.f32 %v3480_v18, %v3481_v50 }
 0x308   :  { %v2858_v0 = vadd.f32 %v5185_v54, %v6370_v16  ;;  %v4619_v25 = vpack.c.bf16 %v3477_v6, %v3477_v6  ;;  %v3496_v55 = vsel %vm1462_vm3, %v3200_v23, -inf  ;;  %v4199_v45 = vsel %vm4180_vm6, %v4131_v63, %v4198_v4 }
 0x309   :  { %v3468_v22 = vmax.f32 %v3466_v33, %v3467_v28  ;;  %v3493_v34 = vmax.f32 %v3491_v62, %v3492_v57  ;;  %v2849_v38 = vpop.f32.mrf.mxu1  ;;  %v3483_v21 = vrot.slane %v3482_v24, 2  ;;  %v3506_v29 = vsel %vm1462_vm3, %v3203_v14, -inf }
 0x30a   :  { %v3201_v42 = vmax.f32 %v2837_v15, 0.0  ;;  %v3507_v60 = vmax.f32 %v3505_v35, %v3506_v29  ;;  %v3206_v11 = vmax.f32 %v2858_v0, 0.0  ;;  %v4133_v41 = vunpack.c.l.b16 %v4619_v25 }
 0x30b   :  { %v4618_v43 = vpack.c.bf16 %v3468_v22, %v3468_v22  ;;  %v3494_v26 = vrot.slane %v3493_v34, 1  ;;  %v5186_v10 = vpop.f32.mrf.mxu1  ;;  %v3484_v8 = vmax.f32 %v3482_v24, %v3483_v21  ;;  %v2850_v53 = vadd.f32 %v6589_v7, %v2849_v38 }
 0x30c   :  { %v3497_v16 = vsel %vm1462_vm3, %v3201_v42, -inf  ;;  %v3508_v36 = vrot.slane %v3507_v60, 4  ;;  %v2861_v51 = vadd.f32 %v6589_v7, %v5186_v10  ;;  %v3523_v56 = vsel %vm1462_vm3, %v3206_v11, -inf }
 0x30d   :  { %v4132_v52 = vunpack.c.l.b16 %v4618_v43  ;;  %v3495_v2 = vmax.f32 %v3493_v34, %v3494_v26  ;;  %v3498_v37 = vmax.f32 %v3496_v55, %v3497_v16  ;;  %v2852_v19 = vpop.f32.mrf.mxu1  ;;  %v3485_v3 = vrot.slane %v3484_v8, 1 }
 0x30e   :  { %v3204_v12 = vmax.f32 %v2850_v53, 0.0  ;;  %v2853_v13 = vadd.f32 %v6589_v7, %v2852_v19  ;;  %v3509_v5 = vmax.f32 %v3507_v60, %v3508_v36  ;;  %v3207_v48 = vmax.f32 %v2861_v51, 0.0 }
 0x30f   :  { %v4200_v9 = vsel %vm4182_vm7, %v4132_v52, %v4199_v45  ;;  %v3499_v30 = vrot.slane %v3498_v37, 4  ;;  %v5189_v1 = vpop.f32.mrf.mxu1  ;;  %v4621_v47 = vpack.c.bf16 %v3495_v2, %v3495_v2  ;;  %v3486_v44 = vmax.f32 %v3484_v8, %v3485_v3 }
 0x310   :  { %v4201_v32 = vsel %vm4184_vm8, %v4133_v41, %v4200_v9  ;;  %v3510_v46 = vrot.slane %v3509_v5, 2  ;;  %v3514_v27 = vsel %vm1462_vm3, %v3204_v12, -inf  ;;  %v3205_v58 = vmax.f32 %v2853_v13, 0.0 }
 0x311   :  { %v3500_v17 = vmax.f32 %v3498_v37, %v3499_v30  ;;  %v2865_v39 = vpop.f32.mrf.mxu1  ;;  %v4620_v59 = vpack.c.bf16 %v3486_v44, %v3486_v44  ;;  %v3524_v18 = vsel %vm1462_vm3, %v3207_v48, -inf  ;;  %v2874_v20 = vadd.f32 %v6589_v7, %v5189_v1 }
 0x312   :  { %v2866_v23 = vadd.f32 %v6589_v7, %v2865_v39  ;;  %v3511_v49 = vmax.f32 %v3509_v5, %v3510_v46  ;;  %v3525_v62 = vmax.f32 %v3523_v56, %v3524_v18  ;;  %v3515_v31 = vsel %vm1462_vm3, %v3205_v58, -inf }
 0x313   :  { %v3501_v33 = vrot.slane %v3500_v17, 2  ;;  %v5190_v61 = vpop.f32.mrf.mxu1  ;;  %v4135_v63 = vunpack.c.l.b16 %v4621_v47  ;;  %v4134_v40 = vunpack.c.l.b16 %v4620_v59  ;;  %v3516_v50 = vmax.f32 %v3514_v27, %v3515_v31 }
 0x314   :  { %v3210_v35 = vmax.f32 %v2874_v20, 0.0  ;;  %v3512_v6 = vrot.slane %v3511_v49, 1  ;;  %v3526_v57 = vrot.slane %v3525_v62, 4  ;;  %v2877_v14 = vadd.f32 %v6589_v7, %v5190_v61 }
 0x315   :  { %v3502_v28 = vmax.f32 %v3500_v17, %v3501_v33  ;;  %v2868_v54 = vpop.f32.mrf.mxu1  ;;  %v4202_v4 = vsel %vm4186_vm9, %v4134_v40, %v4201_v32  ;;  %v3517_v24 = vrot.slane %v3516_v50, 4  ;;  %v3208_v0 = vmax.f32 %v2866_v23, 0.0 }
 0x316   :  { %v3541_v15 = vsel %vm1462_vm3, %v3210_v35, -inf  ;;  %v4203_v25 = vsel %vm4188_vm10, %v4135_v63, %v4202_v4  ;;  %v3513_v22 = vmax.f32 %v3511_v49, %v3512_v6  ;;  %v3527_v55 = vmax.f32 %v3525_v62, %v3526_v57 }
 0x317   :  { %v3503_v34 = vrot.slane %v3502_v28, 1  ;;  %v5193_v38 = vpop.f32.mrf.mxu1  ;;  %v4241_v45 = vpack.c.b16 %v4203_v25, %v4203_v25  ;;  %v3518_v21 = vmax.f32 %v3516_v50, %v3517_v24  ;;  %v3211_v29 = vmax.f32 %v2877_v14, 0.0 }
 0x318   :  { %v2869_v42 = vadd.f32 %v6589_v7, %v2868_v54  ;;  %v4623_v43 = vpack.c.bf16 %v3513_v22, %v3513_v22  ;;  %v3528_v60 = vrot.slane %v3527_v55, 2  ;;  %v2890_v11 = vadd.f32 %v6589_v7, %v5193_v38 }
 0x319   :  { %v3504_v26 = vmax.f32 %v3502_v28, %v3503_v34  ;;  %v2881_v10 = vpop.f32.mrf.mxu1  ;;  %4258 = vst.msk [vmem:[%s6817_s7 + $0x8] sm:$0xf] %vm4255_vm11, %v4241_v45  ;;  %v3519_v41 = vrot.slane %v3518_v21, 2  ;;  %v3542_v8 = vsel %vm1462_vm3, %v3211_v29, -inf  ;;  %v3532_v3 = vsel %vm1462_vm3, %v3208_v0, -inf }
 0x31a   :  { %v3209_v16 = vmax.f32 %v2869_v42, 0.0  ;;  %v2882_v53 = vadd.f32 %v6589_v7, %v2881_v10  ;;  %v3529_v2 = vmax.f32 %v3527_v55, %v3528_v60  ;;  %v3543_v36 = vmax.f32 %v3541_v15, %v3542_v8 }
 0x31b   :  { %v4622_v52 = vpack.c.bf16 %v3504_v26, %v3504_v26  ;;  %v5194_v37 = vpop.f32.mrf.mxu1  ;;  %v3520_v19 = vmax.f32 %v3518_v21, %v3519_v41  ;;  %v3214_v51 = vmax.f32 %v2890_v11, 0.0  ;;  %v4137_v1 = vunpack.c.l.b16 %v4623_v43 }
 0x31c   :  { %v3533_v12 = vsel %vm1462_vm3, %v3209_v16, -inf  ;;  %v3530_v13 = vrot.slane %v3529_v2, 1  ;;  %v3544_v9 = vrot.slane %v3543_v36, 4  ;;  %v3212_v30 = vmax.f32 %v2882_v53, 0.0 }
 0x31d   :  { %v3534_v5 = vmax.f32 %v3532_v3, %v3533_v12  ;;  %v2884_v56 = vpop.f32.mrf.mxu1  ;;  %v4136_v47 = vunpack.c.l.b16 %v4622_v52  ;;  %v3521_v44 = vrot.slane %v3520_v19, 1  ;;  %v2893_v32 = vadd.f32 %v6589_v7, %v5194_v37 }
 0x31e   :  { %v3531_v48 = vmax.f32 %v3529_v2, %v3530_v13  ;;  %v3545_v46 = vmax.f32 %v3543_v36, %v3544_v9  ;;  %v3559_v27 = vsel %vm1462_vm3, %v3214_v51, -inf  ;;  %v2885_v18 = vadd.f32 %v6589_v7, %v2884_v56 }
 0x31f   :  { %v3535_v17 = vrot.slane %v3534_v5, 4  ;;  %v5197_v58 = vpop.f32.mrf.mxu1  ;;  %v3522_v39 = vmax.f32 %v3520_v19, %v3521_v44  ;;  %v3215_v59 = vmax.f32 %v2893_v32, 0.0  ;;  %v3550_v62 = vsel %vm1462_vm3, %v3212_v30, -inf }
 0x320   :  { %v2906_v20 = vadd.f32 %v6589_v7, %v5197_v58  ;;  %v4625_v23 = vpack.c.bf16 %v3531_v48, %v3531_v48  ;;  %v3546_v49 = vrot.slane %v3545_v46, 2  ;;  %v3213_v40 = vmax.f32 %v2885_v18, 0.0 }
 0x321   :  { %v3536_v33 = vmax.f32 %v3534_v5, %v3535_v17  ;;  %v2897_v31 = vpop.f32.mrf.mxu1  ;;  %v4624_v61 = vpack.c.bf16 %v3522_v39, %v3522_v39  ;;  %v3560_v63 = vsel %vm1462_vm3, %v3215_v59, -inf  ;;  %v4204_v35 = vsel %vm4176_vm4, %v4137_v1, %v4136_v47 }
 0x322   :  { %v3218_v50 = vmax.f32 %v2906_v20, 0.0  ;;  %v3547_v6 = vmax.f32 %v3545_v46, %v3546_v49  ;;  %v3561_v57 = vmax.f32 %v3559_v27, %v3560_v63  ;;  %v4139_v54 = vunpack.c.l.b16 %v4625_v23 }
 0x323   :  { %v3537_v28 = vrot.slane %v3536_v33, 2  ;;  %v5198_v14 = vpop.f32.mrf.mxu1  ;;  %v4138_v4 = vunpack.c.l.b16 %v4624_v61  ;;  %v3551_v24 = vsel %vm1462_vm3, %v3213_v40, -inf  ;;  %v2898_v15 = vadd.f32 %v6589_v7, %v2897_v31 }
 0x324   :  { %v3548_v0 = vrot.slane %v3547_v6, 1  ;;  %v3562_v22 = vrot.slane %v3561_v57, 4  ;;  %v3552_v34 = vmax.f32 %v3550_v62, %v3551_v24  ;;  %v3577_v45 = vsel %vm1462_vm3, %v3218_v50, -inf }
 0x325   :  { %v3538_v25 = vmax.f32 %v3536_v33, %v3537_v28  ;;  %v2900_v55 = vpop.f32.mrf.mxu1  ;;  %v4205_v38 = vsel %vm4178_vm5, %v4138_v4, %v4204_v35  ;;  %v2909_v21 = vadd.f32 %v6589_v7, %v5198_v14  ;;  %v3216_v60 = vmax.f32 %v2898_v15, 0.0 }
 0x326   :  { %v2901_v29 = vadd.f32 %v6589_v7, %v2900_v55  ;;  %v3549_v42 = vmax.f32 %v3547_v6, %v3548_v0  ;;  %v3563_v26 = vmax.f32 %v3561_v57, %v3562_v22  ;;  %v4206_v10 = vsel %vm4180_vm6, %v4139_v54, %v4205_v38 }
 0x327   :  { %v3539_v43 = vrot.slane %v3538_v25, 1  ;;  %v5201_v11 = vpop.f32.mrf.mxu1  ;;  %v3553_v41 = vrot.slane %v3552_v34, 4  ;;  %v3219_v8 = vmax.f32 %v2909_v21, 0.0  ;;  %v3568_v5 = vsel %vm1462_vm3, %v3216_v60, -inf }
 0x328   :  { %v3217_v16 = vmax.f32 %v2901_v29, 0.0  ;;  %v4627_v53 = vpack.c.bf16 %v3549_v42, %v3549_v42  ;;  %v3564_v2 = vrot.slane %v3563_v26, 2  ;;  %v2922_v36 = vadd.f32 %v6589_v7, %v5201_v11 }
 0x329   :  { %v3540_v52 = vmax.f32 %v3538_v25, %v3539_v43  ;;  %v2913_v37 = vpop.f32.mrf.mxu1  ;;  %v3554_v19 = vmax.f32 %v3552_v34, %v3553_v41  ;;  %v3578_v3 = vsel %vm1462_vm3, %v3219_v8, -inf }
 0x32a   :  { %v3569_v12 = vsel %vm1462_vm3, %v3217_v16, -inf  ;;  %v2914_v51 = vadd.f32 %v6589_v7, %v2913_v37  ;;  %v3565_v9 = vmax.f32 %v3563_v26, %v3564_v2  ;;  %v3579_v30 = vmax.f32 %v3577_v45, %v3578_v3 }
 0x32b   :  { %v4626_v13 = vpack.c.bf16 %v3540_v52, %v3540_v52  ;;  %v5202_v56 = vpop.f32.mrf.mxu1  ;;  %v3555_v1 = vrot.slane %v3554_v19, 2  ;;  %v3570_v47 = vmax.f32 %v3568_v5, %v3569_v12  ;;  %v3222_v44 = vmax.f32 %v2922_v36, 0.0 }
 0x32c   :  { %v3220_v32 = vmax.f32 %v2914_v51, 0.0  ;;  %v3566_v46 = vrot.slane %v3565_v9, 1  ;;  %v3580_v17 = vrot.slane %v3579_v30, 4  ;;  %v2925_v27 = vadd.f32 %v6589_v7, %v5202_v56 }
 0x32d   :  { %v4140_v48 = vunpack.c.l.b16 %v4626_v13  ;;  %v2916_v58 = vpop.f32.mrf.mxu1  ;;  %v4141_v39 = vunpack.c.l.b16 %v4627_v53  ;;  %v3556_v59 = vmax.f32 %v3554_v19, %v3555_v1  ;;  %v3571_v18 = vrot.slane %v3570_v47, 4 }
 0x32e   :  { %v3595_v20 = vsel %vm1462_vm3, %v3222_v44, -inf  ;;  %v3567_v23 = vmax.f32 %v3565_v9, %v3566_v46  ;;  %v3581_v49 = vmax.f32 %v3579_v30, %v3580_v17  ;;  %v3586_v33 = vsel %vm1462_vm3, %v3220_v32, -inf }
 0x32f   :  { %v3223_v62 = vmax.f32 %v2925_v27, 0.0  ;;  %v5205_v31 = vpop.f32.mrf.mxu1  ;;  %v4207_v61 = vsel %vm4182_vm7, %v4140_v48, %v4206_v10  ;;  %v3557_v63 = vrot.slane %v3556_v59, 1  ;;  %v3572_v40 = vmax.f32 %v3570_v47, %v3571_v18 }
 0x330   :  { %v2917_v50 = vadd.f32 %v6589_v7, %v2916_v58  ;;  %v4629_v35 = vpack.c.bf16 %v3567_v23, %v3567_v23  ;;  %v3582_v6 = vrot.slane %v3581_v49, 2  ;;  %v2938_v57 = vadd.f32 %v6589_v7, %v5205_v31 }
 0x331   :  { %v3596_v28 = vsel %vm1462_vm3, %v3223_v62, -inf  ;;  %v2929_v14 = vpop.f32.mrf.mxu1  ;;  %v3558_v54 = vmax.f32 %v3556_v59, %v3557_v63  ;;  %v3573_v4 = vrot.slane %v3572_v40, 2  ;;  %v4208_v0 = vsel %vm4184_vm8, %v4141_v39, %v4207_v61 }
 0x332   :  { %v3597_v24 = vmax.f32 %v3595_v20, %v3596_v28  ;;  %v3221_v15 = vmax.f32 %v2917_v50, 0.0  ;;  %v3583_v25 = vmax.f32 %v3581_v49, %v3582_v6  ;;  %v3226_v22 = vmax.f32 %v2938_v57, 0.0 }
 0x333   :  { %v2930_v34 = vadd.f32 %v6589_v7, %v2929_v14  ;;  %v5206_v55 = vpop.f32.mrf.mxu1  ;;  %v4628_v38 = vpack.c.bf16 %v3558_v54, %v3558_v54  ;;  %v3574_v45 = vmax.f32 %v3572_v40, %v3573_v4  ;;  %v4143_v42 = vunpack.c.l.b16 %v4629_v35 }
 0x334   :  { %v3598_v21 = vrot.slane %v3597_v24, 4  ;;  %v3587_v29 = vsel %vm1462_vm3, %v3221_v15, -inf  ;;  %v3584_v43 = vrot.slane %v3583_v25, 1  ;;  %v3613_v60 = vsel %vm1462_vm3, %v3226_v22, -inf }
 0x335   :  { %v3588_v26 = vmax.f32 %v3586_v33, %v3587_v29  ;;  %v2932_v11 = vpop.f32.mrf.mxu1  ;;  %v4142_v10 = vunpack.c.l.b16 %v4628_v38  ;;  %v3575_v41 = vrot.slane %v3574_v45, 1  ;;  %v2941_v16 = vadd.f32 %v6589_v7, %v5206_v55 }
 0x336   :  { %v3599_v8 = vmax.f32 %v3597_v24, %v3598_v21  ;;  %v3585_v53 = vmax.f32 %v3583_v25, %v3584_v43  ;;  %v3224_v2 = vmax.f32 %v2930_v34, 0.0  ;;  %v2933_v36 = vadd.f32 %v6589_v7, %v2932_v11 }
 0x337   :  { %v3589_v52 = vrot.slane %v3588_v26, 4  ;;  %v5209_v37 = vpop.f32.mrf.mxu1  ;;  %v4209_v19 = vsel %vm4186_vm9, %v4142_v10, %v4208_v0  ;;  %v3576_v3 = vmax.f32 %v3574_v45, %v3575_v41  ;;  %v3227_v51 = vmax.f32 %v2941_v16, 0.0 }
 0x338   :  { %v3600_v12 = vrot.slane %v3599_v8, 2  ;;  %v4210_v13 = vsel %vm4188_vm10, %v4143_v42, %v4209_v19  ;;  %v4631_v9 = vpack.c.bf16 %v3585_v53, %v3585_v53  ;;  %v3225_v30 = vmax.f32 %v2933_v36, 0.0 }
 0x339   :  { %v3590_v5 = vmax.f32 %v3588_v26, %v3589_v52  ;;  %v2945_v56 = vpop.f32.mrf.mxu1  ;;  %v4242_v1 = vpack.c.b16 %v4210_v13, %v4210_v13  ;;  %v4630_v47 = vpack.c.bf16 %v3576_v3, %v3576_v3  ;;  %v3614_v32 = vsel %vm1462_vm3, %v3227_v51, -inf }
 0x33a   :  { %v3601_v44 = vmax.f32 %v3599_v8, %v3600_v12  ;;  %v3604_v46 = vsel %vm1462_vm3, %v3224_v2, -inf  ;;  %v3615_v17 = vmax.f32 %v3613_v60, %v3614_v32  ;;  %v3605_v27 = vsel %vm1462_vm3, %v3225_v30, -inf }
 0x33b   :  { %v3591_v48 = vrot.slane %v3590_v5, 2  ;;  %v5210_v58 = vpop.f32.mrf.mxu1  ;;  %4259 = vst.msk [vmem:[%s6817_s7 + $0xc] sm:$0xf] %vm4255_vm11, %v4242_v1  ;;  %v4144_v39 = vunpack.c.l.b16 %v4630_v47  ;;  %v3606_v18 = vmax.f32 %v3604_v46, %v3605_v27  ;;  %v2954_v20 = vadd.f32 %v6589_v7, %v5209_v37 }
 0x33c   :  { %v3602_v59 = vrot.slane %v3601_v44, 1  ;;  %v3616_v49 = vrot.slane %v3615_v17, 4  ;;  %v2946_v33 = vadd.f32 %v6589_v7, %v2945_v56  ;;  %v2957_v62 = vadd.f32 %v6589_v7, %v5210_v58 }
 0x33d   :  { %v3592_v23 = vmax.f32 %v3590_v5, %v3591_v48  ;;  %v2948_v31 = vpop.f32.mrf.mxu1  ;;  %v4145_v61 = vunpack.c.l.b16 %v4631_v9  ;;  %v3607_v40 = vrot.slane %v3606_v18, 4  ;;  %v3230_v50 = vmax.f32 %v2954_v20, 0.0 }
 0x33e   :  { %v3603_v63 = vmax.f32 %v3601_v44, %v3602_v59  ;;  %v3617_v6 = vmax.f32 %v3615_v17, %v3616_v49  ;;  %v3228_v28 = vmax.f32 %v2946_v33, 0.0  ;;  %v3231_v57 = vmax.f32 %v2957_v62, 0.0 }
 0x33f   :  { %v3593_v35 = vrot.slane %v3592_v23, 1  ;;  %v5213_v14 = vpop.f32.mrf.mxu1  ;;  %v4211_v54 = vsel %vm4176_vm4, %v4145_v61, %v4144_v39  ;;  %v3608_v24 = vmax.f32 %v3606_v18, %v3607_v40  ;;  %v2949_v15 = vadd.f32 %v6589_v7, %v2948_v31 }
 0x340   :  { %v4633_v4 = vpack.c.bf16 %v3603_v63, %v3603_v63  ;;  %v3618_v25 = vrot.slane %v3617_v6, 2  ;;  %v3631_v22 = vsel %vm1462_vm3, %v3230_v50, -inf  ;;  %v3632_v34 = vsel %vm1462_vm3, %v3231_v57, -inf }
 0x341   :  { %v3594_v0 = vmax.f32 %v3592_v23, %v3593_v35  ;;  %v2961_v55 = vpop.f32.mrf.mxu1  ;;  %v3609_v38 = vrot.slane %v3608_v24, 2  ;;  %v3622_v45 = vsel %vm1462_vm3, %v3228_v28, -inf  ;;  %v3633_v21 = vmax.f32 %v3631_v22, %v3632_v34 }
 0x342   :  { %v3229_v29 = vmax.f32 %v2949_v15, 0.0  ;;  %v3619_v43 = vmax.f32 %v3617_v6, %v3618_v25  ;;  %v2970_v26 = vadd.f32 %v6589_v7, %v5213_v14  ;;  %v2962_v60 = vadd.f32 %v6589_v7, %v2961_v55 }
 0x343   :  { %v4632_v42 = vpack.c.bf16 %v3594_v0, %v3594_v0  ;;  %v5214_v11 = vpop.f32.mrf.mxu1  ;;  %v3610_v10 = vmax.f32 %v3608_v24, %v3609_v38  ;;  %v3634_v41 = vrot.slane %v3633_v21, 4  ;;  %v4147_v19 = vunpack.c.l.b16 %v4633_v4 }
 0x344   :  { %v3623_v8 = vsel %vm1462_vm3, %v3229_v29, -inf  ;;  %v2973_v16 = vadd.f32 %v6589_v7, %v5214_v11  ;;  %v3620_v52 = vrot.slane %v3619_v43, 1  ;;  %v3234_v36 = vmax.f32 %v2970_v26, 0.0 }
 0x345   :  { %v4146_v53 = vunpack.c.l.b16 %v4632_v42  ;;  %v3624_v2 = vmax.f32 %v3622_v45, %v3623_v8  ;;  %v2964_v37 = vpop.f32.mrf.mxu1  ;;  %v3611_v3 = vrot.slane %v3610_v10, 1  ;;  %v3635_v12 = vmax.f32 %v3633_v21, %v3634_v41 }
 0x346   :  { %v3235_v51 = vmax.f32 %v2973_v16, 0.0  ;;  %v3621_v9 = vmax.f32 %v3619_v43, %v3620_v52  ;;  %v3232_v30 = vmax.f32 %v2962_v60, 0.0  ;;  %v3649_v32 = vsel %vm1462_vm3, %v3234_v36, -inf }
 0x347   :  { %v4212_v13 = vsel %vm4178_vm5, %v4146_v53, %v4211_v54  ;;  %v3625_v5 = vrot.slane %v3624_v2, 4  ;;  %v5217_v56 = vpop.f32.mrf.mxu1  ;;  %v3612_v1 = vmax.f32 %v3610_v10, %v3611_v3  ;;  %v3636_v44 = vrot.slane %v3635_v12, 2 }
 0x348   :  { %v4213_v47 = vsel %vm4180_vm6, %v4147_v19, %v4212_v13  ;;  %v4635_v48 = vpack.c.bf16 %v3621_v9, %v3621_v9  ;;  %v3650_v17 = vsel %vm1462_vm3, %v3235_v51, -inf  ;;  %v2965_v27 = vadd.f32 %v6589_v7, %v2964_v37 }
 0x349   :  { %v3626_v46 = vmax.f32 %v3624_v2, %v3625_v5  ;;  %v2977_v58 = vpop.f32.mrf.mxu1  ;;  %v4634_v39 = vpack.c.bf16 %v3612_v1, %v3612_v1  ;;  %v3637_v59 = vmax.f32 %v3635_v12, %v3636_v44  ;;  %v3651_v18 = vmax.f32 %v3649_v32, %v3650_v17 }
 0x34a   :  { %v2986_v20 = vadd.f32 %v6589_v7, %v5217_v56  ;;  %v3640_v49 = vsel %vm1462_vm3, %v3232_v30, -inf  ;;  %v3233_v33 = vmax.f32 %v2965_v27, 0.0  ;;  %v2978_v62 = vadd.f32 %v6589_v7, %v2977_v58 }
 0x34b   :  { %v3627_v23 = vrot.slane %v3626_v46, 2  ;;  %v5218_v31 = vpop.f32.mrf.mxu1  ;;  %v4149_v61 = vunpack.c.l.b16 %v4635_v48  ;;  %v4148_v63 = vunpack.c.l.b16 %v4634_v39  ;;  %v3638_v40 = vrot.slane %v3637_v59, 1 }
 0x34c   :  { %v3652_v50 = vrot.slane %v3651_v18, 4  ;;  %v3641_v6 = vsel %vm1462_vm3, %v3233_v33, -inf  ;;  %v3238_v28 = vmax.f32 %v2986_v20, 0.0  ;;  %v2989_v57 = vadd.f32 %v6589_v7, %v5218_v31 }
 0x34d   :  { %v3628_v35 = vmax.f32 %v3626_v46, %v3627_v23  ;;  %v2980_v14 = vpop.f32.mrf.mxu1  ;;  %v4214_v54 = vsel %vm4182_vm7, %v4148_v63, %v4213_v47  ;;  %v3639_v4 = vmax.f32 %v3637_v59, %v3638_v40  ;;  %v3642_v15 = vmax.f32 %v3640_v49, %v3641_v6 }
 0x34e   :  { %v3653_v24 = vmax.f32 %v3651_v18, %v3652_v50  ;;  %v3236_v25 = vmax.f32 %v2978_v62, 0.0  ;;  %v4215_v34 = vsel %vm4184_vm8, %v4149_v61, %v4214_v54  ;;  %v3239_v45 = vmax.f32 %v2989_v57, 0.0 }
 0x34f   :  { %v3629_v0 = vrot.slane %v3628_v35, 1  ;;  %v5221_v22 = vpop.f32.mrf.mxu1  ;;  %v3643_v38 = vrot.slane %v3642_v15, 4  ;;  %v3667_v29 = vsel %vm1462_vm3, %v3238_v28, -inf  ;;  %v2981_v42 = vadd.f32 %v6589_v7, %v2980_v14 }
 0x350   :  { %v3654_v55 = vrot.slane %v3653_v24, 2  ;;  %v3002_v43 = vadd.f32 %v6589_v7, %v5221_v22  ;;  %v4637_v60 = vpack.c.bf16 %v3639_v4, %v3639_v4  ;;  %v3668_v41 = vsel %vm1462_vm3, %v3239_v45, -inf }
 0x351   :  { %v3630_v21 = vmax.f32 %v3628_v35, %v3629_v0  ;;  %v2993_v26 = vpop.f32.mrf.mxu1  ;;  %v3644_v10 = vmax.f32 %v3642_v15, %v3643_v38  ;;  %v3658_v16 = vsel %vm1462_vm3, %v3236_v25, -inf  ;;  %v3669_v53 = vmax.f32 %v3667_v29, %v3668_v41 }
 0x352   :  { %v3655_v11 = vmax.f32 %v3653_v24, %v3654_v55  ;;  %v3237_v52 = vmax.f32 %v2981_v42, 0.0  ;;  %v3242_v19 = vmax.f32 %v3002_v43, 0.0  ;;  %v2994_v9 = vadd.f32 %v6589_v7, %v2993_v26 }
 0x353   :  { %v4636_v8 = vpack.c.bf16 %v3630_v21, %v3630_v21  ;;  %v5222_v2 = vpop.f32.mrf.mxu1  ;;  %v3645_v37 = vrot.slane %v3644_v10, 2  ;;  %v3670_v51 = vrot.slane %v3669_v53, 4  ;;  %v4151_v30 = vunpack.c.l.b16 %v4637_v60 }
 0x354   :  { %v3656_v36 = vrot.slane %v3655_v11, 1  ;;  %v3005_v3 = vadd.f32 %v6589_v7, %v5222_v2  ;;  %v3659_v13 = vsel %vm1462_vm3, %v3237_v52, -inf  ;;  %v3685_v59 = vsel %vm1462_vm3, %v3242_v19, -inf }
 0x355   :  { %v4150_v12 = vunpack.c.l.b16 %v4636_v8  ;;  %v2996_v5 = vpop.f32.mrf.mxu1  ;;  %v3646_v1 = vmax.f32 %v3644_v10, %v3645_v37  ;;  %v3660_v47 = vmax.f32 %v3658_v16, %v3659_v13  ;;  %v3671_v32 = vmax.f32 %v3669_v53, %v3670_v51 }
 0x356   :  { %v3657_v56 = vmax.f32 %v3655_v11, %v3656_v36  ;;  %v3243_v48 = vmax.f32 %v3005_v3, 0.0  ;;  %v2997_v46 = vadd.f32 %v6589_v7, %v2996_v5  ;;  %v3240_v23 = vmax.f32 %v2994_v9, 0.0 }
 0x357   :  { %v4216_v44 = vsel %vm4186_vm9, %v4150_v12, %v4215_v34  ;;  %v5225_v17 = vpop.f32.mrf.mxu1  ;;  %v3647_v58 = vrot.slane %v3646_v1, 1  ;;  %v3661_v39 = vrot.slane %v3660_v47, 4  ;;  %v3672_v20 = vrot.slane %v3671_v32, 2 }
 0x358   :  { %v4217_v27 = vsel %vm4188_vm10, %v4151_v30, %v4216_v44  ;;  %v3686_v49 = vsel %vm1462_vm3, %v3243_v48, -inf  ;;  %v4639_v62 = vpack.c.bf16 %v3657_v56, %v3657_v56  ;;  %v3241_v50 = vmax.f32 %v2997_v46, 0.0 }
 0x359   :  { %v4243_v18 = vpack.c.b16 %v4217_v27, %v4217_v27  ;;  %v3009_v33 = vpop.f32.mrf.mxu1  ;;  %v3648_v31 = vmax.f32 %v3646_v1, %v3647_v58  ;;  %v3662_v61 = vmax.f32 %v3660_v47, %v3661_v39  ;;  %v3687_v63 = vmax.f32 %v3685_v59, %v3686_v49 }
 0x35a   :  { %v3673_v40 = vmax.f32 %v3671_v32, %v3672_v20  ;;  %v3018_v35 = vadd.f32 %v6589_v7, %v5225_v17  ;;  %v3010_v6 = vadd.f32 %v6589_v7, %v3009_v33  ;;  %v3676_v15 = vsel %vm1462_vm3, %v3240_v23, -inf }
 0x35b   :  { %4260 = vst.msk [vmem:[%s6817_s7 + $0x10] sm:$0xf] %vm4255_vm11, %v4243_v18  ;;  %v5226_v28 = vpop.f32.mrf.mxu1  ;;  %v4638_v57 = vpack.c.bf16 %v3648_v31, %v3648_v31  ;;  %v3663_v14 = vrot.slane %v3662_v61, 2  ;;  %v3688_v54 = vrot.slane %v3687_v63, 4  ;;  %v3677_v0 = vsel %vm1462_vm3, %v3241_v50, -inf }
 0x35c   :  { %v3021_v4 = vadd.f32 %v6589_v7, %v5226_v28  ;;  %v3674_v24 = vrot.slane %v3673_v40, 1  ;;  %v3246_v25 = vmax.f32 %v3018_v35, 0.0  ;;  %v3678_v38 = vmax.f32 %v3676_v15, %v3677_v0 }
 0x35d   :  { %v3012_v22 = vpop.f32.mrf.mxu1  ;;  %v3664_v34 = vmax.f32 %v3662_v61, %v3663_v14  ;;  %v3689_v55 = vmax.f32 %v3687_v63, %v3688_v54  ;;  %v4153_v45 = vunpack.c.l.b16 %v4639_v62  ;;  %v4152_v21 = vunpack.c.l.b16 %v4638_v57 }
 0x35e   :  { %v3244_v29 = vmax.f32 %v3010_v6, 0.0  ;;  %v3247_v42 = vmax.f32 %v3021_v4, 0.0  ;;  %v3675_v26 = vmax.f32 %v3673_v40, %v3674_v24  ;;  %v3679_v10 = vrot.slane %v3678_v38, 4 }
 0x35f   :  { %v5229_v43 = vpop.f32.mrf.mxu1  ;;  %v3665_v60 = vrot.slane %v3664_v34, 1  ;;  %v3690_v11 = vrot.slane %v3689_v55, 2  ;;  %v3703_v41 = vsel %vm1462_vm3, %v3246_v25, -inf  ;;  %v3013_v16 = vadd.f32 %v6589_v7, %v3012_v22 }
 0x360   :  { %v3704_v8 = vsel %vm1462_vm3, %v3247_v42, -inf  ;;  %v3034_v53 = vadd.f32 %v6589_v7, %v5229_v43  ;;  %v3680_v37 = vmax.f32 %v3678_v38, %v3679_v10  ;;  %v3694_v3 = vsel %vm1462_vm3, %v3244_v29, -inf }
 0x361   :  { %v3025_v52 = vpop.f32.mrf.mxu1  ;;  %v3666_v2 = vmax.f32 %v3664_v34, %v3665_v60  ;;  %v3691_v36 = vmax.f32 %v3689_v55, %v3690_v11  ;;  %v3705_v19 = vmax.f32 %v3703_v41, %v3704_v8  ;;  %v3245_v12 = vmax.f32 %v3013_v16, 0.0 }
 0x362   :  { %v3250_v51 = vmax.f32 %v3034_v53, 0.0  ;;  %v3026_v13 = vadd.f32 %v6589_v7, %v3025_v52  ;;  %v3681_v56 = vrot.slane %v3680_v37, 2  ;;  %v4218_v47 = vsel %vm4176_vm4, %v4153_v45, %v4152_v21 }
 0x363   :  { %v5230_v9 = vpop.f32.mrf.mxu1  ;;  %v4640_v5 = vpack.c.bf16 %v3666_v2, %v3666_v2  ;;  %v3692_v30 = vrot.slane %v3691_v36, 1  ;;  %v3706_v1 = vrot.slane %v3705_v19, 4  ;;  %v3695_v44 = vsel %vm1462_vm3, %v3245_v12, -inf }
 0x364   :  { %v3248_v32 = vmax.f32 %v3026_v13, 0.0  ;;  %v3037_v48 = vadd.f32 %v6589_v7, %v5230_v9  ;;  %v3682_v58 = vmax.f32 %v3680_v37, %v3681_v56  ;;  %v4641_v59 = vpack.c.bf16 %v3675_v26, %v3675_v26 }
 0x365   :  { %v3028_v46 = vpop.f32.mrf.mxu1  ;;  %v4154_v17 = vunpack.c.l.b16 %v4640_v5  ;;  %v3693_v27 = vmax.f32 %v3691_v36, %v3692_v30  ;;  %v3707_v39 = vmax.f32 %v3705_v19, %v3706_v1  ;;  %v3696_v18 = vmax.f32 %v3694_v3, %v3695_v44 }
 0x366   :  { %v3251_v20 = vmax.f32 %v3037_v48, 0.0  ;;  %v3029_v23 = vadd.f32 %v6589_v7, %v3028_v46  ;;  %v3683_v33 = vrot.slane %v3682_v58, 1  ;;  %v3721_v31 = vsel %vm1462_vm3, %v3250_v51, -inf }
 0x367   :  { %v5233_v49 = vpop.f32.mrf.mxu1  ;;  %v3708_v62 = vrot.slane %v3707_v39, 2  ;;  %v3712_v61 = vsel %vm1462_vm3, %v3248_v32, -inf  ;;  %v4219_v63 = vsel %vm4178_vm5, %v4154_v17, %v4218_v47  ;;  %v3697_v40 = vrot.slane %v3696_v18, 4 }
 0x368   :  { %v3722_v50 = vsel %vm1462_vm3, %v3251_v20, -inf  ;;  %v3249_v35 = vmax.f32 %v3029_v23, 0.0  ;;  %v4643_v28 = vpack.c.bf16 %v3693_v27, %v3693_v27  ;;  %v3684_v57 = vmax.f32 %v3682_v58, %v3683_v33 }
 0x369   :  { %v3041_v6 = vpop.f32.mrf.mxu1  ;;  %v3709_v14 = vmax.f32 %v3707_v39, %v3708_v62  ;;  %v3723_v54 = vmax.f32 %v3721_v31, %v3722_v50  ;;  %v3698_v4 = vmax.f32 %v3696_v18, %v3697_v40  ;;  %v3050_v15 = vadd.f32 %v6589_v7, %v5233_v49 }
 0x36a   :  { %v3713_v24 = vsel %vm1462_vm3, %v3249_v35, -inf  ;;  %v3042_v0 = vadd.f32 %v6589_v7, %v3041_v6  ;;  %v4642_v22 = vpack.c.bf16 %v3684_v57, %v3684_v57  ;;  %v4155_v45 = vunpack.c.l.b16 %v4641_v59 }
 0x36b   :  { %v5234_v25 = vpop.f32.mrf.mxu1  ;;  %v3710_v34 = vrot.slane %v3709_v14, 1  ;;  %v3724_v55 = vrot.slane %v3723_v54, 4  ;;  %v3714_v38 = vmax.f32 %v3712_v61, %v3713_v24  ;;  %v3699_v21 = vrot.slane %v3698_v4, 2 }
 0x36c   :  { %v3254_v29 = vmax.f32 %v3050_v15, 0.0  ;;  %v3053_v42 = vadd.f32 %v6589_v7, %v5234_v25  ;;  %v4156_v26 = vunpack.c.l.b16 %v4642_v22  ;;  %v4157_v41 = vunpack.c.l.b16 %v4643_v28 }
 0x36d   :  { %v3044_v43 = vpop.f32.mrf.mxu1  ;;  %v3711_v60 = vmax.f32 %v3709_v14, %v3710_v34  ;;  %v3725_v11 = vmax.f32 %v3723_v54, %v3724_v55  ;;  %v3715_v10 = vrot.slane %v3714_v38, 4  ;;  %v4220_v8 = vsel %vm4180_vm6, %v4155_v45, %v4219_v63 }
 0x36e   :  { %v3700_v16 = vmax.f32 %v3698_v4, %v3699_v21  ;;  %v3255_v53 = vmax.f32 %v3053_v42, 0.0  ;;  %v3739_v37 = vsel %vm1462_vm3, %v3254_v29, -inf  ;;  %v3252_v19 = vmax.f32 %v3042_v0, 0.0 }
 0x36f   :  { %v5237_v52 = vpop.f32.mrf.mxu1  ;;  %v3726_v2 = vrot.slane %v3725_v11, 2  ;;  %v3716_v36 = vmax.f32 %v3714_v38, %v3715_v10  ;;  %v4221_v3 = vsel %vm4182_vm7, %v4156_v26, %v4220_v8  ;;  %v3045_v13 = vadd.f32 %v6589_v7, %v3044_v43 }
 0x370   :  { %v3701_v12 = vrot.slane %v3700_v16, 1  ;;  %v3740_v51 = vsel %vm1462_vm3, %v3255_v53, -inf  ;;  %v4645_v5 = vpack.c.bf16 %v3711_v60, %v3711_v60  ;;  %v3066_v32 = vadd.f32 %v6589_v7, %v5237_v52 }
 0x371   :  { %v3057_v9 = vpop.f32.mrf.mxu1  ;;  %v3727_v30 = vmax.f32 %v3725_v11, %v3726_v2  ;;  %v3717_v56 = vrot.slane %v3716_v36, 2  ;;  %v3741_v1 = vmax.f32 %v3739_v37, %v3740_v51  ;;  %v3253_v44 = vmax.f32 %v3045_v13, 0.0 }
 0x372   :  { %v3702_v47 = vmax.f32 %v3700_v16, %v3701_v12  ;;  %v3058_v48 = vadd.f32 %v6589_v7, %v3057_v9  ;;  %v3730_v18 = vsel %vm1462_vm3, %v3252_v19, -inf  ;;  %v3258_v23 = vmax.f32 %v3066_v32, 0.0 }
 0x373   :  { %v5238_v46 = vpop.f32.mrf.mxu1  ;;  %v3728_v17 = vrot.slane %v3727_v30, 1  ;;  %v3718_v27 = vmax.f32 %v3716_v36, %v3717_v56  ;;  %v3742_v58 = vrot.slane %v3741_v1, 4  ;;  %v3731_v20 = vsel %vm1462_vm3, %v3253_v44, -inf }
 0x374   :  { %v3069_v39 = vadd.f32 %v6589_v7, %v5238_v46  ;;  %v4644_v59 = vpack.c.bf16 %v3702_v47, %v3702_v47  ;;  %v3732_v61 = vmax.f32 %v3730_v18, %v3731_v20  ;;  %v4222_v40 = vsel %vm4184_vm8, %v4157_v41, %v4221_v3 }
 0x375   :  { %v3060_v49 = vpop.f32.mrf.mxu1  ;;  %v3729_v33 = vmax.f32 %v3727_v30, %v3728_v17  ;;  %v3719_v62 = vrot.slane %v3718_v27, 1  ;;  %v3743_v31 = vmax.f32 %v3741_v1, %v3742_v58  ;;  %v4159_v6 = vunpack.c.l.b16 %v4645_v5  ;;  %v6749_v5 = vld [vmem:[%s6816_s6] ss:$0 sm:$0xff] }
 0x376   :  { %v4158_v63 = vunpack.c.l.b16 %v4644_v59  ;;  %v3259_v50 = vmax.f32 %v3069_v39, 0.0  ;;  %v3733_v57 = vrot.slane %v3732_v61, 4  ;;  %v3256_v14 = vmax.f32 %v3058_v48, 0.0 }
 0x377   :  { %v5241_v35 = vpop.f32.mrf.mxu1  ;;  %v3744_v28 = vrot.slane %v3743_v31, 2  ;;  %v3061_v24 = vadd.f32 %v6589_v7, %v3060_v49  ;;  %v4647_v22 = vpack.c.bf16 %v3729_v33, %v3729_v33  ;;  %v3720_v34 = vmax.f32 %v3718_v27, %v3719_v62 }
 0x378   :  { %v4223_v54 = vsel %vm4186_vm9, %v4158_v63, %v4222_v40  ;;  %v3758_v4 = vsel %vm1462_vm3, %v3259_v50, -inf  ;;  %v3082_v15 = vadd.f32 %v6589_v7, %v5241_v35  ;;  %v3757_v55 = vsel %vm1462_vm3, %v3258_v23, -inf }
 0x379   :  { %v3073_v0 = vpop.f32.mrf.mxu1  ;;  %v4224_v25 = vsel %vm4188_vm10, %v4159_v6, %v4223_v54  ;;  %v3734_v45 = vmax.f32 %v3732_v61, %v3733_v57  ;;  %v3759_v21 = vmax.f32 %v3757_v55, %v3758_v4  ;;  %v3257_v29 = vmax.f32 %v3061_v24, 0.0 }
 0x37a   :  { %v4244_v38 = vpack.c.b16 %v4224_v25, %v4224_v25  ;;  %v3745_v43 = vmax.f32 %v3743_v31, %v3744_v28  ;;  %v3748_v26 = vsel %vm1462_vm3, %v3256_v14, -inf  ;;  %v3262_v60 = vmax.f32 %v3082_v15, 0.0 }
 0x37b   :  { %v5242_v42 = vpop.f32.mrf.mxu1  ;;  %v3074_v11 = vadd.f32 %v6589_v7, %v3073_v0  ;;  %v3735_v10 = vrot.slane %v3734_v45, 2  ;;  %v3760_v41 = vrot.slane %v3759_v21, 4  ;;  %v3749_v8 = vsel %vm1462_vm3, %v3257_v29, -inf }
 0x37c   :  { %4261 = vst.msk [vmem:[%s6817_s7 + $0x14] sm:$0xf] %vm4255_vm11, %v4244_v38  ;;  %v3085_v16 = vadd.f32 %v6589_v7, %v5242_v42  ;;  %v4161_v52 = vunpack.c.l.b16 %v4647_v22  ;;  %v4646_v2 = vpack.c.bf16 %v3720_v34, %v3720_v34  ;;  %v3750_v36 = vmax.f32 %v3748_v26, %v3749_v8 }
 0x37d   :  { %v3076_v53 = vpop.f32.mrf.mxu1  ;;  %v3736_v37 = vmax.f32 %v3734_v45, %v3735_v10  ;;  %v3761_v19 = vmax.f32 %v3759_v21, %v3760_v41  ;;  %v3260_v3 = vmax.f32 %v3074_v11, 0.0  ;;  %v3746_v13 = vrot.slane %v3745_v43, 1 }
 0x37e   :  { %v3263_v12 = vmax.f32 %v3085_v16, 0.0  ;;  %v3751_v9 = vrot.slane %v3750_v36, 4  ;;  %v3077_v30 = vadd.f32 %v6749_v5, %v3076_v53  ;;  %v3775_v47 = vsel %vm1462_vm3, %v3262_v60, -inf }
 0x37f   :  { %v5245_v51 = vpop.f32.mrf.mxu1  ;;  %v3737_v56 = vrot.slane %v3736_v37, 1  ;;  %v3762_v1 = vrot.slane %v3761_v19, 2  ;;  %v3766_v46 = vsel %vm1462_vm3, %v3260_v3, -inf  ;;  %v4160_v31 = vunpack.c.l.b16 %v4646_v2 }
 0x380   :  { %v3098_v7 = vadd.f32 %v6749_v5, %v5245_v51  ;;  %v3776_v44 = vsel %vm1462_vm3, %v3263_v12, -inf  ;;  %v3752_v48 = vmax.f32 %v3750_v36, %v3751_v9  ;;  %v3261_v27 = vmax.f32 %v3077_v30, 0.0 }
 0x381   :  { %v3089_v32 = vpop.f32.mrf.mxu1  ;;  %v3777_v17 = vmax.f32 %v3775_v47, %v3776_v44  ;;  %v3738_v58 = vmax.f32 %v3736_v37, %v3737_v56  ;;  %v3763_v39 = vmax.f32 %v3761_v19, %v3762_v1  ;;  %v3747_v61 = vmax.f32 %v3745_v43, %v3746_v13 }
 0x382   :  { %v3266_v59 = vmax.f32 %v3098_v7, 0.0  ;;  %v3090_v18 = vadd.f32 %v6749_v5, %v3089_v32  ;;  %v3753_v23 = vrot.slane %v3752_v48, 2  ;;  %v3767_v33 = vsel %vm1462_vm3, %v3261_v27, -inf }
 0x383   :  { %v5246_v20 = vpop.f32.mrf.mxu1  ;;  %v3778_v49 = vrot.slane %v3777_v17, 4  ;;  %v4648_v63 = vpack.c.bf16 %v3738_v58, %v3738_v58  ;;  %v3768_v40 = vmax.f32 %v3766_v46, %v3767_v33  ;;  %v3764_v35 = vrot.slane %v3763_v39, 1 }
 0x384   :  { %v3101_v62 = vadd.f32 %v6749_v5, %v5246_v20  ;;  %v3754_v6 = vmax.f32 %v3752_v48, %v3753_v23  ;;  %v3793_v54 = vsel %vm1462_vm3, %v3266_v59, -inf  ;;  %v3264_v4 = vmax.f32 %v3090_v18, 0.0 }
 0x385   :  { %v3092_v50 = vpop.f32.mrf.mxu1  ;;  %v3779_v28 = vmax.f32 %v3777_v17, %v3778_v49  ;;  %v3769_v14 = vrot.slane %v3768_v40, 4  ;;  %v4162_v0 = vunpack.c.l.b16 %v4648_v63  ;;  %v4225_v55 = vsel %vm4176_vm4, %v4161_v52, %v4160_v31 }
 0x386   :  { %v3267_v57 = vmax.f32 %v3101_v62, 0.0  ;;  %v3093_v24 = vadd.f32 %v6749_v5, %v3092_v50  ;;  %v3755_v25 = vrot.slane %v3754_v6, 1  ;;  %v4649_v29 = vpack.c.bf16 %v3747_v61, %v3747_v61 }
 0x387   :  { %v5249_v15 = vpop.f32.mrf.mxu1  ;;  %v3780_v22 = vrot.slane %v3779_v28, 2  ;;  %v3770_v38 = vmax.f32 %v3768_v40, %v3769_v14  ;;  %v3765_v60 = vmax.f32 %v3763_v39, %v3764_v35  ;;  %v3784_v10 = vsel %vm1462_vm3, %v3264_v4, -inf }
 0x388   :  { %v3794_v34 = vsel %vm1462_vm3, %v3267_v57, -inf  ;;  %v3756_v42 = vmax.f32 %v3754_v6, %v3755_v25  ;;  %v3265_v26 = vmax.f32 %v3093_v24, 0.0  ;;  %v3114_v41 = vadd.f32 %v6749_v5, %v5249_v15 }
 0x389   :  { %v3795_v45 = vmax.f32 %v3793_v54, %v3794_v34  ;;  %v3105_v21 = vpop.f32.mrf.mxu1  ;;  %v3781_v43 = vmax.f32 %v3779_v28, %v3780_v22  ;;  %v3771_v11 = vrot.slane %v3770_v38, 2  ;;  %v4226_v16 = vsel %vm4178_vm5, %v4162_v0, %v4225_v55 }
 0x38a   :  { %v4650_v53 = vpack.c.bf16 %v3756_v42, %v3756_v42  ;;  %v3785_v52 = vsel %vm1462_vm3, %v3265_v26, -inf  ;;  %v3270_v3 = vmax.f32 %v3114_v41, 0.0  ;;  %v4163_v51 = vunpack.c.l.b16 %v4649_v29 }
 0x38b   :  { %v5250_v8 = vpop.f32.mrf.mxu1  ;;  %v3782_v2 = vrot.slane %v3781_v43, 1  ;;  %v3772_v36 = vmax.f32 %v3770_v38, %v3771_v11  ;;  %v3796_v37 = vrot.slane %v3795_v45, 4  ;;  %v3786_v19 = vmax.f32 %v3784_v10, %v3785_v52 }
 0x38c   :  { %v3117_v9 = vadd.f32 %v6749_v5, %v5250_v8  ;;  %v4164_v30 = vunpack.c.l.b16 %v4650_v53  ;;  %v3106_v1 = vadd.f32 %v6749_v5, %v3105_v21  ;;  %v4651_v44 = vpack.c.bf16 %v3765_v60, %v3765_v60 }
 0x38d   :  { %v3108_v12 = vpop.f32.mrf.mxu1  ;;  %v3783_v13 = vmax.f32 %v3781_v43, %v3782_v2  ;;  %v3773_v7 = vrot.slane %v3772_v36, 1  ;;  %v3787_v56 = vrot.slane %v3786_v19, 4  ;;  %v4227_v32 = vsel %vm4180_vm6, %v4163_v51, %v4226_v16 }
 0x38e   :  { %v3271_v48 = vmax.f32 %v3117_v9, 0.0  ;;  %v3797_v17 = vmax.f32 %v3795_v45, %v3796_v37  ;;  %v3811_v58 = vsel %vm1462_vm3, %v3270_v3, -inf  ;;  %v3109_v20 = vadd.f32 %v6749_v5, %v3108_v12 }
 0x38f   :  { %v5253_v47 = vpop.f32.mrf.mxu1  ;;  %v3774_v46 = vmax.f32 %v3772_v36, %v3773_v7  ;;  %v3788_v27 = vmax.f32 %v3786_v19, %v3787_v56  ;;  %v4653_v59 = vpack.c.bf16 %v3783_v13, %v3783_v13  ;;  %v4228_v49 = vsel %vm4182_vm7, %v4164_v30, %v4227_v32 }
 0x390   :  { %v3812_v18 = vsel %vm1462_vm3, %v3271_v48, -inf  ;;  %v3130_v23 = vadd.f32 %v6749_v5, %v5253_v47  ;;  %v3268_v62 = vmax.f32 %v3106_v1, 0.0  ;;  %v4165_v63 = vunpack.c.l.b16 %v4651_v44 }
 0x391   :  { %v3121_v39 = vpop.f32.mrf.mxu1  ;;  %v4652_v33 = vpack.c.bf16 %v3774_v46, %v3774_v46  ;;  %v3813_v31 = vmax.f32 %v3811_v58, %v3812_v18  ;;  %v3789_v40 = vrot.slane %v3788_v27, 2  ;;  %v3269_v50 = vmax.f32 %v3109_v20, 0.0 }
 0x392   :  { %v3274_v57 = vmax.f32 %v3130_v23, 0.0  ;;  %v3122_v14 = vadd.f32 %v6749_v5, %v3121_v39  ;;  %v4167_v4 = vunpack.c.l.b16 %v4653_v59  ;;  %v4229_v24 = vsel %vm4184_vm8, %v4165_v63, %v4228_v49 }
 0x393   :  { %v5254_v61 = vpop.f32.mrf.mxu1  ;;  %v4166_v6 = vunpack.c.l.b16 %v4652_v33  ;;  %v3814_v28 = vrot.slane %v3813_v31, 4  ;;  %v3803_v15 = vsel %vm1462_vm3, %v3269_v50, -inf  ;;  %v3798_v22 = vrot.slane %v3797_v17, 2 }
 0x394   :  { %v3133_v35 = vadd.f32 %v6749_v5, %v5254_v61  ;;  %v3802_v34 = vsel %vm1462_vm3, %v3268_v62, -inf  ;;  %v3790_v43 = vmax.f32 %v3788_v27, %v3789_v40  ;;  %v3829_v26 = vsel %vm1462_vm3, %v3274_v57, -inf }
 0x395   :  { %v3124_v54 = vpop.f32.mrf.mxu1  ;;  %v4230_v25 = vsel %vm4186_vm9, %v4166_v6, %v4229_v24  ;;  %v3815_v55 = vmax.f32 %v3813_v31, %v3814_v28  ;;  %v3804_v21 = vmax.f32 %v3802_v34, %v3803_v15  ;;  %v3272_v60 = vmax.f32 %v3122_v14, 0.0 }
 0x396   :  { %v3275_v0 = vmax.f32 %v3133_v35, 0.0  ;;  %v4231_v45 = vsel %vm4188_vm10, %v4167_v4, %v4230_v25  ;;  %v3125_v8 = vadd.f32 %v6749_v5, %v3124_v54  ;;  %v3799_v53 = vmax.f32 %v3797_v17, %v3798_v22 }
 0x397   :  { %v5257_v38 = vpop.f32.mrf.mxu1  ;;  %v4245_v42 = vpack.c.b16 %v4231_v45, %v4231_v45  ;;  %v3805_v10 = vrot.slane %v3804_v21, 4  ;;  %v3816_v2 = vrot.slane %v3815_v55, 2  ;;  %v3791_v12 = vrot.slane %v3790_v43, 1 }
 0x398   :  { %v3830_v29 = vsel %vm1462_vm3, %v3275_v0, -inf  ;;  %v3146_v16 = vadd.f32 %v6749_v5, %v5257_v38  ;;  %v3273_v3 = vmax.f32 %v3125_v8, 0.0  ;;  %v3820_v51 = vsel %vm1462_vm3, %v3272_v60, -inf }
 0x399   :  { %v3137_v11 = vpop.f32.mrf.mxu1  ;;  %v3831_v41 = vmax.f32 %v3829_v26, %v3830_v29  ;;  %4262 = vst.msk [vmem:[%s6817_s7 + $0x18] sm:$0xf] %vm4255_vm11, %v4245_v42  ;;  %v3806_v37 = vmax.f32 %v3804_v21, %v3805_v10  ;;  %v3800_v47 = vrot.slane %v3799_v53, 1  ;;  %v3817_v44 = vmax.f32 %v3815_v55, %v3816_v2 }
 0x39a   :  { %v3138_v52 = vadd.f32 %v6749_v5, %v3137_v11  ;;  %v3821_v56 = vsel %vm1462_vm3, %v3273_v3, -inf  ;;  %v3278_v1 = vmax.f32 %v3146_v16, 0.0  ;;  %v3792_v39 = vmax.f32 %v3790_v43, %v3791_v12 }
 0x39b   :  { %v5258_v36 = vpop.f32.mrf.mxu1  ;;  %v3832_v19 = vrot.slane %v3831_v41, 4  ;;  %v3807_v30 = vrot.slane %v3806_v37, 2  ;;  %v3822_v32 = vmax.f32 %v3820_v51, %v3821_v56  ;;  %v3801_v33 = vmax.f32 %v3799_v53, %v3800_v47 }
 0x39c   :  { %v3149_v13 = vadd.f32 %v6749_v5, %v5258_v36  ;;  %v3276_v48 = vmax.f32 %v3138_v52, 0.0  ;;  %v3847_v20 = vsel %vm1462_vm3, %v3278_v1, -inf  ;;  %v3818_v62 = vrot.slane %v3817_v44, 1 }
 0x39d   :  { %v3140_v9 = vpop.f32.mrf.mxu1  ;;  %v3833_v7 = vmax.f32 %v3831_v41, %v3832_v19  ;;  %v3808_v46 = vmax.f32 %v3806_v37, %v3807_v30  ;;  %v3823_v59 = vrot.slane %v3822_v32, 4  ;;  %v4654_v57 = vpack.c.bf16 %v3792_v39, %v3792_v39 }
 0x39e   :  { %v3279_v27 = vmax.f32 %v3149_v13, 0.0  ;;  %v3141_v58 = vadd.f32 %v6749_v5, %v3140_v9  ;;  %v3838_v50 = vsel %vm1462_vm3, %v3276_v48, -inf  ;;  %v4655_v15 = vpack.c.bf16 %v3801_v33, %v3801_v33 }
 0x39f   :  { %v3834_v17 = vrot.slane %v3833_v7, 2  ;;  %v3809_v18 = vrot.slane %v3808_v46, 1  ;;  %v3824_v31 = vmax.f32 %v3822_v32, %v3823_v59  ;;  %v3819_v0 = vmax.f32 %v3817_v44, %v3818_v62 }
 0x3a0   :  { %v3848_v23 = vsel %vm1462_vm3, %v3279_v27, -inf  ;;  %v3277_v49 = vmax.f32 %v3141_v58, 0.0  ;;  %v4168_v38 = vunpack.c.l.b16 %v4654_v57  ;;  %v4169_v43 = vunpack.c.l.b16 %v4655_v15 }
 0x3a1   :  { %v3849_v61 = vmax.f32 %v3847_v20, %v3848_v23  ;;  %v3810_v63 = vmax.f32 %v3808_v46, %v3809_v18  ;;  %v3835_v40 = vmax.f32 %v3833_v7, %v3834_v17  ;;  %v3825_v6 = vrot.slane %v3824_v31, 2 }
 0x3a2   :  { %v3839_v35 = vsel %vm1462_vm3, %v3277_v49, -inf  ;;  %v4657_v26 = vpack.c.bf16 %v3819_v0, %v3819_v0  ;;  %v4232_v8 = vsel %vm4176_vm4, %v4169_v43, %v4168_v38 }
 0x3a3   :  { %v3850_v5 = vrot.slane %v3849_v61, 4  ;;  %v3840_v28 = vmax.f32 %v3838_v50, %v3839_v35  ;;  %v4656_v14 = vpack.c.bf16 %v3810_v63, %v3810_v63  ;;  %v3826_v54 = vmax.f32 %v3824_v31, %v3825_v6 }
 0x3a4   :  { %v3836_v25 = vrot.slane %v3835_v40, 1  ;;  %v4171_v36 = vunpack.c.l.b16 %v4657_v26 }
 0x3a5   :  { %v3851_v4 = vmax.f32 %v3849_v61, %v3850_v5  ;;  %v3841_v24 = vrot.slane %v3840_v28, 4  ;;  %v3827_v22 = vrot.slane %v3826_v54, 1  ;;  %v4170_v45 = vunpack.c.l.b16 %v4656_v14 }
 0x3a6   :  { %v3837_v60 = vmax.f32 %v3835_v40, %v3836_v25 }
 0x3a7   :  { %v3852_v34 = vrot.slane %v3851_v4, 2  ;;  %v3842_v55 = vmax.f32 %v3840_v28, %v3841_v24  ;;  %v3828_v21 = vmax.f32 %v3826_v54, %v3827_v22  ;;  %v4233_v16 = vsel %vm4178_vm5, %v4170_v45, %v4232_v8 }
 0x3a8   :  { %v4659_v37 = vpack.c.bf16 %v3837_v60, %v3837_v60  ;;  %v4234_v3 = vsel %vm4180_vm6, %v4171_v36, %v4233_v16 }
 0x3a9   :  { %v3853_v29 = vmax.f32 %v3851_v4, %v3852_v34  ;;  %v3843_v42 = vrot.slane %v3842_v55, 2  ;;  %v4658_v11 = vpack.c.bf16 %v3828_v21, %v3828_v21 }
 0x3aa   :  { %v4173_v9 = vunpack.c.l.b16 %v4659_v37 }
 0x3ab   :  { %v3854_v10 = vrot.slane %v3853_v29, 1  ;;  %v3844_v41 = vmax.f32 %v3842_v55, %v3843_v42  ;;  %v4172_v53 = vunpack.c.l.b16 %v4658_v11 }
 0x3ad   :  { %v3855_v2 = vmax.f32 %v3853_v29, %v3854_v10  ;;  %v3845_v52 = vrot.slane %v3844_v41, 1  ;;  %v4235_v51 = vsel %vm4182_vm7, %v4172_v53, %v4234_v3 }
 0x3ae   :  { %v4236_v56 = vsel %vm4184_vm8, %v4173_v9, %v4235_v51 }
 0x3af   :  { %v3846_v19 = vmax.f32 %v3844_v41, %v3845_v52  ;;  %v4661_v12 = vpack.c.bf16 %v3855_v2, %v3855_v2 }
 0x3b1   :  { %v4660_v13 = vpack.c.bf16 %v3846_v19, %v3846_v19  ;;  %v4175_v7 = vunpack.c.l.b16 %v4661_v12 }
 0x3b3   :  { %v4174_v30 = vunpack.c.l.b16 %v4660_v13 }
 0x3b5   :  { %v4237_v1 = vsel %vm4186_vm9, %v4174_v30, %v4236_v56 }
 0x3b6   :  { %v4238_v47 = vsel %vm4188_vm10, %v4175_v7, %v4237_v1 }
 0x3b7   :  { %v4246_v44 = vpack.c.b16 %v4238_v47, %v4238_v47 }
 0x3b9   :  { %4263 = vst.msk [vmem:[%s6817_s7 + $0x1c] sm:$0xf] %vm4255_vm11, %v4246_v44 }

// kernel: rcnn_forward.8
= control target key start
LH: loop header
LB: loop body
LE: loop exit
PB: predicated region body
PF: predicated region fallthrough
CT: control target
= control target key end

     0   :  { %vm91_vm0 = vcmask 1040384   ;;  %vm92_vm1 = vcmask 1041408   ;;  %v552_v1 = vmov 65535   ;;  %vm84_vm2 = vcmask 547840   ;;  %s658_s1 = inlined_call_operand.vmem [shape: bf16[67,64], index: 1, kind: input, shape index: {}]   ;;  %s659_s0 = inlined_call_operand.vmem [shape: bf16[2,16,67], index: 0, kind: input, shape index: {}]   ;;  %s660_s3 = inlined_call_operand.vmem [shape: bf16[64,64], index: 3, kind: input, shape index: {}]   ;;  %s661_s5 = inlined_call_operand.vmem [shape: bf16[64,128], index: 5, kind: input, shape index: {}]   ;;  %s662_s2 = inlined_call_operand.vmem [shape: f32[1,64], index: 2, kind: input, shape index: {}]   ;;  %s663_s4 = inlined_call_operand.vmem [shape: f32[1,64], index: 4, kind: input, shape index: {}]   ;;  %s664_s6 = inlined_call_operand.vmem [shape: f32[1,128], index: 6, kind: input, shape index: {}]   ;;  %s665_s7 = inlined_call_operand.vmem [shape: bf16[2,128], index: 7, kind: output, shape index: {}]  }
   0x1   :  { %v537_v0 = vld [vmem:[%s658_s1 + $0x20] ss:$0 sps:$4 sm:$0x33]   ;;  %v93_v2 = vsel %vm91_vm0, 4294967295, %v552_v1  ;;  %v538_v5 = vld [vmem:[%s658_s1 + $0x18] sm:$0xff]   ;;  %v539_v7 = vld [vmem:[%s658_s1 + $0x10] sm:$0xff]  }
   0x2   :  { %v94_v3 = vsel %vm92_vm1, %v93_v2, 0  ;;  %v542_v6 = vld [vmem:[%s659_s0] sm:$0xff]   ;;  %v544_v8 = vld [vmem:[%s660_s3 + $0x18] sm:$0xff]   ;;  %v540_v9 = vld [vmem:[%s658_s1 + $0x8] sm:$0xff]   ;;  %vm192_vm3 = vcmask 523264   ;;  %vm429_vm4 = vcmask 1041409  }
   0x3   :  { %v96_v4 = vand.u32 %v537_v0, %v94_v3  ;;  %506 = vmatprep.mubr.msk.bf16.mxu0 %vm84_vm2, %v542_v6  ;;  %510 = vmatprep.subr.bf16.mxu1 %v544_v8  ;;  %v541_v10 = vld [vmem:[%s658_s1] sm:$0xff]   ;;  %v543_v11 = vld [vmem:[%s659_s0 + $0x8] sm:$0xff]   ;;  %v545_v12 = vld [vmem:[%s660_s3 + $0x10] sm:$0xff]   ;;  %v553_v1 = vmov 1966171168  }
   0x4   :  { %511 = vmatpush3.bf16.msra.mxu1 %v544_v8  ;;  %v546_v13 = vld [vmem:[%s660_s3 + $0x8] sm:$0xff]   ;;  %v547_v14 = vld [vmem:[%s660_s3] sm:$0xff]   ;;  %v548_v15 = vld [vmem:[%s661_s5 + $0x18] sm:$0xff]   ;;  %v371_v2 = vunpack.c.l.s4 %v553_v1 }
   0x5   :  { %496 = vmatprep.subr.bf16.mxu0 %v96_v4  ;;  %512 = vmatprep.subr.bf16.mxu1 %v545_v12  ;;  %v452_v18 = vld [vmem:[%s662_s2] ss:$0 sm:$0xff]  ;;  %v549_v31 = vld [vmem:[%s661_s5 + $0x10] sm:$0xff]   ;;  %v550_v32 = vld [vmem:[%s661_s5 + $0x8] sm:$0xff]  }
   0x6   :  { %497 = vmatpush3.bf16.msra.mxu0 %v96_v4  ;;  %v551_v33 = vld [vmem:[%s661_s5] sm:$0xff]   ;;  %v373_v4 = vlaneseq  ;;  %v372_v8 = vunpack.c.0.s8 %v371_v2 }
   0x7   :  { %498 = vmatprep.subr.bf16.mxu0 %v538_v5  ;;  %v462_v36 = vld [vmem:[%s663_s4] ss:$0 sm:$0xff] }
   0x8   :  { %513 = vmatpush3.bf16.msra.mxu1 %v545_v12  ;;  %v469_v50 = vld [vmem:[%s664_s6] ss:$0 sm:$0xff] }
   0x9   :  { %514 = vmatprep.subr.bf16.mxu1 %v546_v13 }
   0xa   :  { %499 = vmatpush3.bf16.msra.mxu0 %v538_v5 }
   0xb   :  { %500 = vmatprep.subr.bf16.mxu0 %v539_v7 }
   0xc   :  { %515 = vmatpush3.bf16.msra.mxu1 %v546_v13 }
   0xd   :  { %516 = vmatprep.subr.bf16.mxu1 %v547_v14 }
   0xe   :  { %501 = vmatpush3.bf16.msra.mxu0 %v539_v7 }
   0xf   :  { %502 = vmatprep.subr.bf16.mxu0 %v540_v9 }
  0x10   :  { %517 = vmatpush3.bf16.msra.mxu1 %v547_v14 }
  0x11   :  { %522 = vmatprep.subr.bf16.mxu1 %v548_v15 }
  0x12   :  { %503 = vmatpush3.bf16.msra.mxu0 %v540_v9 }
  0x13   :  { %504 = vmatprep.subr.bf16.mxu0 %v541_v10 }
  0x16   :  { %505 = vmatpush3.bf16.msra.mxu0 %v541_v10  ;;  %v374_v10 = vshrl.u32 %v373_v4, 7 }
  0x19   :  { %507 = vmatmul.mubr.msk.bf16.vlgmr.msra.gmra.mxu0 %vm84_vm2, %v543_v11  ;;  %v554_v11 = vmov 1935823168  }
  0x1a   :  { %v399_v12 = vunpack.c.l.s4 %v554_v11 }
  0xd9   :  { %v508_v16 = vpop.f32.mrf.mxu0 }
  0xda   :  { %v141_v22 = vadd.f32 %v508_v16, %v452_v18 }
  0xdb   :  { %v132_v17 = vpop.f32.mrf.mxu0 }
  0xdc   :  { %v133_v20 = vadd.f32 %v452_v18, %v132_v17  ;;  %v149_v28 = vmax.f32 %v141_v22, 0.0  ;;  %v375_v17 = vsub.s32 %v372_v8, %v374_v10 }
  0xdd   :  { %v509_v19 = vpop.f32.mrf.mxu0 }
  0xde   :  { %v144_v21 = vadd.f32 %v509_v19, %v452_v18  ;;  %v147_v26 = vmax.f32 %v133_v20, 0.0 }
  0xdf   :  { %v135_v23 = vpop.f32.mrf.mxu0 }
  0xe0   :  { %v136_v24 = vadd.f32 %v452_v18, %v135_v23  ;;  %v150_v25 = vmax.f32 %v144_v21, 0.0  ;;  %v400_v18 = vunpack.c.0.s8 %v399_v12 }
  0xe2   :  { %v148_v27 = vmax.f32 %v136_v24, 0.0  ;;  %v152_v30 = vpack.c.bf16 %v150_v25, %v149_v28  ;;  %v403_v23 = vsub.s32 %v400_v18, %v374_v10 }
  0xe4   :  { %v151_v29 = vpack.c.bf16 %v148_v27, %v147_v26 }
  0xe6   :  { %518 = vmatprep.mubr.msk.bf16.mxu1 %vm192_vm3, %v151_v29 }
  0xe7   :  { %519 = vmatmul.mubr.msk.bf16.vlgmr.msra.gmra.mxu1 %vm192_vm3, %v152_v30 }
  0xe8   :  { %523 = vmatpush3.bf16.msra.mxu1 %v548_v15 }
  0xe9   :  { %524 = vmatprep.subr.bf16.mxu1 %v549_v31 }
  0xec   :  { %525 = vmatpush3.bf16.msra.mxu1 %v549_v31 }
  0xed   :  { %526 = vmatprep.subr.bf16.mxu1 %v550_v32 }
  0xf0   :  { %527 = vmatpush3.bf16.msra.mxu1 %v550_v32 }
  0xf1   :  { %528 = vmatprep.subr.bf16.mxu1 %v551_v33 }
  0xf4   :  { %529 = vmatpush3.bf16.msra.mxu1 %v551_v33 }
 0x1a7   :  { %v520_v34 = vpop.f32.mrf.mxu1 }
 0x1a8   :  { %v242_v40 = vadd.f32 %v520_v34, %v462_v36 }
 0x1a9   :  { %v233_v35 = vpop.f32.mrf.mxu1 }
 0x1aa   :  { %v234_v38 = vadd.f32 %v462_v36, %v233_v35  ;;  %v250_v46 = vmax.f32 %v242_v40, 0.0 }
 0x1ab   :  { %v521_v37 = vpop.f32.mrf.mxu1 }
 0x1ac   :  { %v245_v39 = vadd.f32 %v521_v37, %v462_v36  ;;  %v248_v44 = vmax.f32 %v234_v38, 0.0 }
 0x1ad   :  { %v236_v41 = vpop.f32.mrf.mxu1 }
 0x1ae   :  { %v237_v42 = vadd.f32 %v462_v36, %v236_v41  ;;  %v251_v43 = vmax.f32 %v245_v39, 0.0 }
 0x1b0   :  { %v249_v45 = vmax.f32 %v237_v42, 0.0  ;;  %v253_v48 = vpack.c.bf16 %v251_v43, %v250_v46 }
 0x1b2   :  { %v252_v47 = vpack.c.bf16 %v249_v45, %v248_v44 }
 0x1b4   :  { %530 = vmatprep.mubr.msk.bf16.mxu1 %vm192_vm3, %v252_v47 }
 0x1b5   :  { %531 = vmatmul.mubr.msk.bf16.vlgmr.msra.gmra.mxu1 %vm192_vm3, %v253_v48 }
 0x275   :  { %v532_v49 = vpop.f32.mrf.mxu1 }
 0x276   :  { %v342_v52 = vadd.f32 %v532_v49, %v469_v50 }
 0x277   :  { %v333_v51 = vpop.f32.mrf.mxu1 }
 0x278   :  { %v334_v54 = vadd.f32 %v469_v50, %v333_v51  ;;  %v350_v57 = vmax.f32 %v342_v52, 0.0 }
 0x279   :  { %v533_v53 = vpop.f32.mrf.mxu1 }
 0x27a   :  { %v345_v55 = vadd.f32 %v533_v53, %v469_v50  ;;  %v348_v60 = vmax.f32 %v334_v54, 0.0 }
 0x27b   :  { %v336_v56 = vpop.f32.mrf.mxu1 }
 0x27c   :  { %v351_v58 = vmax.f32 %v345_v55, 0.0  ;;  %v337_v59 = vadd.f32 %v469_v50, %v336_v56 }
 0x27e   :  { %v359_v61 = vmax.f32 %v350_v57, %v351_v58  ;;  %v349_v62 = vmax.f32 %v337_v59, 0.0 }
 0x280   :  { %v360_v63 = vrot.slane %v359_v61, 4  ;;  %v352_v0 = vmax.f32 %v348_v60, %v349_v62 }
 0x282   :  { %v361_v3 = vmax.f32 %v359_v61, %v360_v63  ;;  %v353_v5 = vrot.slane %v352_v0, 4 }
 0x284   :  { %v362_v6 = vrot.slane %v361_v3, 2  ;;  %v354_v7 = vmax.f32 %v352_v0, %v353_v5 }
 0x286   :  { %v363_v9 = vmax.f32 %v361_v3, %v362_v6  ;;  %v355_v13 = vrot.slane %v354_v7, 2 }
 0x288   :  { %v364_v14 = vrot.slane %v363_v9, 1  ;;  %v356_v15 = vmax.f32 %v354_v7, %v355_v13 }
 0x28a   :  { %v365_v16 = vmax.f32 %v363_v9, %v364_v14  ;;  %v357_v19 = vrot.slane %v356_v15, 1 }
 0x28c   :  { %v367_v20 = vpack.c.bf16 %v365_v16, %v365_v16  ;;  %v358_v21 = vmax.f32 %v356_v15, %v357_v19 }
 0x28e   :  { %v390_v22 = vrot.slane %v367_v20, %v375_v17  ;;  %v366_v24 = vpack.c.bf16 %v358_v21, %v358_v21 }
 0x290   :  { %v397_v25 = vrot.slane %v390_v22, %v375_v17  ;;  %v376_v26 = vrot.slane %v366_v24, %v375_v17 }
 0x292   :  { %v418_v27 = vrot.slane %v397_v25, %v403_v23  ;;  %v383_v28 = vrot.slane %v376_v26, %v375_v17 }
 0x294   :  { %v425_v29 = vrot.slane %v418_v27, %v403_v23  ;;  %v404_v30 = vrot.slane %v383_v28, %v403_v23 }
 0x296   :  { %v427_v31 = vunpack.c.l.b16 %v425_v29  ;;  %v411_v32 = vrot.slane %v404_v30, %v403_v23 }
 0x298   :  { %v428_v33 = vrot.slane %v427_v31, 7  ;;  %v426_v34 = vunpack.c.l.b16 %v411_v32 }
 0x29a   :  { %v430_v35 = vsel %vm429_vm4, %v428_v33, %v426_v34 }
 0x29b   :  { %v431_v36 = vpack.c.b16 %v430_v35, %v430_v35 }
 0x29d   :  { %v438_v37 = vrot.slane %v431_v36, %v375_v17 }
 0x29f   :  { %476 = vst.sshfl [vmem:[%s665_s7] sm:$0x1 pattern:$0x73625140] %v438_v37 }

// kernel: rcnn_forward.9
= control target key start
LH: loop header
LB: loop body
LE: loop exit
PB: predicated region body
PF: predicated region fallthrough
CT: control target
= control target key end

     0   :  { %v415_v0 = vmov 0.0   ;;  %vm416_vm0 = vmmov 0   ;;  %vm180_vm1 = vcmask 523264   ;;  %s544_s1 = inlined_call_operand.vmem [shape: bf16[128,64], index: 1, kind: input, shape index: {}]   ;;  %s545_s3 = inlined_call_operand.vmem [shape: bf16[64,64], index: 3, kind: input, shape index: {}]   ;;  %s546_s0 = inlined_call_operand.vmem [shape: bf16[2,128], index: 0, kind: input, shape index: {}]   ;;  %s547_s5 = inlined_call_operand.vmem [shape: bf16[64,128], index: 5, kind: input, shape index: {}]   ;;  %s548_s2 = inlined_call_operand.vmem [shape: f32[1,64], index: 2, kind: input, shape index: {}]   ;;  %s549_s4 = inlined_call_operand.vmem [shape: f32[1,64], index: 4, kind: input, shape index: {}]   ;;  %s550_s6 = inlined_call_operand.vmem [shape: f32[1,128], index: 6, kind: input, shape index: {}]   ;;  %s551_s7 = inlined_call_operand.vmem [shape: f32[2,128], index: 7, kind: output, shape index: {}]  }
   0x1   :  { %353 = vmatprep.subr.bf16.mxu0 %v415_v0  ;;  %v399_v1 = vld [vmem:[%s544_s1 + $0x38] sm:$0xff]   ;;  %369 = vmatprep.mubr.msk.bf16.mxu0 %vm416_vm0, %v415_v0  ;;  %v400_v2 = vld [vmem:[%s544_s1 + $0x30] sm:$0xff]   ;;  %v401_v3 = vld [vmem:[%s544_s1 + $0x28] sm:$0xff]  }
   0x2   :  { %373 = vmatprep.subr.bf16.mxu1 %v415_v0  ;;  %381 = vmatprep.mubr.msk.bf16.mxu1 %vm416_vm0, %v415_v0  ;;  %v407_v4 = vld [vmem:[%s545_s3 + $0x18] sm:$0xff]   ;;  %v402_v5 = vld [vmem:[%s544_s1 + $0x20] sm:$0xff]   ;;  %v408_v6 = vld [vmem:[%s545_s3 + $0x10] sm:$0xff]  }
   0x3   :  { %354 = vmatpush3.bf16.msra.mxu0 %v399_v1  ;;  %374 = vmatpush3.bf16.msra.mxu1 %v407_v4  ;;  %v403_v7 = vld [vmem:[%s544_s1 + $0x18] sm:$0xff]   ;;  %v404_v8 = vld [vmem:[%s544_s1 + $0x10] sm:$0xff]   ;;  %v405_v9 = vld [vmem:[%s544_s1 + $0x8] sm:$0xff]  }
   0x4   :  { %355 = vmatprep.subr.bf16.mxu0 %v415_v0  ;;  %375 = vmatprep.subr.bf16.mxu1 %v415_v0  ;;  %v406_v10 = vld [vmem:[%s544_s1] sm:$0xff]   ;;  %v409_v12 = vld [vmem:[%s545_s3 + $0x8] sm:$0xff]   ;;  %v411_v20 = vld [vmem:[%s547_s5 + $0x18] sm:$0xff]  }
   0x5   :  { %v27_v11 = vld [vmem:[%s546_s0] sm:$0x1]  ;;  %v412_v23 = vld [vmem:[%s547_s5 + $0x10] sm:$0xff]   ;;  %v413_v24 = vld [vmem:[%s547_s5 + $0x8] sm:$0xff]  }
   0x6   :  { %v410_v13 = vld [vmem:[%s545_s3] sm:$0xff]  }
   0x7   :  { %356 = vmatpush3.bf16.msra.mxu0 %v400_v2  ;;  %376 = vmatpush3.bf16.msra.mxu1 %v408_v6  ;;  %v313_v14 = vld [vmem:[%s548_s2] ss:$0 sm:$0xff] }
   0x8   :  { %357 = vmatprep.subr.bf16.mxu0 %v415_v0  ;;  %377 = vmatprep.subr.bf16.mxu1 %v415_v0  ;;  %v414_v25 = vld [vmem:[%s547_s5] sm:$0xff]  }
   0x9   :  { %v322_v26 = vld [vmem:[%s549_s4] ss:$0 sm:$0xff] }
   0xa   :  { %v328_v34 = vld [vmem:[%s550_s6] ss:$0 sm:$0xff] }
   0xb   :  { %358 = vmatpush3.bf16.msra.mxu0 %v401_v3  ;;  %378 = vmatpush3.bf16.msra.mxu1 %v409_v12 }
   0xc   :  { %359 = vmatprep.subr.bf16.mxu0 %v415_v0  ;;  %379 = vmatprep.subr.bf16.mxu1 %v415_v0 }
   0xf   :  { %360 = vmatpush3.bf16.msra.mxu0 %v402_v5  ;;  %380 = vmatpush3.bf16.msra.mxu1 %v410_v13 }
  0x10   :  { %361 = vmatprep.subr.bf16.mxu0 %v415_v0  ;;  %385 = vmatprep.subr.bf16.mxu1 %v415_v0 }
  0x13   :  { %362 = vmatpush3.bf16.msra.mxu0 %v403_v7 }
  0x14   :  { %363 = vmatprep.subr.bf16.mxu0 %v415_v0 }
  0x17   :  { %364 = vmatpush3.bf16.msra.mxu0 %v404_v8 }
  0x18   :  { %365 = vmatprep.subr.bf16.mxu0 %v415_v0 }
  0x1b   :  { %366 = vmatpush3.bf16.msra.mxu0 %v405_v9 }
  0x1c   :  { %367 = vmatprep.subr.bf16.mxu0 %v415_v0 }
  0x1f   :  { %368 = vmatpush3.bf16.msra.mxu0 %v406_v10 }
  0x22   :  { %370 = vmatmul.mubr.bf16.vlgmr.msra.gmra.mxu0 %v27_v11 }
  0xe2   :  { %v133_v15 = vpop.f32.mrf.mxu0 }
  0xe3   :  { %v134_v16 = vadd.f32 %v313_v14, %v133_v15 }
  0xe4   :  { %v371_v17 = vpop.f32.mrf.mxu0 }
  0xe5   :  { %v139_v18 = vmax.f32 %v134_v16, 0.0 }
  0xe6   :  { %v136_v19 = vpop.f32.mrf.mxu0 }
  0xe7   :  { %v140_v21 = vpack.c.bf16 %v139_v18, %v139_v18 }
  0xe8   :  { %v372_v22 = vpop.f32.mrf.mxu0 }
  0xe9   :  { %382 = vmatmul.mubr.msk.bf16.vlgmr.msra.gmra.mxu1 %vm180_vm1, %v140_v21 }
  0xea   :  { %386 = vmatpush3.bf16.msra.mxu1 %v411_v20  ;;  %393 = vmatprep.mubr.msk.bf16.mxu1 %vm416_vm0, %v415_v0 }
  0xeb   :  { %387 = vmatprep.subr.bf16.mxu1 %v415_v0 }
  0xee   :  { %388 = vmatpush3.bf16.msra.mxu1 %v412_v23 }
  0xef   :  { %389 = vmatprep.subr.bf16.mxu1 %v415_v0 }
  0xf2   :  { %390 = vmatpush3.bf16.msra.mxu1 %v413_v24 }
  0xf3   :  { %391 = vmatprep.subr.bf16.mxu1 %v415_v0 }
  0xf6   :  { %392 = vmatpush3.bf16.msra.mxu1 %v414_v25 }
 0x1a9   :  { %v218_v27 = vpop.f32.mrf.mxu1 }
 0x1aa   :  { %v219_v28 = vadd.f32 %v322_v26, %v218_v27 }
 0x1ab   :  { %v383_v29 = vpop.f32.mrf.mxu1 }
 0x1ac   :  { %v224_v30 = vmax.f32 %v219_v28, 0.0 }
 0x1ad   :  { %v221_v31 = vpop.f32.mrf.mxu1 }
 0x1ae   :  { %v225_v32 = vpack.c.bf16 %v224_v30, %v224_v30 }
 0x1af   :  { %v384_v33 = vpop.f32.mrf.mxu1 }
 0x1b0   :  { %394 = vmatmul.mubr.msk.bf16.vlgmr.msra.gmra.mxu1 %vm180_vm1, %v225_v32 }
 0x270   :  { %v302_v35 = vpop.f32.mrf.mxu1 }
 0x271   :  { %v303_v36 = vadd.f32 %v328_v34, %v302_v35 }
 0x272   :  { %v395_v37 = vpop.f32.mrf.mxu1 }
 0x273   :  { %308 = vst [vmem:[%s551_s7] sm:$0x3] %v303_v36 }
 0x274   :  { %v305_v38 = vpop.f32.mrf.mxu1 }
 0x276   :  { %v396_v39 = vpop.f32.mrf.mxu1 }

// kernel: rcnn_forward.7
= control target key start
LH: loop header
LB: loop body
LE: loop exit
PB: predicated region body
PF: predicated region fallthrough
CT: control target
= control target key end

     0   :  { %vm375_vm0 = vcmask 1040384   ;;  %vm376_vm1 = vcmask 1041408   ;;  %v2801_v1 = vmov 65535   ;;  %vm278_vm2 = vcmask 285696   ;;  %s3374_s1 = inlined_call_operand.vmem [shape: bf16[35,32], index: 1, kind: input, shape index: {}]   ;;  %s3375_s0 = inlined_call_operand.vmem [shape: bf16[32,16,35], index: 0, kind: input, shape index: {}]   ;;  %s3376_s3 = inlined_call_operand.vmem [shape: bf16[32,32], index: 3, kind: input, shape index: {}]   ;;  %s3377_s2 = inlined_call_operand.vmem [shape: f32[1,32], index: 2, kind: input, shape index: {}]   ;;  %s3378_s5 = inlined_call_operand.vmem [shape: bf16[32,64], index: 5, kind: input, shape index: {}]   ;;  %s3379_s4 = inlined_call_operand.vmem [shape: f32[1,32], index: 4, kind: input, shape index: {}]   ;;  %s3380_s6 = inlined_call_operand.vmem [shape: f32[1,64], index: 6, kind: input, shape index: {}]   ;;  %s3381_s7 = inlined_call_operand.vmem [shape: bf16[32,64], index: 7, kind: output, shape index: {}]  }
   0x1   :  { %v2761_v0 = vld [vmem:[%s3374_s1 + $0x10] ss:$0 sps:$4 sm:$0x33]   ;;  %v377_v2 = vsel %vm375_vm0, 4294967295, %v2801_v1  ;;  %v2762_v5 = vld [vmem:[%s3374_s1 + $0x8] sm:$0xff]   ;;  %v2764_v6 = vld [vmem:[%s3375_s0] sm:$0xff]  }
   0x2   :  { %v378_v3 = vsel %vm376_vm1, %v377_v2, 0  ;;  %2556 = vmatprep.mubr.msk.bf16.mxu0 %vm278_vm2, %v2764_v6  ;;  %v2763_v7 = vld [vmem:[%s3374_s1] sm:$0xff]   ;;  %v2765_v8 = vld [vmem:[%s3375_s0 + $0x8] sm:$0xff]   ;;  %v2766_v9 = vld [vmem:[%s3375_s0 + $0x10] sm:$0xff]   ;;  %vm790_vm3 = vcmask 261120   ;;  %vm1744_vm4 = vcmask 523264  }
   0x3   :  { %v380_v4 = vand.u32 %v2761_v0, %v378_v3  ;;  %v2767_v10 = vld [vmem:[%s3375_s0 + $0x18] sm:$0xff]   ;;  %v2768_v11 = vld [vmem:[%s3375_s0 + $0x20] sm:$0xff]   ;;  %v2784_v12 = vld [vmem:[%s3376_s3 + $0x8] sm:$0xff]   ;;  %vm2193_vm5 = vcmask 1041409   ;;  %vm2195_vm6 = vcmask 1042434   ;;  %vm2197_vm7 = vcmask 1043459  }
   0x4   :  { %2756 = vmatprep.subr.bf16.mxu1 %v2784_v12  ;;  %v2769_v13 = vld [vmem:[%s3375_s0 + $0x28] sm:$0xff]   ;;  %v2770_v14 = vld [vmem:[%s3375_s0 + $0x30] sm:$0xff]   ;;  %v2771_v15 = vld [vmem:[%s3375_s0 + $0x38] sm:$0xff]   ;;  %vm2199_vm8 = vcmask 1044484   ;;  %vm2201_vm9 = vcmask 1045509   ;;  %vm2203_vm10 = vcmask 1046534  }
   0x5   :  { %2550 = vmatprep.subr.bf16.mxu0 %v380_v4  ;;  %2758 = vmatpush3.bf16.msra.mxu1 %v2784_v12  ;;  %v2797_v16 = vld [vmem:[%s3376_s3] sm:$0xff]   ;;  %v2773_v18 = vld [vmem:[%s3375_s0 + $0x48] sm:$0xff]   ;;  %v2774_v19 = vld [vmem:[%s3375_s0 + $0x50] sm:$0xff]   ;;  %vm2205_vm11 = vcmask 1047559   ;;  %vm2236_vm12 = vcmask 519168  }
   0x6   :  { %2551 = vmatpush3.bf16.msra.mxu0 %v380_v4  ;;  %v2772_v17 = vld [vmem:[%s3375_s0 + $0x40] sm:$0xff]   ;;  %2757 = vmatprep.subr.bf16.mxu1 %v2797_v16  ;;  %v2775_v20 = vld [vmem:[%s3375_s0 + $0x58] sm:$0xff]   ;;  %v2777_v22 = vld [vmem:[%s3375_s0 + $0x68] sm:$0xff]  }
   0x7   :  { %2552 = vmatprep.subr.bf16.mxu0 %v2762_v5  ;;  %v2776_v21 = vld [vmem:[%s3375_s0 + $0x60] sm:$0xff]   ;;  %v2778_v23 = vld [vmem:[%s3375_s0 + $0x70] sm:$0xff]   ;;  %v2779_v24 = vld [vmem:[%s3375_s0 + $0x78] sm:$0xff]  }
   0x8   :  { %v2780_v25 = vld [vmem:[%s3375_s0 + $0x80] sm:$0xff]   ;;  %v2781_v26 = vld [vmem:[%s3375_s0 + $0x88] sm:$0xff]   ;;  %v2782_v27 = vld [vmem:[%s3375_s0 + $0x90] sm:$0xff]  }
   0x9   :  { %2759 = vmatpush3.bf16.msra.mxu1 %v2797_v16  ;;  %v2783_v28 = vld [vmem:[%s3375_s0 + $0x98] sm:$0xff]   ;;  %v2785_v29 = vld [vmem:[%s3375_s0 + $0xa0] sm:$0xff]   ;;  %v2786_v30 = vld [vmem:[%s3375_s0 + $0xa8] sm:$0xff]  }
   0xa   :  { %2553 = vmatpush3.bf16.msra.mxu0 %v2762_v5  ;;  %v2787_v31 = vld [vmem:[%s3375_s0 + $0xb0] sm:$0xff]   ;;  %v2788_v32 = vld [vmem:[%s3375_s0 + $0xb8] sm:$0xff]   ;;  %v2789_v33 = vld [vmem:[%s3375_s0 + $0xc0] sm:$0xff]  }
   0xb   :  { %2554 = vmatprep.subr.bf16.mxu0 %v2763_v7  ;;  %v2790_v34 = vld [vmem:[%s3375_s0 + $0xc8] sm:$0xff]   ;;  %v2791_v35 = vld [vmem:[%s3375_s0 + $0xd0] sm:$0xff]   ;;  %v2792_v36 = vld [vmem:[%s3375_s0 + $0xd8] sm:$0xff]  }
   0xc   :  { %v2793_v37 = vld [vmem:[%s3375_s0 + $0xe0] sm:$0xff]   ;;  %v2794_v38 = vld [vmem:[%s3375_s0 + $0xe8] sm:$0xff]   ;;  %v2795_v39 = vld [vmem:[%s3375_s0 + $0xf0] sm:$0xff]  }
   0xd   :  { %v2796_v40 = vld [vmem:[%s3375_s0 + $0xf8] sm:$0xff]   ;;  %v2988_v43 = vld [vmem:[%s3377_s2] ss:$0 sm:$0xff]  ;;  %v2997_v50 = vld [vmem:[%s3378_s5 + $0x8] sm:$0xff]  }
   0xe   :  { %2555 = vmatpush3.bf16.msra.mxu0 %v2763_v7  ;;  %2688 = vmatprep.subr.bf16.mxu1 %v2997_v50 }
   0xf   :  { %2620 = vmatprep.subr.bf16.mxu0 %v2784_v12 }
  0x11   :  { %2557 = vmatmul.mubr.msk.bf16.vlgmr.msra.gmra.mxu0 %vm278_vm2, %v2765_v8 }
  0x12   :  { %2560 = vmatprep.mubr.msk.bf16.mxu0 %vm278_vm2, %v2766_v9  ;;  %2621 = vmatpush3.bf16.msra.mxu0 %v2784_v12 }
  0x13   :  { %2622 = vmatprep.subr.bf16.mxu0 %v2797_v16 }
  0x16   :  { %2623 = vmatpush3.bf16.msra.mxu0 %v2797_v16 }
  0x19   :  { %2561 = vmatmul.mubr.msk.bf16.gmra.mxu0 %vm278_vm2, %v2767_v10 }
  0x1a   :  { %2564 = vmatprep.mubr.msk.bf16.mxu0 %vm278_vm2, %v2768_v11 }
  0x21   :  { %2565 = vmatmul.mubr.msk.bf16.gmra.mxu0 %vm278_vm2, %v2769_v13 }
  0x22   :  { %2568 = vmatprep.mubr.msk.bf16.mxu0 %vm278_vm2, %v2770_v14 }
  0x29   :  { %2569 = vmatmul.mubr.msk.bf16.gmra.mxu0 %vm278_vm2, %v2771_v15 }
  0x2a   :  { %2572 = vmatprep.mubr.msk.bf16.mxu0 %vm278_vm2, %v2772_v17 }
  0x31   :  { %2573 = vmatmul.mubr.msk.bf16.gmra.mxu0 %vm278_vm2, %v2773_v18 }
  0x32   :  { %2576 = vmatprep.mubr.msk.bf16.mxu0 %vm278_vm2, %v2774_v19 }
  0x39   :  { %2577 = vmatmul.mubr.msk.bf16.gmra.mxu0 %vm278_vm2, %v2775_v20 }
  0x3a   :  { %2580 = vmatprep.mubr.msk.bf16.mxu0 %vm278_vm2, %v2776_v21 }
  0x41   :  { %2581 = vmatmul.mubr.msk.bf16.gmra.mxu0 %vm278_vm2, %v2777_v22 }
  0x42   :  { %2584 = vmatprep.mubr.msk.bf16.mxu0 %vm278_vm2, %v2778_v23 }
  0x49   :  { %2585 = vmatmul.mubr.msk.bf16.gmra.mxu0 %vm278_vm2, %v2779_v24 }
  0x4a   :  { %2588 = vmatprep.mubr.msk.bf16.mxu0 %vm278_vm2, %v2780_v25 }
  0x51   :  { %2589 = vmatmul.mubr.msk.bf16.gmra.mxu0 %vm278_vm2, %v2781_v26 }
  0x52   :  { %2592 = vmatprep.mubr.msk.bf16.mxu0 %vm278_vm2, %v2782_v27 }
  0x59   :  { %2593 = vmatmul.mubr.msk.bf16.gmra.mxu0 %vm278_vm2, %v2783_v28 }
  0x5a   :  { %2596 = vmatprep.mubr.msk.bf16.mxu0 %vm278_vm2, %v2785_v29 }
  0x61   :  { %2597 = vmatmul.mubr.msk.bf16.gmra.mxu0 %vm278_vm2, %v2786_v30 }
  0x62   :  { %2600 = vmatprep.mubr.msk.bf16.mxu0 %vm278_vm2, %v2787_v31 }
  0x69   :  { %2601 = vmatmul.mubr.msk.bf16.gmra.mxu0 %vm278_vm2, %v2788_v32 }
  0x6a   :  { %2604 = vmatprep.mubr.msk.bf16.mxu0 %vm278_vm2, %v2789_v33 }
  0x71   :  { %2605 = vmatmul.mubr.msk.bf16.gmra.mxu0 %vm278_vm2, %v2790_v34 }
  0x72   :  { %2608 = vmatprep.mubr.msk.bf16.mxu0 %vm278_vm2, %v2791_v35 }
  0x79   :  { %2609 = vmatmul.mubr.msk.bf16.gmra.mxu0 %vm278_vm2, %v2792_v36 }
  0x7a   :  { %2612 = vmatprep.mubr.msk.bf16.mxu0 %vm278_vm2, %v2793_v37 }
  0x81   :  { %2613 = vmatmul.mubr.msk.bf16.gmra.mxu0 %vm278_vm2, %v2794_v38 }
  0x82   :  { %2616 = vmatprep.mubr.msk.bf16.mxu0 %vm278_vm2, %v2795_v39 }
  0x89   :  { %2617 = vmatmul.mubr.msk.bf16.gmra.mxu0 %vm278_vm2, %v2796_v40 }
  0xd1   :  { %v2558_v41 = vpop.f32.mrf.mxu0 }
  0xd2   :  { %v425_v47 = vadd.f32 %v2558_v41, %v2988_v43 }
  0xd3   :  { %v416_v42 = vpop.f32.mrf.mxu0 }
  0xd4   :  { %v417_v45 = vadd.f32 %v2988_v43, %v416_v42  ;;  %v673_v55 = vmax.f32 %v425_v47, 0.0 }
  0xd5   :  { %v2559_v44 = vpop.f32.mrf.mxu0 }
  0xd6   :  { %v428_v46 = vadd.f32 %v2559_v44, %v2988_v43  ;;  %v671_v53 = vmax.f32 %v417_v45, 0.0 }
  0xd7   :  { %v419_v48 = vpop.f32.mrf.mxu0 }
  0xd8   :  { %v420_v49 = vadd.f32 %v2988_v43, %v419_v48  ;;  %v674_v51 = vmax.f32 %v428_v46, 0.0 }
  0xd9   :  { %v2562_v52 = vpop.f32.mrf.mxu0 }
  0xda   :  { %v672_v54 = vmax.f32 %v420_v49, 0.0  ;;  %v736_v58 = vpack.c.bf16 %v674_v51, %v673_v55  ;;  %v441_v62 = vadd.f32 %v2562_v52, %v2988_v43 }
  0xdb   :  { %v432_v56 = vpop.f32.mrf.mxu0 }
  0xdc   :  { %v735_v57 = vpack.c.bf16 %v672_v54, %v671_v53  ;;  %v433_v60 = vadd.f32 %v2988_v43, %v432_v56  ;;  %v677_v5 = vmax.f32 %v441_v62, 0.0 }
  0xdd   :  { %v2563_v59 = vpop.f32.mrf.mxu0 }
  0xde   :  { %v444_v61 = vadd.f32 %v2563_v59, %v2988_v43  ;;  %2624 = vmatprep.mubr.msk.bf16.mxu0 %vm790_vm3, %v735_v57  ;;  %v675_v3 = vmax.f32 %v433_v60, 0.0 }
  0xdf   :  { %v435_v63 = vpop.f32.mrf.mxu0  ;;  %2625 = vmatmul.mubr.msk.bf16.vlgmr.msra.gmra.mxu0 %vm790_vm3, %v736_v58 }
  0xe0   :  { %v436_v0 = vadd.f32 %v2988_v43, %v435_v63  ;;  %v678_v1 = vmax.f32 %v444_v61, 0.0 }
  0xe1   :  { %v2566_v2 = vpop.f32.mrf.mxu0 }
  0xe2   :  { %v676_v4 = vmax.f32 %v436_v0, 0.0  ;;  %v738_v8 = vpack.c.bf16 %v678_v1, %v677_v5  ;;  %v457_v12 = vadd.f32 %v2566_v2, %v2988_v43 }
  0xe3   :  { %v448_v6 = vpop.f32.mrf.mxu0 }
  0xe4   :  { %v737_v7 = vpack.c.bf16 %v676_v4, %v675_v3  ;;  %v449_v10 = vadd.f32 %v2988_v43, %v448_v6  ;;  %v681_v19 = vmax.f32 %v457_v12, 0.0 }
  0xe5   :  { %v2567_v9 = vpop.f32.mrf.mxu0 }
  0xe6   :  { %v460_v11 = vadd.f32 %v2567_v9, %v2988_v43  ;;  %2628 = vmatprep.mubr.msk.bf16.mxu0 %vm790_vm3, %v737_v7  ;;  %v679_v17 = vmax.f32 %v449_v10, 0.0 }
  0xe7   :  { %v451_v13 = vpop.f32.mrf.mxu0  ;;  %2629 = vmatmul.mubr.msk.bf16.gmra.mxu0 %vm790_vm3, %v738_v8 }
  0xe8   :  { %v452_v14 = vadd.f32 %v2988_v43, %v451_v13  ;;  %v682_v15 = vmax.f32 %v460_v11, 0.0 }
  0xe9   :  { %v2570_v16 = vpop.f32.mrf.mxu0 }
  0xea   :  { %v680_v18 = vmax.f32 %v452_v14, 0.0  ;;  %v740_v22 = vpack.c.bf16 %v682_v15, %v681_v19  ;;  %v473_v26 = vadd.f32 %v2570_v16, %v2988_v43 }
  0xeb   :  { %v464_v20 = vpop.f32.mrf.mxu0 }
  0xec   :  { %v739_v21 = vpack.c.bf16 %v680_v18, %v679_v17  ;;  %v465_v24 = vadd.f32 %v2988_v43, %v464_v20  ;;  %v685_v33 = vmax.f32 %v473_v26, 0.0 }
  0xed   :  { %v2571_v23 = vpop.f32.mrf.mxu0 }
  0xee   :  { %v476_v25 = vadd.f32 %v2571_v23, %v2988_v43  ;;  %2632 = vmatprep.mubr.msk.bf16.mxu0 %vm790_vm3, %v739_v21  ;;  %v683_v31 = vmax.f32 %v465_v24, 0.0 }
  0xef   :  { %v467_v27 = vpop.f32.mrf.mxu0  ;;  %2633 = vmatmul.mubr.msk.bf16.gmra.mxu0 %vm790_vm3, %v740_v22 }
  0xf0   :  { %v468_v28 = vadd.f32 %v2988_v43, %v467_v27  ;;  %v686_v29 = vmax.f32 %v476_v25, 0.0 }
  0xf1   :  { %v2574_v30 = vpop.f32.mrf.mxu0 }
  0xf2   :  { %v684_v32 = vmax.f32 %v468_v28, 0.0  ;;  %v742_v36 = vpack.c.bf16 %v686_v29, %v685_v33  ;;  %v489_v40 = vadd.f32 %v2574_v30, %v2988_v43 }
  0xf3   :  { %v480_v34 = vpop.f32.mrf.mxu0 }
  0xf4   :  { %v741_v35 = vpack.c.bf16 %v684_v32, %v683_v31  ;;  %v481_v38 = vadd.f32 %v2988_v43, %v480_v34  ;;  %v689_v48 = vmax.f32 %v489_v40, 0.0  ;;  %v2799_v32 = vld [vmem:[%s3378_s5] sm:$0xff]  }
  0xf5   :  { %v2575_v37 = vpop.f32.mrf.mxu0 }
  0xf6   :  { %v492_v39 = vadd.f32 %v2575_v37, %v2988_v43  ;;  %2636 = vmatprep.mubr.msk.bf16.mxu0 %vm790_vm3, %v741_v35  ;;  %v687_v46 = vmax.f32 %v481_v38, 0.0 }
  0xf7   :  { %v483_v41 = vpop.f32.mrf.mxu0  ;;  %2637 = vmatmul.mubr.msk.bf16.gmra.mxu0 %vm790_vm3, %v742_v36 }
  0xf8   :  { %v484_v42 = vadd.f32 %v2988_v43, %v483_v41  ;;  %v690_v44 = vmax.f32 %v492_v39, 0.0 }
  0xf9   :  { %v2578_v45 = vpop.f32.mrf.mxu0 }
  0xfa   :  { %v688_v47 = vmax.f32 %v484_v42, 0.0  ;;  %v744_v52 = vpack.c.bf16 %v690_v44, %v689_v48  ;;  %v505_v56 = vadd.f32 %v2578_v45, %v2988_v43 }
  0xfb   :  { %v496_v49 = vpop.f32.mrf.mxu0 }
  0xfc   :  { %v743_v51 = vpack.c.bf16 %v688_v47, %v687_v46  ;;  %v497_v54 = vadd.f32 %v2988_v43, %v496_v49  ;;  %v693_v63 = vmax.f32 %v505_v56, 0.0 }
  0xfd   :  { %v2579_v53 = vpop.f32.mrf.mxu0 }
  0xfe   :  { %v508_v55 = vadd.f32 %v2579_v53, %v2988_v43  ;;  %2640 = vmatprep.mubr.msk.bf16.mxu0 %vm790_vm3, %v743_v51  ;;  %v691_v61 = vmax.f32 %v497_v54, 0.0 }
  0xff   :  { %v499_v57 = vpop.f32.mrf.mxu0  ;;  %2641 = vmatmul.mubr.msk.bf16.gmra.mxu0 %vm790_vm3, %v744_v52 }
 0x100   :  { %v500_v58 = vadd.f32 %v2988_v43, %v499_v57  ;;  %v694_v59 = vmax.f32 %v508_v55, 0.0 }
 0x101   :  { %v2582_v60 = vpop.f32.mrf.mxu0 }
 0x102   :  { %v692_v62 = vmax.f32 %v500_v58, 0.0  ;;  %v746_v2 = vpack.c.bf16 %v694_v59, %v693_v63  ;;  %v521_v6 = vadd.f32 %v2582_v60, %v2988_v43 }
 0x103   :  { %v512_v0 = vpop.f32.mrf.mxu0 }
 0x104   :  { %v745_v1 = vpack.c.bf16 %v692_v62, %v691_v61  ;;  %v513_v4 = vadd.f32 %v2988_v43, %v512_v0  ;;  %v697_v13 = vmax.f32 %v521_v6, 0.0 }
 0x105   :  { %v2583_v3 = vpop.f32.mrf.mxu0 }
 0x106   :  { %v524_v5 = vadd.f32 %v2583_v3, %v2988_v43  ;;  %2644 = vmatprep.mubr.msk.bf16.mxu0 %vm790_vm3, %v745_v1  ;;  %v695_v11 = vmax.f32 %v513_v4, 0.0 }
 0x107   :  { %v515_v7 = vpop.f32.mrf.mxu0  ;;  %2645 = vmatmul.mubr.msk.bf16.gmra.mxu0 %vm790_vm3, %v746_v2 }
 0x108   :  { %v516_v8 = vadd.f32 %v2988_v43, %v515_v7  ;;  %v698_v9 = vmax.f32 %v524_v5, 0.0 }
 0x109   :  { %v2586_v10 = vpop.f32.mrf.mxu0 }
 0x10a   :  { %v696_v12 = vmax.f32 %v516_v8, 0.0  ;;  %v748_v16 = vpack.c.bf16 %v698_v9, %v697_v13  ;;  %v537_v20 = vadd.f32 %v2586_v10, %v2988_v43 }
 0x10b   :  { %v528_v14 = vpop.f32.mrf.mxu0 }
 0x10c   :  { %v747_v15 = vpack.c.bf16 %v696_v12, %v695_v11  ;;  %v529_v18 = vadd.f32 %v2988_v43, %v528_v14  ;;  %v701_v27 = vmax.f32 %v537_v20, 0.0 }
 0x10d   :  { %v2587_v17 = vpop.f32.mrf.mxu0 }
 0x10e   :  { %v540_v19 = vadd.f32 %v2587_v17, %v2988_v43  ;;  %2648 = vmatprep.mubr.msk.bf16.mxu0 %vm790_vm3, %v747_v15  ;;  %v699_v25 = vmax.f32 %v529_v18, 0.0 }
 0x10f   :  { %v531_v21 = vpop.f32.mrf.mxu0  ;;  %2649 = vmatmul.mubr.msk.bf16.gmra.mxu0 %vm790_vm3, %v748_v16 }
 0x110   :  { %v532_v22 = vadd.f32 %v2988_v43, %v531_v21  ;;  %v702_v23 = vmax.f32 %v540_v19, 0.0 }
 0x111   :  { %v2590_v24 = vpop.f32.mrf.mxu0 }
 0x112   :  { %v700_v26 = vmax.f32 %v532_v22, 0.0  ;;  %v750_v30 = vpack.c.bf16 %v702_v23, %v701_v27  ;;  %v553_v35 = vadd.f32 %v2590_v24, %v2988_v43 }
 0x113   :  { %v544_v28 = vpop.f32.mrf.mxu0 }
 0x114   :  { %v749_v29 = vpack.c.bf16 %v700_v26, %v699_v25  ;;  %v545_v33 = vadd.f32 %v2988_v43, %v544_v28  ;;  %v705_v42 = vmax.f32 %v553_v35, 0.0 }
 0x115   :  { %v2591_v31 = vpop.f32.mrf.mxu0 }
 0x116   :  { %v556_v34 = vadd.f32 %v2591_v31, %v2988_v43  ;;  %2652 = vmatprep.mubr.msk.bf16.mxu1 %vm790_vm3, %v749_v29  ;;  %v703_v40 = vmax.f32 %v545_v33, 0.0 }
 0x117   :  { %v547_v36 = vpop.f32.mrf.mxu0  ;;  %2653 = vmatmul.mubr.msk.bf16.vlgmr.msra.gmra.mxu1 %vm790_vm3, %v750_v30 }
 0x118   :  { %v548_v37 = vadd.f32 %v2988_v43, %v547_v36  ;;  %2689 = vmatpush3.bf16.msra.mxu1 %v2997_v50  ;;  %v706_v38 = vmax.f32 %v556_v34, 0.0 }
 0x119   :  { %v2594_v39 = vpop.f32.mrf.mxu0  ;;  %2690 = vmatprep.subr.bf16.mxu1 %v2799_v32 }
 0x11a   :  { %v704_v41 = vmax.f32 %v548_v37, 0.0  ;;  %v752_v46 = vpack.c.bf16 %v706_v38, %v705_v42  ;;  %v569_v51 = vadd.f32 %v2594_v39, %v2988_v43 }
 0x11b   :  { %v560_v44 = vpop.f32.mrf.mxu0 }
 0x11c   :  { %v751_v45 = vpack.c.bf16 %v704_v41, %v703_v40  ;;  %2691 = vmatpush3.bf16.msra.mxu1 %v2799_v32  ;;  %v561_v48 = vadd.f32 %v2988_v43, %v560_v44  ;;  %v709_v57 = vmax.f32 %v569_v51, 0.0 }
 0x11d   :  { %v2595_v47 = vpop.f32.mrf.mxu0 }
 0x11e   :  { %v572_v49 = vadd.f32 %v2595_v47, %v2988_v43  ;;  %2656 = vmatprep.mubr.msk.bf16.mxu1 %vm790_vm3, %v751_v45  ;;  %v707_v55 = vmax.f32 %v561_v48, 0.0 }
 0x11f   :  { %v563_v50 = vpop.f32.mrf.mxu0  ;;  %2657 = vmatmul.mubr.msk.bf16.gmra.mxu1 %vm790_vm3, %v752_v46 }
 0x120   :  { %v564_v52 = vadd.f32 %v2988_v43, %v563_v50  ;;  %v710_v53 = vmax.f32 %v572_v49, 0.0 }
 0x121   :  { %v2598_v54 = vpop.f32.mrf.mxu0 }
 0x122   :  { %v708_v56 = vmax.f32 %v564_v52, 0.0  ;;  %v754_v60 = vpack.c.bf16 %v710_v53, %v709_v57  ;;  %v585_v0 = vadd.f32 %v2598_v54, %v2988_v43 }
 0x123   :  { %v576_v58 = vpop.f32.mrf.mxu0 }
 0x124   :  { %v753_v59 = vpack.c.bf16 %v708_v56, %v707_v55  ;;  %v577_v62 = vadd.f32 %v2988_v43, %v576_v58  ;;  %v713_v7 = vmax.f32 %v585_v0, 0.0 }
 0x125   :  { %v2599_v61 = vpop.f32.mrf.mxu0 }
 0x126   :  { %v588_v63 = vadd.f32 %v2599_v61, %v2988_v43  ;;  %2660 = vmatprep.mubr.msk.bf16.mxu1 %vm790_vm3, %v753_v59  ;;  %v711_v5 = vmax.f32 %v577_v62, 0.0 }
 0x127   :  { %v579_v1 = vpop.f32.mrf.mxu0  ;;  %2661 = vmatmul.mubr.msk.bf16.gmra.mxu1 %vm790_vm3, %v754_v60 }
 0x128   :  { %v580_v2 = vadd.f32 %v2988_v43, %v579_v1  ;;  %v714_v3 = vmax.f32 %v588_v63, 0.0 }
 0x129   :  { %v2602_v4 = vpop.f32.mrf.mxu0 }
 0x12a   :  { %v712_v6 = vmax.f32 %v580_v2, 0.0  ;;  %v756_v10 = vpack.c.bf16 %v714_v3, %v713_v7  ;;  %v601_v14 = vadd.f32 %v2602_v4, %v2988_v43 }
 0x12b   :  { %v592_v8 = vpop.f32.mrf.mxu0 }
 0x12c   :  { %v755_v9 = vpack.c.bf16 %v712_v6, %v711_v5  ;;  %v593_v12 = vadd.f32 %v2988_v43, %v592_v8  ;;  %v717_v21 = vmax.f32 %v601_v14, 0.0 }
 0x12d   :  { %v2603_v11 = vpop.f32.mrf.mxu0 }
 0x12e   :  { %v604_v13 = vadd.f32 %v2603_v11, %v2988_v43  ;;  %2664 = vmatprep.mubr.msk.bf16.mxu1 %vm790_vm3, %v755_v9  ;;  %v715_v19 = vmax.f32 %v593_v12, 0.0 }
 0x12f   :  { %v595_v15 = vpop.f32.mrf.mxu0  ;;  %2665 = vmatmul.mubr.msk.bf16.gmra.mxu1 %vm790_vm3, %v756_v10 }
 0x130   :  { %v596_v16 = vadd.f32 %v2988_v43, %v595_v15  ;;  %v718_v17 = vmax.f32 %v604_v13, 0.0 }
 0x131   :  { %v2606_v18 = vpop.f32.mrf.mxu0 }
 0x132   :  { %v716_v20 = vmax.f32 %v596_v16, 0.0  ;;  %v758_v24 = vpack.c.bf16 %v718_v17, %v717_v21  ;;  %v617_v28 = vadd.f32 %v2606_v18, %v2988_v43  ;;  %v3099_v18 = vld [vmem:[%s3379_s4] ss:$0 sm:$0xff] }
 0x133   :  { %v608_v22 = vpop.f32.mrf.mxu0 }
 0x134   :  { %v757_v23 = vpack.c.bf16 %v716_v20, %v715_v19  ;;  %v609_v26 = vadd.f32 %v2988_v43, %v608_v22  ;;  %v721_v35 = vmax.f32 %v617_v28, 0.0 }
 0x135   :  { %v2607_v25 = vpop.f32.mrf.mxu0 }
 0x136   :  { %v620_v27 = vadd.f32 %v2607_v25, %v2988_v43  ;;  %2668 = vmatprep.mubr.msk.bf16.mxu1 %vm790_vm3, %v757_v23  ;;  %v719_v33 = vmax.f32 %v609_v26, 0.0 }
 0x137   :  { %v611_v29 = vpop.f32.mrf.mxu0  ;;  %2669 = vmatmul.mubr.msk.bf16.gmra.mxu1 %vm790_vm3, %v758_v24 }
 0x138   :  { %v612_v30 = vadd.f32 %v2988_v43, %v611_v29  ;;  %v722_v31 = vmax.f32 %v620_v27, 0.0 }
 0x139   :  { %v2610_v32 = vpop.f32.mrf.mxu0 }
 0x13a   :  { %v720_v34 = vmax.f32 %v612_v30, 0.0  ;;  %v760_v38 = vpack.c.bf16 %v722_v31, %v721_v35  ;;  %v633_v42 = vadd.f32 %v2610_v32, %v2988_v43 }
 0x13b   :  { %v624_v36 = vpop.f32.mrf.mxu0 }
 0x13c   :  { %v759_v37 = vpack.c.bf16 %v720_v34, %v719_v33  ;;  %v625_v40 = vadd.f32 %v2988_v43, %v624_v36  ;;  %v725_v51 = vmax.f32 %v633_v42, 0.0 }
 0x13d   :  { %v2611_v39 = vpop.f32.mrf.mxu0 }
 0x13e   :  { %v636_v41 = vadd.f32 %v2611_v39, %v2988_v43  ;;  %2672 = vmatprep.mubr.msk.bf16.mxu1 %vm790_vm3, %v759_v37  ;;  %v723_v48 = vmax.f32 %v625_v40, 0.0 }
 0x13f   :  { %v627_v44 = vpop.f32.mrf.mxu0  ;;  %2673 = vmatmul.mubr.msk.bf16.gmra.mxu1 %vm790_vm3, %v760_v38 }
 0x140   :  { %v628_v45 = vadd.f32 %v2988_v43, %v627_v44  ;;  %v726_v46 = vmax.f32 %v636_v41, 0.0 }
 0x141   :  { %v2614_v47 = vpop.f32.mrf.mxu0 }
 0x142   :  { %v724_v49 = vmax.f32 %v628_v45, 0.0  ;;  %v762_v53 = vpack.c.bf16 %v726_v46, %v725_v51  ;;  %v649_v57 = vadd.f32 %v2614_v47, %v2988_v43 }
 0x143   :  { %v640_v50 = vpop.f32.mrf.mxu0 }
 0x144   :  { %v761_v52 = vpack.c.bf16 %v724_v49, %v723_v48  ;;  %v641_v55 = vadd.f32 %v2988_v43, %v640_v50  ;;  %v729_v0 = vmax.f32 %v649_v57, 0.0 }
 0x145   :  { %v2615_v54 = vpop.f32.mrf.mxu0 }
 0x146   :  { %v652_v56 = vadd.f32 %v2615_v54, %v2988_v43  ;;  %2676 = vmatprep.mubr.msk.bf16.mxu1 %vm790_vm3, %v761_v52  ;;  %v727_v62 = vmax.f32 %v641_v55, 0.0 }
 0x147   :  { %v643_v58 = vpop.f32.mrf.mxu0  ;;  %2677 = vmatmul.mubr.msk.bf16.gmra.mxu1 %vm790_vm3, %v762_v53 }
 0x148   :  { %v644_v59 = vadd.f32 %v2988_v43, %v643_v58  ;;  %v730_v60 = vmax.f32 %v652_v56, 0.0 }
 0x149   :  { %v2618_v61 = vpop.f32.mrf.mxu0 }
 0x14a   :  { %v728_v63 = vmax.f32 %v644_v59, 0.0  ;;  %v764_v3 = vpack.c.bf16 %v730_v60, %v729_v0  ;;  %v665_v7 = vadd.f32 %v2618_v61, %v2988_v43 }
 0x14b   :  { %v656_v1 = vpop.f32.mrf.mxu0 }
 0x14c   :  { %v763_v2 = vpack.c.bf16 %v728_v63, %v727_v62  ;;  %v657_v5 = vadd.f32 %v2988_v43, %v656_v1  ;;  %v733_v13 = vmax.f32 %v665_v7, 0.0 }
 0x14d   :  { %v2619_v4 = vpop.f32.mrf.mxu0 }
 0x14e   :  { %v668_v6 = vadd.f32 %v2619_v4, %v2988_v43  ;;  %2680 = vmatprep.mubr.msk.bf16.mxu1 %vm790_vm3, %v763_v2  ;;  %v731_v11 = vmax.f32 %v657_v5, 0.0 }
 0x14f   :  { %v659_v8 = vpop.f32.mrf.mxu0  ;;  %2681 = vmatmul.mubr.msk.bf16.gmra.mxu1 %vm790_vm3, %v764_v3 }
 0x150   :  { %v660_v9 = vadd.f32 %v2988_v43, %v659_v8  ;;  %v734_v10 = vmax.f32 %v668_v6, 0.0 }
 0x152   :  { %v732_v12 = vmax.f32 %v660_v9, 0.0  ;;  %v766_v15 = vpack.c.bf16 %v734_v10, %v733_v13 }
 0x154   :  { %v765_v14 = vpack.c.bf16 %v732_v12, %v731_v11 }
 0x156   :  { %2684 = vmatprep.mubr.msk.bf16.mxu1 %vm790_vm3, %v765_v14 }
 0x157   :  { %2685 = vmatmul.mubr.msk.bf16.gmra.mxu1 %vm790_vm3, %v766_v15 }
 0x19f   :  { %v2626_v16 = vpop.f32.mrf.mxu0 }
 0x1a0   :  { %v930_v21 = vadd.f32 %v2626_v16, %v3099_v18 }
 0x1a1   :  { %v921_v17 = vpop.f32.mrf.mxu0 }
 0x1a2   :  { %v922_v43 = vadd.f32 %v3099_v18, %v921_v17  ;;  %v1178_v28 = vmax.f32 %v930_v21, 0.0 }
 0x1a3   :  { %v2627_v19 = vpop.f32.mrf.mxu0 }
 0x1a4   :  { %v933_v20 = vadd.f32 %v2627_v19, %v3099_v18  ;;  %v1176_v26 = vmax.f32 %v922_v43, 0.0 }
 0x1a5   :  { %v924_v22 = vpop.f32.mrf.mxu0 }
 0x1a6   :  { %v925_v23 = vadd.f32 %v3099_v18, %v924_v22  ;;  %v1179_v24 = vmax.f32 %v933_v20, 0.0 }
 0x1a7   :  { %v2630_v25 = vpop.f32.mrf.mxu0 }
 0x1a8   :  { %v1177_v27 = vmax.f32 %v925_v23, 0.0  ;;  %v1241_v31 = vpack.c.bf16 %v1179_v24, %v1178_v28  ;;  %v946_v35 = vadd.f32 %v2630_v25, %v3099_v18 }
 0x1a9   :  { %v937_v29 = vpop.f32.mrf.mxu0 }
 0x1aa   :  { %v1240_v30 = vpack.c.bf16 %v1177_v27, %v1176_v26  ;;  %v938_v33 = vadd.f32 %v3099_v18, %v937_v29  ;;  %v1182_v42 = vmax.f32 %v946_v35, 0.0 }
 0x1ab   :  { %v2631_v32 = vpop.f32.mrf.mxu0 }
 0x1ac   :  { %v949_v34 = vadd.f32 %v2631_v32, %v3099_v18  ;;  %2692 = vmatprep.mubr.msk.bf16.mxu1 %vm790_vm3, %v1240_v30  ;;  %v1180_v40 = vmax.f32 %v938_v33, 0.0 }
 0x1ad   :  { %v940_v36 = vpop.f32.mrf.mxu0  ;;  %2693 = vmatmul.mubr.msk.bf16.vlgmr.msra.gmra.mxu1 %vm790_vm3, %v1241_v31 }
 0x1ae   :  { %v941_v37 = vadd.f32 %v3099_v18, %v940_v36  ;;  %v1183_v38 = vmax.f32 %v949_v34, 0.0 }
 0x1af   :  { %v2634_v39 = vpop.f32.mrf.mxu0 }
 0x1b0   :  { %v1181_v41 = vmax.f32 %v941_v37, 0.0  ;;  %v1243_v46 = vpack.c.bf16 %v1183_v38, %v1182_v42  ;;  %v962_v51 = vadd.f32 %v2634_v39, %v3099_v18 }
 0x1b1   :  { %v953_v44 = vpop.f32.mrf.mxu0 }
 0x1b2   :  { %v1242_v45 = vpack.c.bf16 %v1181_v41, %v1180_v40  ;;  %v954_v48 = vadd.f32 %v3099_v18, %v953_v44  ;;  %v1186_v57 = vmax.f32 %v962_v51, 0.0 }
 0x1b3   :  { %v2635_v47 = vpop.f32.mrf.mxu0 }
 0x1b4   :  { %v965_v49 = vadd.f32 %v2635_v47, %v3099_v18  ;;  %2696 = vmatprep.mubr.msk.bf16.mxu1 %vm790_vm3, %v1242_v45  ;;  %v1184_v55 = vmax.f32 %v954_v48, 0.0 }
 0x1b5   :  { %v956_v50 = vpop.f32.mrf.mxu0  ;;  %2697 = vmatmul.mubr.msk.bf16.gmra.mxu1 %vm790_vm3, %v1243_v46 }
 0x1b6   :  { %v957_v52 = vadd.f32 %v3099_v18, %v956_v50  ;;  %v1187_v53 = vmax.f32 %v965_v49, 0.0 }
 0x1b7   :  { %v2638_v54 = vpop.f32.mrf.mxu0 }
 0x1b8   :  { %v1185_v56 = vmax.f32 %v957_v52, 0.0  ;;  %v1245_v60 = vpack.c.bf16 %v1187_v53, %v1186_v57  ;;  %v978_v0 = vadd.f32 %v2638_v54, %v3099_v18 }
 0x1b9   :  { %v969_v58 = vpop.f32.mrf.mxu0 }
 0x1ba   :  { %v1244_v59 = vpack.c.bf16 %v1185_v56, %v1184_v55  ;;  %v970_v62 = vadd.f32 %v3099_v18, %v969_v58  ;;  %v1190_v7 = vmax.f32 %v978_v0, 0.0 }
 0x1bb   :  { %v2639_v61 = vpop.f32.mrf.mxu0 }
 0x1bc   :  { %v981_v63 = vadd.f32 %v2639_v61, %v3099_v18  ;;  %2700 = vmatprep.mubr.msk.bf16.mxu1 %vm790_vm3, %v1244_v59  ;;  %v1188_v5 = vmax.f32 %v970_v62, 0.0 }
 0x1bd   :  { %v972_v1 = vpop.f32.mrf.mxu0  ;;  %2701 = vmatmul.mubr.msk.bf16.gmra.mxu1 %vm790_vm3, %v1245_v60 }
 0x1be   :  { %v973_v2 = vadd.f32 %v3099_v18, %v972_v1  ;;  %v1191_v3 = vmax.f32 %v981_v63, 0.0 }
 0x1bf   :  { %v2642_v4 = vpop.f32.mrf.mxu0 }
 0x1c0   :  { %v1189_v6 = vmax.f32 %v973_v2, 0.0  ;;  %v1247_v10 = vpack.c.bf16 %v1191_v3, %v1190_v7  ;;  %v994_v14 = vadd.f32 %v2642_v4, %v3099_v18 }
 0x1c1   :  { %v985_v8 = vpop.f32.mrf.mxu0 }
 0x1c2   :  { %v1246_v9 = vpack.c.bf16 %v1189_v6, %v1188_v5  ;;  %v986_v12 = vadd.f32 %v3099_v18, %v985_v8  ;;  %v1194_v21 = vmax.f32 %v994_v14, 0.0 }
 0x1c3   :  { %v2643_v11 = vpop.f32.mrf.mxu0 }
 0x1c4   :  { %v997_v13 = vadd.f32 %v2643_v11, %v3099_v18  ;;  %2704 = vmatprep.mubr.msk.bf16.mxu1 %vm790_vm3, %v1246_v9  ;;  %v1192_v43 = vmax.f32 %v986_v12, 0.0 }
 0x1c5   :  { %v988_v15 = vpop.f32.mrf.mxu0  ;;  %2705 = vmatmul.mubr.msk.bf16.gmra.mxu1 %vm790_vm3, %v1247_v10 }
 0x1c6   :  { %v989_v16 = vadd.f32 %v3099_v18, %v988_v15  ;;  %v1195_v17 = vmax.f32 %v997_v13, 0.0 }
 0x1c7   :  { %v2646_v19 = vpop.f32.mrf.mxu0 }
 0x1c8   :  { %v1193_v20 = vmax.f32 %v989_v16, 0.0  ;;  %v1249_v24 = vpack.c.bf16 %v1195_v17, %v1194_v21  ;;  %v1010_v28 = vadd.f32 %v2646_v19, %v3099_v18 }
 0x1c9   :  { %v1001_v22 = vpop.f32.mrf.mxu0 }
 0x1ca   :  { %v1248_v23 = vpack.c.bf16 %v1193_v20, %v1192_v43  ;;  %v1002_v26 = vadd.f32 %v3099_v18, %v1001_v22  ;;  %v1198_v35 = vmax.f32 %v1010_v28, 0.0 }
 0x1cb   :  { %v2647_v25 = vpop.f32.mrf.mxu0 }
 0x1cc   :  { %v1013_v27 = vadd.f32 %v2647_v25, %v3099_v18  ;;  %2708 = vmatprep.mubr.msk.bf16.mxu1 %vm790_vm3, %v1248_v23  ;;  %v1196_v33 = vmax.f32 %v1002_v26, 0.0 }
 0x1cd   :  { %v1004_v29 = vpop.f32.mrf.mxu0  ;;  %2709 = vmatmul.mubr.msk.bf16.gmra.mxu1 %vm790_vm3, %v1249_v24 }
 0x1ce   :  { %v1005_v30 = vadd.f32 %v3099_v18, %v1004_v29  ;;  %v1199_v31 = vmax.f32 %v1013_v27, 0.0 }
 0x1cf   :  { %v2650_v32 = vpop.f32.mrf.mxu0 }
 0x1d0   :  { %v1197_v34 = vmax.f32 %v1005_v30, 0.0  ;;  %v1251_v38 = vpack.c.bf16 %v1199_v31, %v1198_v35  ;;  %v1026_v42 = vadd.f32 %v2650_v32, %v3099_v18 }
 0x1d1   :  { %v1017_v36 = vpop.f32.mrf.mxu0 }
 0x1d2   :  { %v1250_v37 = vpack.c.bf16 %v1197_v34, %v1196_v33  ;;  %v1018_v40 = vadd.f32 %v3099_v18, %v1017_v36  ;;  %v1202_v51 = vmax.f32 %v1026_v42, 0.0 }
 0x1d3   :  { %v2651_v39 = vpop.f32.mrf.mxu0 }
 0x1d4   :  { %v1029_v41 = vadd.f32 %v2651_v39, %v3099_v18  ;;  %2712 = vmatprep.mubr.msk.bf16.mxu1 %vm790_vm3, %v1250_v37  ;;  %v1200_v48 = vmax.f32 %v1018_v40, 0.0 }
 0x1d5   :  { %v1020_v44 = vpop.f32.mrf.mxu0  ;;  %2713 = vmatmul.mubr.msk.bf16.gmra.mxu1 %vm790_vm3, %v1251_v38 }
 0x1d6   :  { %v1021_v45 = vadd.f32 %v3099_v18, %v1020_v44  ;;  %v1203_v46 = vmax.f32 %v1029_v41, 0.0 }
 0x1d7   :  { %v2654_v47 = vpop.f32.mrf.mxu1 }
 0x1d8   :  { %v1201_v49 = vmax.f32 %v1021_v45, 0.0  ;;  %v1253_v53 = vpack.c.bf16 %v1203_v46, %v1202_v51  ;;  %v1042_v57 = vadd.f32 %v2654_v47, %v3099_v18 }
 0x1d9   :  { %v1033_v50 = vpop.f32.mrf.mxu1 }
 0x1da   :  { %v1252_v52 = vpack.c.bf16 %v1201_v49, %v1200_v48  ;;  %v1034_v55 = vadd.f32 %v3099_v18, %v1033_v50  ;;  %v1206_v0 = vmax.f32 %v1042_v57, 0.0 }
 0x1db   :  { %v2655_v54 = vpop.f32.mrf.mxu1 }
 0x1dc   :  { %v1045_v56 = vadd.f32 %v2655_v54, %v3099_v18  ;;  %2716 = vmatprep.mubr.msk.bf16.mxu1 %vm790_vm3, %v1252_v52  ;;  %v1204_v62 = vmax.f32 %v1034_v55, 0.0 }
 0x1dd   :  { %v1036_v58 = vpop.f32.mrf.mxu1  ;;  %2717 = vmatmul.mubr.msk.bf16.gmra.mxu1 %vm790_vm3, %v1253_v53 }
 0x1de   :  { %v1037_v59 = vadd.f32 %v3099_v18, %v1036_v58  ;;  %v1207_v60 = vmax.f32 %v1045_v56, 0.0 }
 0x1df   :  { %v2658_v61 = vpop.f32.mrf.mxu1 }
 0x1e0   :  { %v1205_v63 = vmax.f32 %v1037_v59, 0.0  ;;  %v1255_v3 = vpack.c.bf16 %v1207_v60, %v1206_v0  ;;  %v1058_v7 = vadd.f32 %v2658_v61, %v3099_v18 }
 0x1e1   :  { %v1049_v1 = vpop.f32.mrf.mxu1 }
 0x1e2   :  { %v1254_v2 = vpack.c.bf16 %v1205_v63, %v1204_v62  ;;  %v1050_v5 = vadd.f32 %v3099_v18, %v1049_v1  ;;  %v1210_v14 = vmax.f32 %v1058_v7, 0.0 }
 0x1e3   :  { %v2659_v4 = vpop.f32.mrf.mxu1 }
 0x1e4   :  { %v1061_v6 = vadd.f32 %v2659_v4, %v3099_v18  ;;  %2720 = vmatprep.mubr.msk.bf16.mxu1 %vm790_vm3, %v1254_v2  ;;  %v1208_v12 = vmax.f32 %v1050_v5, 0.0 }
 0x1e5   :  { %v1052_v8 = vpop.f32.mrf.mxu1  ;;  %2721 = vmatmul.mubr.msk.bf16.gmra.mxu1 %vm790_vm3, %v1255_v3 }
 0x1e6   :  { %v1053_v9 = vadd.f32 %v3099_v18, %v1052_v8  ;;  %v1211_v10 = vmax.f32 %v1061_v6, 0.0 }
 0x1e7   :  { %v2662_v11 = vpop.f32.mrf.mxu1 }
 0x1e8   :  { %v1209_v13 = vmax.f32 %v1053_v9, 0.0  ;;  %v1257_v17 = vpack.c.bf16 %v1211_v10, %v1210_v14  ;;  %v1074_v21 = vadd.f32 %v2662_v11, %v3099_v18 }
 0x1e9   :  { %v1065_v15 = vpop.f32.mrf.mxu1 }
 0x1ea   :  { %v1256_v16 = vpack.c.bf16 %v1209_v13, %v1208_v12  ;;  %v1066_v43 = vadd.f32 %v3099_v18, %v1065_v15  ;;  %v1214_v28 = vmax.f32 %v1074_v21, 0.0 }
 0x1eb   :  { %v2663_v19 = vpop.f32.mrf.mxu1 }
 0x1ec   :  { %v1077_v20 = vadd.f32 %v2663_v19, %v3099_v18  ;;  %2724 = vmatprep.mubr.msk.bf16.mxu1 %vm790_vm3, %v1256_v16  ;;  %v1212_v26 = vmax.f32 %v1066_v43, 0.0 }
 0x1ed   :  { %v1068_v22 = vpop.f32.mrf.mxu1  ;;  %2725 = vmatmul.mubr.msk.bf16.gmra.mxu1 %vm790_vm3, %v1257_v17 }
 0x1ee   :  { %v1069_v23 = vadd.f32 %v3099_v18, %v1068_v22  ;;  %v1215_v24 = vmax.f32 %v1077_v20, 0.0 }
 0x1ef   :  { %v2666_v25 = vpop.f32.mrf.mxu1 }
 0x1f0   :  { %v1213_v27 = vmax.f32 %v1069_v23, 0.0  ;;  %v1259_v31 = vpack.c.bf16 %v1215_v24, %v1214_v28  ;;  %v1090_v35 = vadd.f32 %v2666_v25, %v3099_v18 }
 0x1f1   :  { %v1081_v29 = vpop.f32.mrf.mxu1 }
 0x1f2   :  { %v1258_v30 = vpack.c.bf16 %v1213_v27, %v1212_v26  ;;  %v1082_v33 = vadd.f32 %v3099_v18, %v1081_v29  ;;  %v1218_v42 = vmax.f32 %v1090_v35, 0.0 }
 0x1f3   :  { %v2667_v32 = vpop.f32.mrf.mxu1 }
 0x1f4   :  { %v1093_v34 = vadd.f32 %v2667_v32, %v3099_v18  ;;  %2728 = vmatprep.mubr.msk.bf16.mxu1 %vm790_vm3, %v1258_v30  ;;  %v1216_v40 = vmax.f32 %v1082_v33, 0.0 }
 0x1f5   :  { %v1084_v36 = vpop.f32.mrf.mxu1  ;;  %2729 = vmatmul.mubr.msk.bf16.gmra.mxu1 %vm790_vm3, %v1259_v31 }
 0x1f6   :  { %v1085_v37 = vadd.f32 %v3099_v18, %v1084_v36  ;;  %v1219_v38 = vmax.f32 %v1093_v34, 0.0 }
 0x1f7   :  { %v2670_v39 = vpop.f32.mrf.mxu1 }
 0x1f8   :  { %v1217_v41 = vmax.f32 %v1085_v37, 0.0  ;;  %v1261_v46 = vpack.c.bf16 %v1219_v38, %v1218_v42  ;;  %v1106_v51 = vadd.f32 %v2670_v39, %v3099_v18 }
 0x1f9   :  { %v1097_v44 = vpop.f32.mrf.mxu1 }
 0x1fa   :  { %v1260_v45 = vpack.c.bf16 %v1217_v41, %v1216_v40  ;;  %v1098_v48 = vadd.f32 %v3099_v18, %v1097_v44  ;;  %v1222_v57 = vmax.f32 %v1106_v51, 0.0 }
 0x1fb   :  { %v2671_v47 = vpop.f32.mrf.mxu1 }
 0x1fc   :  { %v1109_v49 = vadd.f32 %v2671_v47, %v3099_v18  ;;  %2732 = vmatprep.mubr.msk.bf16.mxu1 %vm790_vm3, %v1260_v45  ;;  %v1220_v55 = vmax.f32 %v1098_v48, 0.0 }
 0x1fd   :  { %v1100_v50 = vpop.f32.mrf.mxu1  ;;  %2733 = vmatmul.mubr.msk.bf16.gmra.mxu1 %vm790_vm3, %v1261_v46 }
 0x1fe   :  { %v1101_v52 = vadd.f32 %v3099_v18, %v1100_v50  ;;  %v1223_v53 = vmax.f32 %v1109_v49, 0.0 }
 0x1ff   :  { %v2674_v54 = vpop.f32.mrf.mxu1 }
 0x200   :  { %v1221_v56 = vmax.f32 %v1101_v52, 0.0  ;;  %v1263_v60 = vpack.c.bf16 %v1223_v53, %v1222_v57  ;;  %v1122_v0 = vadd.f32 %v2674_v54, %v3099_v18  ;;  %v3200_v52 = vld [vmem:[%s3380_s6] ss:$0 sm:$0xff] }
 0x201   :  { %v1113_v58 = vpop.f32.mrf.mxu1 }
 0x202   :  { %v1262_v59 = vpack.c.bf16 %v1221_v56, %v1220_v55  ;;  %v1114_v62 = vadd.f32 %v3099_v18, %v1113_v58  ;;  %v1226_v7 = vmax.f32 %v1122_v0, 0.0 }
 0x203   :  { %v2675_v61 = vpop.f32.mrf.mxu1 }
 0x204   :  { %v1125_v63 = vadd.f32 %v2675_v61, %v3099_v18  ;;  %2736 = vmatprep.mubr.msk.bf16.mxu1 %vm790_vm3, %v1262_v59  ;;  %v1224_v5 = vmax.f32 %v1114_v62, 0.0 }
 0x205   :  { %v1116_v1 = vpop.f32.mrf.mxu1  ;;  %2737 = vmatmul.mubr.msk.bf16.gmra.mxu1 %vm790_vm3, %v1263_v60 }
 0x206   :  { %v1117_v2 = vadd.f32 %v3099_v18, %v1116_v1  ;;  %v1227_v3 = vmax.f32 %v1125_v63, 0.0 }
 0x207   :  { %v2678_v4 = vpop.f32.mrf.mxu1 }
 0x208   :  { %v1225_v6 = vmax.f32 %v1117_v2, 0.0  ;;  %v1265_v10 = vpack.c.bf16 %v1227_v3, %v1226_v7  ;;  %v1138_v14 = vadd.f32 %v2678_v4, %v3099_v18 }
 0x209   :  { %v1129_v8 = vpop.f32.mrf.mxu1 }
 0x20a   :  { %v1264_v9 = vpack.c.bf16 %v1225_v6, %v1224_v5  ;;  %v1130_v12 = vadd.f32 %v3099_v18, %v1129_v8  ;;  %v1230_v21 = vmax.f32 %v1138_v14, 0.0 }
 0x20b   :  { %v2679_v11 = vpop.f32.mrf.mxu1 }
 0x20c   :  { %v1141_v13 = vadd.f32 %v2679_v11, %v3099_v18  ;;  %2740 = vmatprep.mubr.msk.bf16.mxu1 %vm790_vm3, %v1264_v9  ;;  %v1228_v43 = vmax.f32 %v1130_v12, 0.0 }
 0x20d   :  { %v1132_v15 = vpop.f32.mrf.mxu1  ;;  %2741 = vmatmul.mubr.msk.bf16.gmra.mxu1 %vm790_vm3, %v1265_v10 }
 0x20e   :  { %v1133_v16 = vadd.f32 %v3099_v18, %v1132_v15  ;;  %v1231_v17 = vmax.f32 %v1141_v13, 0.0 }
 0x20f   :  { %v2682_v19 = vpop.f32.mrf.mxu1 }
 0x210   :  { %v1229_v20 = vmax.f32 %v1133_v16, 0.0  ;;  %v1267_v24 = vpack.c.bf16 %v1231_v17, %v1230_v21  ;;  %v1154_v28 = vadd.f32 %v2682_v19, %v3099_v18 }
 0x211   :  { %v1145_v22 = vpop.f32.mrf.mxu1 }
 0x212   :  { %v1266_v23 = vpack.c.bf16 %v1229_v20, %v1228_v43  ;;  %v1146_v26 = vadd.f32 %v3099_v18, %v1145_v22  ;;  %v1234_v35 = vmax.f32 %v1154_v28, 0.0 }
 0x213   :  { %v2683_v25 = vpop.f32.mrf.mxu1 }
 0x214   :  { %v1157_v27 = vadd.f32 %v2683_v25, %v3099_v18  ;;  %2744 = vmatprep.mubr.msk.bf16.mxu1 %vm790_vm3, %v1266_v23  ;;  %v1232_v33 = vmax.f32 %v1146_v26, 0.0 }
 0x215   :  { %v1148_v29 = vpop.f32.mrf.mxu1  ;;  %2745 = vmatmul.mubr.msk.bf16.gmra.mxu1 %vm790_vm3, %v1267_v24 }
 0x216   :  { %v1149_v30 = vadd.f32 %v3099_v18, %v1148_v29  ;;  %v1235_v31 = vmax.f32 %v1157_v27, 0.0 }
 0x217   :  { %v2686_v32 = vpop.f32.mrf.mxu1 }
 0x218   :  { %v1233_v34 = vmax.f32 %v1149_v30, 0.0  ;;  %v1269_v38 = vpack.c.bf16 %v1235_v31, %v1234_v35  ;;  %v1170_v42 = vadd.f32 %v2686_v32, %v3099_v18 }
 0x219   :  { %v1161_v36 = vpop.f32.mrf.mxu1 }
 0x21a   :  { %v1268_v37 = vpack.c.bf16 %v1233_v34, %v1232_v33  ;;  %v1162_v40 = vadd.f32 %v3099_v18, %v1161_v36  ;;  %v1238_v49 = vmax.f32 %v1170_v42, 0.0 }
 0x21b   :  { %v2687_v39 = vpop.f32.mrf.mxu1 }
 0x21c   :  { %v1173_v41 = vadd.f32 %v2687_v39, %v3099_v18  ;;  %2748 = vmatprep.mubr.msk.bf16.mxu1 %vm790_vm3, %v1268_v37  ;;  %v1236_v47 = vmax.f32 %v1162_v40, 0.0 }
 0x21d   :  { %v1164_v44 = vpop.f32.mrf.mxu1  ;;  %2749 = vmatmul.mubr.msk.bf16.gmra.mxu1 %vm790_vm3, %v1269_v38 }
 0x21e   :  { %v1165_v45 = vadd.f32 %v3099_v18, %v1164_v44  ;;  %v1239_v46 = vmax.f32 %v1173_v41, 0.0 }
 0x220   :  { %v1237_v48 = vmax.f32 %v1165_v45, 0.0  ;;  %v1271_v50 = vpack.c.bf16 %v1239_v46, %v1238_v49 }
 0x222   :  { %v1270_v51 = vpack.c.bf16 %v1237_v48, %v1236_v47 }
 0x224   :  { %2752 = vmatprep.mubr.msk.bf16.mxu1 %vm790_vm3, %v1270_v51 }
 0x225   :  { %2753 = vmatmul.mubr.msk.bf16.gmra.mxu1 %vm790_vm3, %v1271_v50 }
 0x26d   :  { %v2694_v53 = vpop.f32.mrf.mxu1 }
 0x26e   :  { %v1434_v54 = vadd.f32 %v2694_v53, %v3200_v52 }
 0x26f   :  { %v1425_v55 = vpop.f32.mrf.mxu1 }
 0x270   :  { %v1426_v18 = vadd.f32 %v3200_v52, %v1425_v55  ;;  %v1682_v57 = vmax.f32 %v1434_v54, 0.0 }
 0x271   :  { %v2695_v56 = vpop.f32.mrf.mxu1 }
 0x272   :  { %v1437_v58 = vadd.f32 %v2695_v56, %v3200_v52  ;;  %v1680_v60 = vmax.f32 %v1426_v18, 0.0  ;;  %v1754_v0 = vsel %vm1744_vm4, %v1682_v57, -inf }
 0x273   :  { %v1428_v59 = vpop.f32.mrf.mxu1 }
 0x274   :  { %v1683_v61 = vmax.f32 %v1437_v58, 0.0  ;;  %v1429_v62 = vadd.f32 %v3200_v52, %v1428_v59  ;;  %v1745_v6 = vsel %vm1744_vm4, %v1680_v60, -inf }
 0x275   :  { %v2698_v63 = vpop.f32.mrf.mxu1 }
 0x276   :  { %v1755_v1 = vsel %vm1744_vm4, %v1683_v61, -inf  ;;  %v1681_v2 = vmax.f32 %v1429_v62, 0.0  ;;  %v1450_v3 = vadd.f32 %v2698_v63, %v3200_v52 }
 0x277   :  { %v1756_v4 = vmax.f32 %v1754_v0, %v1755_v1  ;;  %v1441_v5 = vpop.f32.mrf.mxu1 }
 0x278   :  { %v1746_v7 = vsel %vm1744_vm4, %v1681_v2, -inf  ;;  %v1442_v8 = vadd.f32 %v3200_v52, %v1441_v5  ;;  %v1686_v12 = vmax.f32 %v1450_v3, 0.0 }
 0x279   :  { %v1757_v9 = vrot.slane %v1756_v4, 4  ;;  %v1747_v10 = vmax.f32 %v1745_v6, %v1746_v7  ;;  %v2699_v11 = vpop.f32.mrf.mxu1 }
 0x27a   :  { %v1453_v13 = vadd.f32 %v2699_v11, %v3200_v52  ;;  %v1684_v17 = vmax.f32 %v1442_v8, 0.0  ;;  %v1772_v23 = vsel %vm1744_vm4, %v1686_v12, -inf }
 0x27b   :  { %v1758_v14 = vmax.f32 %v1756_v4, %v1757_v9  ;;  %v1748_v15 = vrot.slane %v1747_v10, 4  ;;  %v1444_v16 = vpop.f32.mrf.mxu1 }
 0x27c   :  { %v1687_v19 = vmax.f32 %v1453_v13, 0.0  ;;  %v1445_v43 = vadd.f32 %v3200_v52, %v1444_v16  ;;  %v1763_v31 = vsel %vm1744_vm4, %v1684_v17, -inf }
 0x27d   :  { %v1759_v20 = vrot.slane %v1758_v14, 2  ;;  %v1749_v21 = vmax.f32 %v1747_v10, %v1748_v15  ;;  %v2702_v22 = vpop.f32.mrf.mxu1 }
 0x27e   :  { %v1773_v24 = vsel %vm1744_vm4, %v1687_v19, -inf  ;;  %v1685_v25 = vmax.f32 %v1445_v43, 0.0  ;;  %v1466_v26 = vadd.f32 %v2702_v22, %v3200_v52 }
 0x27f   :  { %v1760_v27 = vmax.f32 %v1758_v14, %v1759_v20  ;;  %v1750_v28 = vrot.slane %v1749_v21, 2  ;;  %v1774_v29 = vmax.f32 %v1772_v23, %v1773_v24  ;;  %v1457_v30 = vpop.f32.mrf.mxu1 }
 0x280   :  { %v1764_v32 = vsel %vm1744_vm4, %v1685_v25, -inf  ;;  %v1458_v33 = vadd.f32 %v3200_v52, %v1457_v30  ;;  %v1690_v39 = vmax.f32 %v1466_v26, 0.0 }
 0x281   :  { %v1761_v34 = vrot.slane %v1760_v27, 1  ;;  %v1751_v35 = vmax.f32 %v1749_v21, %v1750_v28  ;;  %v1775_v36 = vrot.slane %v1774_v29, 4  ;;  %v1765_v37 = vmax.f32 %v1763_v31, %v1764_v32  ;;  %v2703_v38 = vpop.f32.mrf.mxu1 }
 0x282   :  { %v1688_v40 = vmax.f32 %v1458_v33, 0.0  ;;  %v1469_v41 = vadd.f32 %v2703_v38, %v3200_v52  ;;  %v1790_v55 = vsel %vm1744_vm4, %v1690_v39, -inf }
 0x283   :  { %v1762_v42 = vmax.f32 %v1760_v27, %v1761_v34  ;;  %v1752_v44 = vrot.slane %v1751_v35, 1  ;;  %v1776_v45 = vmax.f32 %v1774_v29, %v1775_v36  ;;  %v1766_v46 = vrot.slane %v1765_v37, 4  ;;  %v1460_v47 = vpop.f32.mrf.mxu1 }
 0x284   :  { %v1691_v48 = vmax.f32 %v1469_v41, 0.0  ;;  %v1461_v49 = vadd.f32 %v3200_v52, %v1460_v47  ;;  %v1781_v61 = vsel %vm1744_vm4, %v1688_v40, -inf }
 0x285   :  { %v1753_v51 = vmax.f32 %v1751_v35, %v1752_v44  ;;  %v1777_v50 = vrot.slane %v1776_v45, 2  ;;  %v1767_v53 = vmax.f32 %v1765_v37, %v1766_v46  ;;  %v2706_v54 = vpop.f32.mrf.mxu1  ;;  %v2416_v58 = vpack.c.bf16 %v1762_v42, %v1762_v42 }
 0x286   :  { %v1791_v18 = vsel %vm1744_vm4, %v1691_v48, -inf  ;;  %v1689_v56 = vmax.f32 %v1461_v49, 0.0  ;;  %v1482_v57 = vadd.f32 %v2706_v54, %v3200_v52 }
 0x287   :  { %v1778_v59 = vmax.f32 %v1776_v45, %v1777_v50  ;;  %v1768_v60 = vrot.slane %v1767_v53, 2  ;;  %v1473_v62 = vpop.f32.mrf.mxu1  ;;  %v2415_v63 = vpack.c.bf16 %v1753_v51, %v1753_v51  ;;  %v1792_v0 = vmax.f32 %v1790_v55, %v1791_v18 }
 0x288   :  { %v1782_v1 = vsel %vm1744_vm4, %v1689_v56, -inf  ;;  %v1474_v2 = vadd.f32 %v3200_v52, %v1473_v62  ;;  %v1694_v6 = vmax.f32 %v1482_v57, 0.0  ;;  %v2162_v10 = vunpack.c.l.b16 %v2416_v58 }
 0x289   :  { %v1779_v3 = vrot.slane %v1778_v59, 1  ;;  %v1769_v4 = vmax.f32 %v1767_v53, %v1768_v60  ;;  %v1783_v5 = vmax.f32 %v1781_v61, %v1782_v1  ;;  %v2707_v7 = vpop.f32.mrf.mxu1  ;;  %v1793_v8 = vrot.slane %v1792_v0, 4 }
 0x28a   :  { %v1485_v9 = vadd.f32 %v2707_v7, %v3200_v52  ;;  %v1692_v16 = vmax.f32 %v1474_v2, 0.0  ;;  %v2161_v43 = vunpack.c.l.b16 %v2415_v63  ;;  %v1808_v22 = vsel %vm1744_vm4, %v1694_v6, -inf }
 0x28b   :  { %v1780_v11 = vmax.f32 %v1778_v59, %v1779_v3  ;;  %v1770_v12 = vrot.slane %v1769_v4, 1  ;;  %v1784_v13 = vrot.slane %v1783_v5, 4  ;;  %v1476_v14 = vpop.f32.mrf.mxu1  ;;  %v1794_v15 = vmax.f32 %v1792_v0, %v1793_v8 }
 0x28c   :  { %v1695_v17 = vmax.f32 %v1485_v9, 0.0  ;;  %v1477_v19 = vadd.f32 %v3200_v52, %v1476_v14  ;;  %v1799_v34 = vsel %vm1744_vm4, %v1692_v16, -inf  ;;  %v2194_v42 = vsel %vm2193_vm5, %v2162_v10, %v2161_v43 }
 0x28d   :  { %v1771_v20 = vmax.f32 %v1769_v4, %v1770_v12  ;;  %v1785_v21 = vmax.f32 %v1783_v5, %v1784_v13  ;;  %v2710_v23 = vpop.f32.mrf.mxu1  ;;  %v1795_v24 = vrot.slane %v1794_v15, 2  ;;  %v2418_v28 = vpack.c.bf16 %v1780_v11, %v1780_v11 }
 0x28e   :  { %v1809_v25 = vsel %vm1744_vm4, %v1695_v17, -inf  ;;  %v1693_v26 = vmax.f32 %v1477_v19, 0.0  ;;  %v1498_v27 = vadd.f32 %v2710_v23, %v3200_v52 }
 0x28f   :  { %v2417_v29 = vpack.c.bf16 %v1771_v20, %v1771_v20  ;;  %v1786_v30 = vrot.slane %v1785_v21, 2  ;;  %v1810_v31 = vmax.f32 %v1808_v22, %v1809_v25  ;;  %v1489_v32 = vpop.f32.mrf.mxu1  ;;  %v1796_v33 = vmax.f32 %v1794_v15, %v1795_v24 }
 0x290   :  { %v1800_v35 = vsel %vm1744_vm4, %v1693_v26, -inf  ;;  %v1698_v36 = vmax.f32 %v1498_v27, 0.0  ;;  %v1490_v45 = vadd.f32 %v3200_v52, %v1489_v32  ;;  %v2164_v47 = vunpack.c.l.b16 %v2418_v28 }
 0x291   :  { %v2163_v37 = vunpack.c.l.b16 %v2417_v29  ;;  %v1787_v38 = vmax.f32 %v1785_v21, %v1786_v30  ;;  %v1811_v39 = vrot.slane %v1810_v31, 4  ;;  %v1801_v40 = vmax.f32 %v1799_v34, %v1800_v35  ;;  %v2711_v41 = vpop.f32.mrf.mxu1 }
 0x292   :  { %v1797_v44 = vrot.slane %v1796_v33, 1  ;;  %v1501_v46 = vadd.f32 %v2711_v41, %v3200_v52  ;;  %v1826_v55 = vsel %vm1744_vm4, %v1698_v36, -inf  ;;  %v1696_v62 = vmax.f32 %v1490_v45, 0.0 }
 0x293   :  { %v1788_v48 = vrot.slane %v1787_v38, 1  ;;  %v1812_v49 = vmax.f32 %v1810_v31, %v1811_v39  ;;  %v1802_v51 = vrot.slane %v1801_v40, 4  ;;  %v1492_v50 = vpop.f32.mrf.mxu1  ;;  %v2196_v53 = vsel %vm2195_vm6, %v2163_v37, %v2194_v42 }
 0x294   :  { %v1798_v54 = vmax.f32 %v1796_v33, %v1797_v44  ;;  %v1699_v18 = vmax.f32 %v1501_v46, 0.0  ;;  %v1493_v59 = vadd.f32 %v3200_v52, %v1492_v50  ;;  %v2198_v6 = vsel %vm2197_vm7, %v2164_v47, %v2196_v53 }
 0x295   :  { %v1789_v56 = vmax.f32 %v1787_v38, %v1788_v48  ;;  %v1813_v57 = vrot.slane %v1812_v49, 2  ;;  %v1803_v58 = vmax.f32 %v1801_v40, %v1802_v51  ;;  %v2714_v60 = vpop.f32.mrf.mxu1  ;;  %v1817_v14 = vsel %vm1744_vm4, %v1696_v62, -inf }
 0x296   :  { %v2420_v61 = vpack.c.bf16 %v1798_v54, %v1798_v54  ;;  %v1827_v63 = vsel %vm1744_vm4, %v1699_v18, -inf  ;;  %v1514_v0 = vadd.f32 %v2714_v60, %v3200_v52  ;;  %v1697_v7 = vmax.f32 %v1493_v59, 0.0 }
 0x297   :  { %v2419_v1 = vpack.c.bf16 %v1789_v56, %v1789_v56  ;;  %v1814_v2 = vmax.f32 %v1812_v49, %v1813_v57  ;;  %v1804_v3 = vrot.slane %v1803_v58, 2  ;;  %v1828_v4 = vmax.f32 %v1826_v55, %v1827_v63  ;;  %v1505_v5 = vpop.f32.mrf.mxu1 }
 0x298   :  { %v1506_v8 = vadd.f32 %v3200_v52, %v1505_v5  ;;  %v1818_v15 = vsel %vm1744_vm4, %v1697_v7, -inf  ;;  %v1702_v16 = vmax.f32 %v1514_v0, 0.0  ;;  %v2166_v19 = vunpack.c.l.b16 %v2420_v61 }
 0x299   :  { %v2165_v9 = vunpack.c.l.b16 %v2419_v1  ;;  %v1815_v10 = vrot.slane %v1814_v2, 1  ;;  %v1805_v11 = vmax.f32 %v1803_v58, %v1804_v3  ;;  %v1829_v12 = vrot.slane %v1828_v4, 4  ;;  %v2715_v13 = vpop.f32.mrf.mxu1 }
 0x29a   :  { %v1517_v17 = vadd.f32 %v2715_v13, %v3200_v52  ;;  %v1819_v24 = vmax.f32 %v1817_v14, %v1818_v15  ;;  %v1700_v25 = vmax.f32 %v1506_v8, 0.0  ;;  %v1844_v33 = vsel %vm1744_vm4, %v1702_v16, -inf }
 0x29b   :  { %v1816_v43 = vmax.f32 %v1814_v2, %v1815_v10  ;;  %v1806_v20 = vrot.slane %v1805_v11, 1  ;;  %v1830_v21 = vmax.f32 %v1828_v4, %v1829_v12  ;;  %v1508_v22 = vpop.f32.mrf.mxu1  ;;  %v2200_v23 = vsel %vm2199_vm8, %v2165_v9, %v2198_v6 }
 0x29c   :  { %v1703_v26 = vmax.f32 %v1517_v17, 0.0  ;;  %v1509_v30 = vadd.f32 %v3200_v52, %v1508_v22  ;;  %v1820_v32 = vrot.slane %v1819_v24, 4  ;;  %v2202_v37 = vsel %vm2201_vm9, %v2166_v19, %v2200_v23 }
 0x29d   :  { %v2422_v27 = vpack.c.bf16 %v1816_v43, %v1816_v43  ;;  %v1807_v28 = vmax.f32 %v1805_v11, %v1806_v20  ;;  %v1831_v29 = vrot.slane %v1830_v21, 2  ;;  %v2718_v31 = vpop.f32.mrf.mxu1  ;;  %v1835_v42 = vsel %vm1744_vm4, %v1700_v25, -inf }
 0x29e   :  { %v1845_v34 = vsel %vm1744_vm4, %v1703_v26, -inf  ;;  %v1530_v35 = vadd.f32 %v2718_v31, %v3200_v52  ;;  %v1821_v41 = vmax.f32 %v1819_v24, %v1820_v32  ;;  %v1701_v44 = vmax.f32 %v1509_v30, 0.0 }
 0x29f   :  { %v2421_v36 = vpack.c.bf16 %v1807_v28, %v1807_v28  ;;  %v1832_v38 = vmax.f32 %v1830_v21, %v1831_v29  ;;  %v1846_v39 = vmax.f32 %v1844_v33, %v1845_v34  ;;  %v1521_v40 = vpop.f32.mrf.mxu1  ;;  %v2168_v46 = vunpack.c.l.b16 %v2422_v27 }
 0x2a0   :  { %v1522_v45 = vadd.f32 %v3200_v52, %v1521_v40  ;;  %v1822_v50 = vrot.slane %v1821_v41, 2  ;;  %v1836_v53 = vsel %vm1744_vm4, %v1701_v44, -inf  ;;  %v1706_v54 = vmax.f32 %v1530_v35, 0.0 }
 0x2a1   :  { %v2167_v47 = vunpack.c.l.b16 %v2421_v36  ;;  %v1833_v48 = vrot.slane %v1832_v38, 1  ;;  %v1847_v49 = vrot.slane %v1846_v39, 4  ;;  %v2719_v51 = vpop.f32.mrf.mxu1  ;;  %v1837_v58 = vmax.f32 %v1835_v42, %v1836_v53 }
 0x2a2   :  { %v1704_v55 = vmax.f32 %v1522_v45, 0.0  ;;  %v1823_v61 = vmax.f32 %v1821_v41, %v1822_v50  ;;  %v1533_v62 = vadd.f32 %v2719_v51, %v3200_v52  ;;  %v1862_v10 = vsel %vm1744_vm4, %v1706_v54, -inf }
 0x2a3   :  { %v2204_v18 = vsel %vm2203_vm10, %v2167_v47, %v2202_v37  ;;  %v1834_v56 = vmax.f32 %v1832_v38, %v1833_v48  ;;  %v1848_v57 = vmax.f32 %v1846_v39, %v1847_v49  ;;  %v1524_v59 = vpop.f32.mrf.mxu1  ;;  %v1838_v2 = vrot.slane %v1837_v58, 4 }
 0x2a4   :  { %v2206_v60 = vsel %vm2205_vm11, %v2168_v46, %v2204_v18  ;;  %v1824_v4 = vrot.slane %v1823_v61, 1  ;;  %v1707_v5 = vmax.f32 %v1533_v62, 0.0  ;;  %v1525_v6 = vadd.f32 %v3200_v52, %v1524_v59 }
 0x2a5   :  { %v2228_v63 = vpack.c.b16 %v2206_v60, %v2206_v60  ;;  %v2424_v0 = vpack.c.bf16 %v1834_v56, %v1834_v56  ;;  %v1849_v1 = vrot.slane %v1848_v57, 2  ;;  %v2722_v3 = vpop.f32.mrf.mxu1  ;;  %v1839_v9 = vmax.f32 %v1837_v58, %v1838_v2 }
 0x2a6   :  { %v1546_v7 = vadd.f32 %v2722_v3, %v3200_v52  ;;  %v1853_v11 = vsel %vm1744_vm4, %v1704_v55, -inf  ;;  %v1825_v13 = vmax.f32 %v1823_v61, %v1824_v4  ;;  %v1863_v14 = vsel %vm1744_vm4, %v1707_v5, -inf }
 0x2a7   :  { %2237 = vst.msk [vmem:[%s3381_s7] sm:$0xf] %vm2236_vm12, %v2228_v63  ;;  %v1850_v8 = vmax.f32 %v1848_v57, %v1849_v1  ;;  %v1537_v12 = vpop.f32.mrf.mxu1  ;;  %v1705_v15 = vmax.f32 %v1525_v6, 0.0  ;;  %v1840_v19 = vrot.slane %v1839_v9, 2  ;;  %v1864_v43 = vmax.f32 %v1862_v10, %v1863_v14 }
 0x2a8   :  { %v1710_v16 = vmax.f32 %v1546_v7, 0.0  ;;  %v1538_v20 = vadd.f32 %v3200_v52, %v1537_v12  ;;  %v2170_v22 = vunpack.c.l.b16 %v2424_v0  ;;  %v2423_v23 = vpack.c.bf16 %v1825_v13, %v1825_v13 }
 0x2a9   :  { %v1851_v17 = vrot.slane %v1850_v8, 1  ;;  %v2723_v21 = vpop.f32.mrf.mxu1  ;;  %v1854_v24 = vsel %vm1744_vm4, %v1705_v15, -inf  ;;  %v1841_v27 = vmax.f32 %v1839_v9, %v1840_v19  ;;  %v1865_v28 = vrot.slane %v1864_v43, 4 }
 0x2aa   :  { %v1549_v25 = vadd.f32 %v2723_v21, %v3200_v52  ;;  %v1855_v29 = vmax.f32 %v1853_v11, %v1854_v24  ;;  %v2169_v31 = vunpack.c.l.b16 %v2423_v23  ;;  %v1708_v32 = vmax.f32 %v1538_v20, 0.0 }
 0x2ab   :  { %v1852_v26 = vmax.f32 %v1850_v8, %v1851_v17  ;;  %v1540_v30 = vpop.f32.mrf.mxu1  ;;  %v1842_v35 = vrot.slane %v1841_v27, 1  ;;  %v1866_v36 = vmax.f32 %v1864_v43, %v1865_v28  ;;  %v1880_v38 = vsel %vm1744_vm4, %v1710_v16, -inf }
 0x2ac   :  { %v1711_v33 = vmax.f32 %v1549_v25, 0.0  ;;  %v1541_v34 = vadd.f32 %v3200_v52, %v1540_v30  ;;  %v1856_v37 = vrot.slane %v1855_v29, 4  ;;  %v2207_v40 = vsel %vm2193_vm5, %v2170_v22, %v2169_v31 }
 0x2ad   :  { %v2726_v39 = vpop.f32.mrf.mxu1  ;;  %v2426_v41 = vpack.c.bf16 %v1852_v26, %v1852_v26  ;;  %v1843_v45 = vmax.f32 %v1841_v27, %v1842_v35  ;;  %v1867_v46 = vrot.slane %v1866_v36, 2  ;;  %v1871_v48 = vsel %vm1744_vm4, %v1708_v32, -inf }
 0x2ae   :  { %v1881_v42 = vsel %vm1744_vm4, %v1711_v33, -inf  ;;  %v1709_v44 = vmax.f32 %v1541_v34, 0.0  ;;  %v1857_v47 = vmax.f32 %v1855_v29, %v1856_v37  ;;  %v1562_v53 = vadd.f32 %v2726_v39, %v3200_v52 }
 0x2af   :  { %v1553_v49 = vpop.f32.mrf.mxu1  ;;  %v1882_v51 = vmax.f32 %v1880_v38, %v1881_v42  ;;  %v2425_v55 = vpack.c.bf16 %v1843_v45, %v1843_v45  ;;  %v1868_v18 = vmax.f32 %v1866_v36, %v1867_v46  ;;  %v2172_v4 = vunpack.c.l.b16 %v2426_v41 }
 0x2b0   :  { %v1872_v50 = vsel %vm1744_vm4, %v1709_v44, -inf  ;;  %v1554_v54 = vadd.f32 %v3200_v52, %v1553_v49  ;;  %v1858_v56 = vrot.slane %v1857_v47, 2  ;;  %v1714_v60 = vmax.f32 %v1562_v53, 0.0 }
 0x2b1   :  { %v1873_v57 = vmax.f32 %v1871_v48, %v1872_v50  ;;  %v2727_v58 = vpop.f32.mrf.mxu1  ;;  %v1883_v59 = vrot.slane %v1882_v51, 4  ;;  %v2171_v63 = vunpack.c.l.b16 %v2425_v55  ;;  %v1869_v0 = vrot.slane %v1868_v18, 1 }
 0x2b2   :  { %v1712_v61 = vmax.f32 %v1554_v54, 0.0  ;;  %v1565_v62 = vadd.f32 %v2727_v58, %v3200_v52  ;;  %v1859_v1 = vmax.f32 %v1857_v47, %v1858_v56  ;;  %v1898_v6 = vsel %vm1744_vm4, %v1714_v60, -inf }
 0x2b3   :  { %v1874_v2 = vrot.slane %v1873_v57, 4  ;;  %v1556_v3 = vpop.f32.mrf.mxu1  ;;  %v1884_v5 = vmax.f32 %v1882_v51, %v1883_v59  ;;  %v1870_v8 = vmax.f32 %v1868_v18, %v1869_v0  ;;  %v2208_v13 = vsel %vm2195_vm6, %v2171_v63, %v2207_v40 }
 0x2b4   :  { %v1715_v7 = vmax.f32 %v1565_v62, 0.0  ;;  %v1860_v9 = vrot.slane %v1859_v1, 1  ;;  %v1889_v11 = vsel %vm1744_vm4, %v1712_v61, -inf  ;;  %v1557_v16 = vadd.f32 %v3200_v52, %v1556_v3 }
 0x2b5   :  { %v1875_v10 = vmax.f32 %v1873_v57, %v1874_v2  ;;  %v2730_v12 = vpop.f32.mrf.mxu1  ;;  %v1885_v14 = vrot.slane %v1884_v5, 2  ;;  %v2428_v17 = vpack.c.bf16 %v1870_v8, %v1870_v8  ;;  %v2209_v27 = vsel %vm2197_vm7, %v2172_v4, %v2208_v13 }
 0x2b6   :  { %v1899_v15 = vsel %vm1744_vm4, %v1715_v7, -inf  ;;  %v1861_v19 = vmax.f32 %v1859_v1, %v1860_v9  ;;  %v1713_v23 = vmax.f32 %v1557_v16, 0.0  ;;  %v1578_v24 = vadd.f32 %v2730_v12, %v3200_v52 }
 0x2b7   :  { %v1876_v43 = vrot.slane %v1875_v10, 2  ;;  %v1900_v20 = vmax.f32 %v1898_v6, %v1899_v15  ;;  %v1569_v21 = vpop.f32.mrf.mxu1  ;;  %v1886_v22 = vmax.f32 %v1884_v5, %v1885_v14  ;;  %v2174_v40 = vunpack.c.l.b16 %v2428_v17 }
 0x2b8   :  { %v1570_v25 = vadd.f32 %v3200_v52, %v1569_v21  ;;  %v2427_v26 = vpack.c.bf16 %v1861_v19, %v1861_v19  ;;  %v1890_v32 = vsel %vm1744_vm4, %v1713_v23, -inf  ;;  %v1718_v33 = vmax.f32 %v1578_v24, 0.0 }
 0x2b9   :  { %v1877_v28 = vmax.f32 %v1875_v10, %v1876_v43  ;;  %v1901_v29 = vrot.slane %v1900_v20, 4  ;;  %v2731_v30 = vpop.f32.mrf.mxu1  ;;  %v1887_v31 = vrot.slane %v1886_v22, 1  ;;  %v1891_v38 = vmax.f32 %v1889_v11, %v1890_v32 }
 0x2ba   :  { %v1716_v34 = vmax.f32 %v1570_v25, 0.0  ;;  %v2173_v35 = vunpack.c.l.b16 %v2427_v26  ;;  %v1916_v42 = vsel %vm1744_vm4, %v1718_v33, -inf  ;;  %v1581_v44 = vadd.f32 %v2731_v30, %v3200_v52 }
 0x2bb   :  { %v1878_v36 = vrot.slane %v1877_v28, 1  ;;  %v1902_v37 = vmax.f32 %v1900_v20, %v1901_v29  ;;  %v1572_v39 = vpop.f32.mrf.mxu1  ;;  %v1888_v41 = vmax.f32 %v1886_v22, %v1887_v31  ;;  %v1892_v48 = vrot.slane %v1891_v38, 4 }
 0x2bc   :  { %v2210_v45 = vsel %vm2199_vm8, %v2173_v35, %v2209_v27  ;;  %v1907_v50 = vsel %vm1744_vm4, %v1716_v34, -inf  ;;  %v1719_v53 = vmax.f32 %v1581_v44, 0.0  ;;  %v1573_v54 = vadd.f32 %v3200_v52, %v1572_v39 }
 0x2bd   :  { %v1879_v46 = vmax.f32 %v1877_v28, %v1878_v36  ;;  %v1903_v47 = vrot.slane %v1902_v37, 2  ;;  %v2734_v49 = vpop.f32.mrf.mxu1  ;;  %v2430_v51 = vpack.c.bf16 %v1888_v41, %v1888_v41  ;;  %v1893_v56 = vmax.f32 %v1891_v38, %v1892_v48 }
 0x2be   :  { %v1594_v57 = vadd.f32 %v2734_v49, %v3200_v52  ;;  %v2211_v59 = vsel %vm2201_vm9, %v2174_v40, %v2210_v45  ;;  %v1917_v60 = vsel %vm1744_vm4, %v1719_v53, -inf  ;;  %v1717_v61 = vmax.f32 %v1573_v54, 0.0 }
 0x2bf   :  { %v2429_v55 = vpack.c.bf16 %v1879_v46, %v1879_v46  ;;  %v1904_v18 = vmax.f32 %v1902_v37, %v1903_v47  ;;  %v1585_v58 = vpop.f32.mrf.mxu1  ;;  %v1894_v1 = vrot.slane %v1893_v56, 2  ;;  %v1918_v2 = vmax.f32 %v1916_v42, %v1917_v60 }
 0x2c0   :  { %v1586_v62 = vadd.f32 %v3200_v52, %v1585_v58  ;;  %v2176_v4 = vunpack.c.l.b16 %v2430_v51  ;;  %v1908_v5 = vsel %vm1744_vm4, %v1717_v61, -inf  ;;  %v1722_v6 = vmax.f32 %v1594_v57, 0.0 }
 0x2c1   :  { %v2175_v63 = vunpack.c.l.b16 %v2429_v55  ;;  %v1905_v0 = vrot.slane %v1904_v18, 1  ;;  %v2735_v3 = vpop.f32.mrf.mxu1  ;;  %v1895_v10 = vmax.f32 %v1893_v56, %v1894_v1  ;;  %v1919_v11 = vrot.slane %v1918_v2, 4 }
 0x2c2   :  { %v1597_v7 = vadd.f32 %v2735_v3, %v3200_v52  ;;  %v1909_v14 = vmax.f32 %v1907_v50, %v1908_v5  ;;  %v1720_v15 = vmax.f32 %v1586_v62, 0.0  ;;  %v1934_v27 = vsel %vm1744_vm4, %v1722_v6, -inf }
 0x2c3   :  { %v2212_v8 = vsel %vm2203_vm10, %v2175_v63, %v2211_v59  ;;  %v1906_v9 = vmax.f32 %v1904_v18, %v1905_v0  ;;  %v1588_v12 = vpop.f32.mrf.mxu1  ;;  %v1896_v17 = vrot.slane %v1895_v10, 1  ;;  %v1920_v19 = vmax.f32 %v1918_v2, %v1919_v11 }
 0x2c4   :  { %v2213_v13 = vsel %vm2205_vm11, %v2176_v4, %v2212_v8  ;;  %v1910_v20 = vrot.slane %v1909_v14, 4  ;;  %v1723_v21 = vmax.f32 %v1597_v7, 0.0  ;;  %v1589_v22 = vadd.f32 %v3200_v52, %v1588_v12 }
 0x2c5   :  { %v2229_v16 = vpack.c.b16 %v2213_v13, %v2213_v13  ;;  %v2738_v43 = vpop.f32.mrf.mxu1  ;;  %v2432_v24 = vpack.c.bf16 %v1906_v9, %v1906_v9  ;;  %v1897_v25 = vmax.f32 %v1895_v10, %v1896_v17  ;;  %v1921_v26 = vrot.slane %v1920_v19, 2 }
 0x2c6   :  { %v1610_v23 = vadd.f32 %v2738_v43, %v3200_v52  ;;  %v1911_v29 = vmax.f32 %v1909_v14, %v1910_v20  ;;  %v1925_v30 = vsel %vm1744_vm4, %v1720_v15, -inf  ;;  %v1935_v31 = vsel %vm1744_vm4, %v1723_v21, -inf }
 0x2c7   :  { %2238 = vst.msk [vmem:[%s3381_s7 + $0x4] sm:$0xf] %vm2236_vm12, %v2229_v16  ;;  %v1601_v28 = vpop.f32.mrf.mxu1  ;;  %v1721_v32 = vmax.f32 %v1589_v22, 0.0  ;;  %v1922_v33 = vmax.f32 %v1920_v19, %v1921_v26  ;;  %v1936_v34 = vmax.f32 %v1934_v27, %v1935_v31  ;;  %v2431_v38 = vpack.c.bf16 %v1897_v25, %v1897_v25 }
 0x2c8   :  { %v1726_v35 = vmax.f32 %v1610_v23, 0.0  ;;  %v1602_v36 = vadd.f32 %v3200_v52, %v1601_v28  ;;  %v1912_v39 = vrot.slane %v1911_v29, 2  ;;  %v2178_v42 = vunpack.c.l.b16 %v2432_v24 }
 0x2c9   :  { %v2739_v37 = vpop.f32.mrf.mxu1  ;;  %v1926_v40 = vsel %vm1744_vm4, %v1721_v32, -inf  ;;  %v1923_v44 = vrot.slane %v1922_v33, 1  ;;  %v1937_v45 = vrot.slane %v1936_v34, 4  ;;  %v2177_v57 = vunpack.c.l.b16 %v2431_v38 }
 0x2ca   :  { %v1613_v41 = vadd.f32 %v2739_v37, %v3200_v52  ;;  %v1927_v46 = vmax.f32 %v1925_v30, %v1926_v40  ;;  %v1913_v48 = vmax.f32 %v1911_v29, %v1912_v39  ;;  %v1724_v49 = vmax.f32 %v1602_v36, 0.0 }
 0x2cb   :  { %v1604_v47 = vpop.f32.mrf.mxu1  ;;  %v1924_v53 = vmax.f32 %v1922_v33, %v1923_v44  ;;  %v1938_v54 = vmax.f32 %v1936_v34, %v1937_v45  ;;  %v1952_v18 = vsel %vm1744_vm4, %v1726_v35, -inf  ;;  %v2214_v20 = vsel %vm2193_vm5, %v2178_v42, %v2177_v57 }
 0x2cc   :  { %v1727_v51 = vmax.f32 %v1613_v41, 0.0  ;;  %v1605_v50 = vadd.f32 %v3200_v52, %v1604_v47  ;;  %v1928_v55 = vrot.slane %v1927_v46, 4  ;;  %v1914_v58 = vrot.slane %v1913_v48, 1 }
 0x2cd   :  { %v2742_v56 = vpop.f32.mrf.mxu1  ;;  %v1939_v61 = vrot.slane %v1938_v54, 2  ;;  %v1943_v63 = vsel %vm1744_vm4, %v1724_v49, -inf  ;;  %v2434_v6 = vpack.c.bf16 %v1924_v53, %v1924_v53 }
 0x2ce   :  { %v1953_v59 = vsel %vm1744_vm4, %v1727_v51, -inf  ;;  %v1725_v60 = vmax.f32 %v1605_v50, 0.0  ;;  %v1929_v62 = vmax.f32 %v1927_v46, %v1928_v55  ;;  %v1915_v2 = vmax.f32 %v1913_v48, %v1914_v58 }
 0x2cf   :  { %v1954_v0 = vmax.f32 %v1952_v18, %v1953_v59  ;;  %v1617_v1 = vpop.f32.mrf.mxu1  ;;  %v1626_v4 = vadd.f32 %v2742_v56, %v3200_v52  ;;  %v1940_v7 = vmax.f32 %v1938_v54, %v1939_v61  ;;  %v2180_v28 = vunpack.c.l.b16 %v2434_v6 }
 0x2d0   :  { %v1944_v3 = vsel %vm1744_vm4, %v1725_v60, -inf  ;;  %v1618_v5 = vadd.f32 %v3200_v52, %v1617_v1  ;;  %v1930_v8 = vrot.slane %v1929_v62, 2  ;;  %v2433_v11 = vpack.c.bf16 %v1915_v2, %v1915_v2 }
 0x2d1   :  { %v1955_v9 = vrot.slane %v1954_v0, 4  ;;  %v2743_v10 = vpop.f32.mrf.mxu1  ;;  %v1945_v12 = vmax.f32 %v1943_v63, %v1944_v3  ;;  %v1730_v13 = vmax.f32 %v1626_v4, 0.0  ;;  %v1941_v15 = vrot.slane %v1940_v7, 1 }
 0x2d2   :  { %v1728_v14 = vmax.f32 %v1618_v5, 0.0  ;;  %v1931_v16 = vmax.f32 %v1929_v62, %v1930_v8  ;;  %v1629_v19 = vadd.f32 %v2743_v10, %v3200_v52  ;;  %v2179_v21 = vunpack.c.l.b16 %v2433_v11 }
 0x2d3   :  { %v1956_v17 = vmax.f32 %v1954_v0, %v1955_v9  ;;  %v1620_v43 = vpop.f32.mrf.mxu1  ;;  %v1946_v22 = vrot.slane %v1945_v12, 4  ;;  %v1942_v23 = vmax.f32 %v1940_v7, %v1941_v15  ;;  %v1970_v34 = vsel %vm1744_vm4, %v1730_v13, -inf }
 0x2d4   :  { %v1932_v24 = vrot.slane %v1931_v16, 1  ;;  %v1731_v26 = vmax.f32 %v1629_v19, 0.0  ;;  %v1621_v30 = vadd.f32 %v3200_v52, %v1620_v43  ;;  %v1961_v35 = vsel %vm1744_vm4, %v1728_v14, -inf }
 0x2d5   :  { %v1957_v25 = vrot.slane %v1956_v17, 2  ;;  %v2746_v27 = vpop.f32.mrf.mxu1  ;;  %v1947_v29 = vmax.f32 %v1945_v12, %v1946_v22  ;;  %v2215_v37 = vsel %vm2195_vm6, %v2179_v21, %v2214_v20  ;;  %v2436_v41 = vpack.c.bf16 %v1942_v23, %v1942_v23 }
 0x2d6   :  { %v1642_v31 = vadd.f32 %v2746_v27, %v3200_v52  ;;  %v1933_v32 = vmax.f32 %v1931_v16, %v1932_v24  ;;  %v1971_v39 = vsel %vm1744_vm4, %v1731_v26, -inf  ;;  %v1729_v40 = vmax.f32 %v1621_v30, 0.0 }
 0x2d7   :  { %v1958_v33 = vmax.f32 %v1956_v17, %v1957_v25  ;;  %v1633_v36 = vpop.f32.mrf.mxu1  ;;  %v1948_v38 = vrot.slane %v1947_v29, 2  ;;  %v1972_v45 = vmax.f32 %v1970_v34, %v1971_v39  ;;  %v2216_v60 = vsel %vm2197_vm7, %v2180_v28, %v2215_v37 }
 0x2d8   :  { %v2435_v42 = vpack.c.bf16 %v1933_v32, %v1933_v32  ;;  %v1962_v48 = vsel %vm1744_vm4, %v1729_v40, -inf  ;;  %v1734_v49 = vmax.f32 %v1642_v31, 0.0  ;;  %v1634_v51 = vadd.f32 %v3200_v52, %v1633_v36 }
 0x2d9   :  { %v1959_v44 = vrot.slane %v1958_v33, 1  ;;  %v2747_v46 = vpop.f32.mrf.mxu1  ;;  %v1949_v47 = vmax.f32 %v1947_v29, %v1948_v38  ;;  %v1973_v54 = vrot.slane %v1972_v45, 4  ;;  %v1963_v55 = vmax.f32 %v1961_v35, %v1962_v48 }
 0x2da   :  { %v2181_v50 = vunpack.c.l.b16 %v2435_v42  ;;  %v1732_v57 = vmax.f32 %v1634_v51, 0.0  ;;  %v1645_v58 = vadd.f32 %v2747_v46, %v3200_v52  ;;  %v2182_v63 = vunpack.c.l.b16 %v2436_v41 }
 0x2db   :  { %v1960_v53 = vmax.f32 %v1958_v33, %v1959_v44  ;;  %v1636_v18 = vpop.f32.mrf.mxu1  ;;  %v1950_v56 = vrot.slane %v1949_v47, 1  ;;  %v1964_v61 = vrot.slane %v1963_v55, 4  ;;  %v1974_v4 = vmax.f32 %v1972_v45, %v1973_v54 }
 0x2dc   :  { %v1637_v59 = vadd.f32 %v3200_v52, %v1636_v18  ;;  %v1735_v2 = vmax.f32 %v1645_v58, 0.0  ;;  %v2217_v3 = vsel %vm2199_vm8, %v2181_v50, %v2216_v60  ;;  %v1988_v5 = vsel %vm1744_vm4, %v1734_v49, -inf }
 0x2dd   :  { %v2750_v62 = vpop.f32.mrf.mxu1  ;;  %v2438_v0 = vpack.c.bf16 %v1960_v53, %v1960_v53  ;;  %v1951_v1 = vmax.f32 %v1949_v47, %v1950_v56  ;;  %v1979_v9 = vsel %vm1744_vm4, %v1732_v57, -inf  ;;  %v1965_v12 = vmax.f32 %v1963_v55, %v1964_v61  ;;  %v2800_v53 = vld [vmem:[%s3380_s6] ss:$0 sm:$0xff] }
 0x2de   :  { %v1733_v6 = vmax.f32 %v1637_v59, 0.0  ;;  %v1989_v10 = vsel %vm1744_vm4, %v1735_v2, -inf  ;;  %v1658_v11 = vadd.f32 %v2750_v62, %v3200_v52  ;;  %v2218_v43 = vsel %vm2201_vm9, %v2182_v63, %v2217_v3 }
 0x2df   :  { %v1649_v7 = vpop.f32.mrf.mxu1  ;;  %v2437_v8 = vpack.c.bf16 %v1951_v1, %v1951_v1  ;;  %v1990_v13 = vmax.f32 %v1988_v5, %v1989_v10  ;;  %v2184_v17 = vunpack.c.l.b16 %v2438_v0  ;;  %v1975_v21 = vrot.slane %v1974_v4, 2 }
 0x2e0   :  { %v1980_v14 = vsel %vm1744_vm4, %v1733_v6, -inf  ;;  %v1650_v15 = vadd.f32 %v3200_v52, %v1649_v7  ;;  %v1738_v23 = vmax.f32 %v1658_v11, 0.0  ;;  %v1966_v29 = vrot.slane %v1965_v12, 2 }
 0x2e1   :  { %v2751_v16 = vpop.f32.mrf.mxu1  ;;  %v2183_v19 = vunpack.c.l.b16 %v2437_v8  ;;  %v1981_v20 = vmax.f32 %v1979_v9, %v1980_v14  ;;  %v1991_v22 = vrot.slane %v1990_v13, 4  ;;  %v1976_v37 = vmax.f32 %v1974_v4, %v1975_v21 }
 0x2e2   :  { %v1661_v24 = vadd.f32 %v2751_v16, %v3200_v52  ;;  %v1736_v31 = vmax.f32 %v1650_v15, 0.0  ;;  %v2006_v38 = vsel %vm1744_vm4, %v1738_v23, -inf  ;;  %v1967_v45 = vmax.f32 %v1965_v12, %v1966_v29 }
 0x2e3   :  { %v1652_v25 = vpop.f32.mrf.mxu1  ;;  %v2219_v26 = vsel %vm2203_vm10, %v2183_v19, %v2218_v43  ;;  %v1982_v27 = vrot.slane %v1981_v20, 4  ;;  %v1992_v30 = vmax.f32 %v1990_v13, %v1991_v22  ;;  %v1977_v57 = vrot.slane %v1976_v37, 1 }
 0x2e4   :  { %v2220_v28 = vsel %vm2205_vm11, %v2184_v17, %v2219_v26  ;;  %v1739_v35 = vmax.f32 %v1661_v24, 0.0  ;;  %v1653_v36 = vadd.f32 %v3200_v52, %v1652_v25  ;;  %v1997_v51 = vsel %vm1744_vm4, %v1736_v31, -inf }
 0x2e5   :  { %v2754_v32 = vpop.f32.mrf.mxu1  ;;  %v2230_v33 = vpack.c.b16 %v2220_v28, %v2220_v28  ;;  %v1983_v34 = vmax.f32 %v1981_v20, %v1982_v27  ;;  %v1993_v46 = vrot.slane %v1992_v30, 2  ;;  %v1968_v59 = vrot.slane %v1967_v45, 1 }
 0x2e6   :  { %v2007_v41 = vsel %vm1744_vm4, %v1739_v35, -inf  ;;  %v1737_v42 = vmax.f32 %v1653_v36, 0.0  ;;  %v1674_v44 = vadd.f32 %v2754_v32, %v3200_v52  ;;  %v1978_v8 = vmax.f32 %v1976_v37, %v1977_v57 }
 0x2e7   :  { %v1665_v39 = vpop.f32.mrf.mxu1  ;;  %2239 = vst.msk [vmem:[%s3381_s7 + $0x8] sm:$0xf] %vm2236_vm12, %v2230_v33  ;;  %v1984_v40 = vrot.slane %v1983_v34, 2  ;;  %v2008_v47 = vmax.f32 %v2006_v38, %v2007_v41  ;;  %v1994_v60 = vmax.f32 %v1992_v30, %v1993_v46  ;;  %v1969_v9 = vmax.f32 %v1967_v45, %v1968_v59 }
 0x2e8   :  { %v1998_v50 = vsel %vm1744_vm4, %v1737_v42, -inf  ;;  %v1666_v54 = vadd.f32 %v2800_v53, %v1665_v39  ;;  %v1742_v58 = vmax.f32 %v1674_v44, 0.0  ;;  %v2440_v23 = vpack.c.bf16 %v1978_v8, %v1978_v8 }
 0x2e9   :  { %v2755_v48 = vpop.f32.mrf.mxu1  ;;  %v1985_v49 = vmax.f32 %v1983_v34, %v1984_v40  ;;  %v2009_v55 = vrot.slane %v2008_v47, 4  ;;  %v1999_v18 = vmax.f32 %v1997_v51, %v1998_v50  ;;  %v1995_v12 = vrot.slane %v1994_v60, 1 }
 0x2ea   :  { %v1677_v52 = vadd.f32 %v2800_v53, %v2755_v48  ;;  %v1740_v0 = vmax.f32 %v1666_v54, 0.0  ;;  %v2024_v5 = vsel %vm1744_vm4, %v1742_v58, -inf  ;;  %v2439_v20 = vpack.c.bf16 %v1969_v9, %v1969_v9 }
 0x2eb   :  { %v1668_v56 = vpop.f32.mrf.mxu1  ;;  %v2010_v61 = vmax.f32 %v2008_v47, %v2009_v55  ;;  %v2000_v62 = vrot.slane %v1999_v18, 4  ;;  %v1986_v63 = vrot.slane %v1985_v49, 1  ;;  %v1996_v26 = vmax.f32 %v1994_v60, %v1995_v12 }
 0x2ec   :  { %v1743_v1 = vmax.f32 %v1677_v52, 0.0  ;;  %v1669_v2 = vadd.f32 %v2800_v53, %v1668_v56  ;;  %v2015_v14 = vsel %vm1744_vm4, %v1740_v0, -inf  ;;  %v2185_v31 = vunpack.c.l.b16 %v2439_v20 }
 0x2ed   :  { %v2011_v3 = vrot.slane %v2010_v61, 2  ;;  %v2001_v4 = vmax.f32 %v1999_v18, %v2000_v62  ;;  %v1987_v13 = vmax.f32 %v1985_v49, %v1986_v63  ;;  %v2186_v36 = vunpack.c.l.b16 %v2440_v23 }
 0x2ee   :  { %v2025_v6 = vsel %vm1744_vm4, %v1743_v1, -inf  ;;  %v1741_v7 = vmax.f32 %v1669_v2, 0.0  ;;  %v2442_v37 = vpack.c.bf16 %v1996_v26, %v1996_v26 }
 0x2ef   :  { %v2002_v10 = vrot.slane %v2001_v4, 2  ;;  %v2026_v11 = vmax.f32 %v2024_v5, %v2025_v6  ;;  %v2012_v16 = vmax.f32 %v2010_v61, %v2011_v3  ;;  %v2441_v24 = vpack.c.bf16 %v1987_v13, %v1987_v13 }
 0x2f0   :  { %v2016_v15 = vsel %vm1744_vm4, %v1741_v7, -inf  ;;  %v2221_v41 = vsel %vm2193_vm5, %v2186_v36, %v2185_v31  ;;  %v2188_v47 = vunpack.c.l.b16 %v2442_v37 }
 0x2f1   :  { %v2003_v17 = vmax.f32 %v2001_v4, %v2002_v10  ;;  %v2027_v19 = vrot.slane %v2026_v11, 4  ;;  %v2017_v43 = vmax.f32 %v2015_v14, %v2016_v15  ;;  %v2013_v27 = vrot.slane %v2012_v16, 1 }
 0x2f2   :  { %v2187_v33 = vunpack.c.l.b16 %v2441_v24 }
 0x2f3   :  { %v2004_v21 = vrot.slane %v2003_v17, 1  ;;  %v2028_v22 = vmax.f32 %v2026_v11, %v2027_v19  ;;  %v2018_v25 = vrot.slane %v2017_v43, 4  ;;  %v2014_v38 = vmax.f32 %v2012_v16, %v2013_v27 }
 0x2f4   :  { %v2222_v44 = vsel %vm2195_vm6, %v2187_v33, %v2221_v41 }
 0x2f5   :  { %v2005_v28 = vmax.f32 %v2003_v17, %v2004_v21  ;;  %v2029_v29 = vrot.slane %v2028_v22, 2  ;;  %v2019_v30 = vmax.f32 %v2017_v43, %v2018_v25  ;;  %v2444_v48 = vpack.c.bf16 %v2014_v38, %v2014_v38 }
 0x2f6   :  { %v2223_v51 = vsel %vm2197_vm7, %v2188_v47, %v2222_v44 }
 0x2f7   :  { %v2030_v32 = vmax.f32 %v2028_v22, %v2029_v29  ;;  %v2443_v34 = vpack.c.bf16 %v2005_v28, %v2005_v28  ;;  %v2020_v35 = vrot.slane %v2019_v30, 2  ;;  %v2190_v55 = vunpack.c.l.b16 %v2444_v48 }
 0x2f9   :  { %v2031_v39 = vrot.slane %v2030_v32, 1  ;;  %v2021_v40 = vmax.f32 %v2019_v30, %v2020_v35  ;;  %v2189_v45 = vunpack.c.l.b16 %v2443_v34 }
 0x2fb   :  { %v2032_v42 = vmax.f32 %v2030_v32, %v2031_v39  ;;  %v2022_v46 = vrot.slane %v2021_v40, 1  ;;  %v2224_v53 = vsel %vm2199_vm8, %v2189_v45, %v2223_v51 }
 0x2fc   :  { %v2225_v57 = vsel %vm2201_vm9, %v2190_v55, %v2224_v53 }
 0x2fd   :  { %v2023_v49 = vmax.f32 %v2021_v40, %v2022_v46  ;;  %v2446_v50 = vpack.c.bf16 %v2032_v42, %v2032_v42 }
 0x2ff   :  { %v2445_v54 = vpack.c.bf16 %v2023_v49, %v2023_v49  ;;  %v2192_v56 = vunpack.c.l.b16 %v2446_v50 }
 0x301   :  { %v2191_v18 = vunpack.c.l.b16 %v2445_v54 }
 0x303   :  { %v2226_v58 = vsel %vm2203_vm10, %v2191_v18, %v2225_v57 }
 0x304   :  { %v2227_v52 = vsel %vm2205_vm11, %v2192_v56, %v2226_v58 }
 0x305   :  { %v2231_v59 = vpack.c.b16 %v2227_v52, %v2227_v52 }
 0x307   :  { %2240 = vst.msk [vmem:[%s3381_s7 + $0xc] sm:$0xf] %vm2236_vm12, %v2231_v59 }

</bundles_post_ra>
